<compile_context>
chip_gen: v5e
topology: v5e:2x2
jax: 0.10.0
libtpu: 0.0.40
codegen_flags: <defaults>
</compile_context>

<pallas_src>
import functools

import jax
import jax.numpy as jnp
from jax.experimental import pallas as pl
from jax.experimental.pallas import tpu as pltpu

WINDOW_SIZE = 16
COMPUTE_DTYPE = jnp.bfloat16          # MXU operand dtype (accumulation is f32)
_ITEMSIZE = jnp.dtype(COMPUTE_DTYPE).itemsize
_MAX_TILE_ROWS = 256                  # hard cap for spatial row tiles


@functools.lru_cache(maxsize=None)
def _vmem_budgets():
    """(vmem_limit_bytes, per-tile VMEM budget) -- TPU-generation aware."""
    cap = 64 * 1024 * 1024                       # conservative default (v7x)
    try:
        get_info = getattr(pltpu, "get_tpu_info", None)
        if get_info is not None:
            info = get_info()
            v = int(getattr(info, "vmem_capacity_bytes", 0) or 0)
            if v > 0:
                cap = v
    except Exception:
        pass
    limit = min(cap * 3 // 4, 112 * 1024 * 1024)   # ~96 MiB on v5e/v6e, 48 MiB on v7x
    tile_budget = (12 * 1024 * 1024 if cap >= 100 * 1024 * 1024
                   else 3 * 1024 * 1024)
    return int(limit), int(tile_budget)


def _cparams(semantics):
    return pltpu.CompilerParams(
        dimension_semantics=tuple(semantics),
        vmem_limit_bytes=_vmem_budgets()[0],
    )


def _pick_tile_rows(n_rows, row_bytes, *, multiple=1, row_elems=None, cap=None,
                    budget=None, sublane=16):
    """Largest divisor d of n_rows with d % multiple == 0, d <= cap,
    d*row_bytes <= budget and (d*row_elems) % sublane == 0 (bf16 sublane
    packing, when the tiled axis is the sublane axis of a block).
    Falls back to n_rows (single full tile, which is always block-legal)."""
    cap = _MAX_TILE_ROWS if cap is None else cap
    budget = _vmem_budgets()[1] if budget is None else budget
    best = None
    for d in range(1, n_rows + 1):
        if n_rows % d or d % multiple:
            continue
        if row_elems is not None and (d * row_elems) % sublane:
            continue
        if d > cap or d * row_bytes > budget:
            continue
        best = d
    return n_rows if best is None else best


def _pick_dconv_tile(Ho, Wo, Cin, Cmid, TCout, cap):
    """Row tile TH for the fused DoubleConv: multiple of 8 (halo block trick),
    divides Ho, per-step working set within the per-tile VMEM budget.
    Returns None -> single whole-image tile path."""
    cap = _MAX_TILE_ROWS if cap is None else cap
    budget = _vmem_budgets()[1]
    legal, fitting = [], []
    for d in range(8, Ho + 1, 8):
        if Ho % d or d > max(cap, 8):
            continue
        legal.append(d)
        rows = d * Wo
        byt = (rows + 8 * Wo) * Cin * _ITEMSIZE           # window scratch
        byt += 2 * rows * Cin * _ITEMSIZE                 # double-buffered input
        byt += (rows + 2 * Wo + 16) * Cmid * _ITEMSIZE    # mid scratch
        byt += (rows + 2 * Wo) * Cmid * 4                 # conv1 f32 accumulator
        byt += rows * TCout * (4 + 2 * _ITEMSIZE)         # conv2 acc + output dbuf
        if byt <= budget:
            fitting.append(d)
    if fitting:
        return max(fitting)
    return min(legal) if legal else None


# ---------------------------------------------------------------------------
# Pallas kernels
# ---------------------------------------------------------------------------

def _matmul_bias_kernel(x_ref, w_ref, b_ref, o_ref, *, relu):
    # Row-tiled im2col matmul: (THW, 9*Cin) x (9*Cin, Cout) + bias (+ ReLU).
    acc = jnp.dot(x_ref[0], w_ref[...], preferred_element_type=jnp.float32)
    acc = acc + b_ref[...]
    if relu:
        acc = jnp.maximum(acc, 0.0)
    o_ref[0] = acc.astype(o_ref.dtype)


def _double_conv_kernel(xa_ref, xb_ref, w1_ref, b1_ref, w2_ref, b2_ref, o_ref,
                        win_ref, mid_ref, *, TH, Wo, D, n_t, n_co, multi_tile):
    # Fused, row-tiled, Cout-sliced DoubleConv on the flattened row-padded input.
    #   multi_tile:  xa = (1, TH*Wo, Cin) tile rows, xb = (1, 8*Wo, Cin) halo;
    #                both copied into a contiguous VMEM window.
    #   single tile: xa = whole padded flat image, read in place (xb unused).
    # conv1 output ((TH+2)*Wo rows, incl. 1-row halo each side) lives in
    # mid_ref (offset D) and is computed only when the Cout-slice index is 0;
    # later Cout slices reuse it.  mid_ref is never fully zeroed: only the
    # boundary halo rows (conv1 at global row -1 / Ho) are zeroed, on the
    # boundary row tiles, and no later iteration writes valid data there.
    t = pl.program_id(1)
    HWt = TH * Wo                     # conv2 output rows in this tile
    L1 = (TH + 2) * Wo                # conv1 output rows in this tile
    Cmid = mid_ref.shape[-1]

    col1 = jax.lax.broadcasted_iota(jnp.int32, (L1, 1), 0) % Wo
    col2 = jax.lax.broadcasted_iota(jnp.int32, (HWt, 1), 0) % Wo

    def conv3x3(load, w_ref_, b_ref_, col, L):
        mask_l = col != 0             # invalid source rows for kx == 0 taps
        mask_r = col != (Wo - 1)      # invalid source rows for kx == 2 taps
        acc = jnp.zeros((L, w_ref_.shape[-1]), jnp.float32)
        for ky in range(3):
            for kx in range(3):
                patch = load(ky, kx)
                if kx == 0:
                    patch = jnp.where(mask_l, patch, 0)
                elif kx == 2:
                    patch = jnp.where(mask_r, patch, 0)
                acc = acc + jnp.dot(patch, w_ref_[ky * 3 + kx],
                                    preferred_element_type=jnp.float32)
        return jnp.maximum(acc + b_ref_[...], 0.0)

    def conv1_phase():
        if multi_tile:
            win_ref[pl.ds(0, HWt), :] = xa_ref[0]
            win_ref[pl.ds(HWt, 8 * Wo), :] = xb_ref[0]
            load1 = lambda ky, kx: win_ref[pl.ds(ky * Wo + kx, L1), :]
        else:
            load1 = lambda ky, kx: xa_ref[0, pl.ds(ky * Wo + kx, L1), :]
        y1 = conv3x3(load1, w1_ref, b1_ref, col1, L1)
        mid_ref[pl.ds(D, L1), :] = y1.astype(mid_ref.dtype)

        def zero_top():
            mid_ref[pl.ds(D, Wo), :] = jnp.zeros((Wo, Cmid), mid_ref.dtype)

        def zero_bot():
            mid_ref[pl.ds(D + (TH + 1) * Wo, Wo), :] = jnp.zeros(
                (Wo, Cmid), mid_ref.dtype)

        if n_t == 1:
            zero_top()
            zero_bot()
        else:
            pl.when(t == 0)(zero_top)
            pl.when(t == n_t - 1)(zero_bot)

    if n_co == 1:
        conv1_phase()
    else:
        pl.when(pl.program_id(2) == 0)(conv1_phase)

    load2 = lambda ky, kx: mid_ref[pl.ds(D + ky * Wo + kx - 1, HWt), :]
    y2 = conv3x3(load2, w2_ref, b2_ref, col2, HWt)
    o_ref[0] = y2.astype(o_ref.dtype)


def _maxpool_kernel(x_ref, o_ref, *, C):
    # x_ref: (1, THo, 2, Wo, 2*C) -- a free reshape of the NHWC feature map
    # (no wrapper transpose); the 2x2 reduction happens here on the VPU.
    top = x_ref[0, :, 0, :, :]               # (THo, Wo, 2*C)
    bot = x_ref[0, :, 1, :, :]
    m = jnp.maximum(top, bot)                # max over the row pair
    o_ref[0] = jnp.maximum(m[:, :, :C], m[:, :, C:])   # max over the column pair


def _convt2x2_kernel(*refs, has_res, has_final):
    # ConvTranspose2d(k=2, s=2): no overlap -> 4 independent matmuls, one per
    # output sub-position. Residual add and (for up1) the final 1x1 conv are
    # fused in.
    if has_res and has_final:
        x_ref, r_ref, w_ref, b_ref, wf_ref, bf_ref, o_ref = refs
    elif has_res:
        x_ref, r_ref, w_ref, b_ref, o_ref = refs
    elif has_final:
        x_ref, w_ref, b_ref, wf_ref, bf_ref, o_ref = refs
    else:
        x_ref, w_ref, b_ref, o_ref = refs

    x = x_ref[0]
    if has_res:
        x = (x.astype(jnp.float32) + r_ref[0].astype(jnp.float32)
             ).astype(COMPUTE_DTYPE)
    for dy in range(2):
        for dx in range(2):
            y = jnp.dot(x, w_ref[dy * 2 + dx],
                        preferred_element_type=jnp.float32) + b_ref[...]
            if has_final:
                y = jnp.dot(y.astype(COMPUTE_DTYPE), wf_ref[...],
                            preferred_element_type=jnp.float32) + bf_ref[...]
            o_ref[0, dy, dx] = y.astype(o_ref.dtype)


# ---------------------------------------------------------------------------
# Wrappers (glue stays in plain JAX: only free reshapes + small pads)
# ---------------------------------------------------------------------------

def conv3x3_first(x, w, b, *, relu, tile_cap=None):
    # Small-Cin first layer as an im2col matmul (K = 9*Cin contraction).
    # x: (N, H, W, Cin) NHWC in COMPUTE_DTYPE; w: (Cout, Cin, 3, 3); b: (Cout,)
    N, H, W, Cin = x.shape
    Cout = w.shape[0]
    K = 9 * Cin

    xp = jnp.pad(x, ((0, 0), (1, 1), (1, 1), (0, 0)))
    taps = [xp[:, ky:ky + H, kx:kx + W, :] for ky in range(3) for kx in range(3)]
    xim = jnp.concatenate(taps, axis=-1).reshape(N, H * W, K)
    wt = jnp.transpose(w, (2, 3, 1, 0)).reshape(K, Cout).astype(COMPUTE_DTYPE)
    bt = b.reshape(1, Cout).astype(jnp.float32)

    TH = _pick_tile_rows(H, W * (K + Cout) * _ITEMSIZE, row_elems=W,
                         cap=tile_cap)
    THW = TH * W
    n_t = H // TH

    yf = pl.pallas_call(
        functools.partial(_matmul_bias_kernel, relu=relu),
        out_shape=jax.ShapeDtypeStruct((N, H * W, Cout), COMPUTE_DTYPE),
        grid=(N, n_t),
        in_specs=[
            pl.BlockSpec((1, THW, K), lambda n, t: (n, t, 0)),
            pl.BlockSpec((K, Cout), lambda n, t: (0, 0)),
            pl.BlockSpec((1, Cout), lambda n, t: (0, 0)),
        ],
        out_specs=pl.BlockSpec((1, THW, Cout), lambda n, t: (n, t, 0)),
        compiler_params=_cparams(("parallel", "parallel")),
        cost_estimate=pl.CostEstimate(
            flops=int(2 * N * H * W * K * Cout),
            transcendentals=0,
            bytes_accessed=int((xim.size + wt.size + N * H * W * Cout)
                               * _ITEMSIZE),
        ),
    )(xim, wt, bt)
    return yf.reshape(N, H, W, Cout)


def double_conv(x, p, *, tile_cap=None, cout_cap=None):
    # x: (N, Ho, Wo, Cin) pooled activations (COMPUTE_DTYPE)
    # p: ((w1, b1), (w2, b2)) with w*: (Cout, Cin, 3, 3)
    (w1, b1), (w2, b2) = p
    N, Ho, Wo, Cin = x.shape
    Cmid, Cout = w1.shape[0], w2.shape[0]

    # ---- Cout slicing (only lane-aligned, 128-multiple slices) ----
    cap_co = 256 if cout_cap is None else cout_cap
    TCout = Cout
    if Cout > cap_co and Cout % 128 == 0:
        TCout = 128
        c = 128
        while c <= cap_co:
            if Cout % c == 0:
                TCout = c
            c += 128
    n_co = Cout // TCout

    # ---- row tiling (multi-tile uses an 8-row halo block view) ----
    TH = _pick_dconv_tile(Ho, Wo, Cin, Cmid, TCout, tile_cap)
    multi = TH is not None
    if not multi:
        TH = Ho
    n_t = Ho // TH
    HWt = TH * Wo
    D = 8                                  # aligned data offset in mid scratch
    flat_len = (Ho + 8) * Wo

    # Flattened input with 2 zero rows top/bottom and a 1-element front shift:
    # flat index of (row r, col c) is (r + 2) * Wo + c + 1.
    xp = jnp.pad(x, ((0, 0), (2, 2), (0, 0), (0, 0)))
    xf = jnp.pad(xp.reshape(N, (Ho + 4) * Wo, Cin),
                 ((0, 0), (1, 4 * Wo - 1), (0, 0)))

    w1t = jnp.transpose(w1, (2, 3, 1, 0)).reshape(9, Cin, Cmid).astype(COMPUTE_DTYPE)
    w2t = jnp.transpose(w2, (2, 3, 1, 0)).reshape(9, Cmid, Cout).astype(COMPUTE_DTYPE)
    b1t = b1.reshape(1, Cmid).astype(jnp.float32)
    b2t = b2.reshape(1, Cout).astype(jnp.float32)

    if multi:
        step_b = TH // 8
        a_spec = pl.BlockSpec((1, HWt, Cin), lambda n, t, c: (n, t, 0))
        b_spec = pl.BlockSpec((1, 8 * Wo, Cin),
                              lambda n, t, c: (n, (t + 1) * step_b, 0))
        win_shape = (HWt + 8 * Wo, Cin)
    else:
        a_spec = pl.BlockSpec((1, flat_len, Cin), lambda n, t, c: (n, 0, 0))
        b_spec = pl.BlockSpec((1, 8 * Wo, Cin), lambda n, t, c: (n, 0, 0))
        win_shape = (8, Cin)               # unused dummy scratch

    kern = functools.partial(_double_conv_kernel, TH=TH, Wo=Wo, D=D,
                             n_t=n_t, n_co=n_co, multi_tile=multi)
    yf = pl.pallas_call(
        kern,
        out_shape=jax.ShapeDtypeStruct((N, Ho * Wo, Cout), COMPUTE_DTYPE),
        grid=(N, n_t, n_co),
        in_specs=[
            a_spec, b_spec,
            pl.BlockSpec((9, Cin, Cmid), lambda n, t, c: (0, 0, 0)),
            pl.BlockSpec((1, Cmid), lambda n, t, c: (0, 0)),
            pl.BlockSpec((9, Cmid, TCout), lambda n, t, c: (0, 0, c)),
            pl.BlockSpec((1, TCout), lambda n, t, c: (0, c)),
        ],
        out_specs=pl.BlockSpec((1, HWt, TCout), lambda n, t, c: (n, t, c)),
        scratch_shapes=[pltpu.VMEM(win_shape, COMPUTE_DTYPE),
                        pltpu.VMEM((D + (TH + 2) * Wo + 8, Cmid), COMPUTE_DTYPE)],
        compiler_params=_cparams(("parallel", "parallel", "arbitrary")),
        cost_estimate=pl.CostEstimate(
            flops=int(2 * N * Ho * Wo * 9 * (Cin * Cmid + Cmid * Cout)),
            transcendentals=0,
            bytes_accessed=int((xf.size + w1t.size + n_co * w2t.size
                                + N * Ho * Wo * Cout) * _ITEMSIZE),
        ),
    )(xf, xf, w1t, b1t, w2t, b2t)
    return yf.reshape(N, Ho, Wo, Cout)


def maxpool2x2(x, *, tile_cap=None):
    N, H, W, C = x.shape
    Ho, Wo = H // 2, W // 2
    xr = x.reshape(N, Ho, 2, Wo, 2 * C)          # pure reshape, no HBM shuffle
    THo = _pick_tile_rows(Ho, 2 * Wo * 2 * C * _ITEMSIZE, cap=tile_cap)
    n_t = Ho // THo
    return pl.pallas_call(
        functools.partial(_maxpool_kernel, C=C),
        out_shape=jax.ShapeDtypeStruct((N, Ho, Wo, C), x.dtype),
        grid=(N, n_t),
        in_specs=[pl.BlockSpec((1, THo, 2, Wo, 2 * C),
                               lambda n, t: (n, t, 0, 0, 0))],
        out_specs=pl.BlockSpec((1, THo, Wo, C), lambda n, t: (n, t, 0, 0)),
        compiler_params=_cparams(("parallel", "parallel")),
    )(xr)


def convt2x2(x, res, w, b, *, final=None, out_dtype=None, tile_cap=None):
    # x: (N, H, W, Cin); w: (Cin, Cout, 2, 2) (PyTorch ConvTranspose2d layout)
    # final: optional (w1x1, b1x1) with w1x1: (Cf, Cout, 1, 1), fused in-kernel.
    N, H, W, Cin = x.shape
    Cout = w.shape[1]
    HW = H * W
    TH = _pick_tile_rows(H, W * Cin * _ITEMSIZE, row_elems=W, cap=tile_cap)
    THW = TH * W
    n_t = H // TH

    xf = x.reshape(N, HW, Cin)
    wt = jnp.transpose(w, (2, 3, 0, 1)).reshape(4, Cin, Cout).astype(COMPUTE_DTYPE)
    bt = b.reshape(1, Cout).astype(jnp.float32)
    has_res = res is not None
    has_final = final is not None

    args = [xf]
    in_specs = [pl.BlockSpec((1, THW, Cin), lambda n, t: (n, t, 0))]
    if has_res:
        args.append(res.reshape(N, HW, Cin))
        in_specs.append(pl.BlockSpec((1, THW, Cin), lambda n, t: (n, t, 0)))
    args += [wt, bt]
    in_specs += [pl.BlockSpec((4, Cin, Cout), lambda n, t: (0, 0, 0)),
                 pl.BlockSpec((1, Cout), lambda n, t: (0, 0))]
    Cf = Cout
    if has_final:
        wf, bf_ = final
        Cf = wf.shape[0]
        args += [jnp.transpose(wf[:, :, 0, 0], (1, 0)).astype(COMPUTE_DTYPE),
                 bf_.reshape(1, Cf).astype(jnp.float32)]
        in_specs += [pl.BlockSpec((Cout, Cf), lambda n, t: (0, 0)),
                     pl.BlockSpec((1, Cf), lambda n, t: (0, 0))]
    out_dtype = COMPUTE_DTYPE if out_dtype is None else out_dtype

    out6 = pl.pallas_call(
        functools.partial(_convt2x2_kernel, has_res=has_res, has_final=has_final),
        out_shape=jax.ShapeDtypeStruct((N, 2, 2, HW, Cf), out_dtype),
        grid=(N, n_t),
        in_specs=in_specs,
        out_specs=pl.BlockSpec((1, 2, 2, THW, Cf), lambda n, t: (n, 0, 0, t, 0)),
        compiler_params=_cparams(("parallel", "parallel")),
        cost_estimate=pl.CostEstimate(
            flops=int(2 * N * HW * 4 * (Cin * Cout + (Cout * Cf if has_final else 0))),
            transcendentals=0,
            bytes_accessed=int((N * HW * Cin * (2 if has_res else 1)
                                + N * 4 * HW * Cf) * _ITEMSIZE),
        ),
    )(*args)
    # Interleave (dy, dx) back into the spatial grid (for the final stage this
    # runs on Cf=3 channels only).  TODO(synk): store (N,H,2,W,2*Cf) in-kernel
    # so this becomes a free reshape.
    out = (out6.reshape(N, 2, 2, H, W, Cf)
           .transpose(0, 3, 1, 4, 2, 5)
           .reshape(N, 2 * H, 2 * W, Cf))
    return out


def check_image_size(x):
    # x: NCHW, reflect-pad bottom/right to a multiple of WINDOW_SIZE
    h, w = x.shape[2], x.shape[3]
    mph = (WINDOW_SIZE - h % WINDOW_SIZE) % WINDOW_SIZE
    mpw = (WINDOW_SIZE - w % WINDOW_SIZE) % WINDOW_SIZE
    if mph or mpw:
        x = jnp.pad(x, ((0, 0), (0, 0), (0, mph), (0, mpw)), mode="reflect")
    return x


def unet_forward(params, inp_img, inp_s1_img, *, tile_cap=None, cout_cap=None):
    # inference path (gt=None) of UNet.forward; returns (out, out) in NCHW.
    H, W = inp_img.shape[2], inp_img.shape[3]
    inp_img = check_image_size(inp_img)
    _ = check_image_size(inp_s1_img)   # matches reference; unused downstream
    x = jnp.transpose(inp_img, (0, 2, 3, 1)).astype(COMPUTE_DTYPE)

    x = conv3x3_first(x, *params["conv_first"], relu=False, tile_cap=tile_cap)
    x1 = double_conv(maxpool2x2(x, tile_cap=tile_cap), params["down1"],
                     tile_cap=tile_cap, cout_cap=cout_cap)
    x2 = double_conv(maxpool2x2(x1, tile_cap=tile_cap), params["down2"],
                     tile_cap=tile_cap, cout_cap=cout_cap)
    x3 = double_conv(maxpool2x2(x2, tile_cap=tile_cap), params["down3"],
                     tile_cap=tile_cap, cout_cap=cout_cap)
    u = convt2x2(x3, None, *params["up3"], tile_cap=tile_cap)
    u = convt2x2(u, x2, *params["up2"], tile_cap=tile_cap)
    out = convt2x2(u, x1, *params["up1"], final=params["final"],
                   out_dtype=jnp.float32, tile_cap=tile_cap)

    out = jnp.transpose(out, (0, 3, 1, 2))[..., :H, :W]   # NHWC -> NCHW, crop
    return out, out


# ---------------------------------------------------------------------------
# Deterministic parameter init (PyTorch-like uniform bounds; synthetic weights)
# ---------------------------------------------------------------------------

def _init_conv(key, cout, cin, k):
    kw, kb = jax.random.split(key)
    bound = 1.0 / float(cin * k * k) ** 0.5
    w = jax.random.uniform(kw, (cout, cin, k, k), jnp.float32, -bound, bound)
    b = jax.random.uniform(kb, (cout,), jnp.float32, -bound, bound)
    return w, b


def _init_convt(key, cin, cout, k):
    kw, kb = jax.random.split(key)
    bound = 1.0 / float(cout * k * k) ** 0.5
    w = jax.random.uniform(kw, (cin, cout, k, k), jnp.float32, -bound, bound)
    b = jax.random.uniform(kb, (cout,), jnp.float32, -bound, bound)
    return w, b


def init_params(key, in_channels=3, out_channels=3, nf=8):
    ks = jax.random.split(key, 11)
    return {
        "conv_first": _init_conv(ks[0], nf, in_channels, 3),
        "down1": (_init_conv(ks[1], nf, nf, 3), _init_conv(ks[2], nf, nf, 3)),
        "down2": (_init_conv(ks[3], nf * 2, nf, 3), _init_conv(ks[4], nf * 2, nf * 2, 3)),
        "down3": (_init_conv(ks[5], nf * 4, nf * 2, 3), _init_conv(ks[6], nf * 4, nf * 4, 3)),
        "up3": _init_convt(ks[7], nf * 4, nf * 2, 2),
        "up2": _init_convt(ks[8], nf * 2, nf, 2),
        "up1": _init_convt(ks[9], nf, nf, 2),
        "final": _init_conv(ks[10], out_channels, nf, 1),
    }


# ---------------------------------------------------------------------------
# Pure-JAX reference (same math, same bf16/f32 policy) to verify the kernels
# ---------------------------------------------------------------------------

def _ref_conv3x3(x, w, b, *, relu):
    N, H, W, _ = x.shape
    xp = jnp.pad(x, ((0, 0), (1, 1), (1, 1), (0, 0)))
    wq = w.astype(COMPUTE_DTYPE)
    acc = jnp.zeros((N, H, W, w.shape[0]), jnp.float32)
    for ky in range(3):
        for kx in range(3):
            acc = acc + jnp.einsum("nhwc,oc->nhwo",
                                   xp[:, ky:ky + H, kx:kx + W, :], wq[:, :, ky, kx],
                                   preferred_element_type=jnp.float32)
    acc = acc + b.astype(jnp.float32)
    return jnp.maximum(acc, 0.0) if relu else acc


def _ref_double_conv(x, p):
    (w1, b1), (w2, b2) = p
    y1 = _ref_conv3x3(x, w1, b1, relu=True).astype(COMPUTE_DTYPE)
    y2 = _ref_conv3x3(y1, w2, b2, relu=True).astype(COMPUTE_DTYPE)
    return y2


def _ref_maxpool(x):
    N, H, W, C = x.shape
    return x.reshape(N, H // 2, 2, W // 2, 2, C).max(axis=(2, 4))


def _ref_convt(x, res, w, b, final=None):
    if res is not None:
        x = (x.astype(jnp.float32) + res.astype(jnp.float32)).astype(COMPUTE_DTYPE)
    N, H, W, _ = x.shape
    wq = w.astype(COMPUTE_DTYPE)
    rows = []
    for dy in range(2):
        cols = []
        for dx in range(2):
            y = jnp.einsum("nhwi,io->nhwo", x, wq[:, :, dy, dx],
                           preferred_element_type=jnp.float32) + b.astype(jnp.float32)
            if final is not None:
                wf, bf_ = final
                y = jnp.einsum("nhwo,of->nhwf", y.astype(COMPUTE_DTYPE),
                               jnp.transpose(wf[:, :, 0, 0], (1, 0)).astype(COMPUTE_DTYPE),
                               preferred_element_type=jnp.float32) + bf_.astype(jnp.float32)
            cols.append(y)
        rows.append(jnp.stack(cols, axis=0))
    y = jnp.stack(rows, axis=0)                                # (2,2,N,H,W,Cf)
    Cf = y.shape[-1]
    y = jnp.transpose(y, (2, 3, 0, 4, 1, 5)).reshape(N, 2 * H, 2 * W, Cf)
    if final is None:
        y = y.astype(COMPUTE_DTYPE)
    return y


def unet_reference(params, inp_img, inp_s1_img):
    H, W = inp_img.shape[2], inp_img.shape[3]
    x = check_image_size(inp_img)
    x = jnp.transpose(x, (0, 2, 3, 1)).astype(COMPUTE_DTYPE)
    x = _ref_conv3x3(x, *params["conv_first"], relu=False).astype(COMPUTE_DTYPE)
    x1 = _ref_double_conv(_ref_maxpool(x), params["down1"])
    x2 = _ref_double_conv(_ref_maxpool(x1), params["down2"])
    x3 = _ref_double_conv(_ref_maxpool(x2), params["down3"])
    u = _ref_convt(x3, None, *params["up3"])
    u = _ref_convt(u, x2, *params["up2"])
    out = _ref_convt(u, x1, *params["up1"], final=params["final"])
    out = jnp.transpose(out, (0, 3, 1, 2))[..., :H, :W]
    return out, out


# ---------------------------------------------------------------------------

if __name__ == "__main__":
    nf = 8  # small synthetic width (module default is 256)
    params = init_params(jax.random.PRNGKey(0), in_channels=3, out_channels=3, nf=nf)

    # Config 1: batch=2, 16x16 (single row-tile per kernel).
    k1, k2 = jax.random.split(jax.random.PRNGKey(1))
    inp_img = jax.random.normal(k1, (2, 3, 16, 16), jnp.float32)     # NCHW
    inp_s1_img = jax.random.normal(k2, (2, 3, 16, 16), jnp.float32)  # NCHW

    fwd = jax.jit(unet_forward)
    out, out_dup = fwd(params, inp_img, inp_s1_img)
    jax.block_until_ready(out)
    assert out.shape == (2, 3, 16, 16), out.shape
    ref, _ = unet_reference(params, inp_img, inp_s1_img)
    err = float(jnp.max(jnp.abs(out - ref)))
    assert err < 2e-2, f"Pallas/XLA mismatch (16x16): max abs err = {err}"

    # Config 2: non-multiple-of-16 size (exercises the reflect pad) with a
    # small tile cap so the spatially tiled kernels run with multiple row tiles.
    k3, k4 = jax.random.split(jax.random.PRNGKey(2))
    a = jax.random.normal(k3, (1, 3, 40, 28), jnp.float32)
    b = jax.random.normal(k4, (1, 3, 40, 28), jnp.float32)
    fwd_tiled = jax.jit(functools.partial(unet_forward, tile_cap=8))
    out2, _ = fwd_tiled(params, a, b)
    jax.block_until_ready(out2)
    assert out2.shape == (1, 3, 40, 28), out2.shape
    ref2, _ = unet_reference(params, a, b)
    err2 = float(jnp.max(jnp.abs(out2 - ref2)))
    assert err2 < 2e-2, f"Pallas/XLA mismatch (tiled): max abs err = {err2}"

    # Config 3: standalone DoubleConv with Cout=256 and cout_cap=128 to
    # exercise the row-tile + Cout-slice grid (conv1 computed once per row
    # tile, reused across Cout slices).
    kd = jax.random.split(jax.random.PRNGKey(3), 3)
    xdc = jax.random.normal(kd[0], (1, 16, 16, 16), jnp.float32).astype(COMPUTE_DTYPE)
    pdc = (_init_conv(kd[1], 32, 16, 3), _init_conv(kd[2], 256, 32, 3))
    dc = jax.jit(functools.partial(double_conv, tile_cap=8, cout_cap=128))
    out3 = dc(xdc, pdc)
    jax.block_until_ready(out3)
    assert out3.shape == (1, 16, 16, 256), out3.shape
    ref3 = _ref_double_conv(xdc, pdc)
    err3 = float(jnp.max(jnp.abs(out3.astype(jnp.float32) - ref3.astype(jnp.float32))))
    assert err3 < 2e-2, f"Pallas/XLA mismatch (cout-sliced DoubleConv): max abs err = {err3}"

    print("KERNEL_OK")
</pallas_src>

<mosaic_0001>
module attributes {stable_mosaic.version = 11 : i64} {
  func.func @_maxpool_kernel(%arg0: i32, %arg1: i32, %arg2: memref<1x8x2x8x16xbf16, #tpu.memory_space<vmem>>, %arg3: memref<1x8x8x8xbf16, #tpu.memory_space<vmem>>) attributes {dimension_semantics = [#tpu.dimension_semantics<parallel>, #tpu.dimension_semantics<parallel>], iteration_bounds = array<i64: 2, 1>, scalar_prefetch = 0 : i64, scratch_operands = 0 : i64, tpu.core_type = #tpu.core_type<tc>, window_params = [{transform_indices = @transform_0, window_bounds = array<i64: 1, 8, 2, 8, 16>}, {transform_indices = @transform_1, window_bounds = array<i64: 1, 8, 8, 8>}]} {
    %c0 = arith.constant 0 : index
    %c0_0 = arith.constant 0 : index
    %c0_1 = arith.constant 0 : index
    %c0_2 = arith.constant 0 : index
    %c0_3 = arith.constant 0 : index
    %0 = vector.load %arg2[%c0, %c0_0, %c0_1, %c0_2, %c0_3] : memref<1x8x2x8x16xbf16, #tpu.memory_space<vmem>>, vector<1x8x1x8x16xbf16>
    %1 = vector.shape_cast %0 : vector<1x8x1x8x16xbf16> to vector<8x8x16xbf16>
    %c0_4 = arith.constant 0 : index
    %c0_5 = arith.constant 0 : index
    %c1 = arith.constant 1 : index
    %c0_6 = arith.constant 0 : index
    %c0_7 = arith.constant 0 : index
    %2 = vector.load %arg2[%c0_4, %c0_5, %c1, %c0_6, %c0_7] : memref<1x8x2x8x16xbf16, #tpu.memory_space<vmem>>, vector<1x8x1x8x16xbf16>
    %3 = vector.shape_cast %2 : vector<1x8x1x8x16xbf16> to vector<8x8x16xbf16>
    %4 = arith.maximumf %1, %3 : vector<8x8x16xbf16>
    %5 = vector.extract_strided_slice %4 {offsets = [0, 0, 0], sizes = [8, 8, 8], strides = [1, 1, 1]} : vector<8x8x16xbf16> to vector<8x8x8xbf16>
    %6 = vector.extract_strided_slice %4 {offsets = [0, 0, 8], sizes = [8, 8, 8], strides = [1, 1, 1]} : vector<8x8x16xbf16> to vector<8x8x8xbf16>
    %7 = arith.maximumf %5, %6 : vector<8x8x8xbf16>
    %c0_8 = arith.constant 0 : index
    %c0_9 = arith.constant 0 : index
    %c0_10 = arith.constant 0 : index
    %c0_11 = arith.constant 0 : index
    %8 = vector.load %arg3[%c0_8, %c0_9, %c0_10, %c0_11] : memref<1x8x8x8xbf16, #tpu.memory_space<vmem>>, vector<1x8x8x8xbf16>
    %9 = vector.shape_cast %8 : vector<1x8x8x8xbf16> to vector<8x8x8xbf16>
    %10 = vector.shape_cast %7 : vector<8x8x8xbf16> to vector<1x8x8x8xbf16>
    tpu.vector_store %arg3[%c0_8, %c0_9, %c0_10, %c0_11], %10 {strides = array<i32>} : memref<1x8x8x8xbf16, #tpu.memory_space<vmem>>, vector<1x8x8x8xbf16>,
    return
  }
  func.func @transform_0(%arg0: i32, %arg1: i32) -> (i32, i32, i32, i32, i32) {
    %c0_i32 = arith.constant 0 : i32
    %c0_i32_0 = arith.constant 0 : i32
    %c0_i32_1 = arith.constant 0 : i32
    %c0_i32_2 = arith.constant 0 : i32
    return %arg0, %arg1, %c0_i32, %c0_i32_0, %c0_i32_1 : i32, i32, i32, i32, i32
  }
  func.func @transform_1(%arg0: i32, %arg1: i32) -> (i32, i32, i32, i32) {
    %c0_i32 = arith.constant 0 : i32
    %c0_i32_0 = arith.constant 0 : i32
    %c0_i32_1 = arith.constant 0 : i32
    return %arg0, %arg1, %c0_i32, %c0_i32_0 : i32, i32, i32, i32
  }
}

module attributes {stable_mosaic.version = 11 : i64} {
  func.func @_matmul_bias_kernel(%arg0: i32, %arg1: i32, %arg2: memref<1x256x27xbf16, #tpu.memory_space<vmem>>, %arg3: memref<27x8xbf16, #tpu.memory_space<vmem>>, %arg4: memref<1x8xf32, #tpu.memory_space<vmem>>, %arg5: memref<1x256x8xbf16, #tpu.memory_space<vmem>>) attributes {dimension_semantics = [#tpu.dimension_semantics<parallel>, #tpu.dimension_semantics<parallel>], iteration_bounds = array<i64: 2, 1>, scalar_prefetch = 0 : i64, scratch_operands = 0 : i64, tpu.core_type = #tpu.core_type<tc>, window_params = [{transform_indices = @transform_0, window_bounds = array<i64: 1, 256, 27>}, {pipeline_mode = #tpu.pipeline_mode<synchronous>, transform_indices = @transform_1, window_bounds = array<i64: 27, 8>}, {pipeline_mode = #tpu.pipeline_mode<synchronous>, transform_indices = @transform_2, window_bounds = array<i64: 1, 8>}, {transform_indices = @transform_3, window_bounds = array<i64: 1, 256, 8>}]} {
    %c0 = arith.constant 0 : index
    %c0_0 = arith.constant 0 : index
    %c0_1 = arith.constant 0 : index
    %0 = vector.load %arg2[%c0, %c0_0, %c0_1] : memref<1x256x27xbf16, #tpu.memory_space<vmem>>, vector<1x256x27xbf16>
    %1 = vector.shape_cast %0 : vector<1x256x27xbf16> to vector<256x27xbf16>
    %c0_2 = arith.constant 0 : index
    %c0_3 = arith.constant 0 : index
    %2 = vector.load %arg3[%c0_2, %c0_3] : memref<27x8xbf16, #tpu.memory_space<vmem>>, vector<27x8xbf16>
    %cst = arith.constant dense<0.000000e+00> : vector<256x8xf32>
    %3 = tpu.matmul %1, %2, %cst {dimension_numbers = #tpu.dot_dimension_numbers<[1], [0], [0], [1], [0, 0, 1, 1], [], []>} : vector<256x27xbf16>, vector<27x8xbf16>, vector<256x8xf32> -> vector<256x8xf32>
    %c0_4 = arith.constant 0 : index
    %c0_5 = arith.constant 0 : index
    %4 = vector.load %arg4[%c0_4, %c0_5] : memref<1x8xf32, #tpu.memory_space<vmem>>, vector<1x8xf32>
    %5 = vector.broadcast %4 : vector<1x8xf32> to vector<256x8xf32>
    %6 = arith.addf %3, %5 : vector<256x8xf32>
    %7 = arith.truncf %6 : vector<256x8xf32> to vector<256x8xbf16>
    %c0_6 = arith.constant 0 : index
    %c0_7 = arith.constant 0 : index
    %c0_8 = arith.constant 0 : index
    %8 = vector.load %arg5[%c0_6, %c0_7, %c0_8] : memref<1x256x8xbf16, #tpu.memory_space<vmem>>, vector<1x256x8xbf16>
    %9 = vector.shape_cast %8 : vector<1x256x8xbf16> to vector<256x8xbf16>
    %10 = vector.shape_cast %7 : vector<256x8xbf16> to vector<1x256x8xbf16>
    tpu.vector_store %arg5[%c0_6, %c0_7, %c0_8], %10 {strides = array<i32>} : memref<1x256x8xbf16, #tpu.memory_space<vmem>>, vector<1x256x8xbf16>,
    return
  }
  func.func @transform_0(%arg0: i32, %arg1: i32) -> (i32, i32, i32) {
    %c0_i32 = arith.constant 0 : i32
    %c0_i32_0 = arith.constant 0 : i32
    return %arg0, %arg1, %c0_i32 : i32, i32, i32
  }
  func.func @transform_1(%arg0: i32, %arg1: i32) -> (i32, i32) {
    %c0_i32 = arith.constant 0 : i32
    %c0_i32_0 = arith.constant 0 : i32
    %c0_i32_1 = arith.constant 0 : i32
    return %c0_i32, %c0_i32_0 : i32, i32
  }
  func.func @transform_2(%arg0: i32, %arg1: i32) -> (i32, i32) {
    %c0_i32 = arith.constant 0 : i32
    %c0_i32_0 = arith.constant 0 : i32
    %c0_i32_1 = arith.constant 0 : i32
    return %c0_i32, %c0_i32_0 : i32, i32
  }
  func.func @transform_3(%arg0: i32, %arg1: i32) -> (i32, i32, i32) {
    %c0_i32 = arith.constant 0 : i32
    %c0_i32_0 = arith.constant 0 : i32
    return %arg0, %arg1, %c0_i32 : i32, i32, i32
  }
}

module attributes {stable_mosaic.version = 11 : i64} {
  func.func @_double_conv_kernel(%arg0: i32, %arg1: i32, %arg2: i32, %arg3: memref<1x64x8xbf16, #tpu.memory_space<vmem>>, %arg4: memref<1x64x8xbf16, #tpu.memory_space<vmem>>, %arg5: memref<9x8x8xbf16, #tpu.memory_space<vmem>>, %arg6: memref<1x8xf32, #tpu.memory_space<vmem>>, %arg7: memref<9x8x8xbf16, #tpu.memory_space<vmem>>, %arg8: memref<1x8xf32, #tpu.memory_space<vmem>>, %arg9: memref<1x64x8xbf16, #tpu.memory_space<vmem>>, %arg10: memref<128x8xbf16, #tpu.memory_space<vmem>>, %arg11: memref<96x8xbf16, #tpu.memory_space<vmem>>) attributes {dimension_semantics = [#tpu.dimension_semantics<parallel>, #tpu.dimension_semantics<parallel>, #tpu.dimension_semantics<arbitrary>], iteration_bounds = array<i64: 2, 1, 1>, scalar_prefetch = 0 : i64, scratch_operands = 2 : i64, tpu.core_type = #tpu.core_type<tc>, window_params = [{transform_indices = @transform_0, window_bounds = array<i64: 1, 64, 8>}, {transform_indices = @transform_1, window_bounds = array<i64: 1, 64, 8>}, {pipeline_mode = #tpu.pipeline_mode<synchronous>, transform_indices = @transform_2, window_bounds = array<i64: 9, 8, 8>}, {pipeline_mode = #tpu.pipeline_mode<synchronous>, transform_indices = @transform_3, window_bounds = array<i64: 1, 8>}, {transform_indices = @transform_4, window_bounds = array<i64: 9, 8, 8>}, {transform_indices = @transform_5, window_bounds = array<i64: 1, 8>}, {transform_indices = @transform_6, window_bounds = array<i64: 1, 64, 8>}]} {
    %0 = tpu.iota {dimensions = array<i32: 0>} : vector<80x1xi32>
    %c8_i32 = arith.constant 8 : i32
    %c0_i32 = arith.constant 0 : i32
    %1 = arith.cmpi eq, %c8_i32, %c0_i32 : i32
    %c1_i32 = arith.constant 1 : i32
    %2 = arith.select %1, %c1_i32, %c8_i32 : i32
    %3 = vector.broadcast %2 : i32 to vector<80x1xi32>
    %4 = arith.remsi %0, %3 : vector<80x1xi32>
    %c0_i32_0 = arith.constant 0 : i32
    %5 = vector.broadcast %c0_i32_0 : i32 to vector<80x1xi32>
    %6 = arith.cmpi ne, %4, %5 : vector<80x1xi32>
    %c0_i32_1 = arith.constant 0 : i32
    %7 = vector.broadcast %c0_i32_1 : i32 to vector<80x1xi32>
    %8 = arith.cmpi slt, %4, %7 : vector<80x1xi32>
    %c0_i32_2 = arith.constant 0 : i32
    %9 = arith.cmpi slt, %2, %c0_i32_2 : i32
    %10 = vector.broadcast %9 : i1 to vector<80x1xi1>
    %11 = vector.broadcast %10 : vector<80x1xi1> to vector<80x1xi1>
    %12 = arith.xori %8, %11 : vector<80x1xi1>
    %13 = arith.andi %12, %6 : vector<80x1xi1>
    %14 = vector.broadcast %2 : i32 to vector<80x1xi32>
    %15 = arith.addi %4, %14 : vector<80x1xi32>
    %16 = arith.select %13, %15, %4 : vector<80x1xi1>, vector<80x1xi32>
    %17 = tpu.iota {dimensions = array<i32: 0>} : vector<64x1xi32>
    %c8_i32_3 = arith.constant 8 : i32
    %c0_i32_4 = arith.constant 0 : i32
    %18 = arith.cmpi eq, %c8_i32_3, %c0_i32_4 : i32
    %c1_i32_5 = arith.constant 1 : i32
    %19 = arith.select %18, %c1_i32_5, %c8_i32_3 : i32
    %20 = vector.broadcast %19 : i32 to vector<64x1xi32>
    %21 = arith.remsi %17, %20 : vector<64x1xi32>
    %c0_i32_6 = arith.constant 0 : i32
    %22 = vector.broadcast %c0_i32_6 : i32 to vector<64x1xi32>
    %23 = arith.cmpi ne, %21, %22 : vector<64x1xi32>
    %c0_i32_7 = arith.constant 0 : i32
    %24 = vector.broadcast %c0_i32_7 : i32 to vector<64x1xi32>
    %25 = arith.cmpi slt, %21, %24 : vector<64x1xi32>
    %c0_i32_8 = arith.constant 0 : i32
    %26 = arith.cmpi slt, %19, %c0_i32_8 : i32
    %27 = vector.broadcast %26 : i1 to vector<64x1xi1>
    %28 = vector.broadcast %27 : vector<64x1xi1> to vector<64x1xi1>
    %29 = arith.xori %25, %28 : vector<64x1xi1>
    %30 = arith.andi %29, %23 : vector<64x1xi1>
    %31 = vector.broadcast %19 : i32 to vector<64x1xi32>
    %32 = arith.addi %21, %31 : vector<64x1xi32>
    %33 = arith.select %30, %32, %21 : vector<64x1xi1>, vector<64x1xi32>
    %c0 = arith.constant 0 : index
    %c0_9 = arith.constant 0 : index
    %c0_10 = arith.constant 0 : index
    %34 = vector.load %arg3[%c0, %c0_9, %c0_10] : memref<1x64x8xbf16, #tpu.memory_space<vmem>>, vector<1x64x8xbf16>
    %35 = vector.shape_cast %34 : vector<1x64x8xbf16> to vector<64x8xbf16>
    %c0_11 = arith.constant 0 : index
    %c0_12 = arith.constant 0 : index
    %36 = vector.load %arg10[%c0_11, %c0_12] : memref<128x8xbf16, #tpu.memory_space<vmem>>, vector<64x8xbf16>
    tpu.vector_store %arg10[%c0_11, %c0_12], %35 {strides = array<i32>} : memref<128x8xbf16, #tpu.memory_space<vmem>>, vector<64x8xbf16>,
    %c0_13 = arith.constant 0 : index
    %c0_14 = arith.constant 0 : index
    %c0_15 = arith.constant 0 : index
    %37 = vector.load %arg4[%c0_13, %c0_14, %c0_15] : memref<1x64x8xbf16, #tpu.memory_space<vmem>>, vector<1x64x8xbf16>
    %38 = vector.shape_cast %37 : vector<1x64x8xbf16> to vector<64x8xbf16>
    %c64 = arith.constant 64 : index
    %c0_16 = arith.constant 0 : index
    %39 = vector.load %arg10[%c64, %c0_16] : memref<128x8xbf16, #tpu.memory_space<vmem>>, vector<64x8xbf16>
    tpu.vector_store %arg10[%c64, %c0_16], %38 {strides = array<i32>} : memref<128x8xbf16, #tpu.memory_space<vmem>>, vector<64x8xbf16>,
    %c0_i32_17 = arith.constant 0 : i32
    %40 = vector.broadcast %c0_i32_17 : i32 to vector<80x1xi32>
    %41 = arith.cmpi ne, %16, %40 : vector<80x1xi32>
    %c7_i32 = arith.constant 7 : i32
    %42 = vector.broadcast %c7_i32 : i32 to vector<80x1xi32>
    %43 = arith.cmpi ne, %16, %42 : vector<80x1xi32>
    %cst = arith.constant 0.000000e+00 : f32
    %44 = vector.broadcast %cst : f32 to vector<80x8xf32>
    %c0_18 = arith.constant 0 : index
    %c0_19 = arith.constant 0 : index
    %45 = vector.load %arg10[%c0_18, %c0_19] : memref<128x8xbf16, #tpu.memory_space<vmem>>, vector<80x8xbf16>
    %c0_i32_20 = arith.constant 0 : i32
    %46 = arith.sitofp %c0_i32_20 : i32 to bf16
    %47 = vector.shape_cast %41 : vector<80x1xi1> to vector<80x1xi1>
    %48 = vector.broadcast %47 : vector<80x1xi1> to vector<80x8xi1>
    %49 = vector.broadcast %46 : bf16 to vector<80x8xbf16>
    %50 = arith.select %48, %45, %49 : vector<80x8xi1>, vector<80x8xbf16>
    %c0_21 = arith.constant 0 : index
    %c0_22 = arith.constant 0 : index
    %c0_23 = arith.constant 0 : index
    %51 = vector.load %arg5[%c0_21, %c0_22, %c0_23] : memref<9x8x8xbf16, #tpu.memory_space<vmem>>, vector<1x8x8xbf16>
    %52 = vector.shape_cast %51 : vector<1x8x8xbf16> to vector<8x8xbf16>
    %cst_24 = arith.constant dense<0.000000e+00> : vector<80x8xf32>
    %53 = tpu.matmul %50, %52, %cst_24 {dimension_numbers = #tpu.dot_dimension_numbers<[1], [0], [0], [1], [0, 0, 1, 1], [], []>} : vector<80x8xbf16>, vector<8x8xbf16>, vector<80x8xf32> -> vector<80x8xf32>
    %54 = arith.addf %44, %53 : vector<80x8xf32>
    %c1 = arith.constant 1 : index
    %c0_25 = arith.constant 0 : index
    %55 = vector.load %arg10[%c1, %c0_25] : memref<128x8xbf16, #tpu.memory_space<vmem>>, vector<80x8xbf16>
    %c1_26 = arith.constant 1 : index
    %c0_27 = arith.constant 0 : index
    %c0_28 = arith.constant 0 : index
    %56 = vector.load %arg5[%c1_26, %c0_27, %c0_28] : memref<9x8x8xbf16, #tpu.memory_space<vmem>>, vector<1x8x8xbf16>
    %57 = vector.shape_cast %56 : vector<1x8x8xbf16> to vector<8x8xbf16>
    %cst_29 = arith.constant dense<0.000000e+00> : vector<80x8xf32>
    %58 = tpu.matmul %55, %57, %cst_29 {dimension_numbers = #tpu.dot_dimension_numbers<[1], [0], [0], [1], [0, 0, 1, 1], [], []>} : vector<80x8xbf16>, vector<8x8xbf16>, vector<80x8xf32> -> vector<80x8xf32>
    %59 = arith.addf %54, %58 : vector<80x8xf32>
    %c2 = arith.constant 2 : index
    %c0_30 = arith.constant 0 : index
    %60 = vector.load %arg10[%c2, %c0_30] : memref<128x8xbf16, #tpu.memory_space<vmem>>, vector<80x8xbf16>
    %c0_i32_31 = arith.constant 0 : i32
    %61 = arith.sitofp %c0_i32_31 : i32 to bf16
    %62 = vector.shape_cast %43 : vector<80x1xi1> to vector<80x1xi1>
    %63 = vector.broadcast %62 : vector<80x1xi1> to vector<80x8xi1>
    %64 = vector.broadcast %61 : bf16 to vector<80x8xbf16>
    %65 = arith.select %63, %60, %64 : vector<80x8xi1>, vector<80x8xbf16>
    %c2_32 = arith.constant 2 : index
    %c0_33 = arith.constant 0 : index
    %c0_34 = arith.constant 0 : index
    %66 = vector.load %arg5[%c2_32, %c0_33, %c0_34] : memref<9x8x8xbf16, #tpu.memory_space<vmem>>, vector<1x8x8xbf16>
    %67 = vector.shape_cast %66 : vector<1x8x8xbf16> to vector<8x8xbf16>
    %cst_35 = arith.constant dense<0.000000e+00> : vector<80x8xf32>
    %68 = tpu.matmul %65, %67, %cst_35 {dimension_numbers = #tpu.dot_dimension_numbers<[1], [0], [0], [1], [0, 0, 1, 1], [], []>} : vector<80x8xbf16>, vector<8x8xbf16>, vector<80x8xf32> -> vector<80x8xf32>
    %69 = arith.addf %59, %68 : vector<80x8xf32>
    %c8 = arith.constant 8 : index
    %c0_36 = arith.constant 0 : index
    %70 = vector.load %arg10[%c8, %c0_36] : memref<128x8xbf16, #tpu.memory_space<vmem>>, vector<80x8xbf16>
    %c0_i32_37 = arith.constant 0 : i32
    %71 = arith.sitofp %c0_i32_37 : i32 to bf16
    %72 = vector.shape_cast %41 : vector<80x1xi1> to vector<80x1xi1>
    %73 = vector.broadcast %72 : vector<80x1xi1> to vector<80x8xi1>
    %74 = vector.broadcast %71 : bf16 to vector<80x8xbf16>
    %75 = arith.select %73, %70, %74 : vector<80x8xi1>, vector<80x8xbf16>
    %c3 = arith.constant 3 : index
    %c0_38 = arith.constant 0 : index
    %c0_39 = arith.constant 0 : index
    %76 = vector.load %arg5[%c3, %c0_38, %c0_39] : memref<9x8x8xbf16, #tpu.memory_space<vmem>>, vector<1x8x8xbf16>
    %77 = vector.shape_cast %76 : vector<1x8x8xbf16> to vector<8x8xbf16>
    %cst_40 = arith.constant dense<0.000000e+00> : vector<80x8xf32>
    %78 = tpu.matmul %75, %77, %cst_40 {dimension_numbers = #tpu.dot_dimension_numbers<[1], [0], [0], [1], [0, 0, 1, 1], [], []>} : vector<80x8xbf16>, vector<8x8xbf16>, vector<80x8xf32> -> vector<80x8xf32>
    %79 = arith.addf %69, %78 : vector<80x8xf32>
    %c9 = arith.constant 9 : index
    %c0_41 = arith.constant 0 : index
    %80 = vector.load %arg10[%c9, %c0_41] : memref<128x8xbf16, #tpu.memory_space<vmem>>, vector<80x8xbf16>
    %c4 = arith.constant 4 : index
    %c0_42 = arith.constant 0 : index
    %c0_43 = arith.constant 0 : index
    %81 = vector.load %arg5[%c4, %c0_42, %c0_43] : memref<9x8x8xbf16, #tpu.memory_space<vmem>>, vector<1x8x8xbf16>
    %82 = vector.shape_cast %81 : vector<1x8x8xbf16> to vector<8x8xbf16>
    %cst_44 = arith.constant dense<0.000000e+00> : vector<80x8xf32>
    %83 = tpu.matmul %80, %82, %cst_44 {dimension_numbers = #tpu.dot_dimension_numbers<[1], [0], [0], [1], [0, 0, 1, 1], [], []>} : vector<80x8xbf16>, vector<8x8xbf16>, vector<80x8xf32> -> vector<80x8xf32>
    %84 = arith.addf %79, %83 : vector<80x8xf32>
    %c10 = arith.constant 10 : index
    %c0_45 = arith.constant 0 : index
    %85 = vector.load %arg10[%c10, %c0_45] : memref<128x8xbf16, #tpu.memory_space<vmem>>, vector<80x8xbf16>
    %c0_i32_46 = arith.constant 0 : i32
    %86 = arith.sitofp %c0_i32_46 : i32 to bf16
    %87 = vector.shape_cast %43 : vector<80x1xi1> to vector<80x1xi1>
    %88 = vector.broadcast %87 : vector<80x1xi1> to vector<80x8xi1>
    %89 = vector.broadcast %86 : bf16 to vector<80x8xbf16>
    %90 = arith.select %88, %85, %89 : vector<80x8xi1>, vector<80x8xbf16>
    %c5 = arith.constant 5 : index
    %c0_47 = arith.constant 0 : index
    %c0_48 = arith.constant 0 : index
    %91 = vector.load %arg5[%c5, %c0_47, %c0_48] : memref<9x8x8xbf16, #tpu.memory_space<vmem>>, vector<1x8x8xbf16>
    %92 = vector.shape_cast %91 : vector<1x8x8xbf16> to vector<8x8xbf16>
    %cst_49 = arith.constant dense<0.000000e+00> : vector<80x8xf32>
    %93 = tpu.matmul %90, %92, %cst_49 {dimension_numbers = #tpu.dot_dimension_numbers<[1], [0], [0], [1], [0, 0, 1, 1], [], []>} : vector<80x8xbf16>, vector<8x8xbf16>, vector<80x8xf32> -> vector<80x8xf32>
    %94 = arith.addf %84, %93 : vector<80x8xf32>
    %c16 = arith.constant 16 : index
    %c0_50 = arith.constant 0 : index
    %95 = vector.load %arg10[%c16, %c0_50] : memref<128x8xbf16, #tpu.memory_space<vmem>>, vector<80x8xbf16>
    %c0_i32_51 = arith.constant 0 : i32
    %96 = arith.sitofp %c0_i32_51 : i32 to bf16
    %97 = vector.shape_cast %41 : vector<80x1xi1> to vector<80x1xi1>
    %98 = vector.broadcast %97 : vector<80x1xi1> to vector<80x8xi1>
    %99 = vector.broadcast %96 : bf16 to vector<80x8xbf16>
    %100 = arith.select %98, %95, %99 : vector<80x8xi1>, vector<80x8xbf16>
    %c6 = arith.constant 6 : index
    %c0_52 = arith.constant 0 : index
    %c0_53 = arith.constant 0 : index
    %101 = vector.load %arg5[%c6, %c0_52, %c0_53] : memref<9x8x8xbf16, #tpu.memory_space<vmem>>, vector<1x8x8xbf16>
    %102 = vector.shape_cast %101 : vector<1x8x8xbf16> to vector<8x8xbf16>
    %cst_54 = arith.constant dense<0.000000e+00> : vector<80x8xf32>
    %103 = tpu.matmul %100, %102, %cst_54 {dimension_numbers = #tpu.dot_dimension_numbers<[1], [0], [0], [1], [0, 0, 1, 1], [], []>} : vector<80x8xbf16>, vector<8x8xbf16>, vector<80x8xf32> -> vector<80x8xf32>
    %104 = arith.addf %94, %103 : vector<80x8xf32>
    %c17 = arith.constant 17 : index
    %c0_55 = arith.constant 0 : index
    %105 = vector.load %arg10[%c17, %c0_55] : memref<128x8xbf16, #tpu.memory_space<vmem>>, vector<80x8xbf16>
    %c7 = arith.constant 7 : index
    %c0_56 = arith.constant 0 : index
    %c0_57 = arith.constant 0 : index
    %106 = vector.load %arg5[%c7, %c0_56, %c0_57] : memref<9x8x8xbf16, #tpu.memory_space<vmem>>, vector<1x8x8xbf16>
    %107 = vector.shape_cast %106 : vector<1x8x8xbf16> to vector<8x8xbf16>
    %cst_58 = arith.constant dense<0.000000e+00> : vector<80x8xf32>
    %108 = tpu.matmul %105, %107, %cst_58 {dimension_numbers = #tpu.dot_dimension_numbers<[1], [0], [0], [1], [0, 0, 1, 1], [], []>} : vector<80x8xbf16>, vector<8x8xbf16>, vector<80x8xf32> -> vector<80x8xf32>
    %109 = arith.addf %104, %108 : vector<80x8xf32>
    %c18 = arith.constant 18 : index
    %c0_59 = arith.constant 0 : index
    %110 = vector.load %arg10[%c18, %c0_59] : memref<128x8xbf16, #tpu.memory_space<vmem>>, vector<80x8xbf16>
    %c0_i32_60 = arith.constant 0 : i32
    %111 = arith.sitofp %c0_i32_60 : i32 to bf16
    %112 = vector.shape_cast %43 : vector<80x1xi1> to vector<80x1xi1>
    %113 = vector.broadcast %112 : vector<80x1xi1> to vector<80x8xi1>
    %114 = vector.broadcast %111 : bf16 to vector<80x8xbf16>
    %115 = arith.select %113, %110, %114 : vector<80x8xi1>, vector<80x8xbf16>
    %c8_61 = arith.constant 8 : index
    %c0_62 = arith.constant 0 : index
    %c0_63 = arith.constant 0 : index
    %116 = vector.load %arg5[%c8_61, %c0_62, %c0_63] : memref<9x8x8xbf16, #tpu.memory_space<vmem>>, vector<1x8x8xbf16>
    %117 = vector.shape_cast %116 : vector<1x8x8xbf16> to vector<8x8xbf16>
    %cst_64 = arith.constant dense<0.000000e+00> : vector<80x8xf32>
    %118 = tpu.matmul %115, %117, %cst_64 {dimension_numbers = #tpu.dot_dimension_numbers<[1], [0], [0], [1], [0, 0, 1, 1], [], []>} : vector<80x8xbf16>, vector<8x8xbf16>, vector<80x8xf32> -> vector<80x8xf32>
    %119 = arith.addf %109, %118 : vector<80x8xf32>
    %c0_65 = arith.constant 0 : index
    %c0_66 = arith.constant 0 : index
    %120 = vector.load %arg6[%c0_65, %c0_66] : memref<1x8xf32, #tpu.memory_space<vmem>>, vector<1x8xf32>
    %121 = vector.broadcast %120 : vector<1x8xf32> to vector<80x8xf32>
    %122 = arith.addf %119, %121 : vector<80x8xf32>
    %cst_67 = arith.constant 0.000000e+00 : f32
    %123 = vector.broadcast %cst_67 : f32 to vector<80x8xf32>
    %124 = arith.maximumf %122, %123 : vector<80x8xf32>
    %125 = arith.truncf %124 : vector<80x8xf32> to vector<80x8xbf16>
    %c8_68 = arith.constant 8 : index
    %c0_69 = arith.constant 0 : index
    %126 = vector.load %arg11[%c8_68, %c0_69] : memref<96x8xbf16, #tpu.memory_space<vmem>>, vector<80x8xbf16>
    tpu.vector_store %arg11[%c8_68, %c0_69], %125 {strides = array<i32>} : memref<96x8xbf16, #tpu.memory_space<vmem>>, vector<80x8xbf16>,
    %cst_70 = arith.constant 0.000000e+00 : bf16
    %127 = vector.broadcast %cst_70 : bf16 to vector<8x8xbf16>
    %c8_71 = arith.constant 8 : index
    %c0_72 = arith.constant 0 : index
    %128 = vector.load %arg11[%c8_71, %c0_72] : memref<96x8xbf16, #tpu.memory_space<vmem>>, vector<8x8xbf16>
    tpu.vector_store %arg11[%c8_71, %c0_72], %127 {strides = array<i32>} : memref<96x8xbf16, #tpu.memory_space<vmem>>, vector<8x8xbf16>,
    %cst_73 = arith.constant 0.000000e+00 : bf16
    %129 = vector.broadcast %cst_73 : bf16 to vector<8x8xbf16>
    %c80 = arith.constant 80 : index
    %c0_74 = arith.constant 0 : index
    %130 = vector.load %arg11[%c80, %c0_74] : memref<96x8xbf16, #tpu.memory_space<vmem>>, vector<8x8xbf16>
    tpu.vector_store %arg11[%c80, %c0_74], %129 {strides = array<i32>} : memref<96x8xbf16, #tpu.memory_space<vmem>>, vector<8x8xbf16>,
    %c0_i32_75 = arith.constant 0 : i32
    %131 = vector.broadcast %c0_i32_75 : i32 to vector<64x1xi32>
    %132 = arith.cmpi ne, %33, %131 : vector<64x1xi32>
    %c7_i32_76 = arith.constant 7 : i32
    %133 = vector.broadcast %c7_i32_76 : i32 to vector<64x1xi32>
    %134 = arith.cmpi ne, %33, %133 : vector<64x1xi32>
    %cst_77 = arith.constant 0.000000e+00 : f32
    %135 = vector.broadcast %cst_77 : f32 to vector<64x8xf32>
    %c7_78 = arith.constant 7 : index
    %c0_79 = arith.constant 0 : index
    %136 = vector.load %arg11[%c7_78, %c0_79] : memref<96x8xbf16, #tpu.memory_space<vmem>>, vector<64x8xbf16>
    %c0_i32_80 = arith.constant 0 : i32
    %137 = arith.sitofp %c0_i32_80 : i32 to bf16
    %138 = vector.shape_cast %132 : vector<64x1xi1> to vector<64x1xi1>
    %139 = vector.broadcast %138 : vector<64x1xi1> to vector<64x8xi1>
    %140 = vector.broadcast %137 : bf16 to vector<64x8xbf16>
    %141 = arith.select %139, %136, %140 : vector<64x8xi1>, vector<64x8xbf16>
    %c0_81 = arith.constant 0 : index
    %c0_82 = arith.constant 0 : index
    %c0_83 = arith.constant 0 : index
    %142 = vector.load %arg7[%c0_81, %c0_82, %c0_83] : memref<9x8x8xbf16, #tpu.memory_space<vmem>>, vector<1x8x8xbf16>
    %143 = vector.shape_cast %142 : vector<1x8x8xbf16> to vector<8x8xbf16>
    %cst_84 = arith.constant dense<0.000000e+00> : vector<64x8xf32>
    %144 = tpu.matmul %141, %143, %cst_84 {dimension_numbers = #tpu.dot_dimension_numbers<[1], [0], [0], [1], [0, 0, 1, 1], [], []>} : vector<64x8xbf16>, vector<8x8xbf16>, vector<64x8xf32> -> vector<64x8xf32>
    %145 = arith.addf %135, %144 : vector<64x8xf32>
    %c8_85 = arith.constant 8 : index
    %c0_86 = arith.constant 0 : index
    %146 = vector.load %arg11[%c8_85, %c0_86] : memref<96x8xbf16, #tpu.memory_space<vmem>>, vector<64x8xbf16>
    %c1_87 = arith.constant 1 : index
    %c0_88 = arith.constant 0 : index
    %c0_89 = arith.constant 0 : index
    %147 = vector.load %arg7[%c1_87, %c0_88, %c0_89] : memref<9x8x8xbf16, #tpu.memory_space<vmem>>, vector<1x8x8xbf16>
    %148 = vector.shape_cast %147 : vector<1x8x8xbf16> to vector<8x8xbf16>
    %cst_90 = arith.constant dense<0.000000e+00> : vector<64x8xf32>
    %149 = tpu.matmul %146, %148, %cst_90 {dimension_numbers = #tpu.dot_dimension_numbers<[1], [0], [0], [1], [0, 0, 1, 1], [], []>} : vector<64x8xbf16>, vector<8x8xbf16>, vector<64x8xf32> -> vector<64x8xf32>
    %150 = arith.addf %145, %149 : vector<64x8xf32>
    %c9_91 = arith.constant 9 : index
    %c0_92 = arith.constant 0 : index
    %151 = vector.load %arg11[%c9_91, %c0_92] : memref<96x8xbf16, #tpu.memory_space<vmem>>, vector<64x8xbf16>
    %c0_i32_93 = arith.constant 0 : i32
    %152 = arith.sitofp %c0_i32_93 : i32 to bf16
    %153 = vector.shape_cast %134 : vector<64x1xi1> to vector<64x1xi1>
    %154 = vector.broadcast %153 : vector<64x1xi1> to vector<64x8xi1>
    %155 = vector.broadcast %152 : bf16 to vector<64x8xbf16>
    %156 = arith.select %154, %151, %155 : vector<64x8xi1>, vector<64x8xbf16>
    %c2_94 = arith.constant 2 : index
    %c0_95 = arith.constant 0 : index
    %c0_96 = arith.constant 0 : index
    %157 = vector.load %arg7[%c2_94, %c0_95, %c0_96] : memref<9x8x8xbf16, #tpu.memory_space<vmem>>, vector<1x8x8xbf16>
    %158 = vector.shape_cast %157 : vector<1x8x8xbf16> to vector<8x8xbf16>
    %cst_97 = arith.constant dense<0.000000e+00> : vector<64x8xf32>
    %159 = tpu.matmul %156, %158, %cst_97 {dimension_numbers = #tpu.dot_dimension_numbers<[1], [0], [0], [1], [0, 0, 1, 1], [], []>} : vector<64x8xbf16>, vector<8x8xbf16>, vector<64x8xf32> -> vector<64x8xf32>
    %160 = arith.addf %150, %159 : vector<64x8xf32>
    %c15 = arith.constant 15 : index
    %c0_98 = arith.constant 0 : index
    %161 = vector.load %arg11[%c15, %c0_98] : memref<96x8xbf16, #tpu.memory_space<vmem>>, vector<64x8xbf16>
    %c0_i32_99 = arith.constant 0 : i32
    %162 = arith.sitofp %c0_i32_99 : i32 to bf16
    %163 = vector.shape_cast %132 : vector<64x1xi1> to vector<64x1xi1>
    %164 = vector.broadcast %163 : vector<64x1xi1> to vector<64x8xi1>
    %165 = vector.broadcast %162 : bf16 to vector<64x8xbf16>
    %166 = arith.select %164, %161, %165 : vector<64x8xi1>, vector<64x8xbf16>
    %c3_100 = arith.constant 3 : index
    %c0_101 = arith.constant 0 : index
    %c0_102 = arith.constant 0 : index
    %167 = vector.load %arg7[%c3_100, %c0_101, %c0_102] : memref<9x8x8xbf16, #tpu.memory_space<vmem>>, vector<1x8x8xbf16>
    %168 = vector.shape_cast %167 : vector<1x8x8xbf16> to vector<8x8xbf16>
    %cst_103 = arith.constant dense<0.000000e+00> : vector<64x8xf32>
    %169 = tpu.matmul %166, %168, %cst_103 {dimension_numbers = #tpu.dot_dimension_numbers<[1], [0], [0], [1], [0, 0, 1, 1], [], []>} : vector<64x8xbf16>, vector<8x8xbf16>, vector<64x8xf32> -> vector<64x8xf32>
    %170 = arith.addf %160, %169 : vector<64x8xf32>
    %c16_104 = arith.constant 16 : index
    %c0_105 = arith.constant 0 : index
    %171 = vector.load %arg11[%c16_104, %c0_105] : memref<96x8xbf16, #tpu.memory_space<vmem>>, vector<64x8xbf16>
    %c4_106 = arith.constant 4 : index
    %c0_107 = arith.constant 0 : index
    %c0_108 = arith.constant 0 : index
    %172 = vector.load %arg7[%c4_106, %c0_107, %c0_108] : memref<9x8x8xbf16, #tpu.memory_space<vmem>>, vector<1x8x8xbf16>
    %173 = vector.shape_cast %172 : vector<1x8x8xbf16> to vector<8x8xbf16>
    %cst_109 = arith.constant dense<0.000000e+00> : vector<64x8xf32>
    %174 = tpu.matmul %171, %173, %cst_109 {dimension_numbers = #tpu.dot_dimension_numbers<[1], [0], [0], [1], [0, 0, 1, 1], [], []>} : vector<64x8xbf16>, vector<8x8xbf16>, vector<64x8xf32> -> vector<64x8xf32>
    %175 = arith.addf %170, %174 : vector<64x8xf32>
    %c17_110 = arith.constant 17 : index
    %c0_111 = arith.constant 0 : index
    %176 = vector.load %arg11[%c17_110, %c0_111] : memref<96x8xbf16, #tpu.memory_space<vmem>>, vector<64x8xbf16>
    %c0_i32_112 = arith.constant 0 : i32
    %177 = arith.sitofp %c0_i32_112 : i32 to bf16
    %178 = vector.shape_cast %134 : vector<64x1xi1> to vector<64x1xi1>
    %179 = vector.broadcast %178 : vector<64x1xi1> to vector<64x8xi1>
    %180 = vector.broadcast %177 : bf16 to vector<64x8xbf16>
    %181 = arith.select %179, %176, %180 : vector<64x8xi1>, vector<64x8xbf16>
    %c5_113 = arith.constant 5 : index
    %c0_114 = arith.constant 0 : index
    %c0_115 = arith.constant 0 : index
    %182 = vector.load %arg7[%c5_113, %c0_114, %c0_115] : memref<9x8x8xbf16, #tpu.memory_space<vmem>>, vector<1x8x8xbf16>
    %183 = vector.shape_cast %182 : vector<1x8x8xbf16> to vector<8x8xbf16>
    %cst_116 = arith.constant dense<0.000000e+00> : vector<64x8xf32>
    %184 = tpu.matmul %181, %183, %cst_116 {dimension_numbers = #tpu.dot_dimension_numbers<[1], [0], [0], [1], [0, 0, 1, 1], [], []>} : vector<64x8xbf16>, vector<8x8xbf16>, vector<64x8xf32> -> vector<64x8xf32>
    %185 = arith.addf %175, %184 : vector<64x8xf32>
    %c23 = arith.constant 23 : index
    %c0_117 = arith.constant 0 : index
    %186 = vector.load %arg11[%c23, %c0_117] : memref<96x8xbf16, #tpu.memory_space<vmem>>, vector<64x8xbf16>
    %c0_i32_118 = arith.constant 0 : i32
    %187 = arith.sitofp %c0_i32_118 : i32 to bf16
    %188 = vector.shape_cast %132 : vector<64x1xi1> to vector<64x1xi1>
    %189 = vector.broadcast %188 : vector<64x1xi1> to vector<64x8xi1>
    %190 = vector.broadcast %187 : bf16 to vector<64x8xbf16>
    %191 = arith.select %189, %186, %190 : vector<64x8xi1>, vector<64x8xbf16>
    %c6_119 = arith.constant 6 : index
    %c0_120 = arith.constant 0 : index
    %c0_121 = arith.constant 0 : index
    %192 = vector.load %arg7[%c6_119, %c0_120, %c0_121] : memref<9x8x8xbf16, #tpu.memory_space<vmem>>, vector<1x8x8xbf16>
    %193 = vector.shape_cast %192 : vector<1x8x8xbf16> to vector<8x8xbf16>
    %cst_122 = arith.constant dense<0.000000e+00> : vector<64x8xf32>
    %194 = tpu.matmul %191, %193, %cst_122 {dimension_numbers = #tpu.dot_dimension_numbers<[1], [0], [0], [1], [0, 0, 1, 1], [], []>} : vector<64x8xbf16>, vector<8x8xbf16>, vector<64x8xf32> -> vector<64x8xf32>
    %195 = arith.addf %185, %194 : vector<64x8xf32>
    %c24 = arith.constant 24 : index
    %c0_123 = arith.constant 0 : index
    %196 = vector.load %arg11[%c24, %c0_123] : memref<96x8xbf16, #tpu.memory_space<vmem>>, vector<64x8xbf16>
    %c7_124 = arith.constant 7 : index
    %c0_125 = arith.constant 0 : index
    %c0_126 = arith.constant 0 : index
    %197 = vector.load %arg7[%c7_124, %c0_125, %c0_126] : memref<9x8x8xbf16, #tpu.memory_space<vmem>>, vector<1x8x8xbf16>
    %198 = vector.shape_cast %197 : vector<1x8x8xbf16> to vector<8x8xbf16>
    %cst_127 = arith.constant dense<0.000000e+00> : vector<64x8xf32>
    %199 = tpu.matmul %196, %198, %cst_127 {dimension_numbers = #tpu.dot_dimension_numbers<[1], [0], [0], [1], [0, 0, 1, 1], [], []>} : vector<64x8xbf16>, vector<8x8xbf16>, vector<64x8xf32> -> vector<64x8xf32>
    %200 = arith.addf %195, %199 : vector<64x8xf32>
    %c25 = arith.constant 25 : index
    %c0_128 = arith.constant 0 : index
    %201 = vector.load %arg11[%c25, %c0_128] : memref<96x8xbf16, #tpu.memory_space<vmem>>, vector<64x8xbf16>
    %c0_i32_129 = arith.constant 0 : i32
    %202 = arith.sitofp %c0_i32_129 : i32 to bf16
    %203 = vector.shape_cast %134 : vector<64x1xi1> to vector<64x1xi1>
    %204 = vector.broadcast %203 : vector<64x1xi1> to vector<64x8xi1>
    %205 = vector.broadcast %202 : bf16 to vector<64x8xbf16>
    %206 = arith.select %204, %201, %205 : vector<64x8xi1>, vector<64x8xbf16>
    %c8_130 = arith.constant 8 : index
    %c0_131 = arith.constant 0 : index
    %c0_132 = arith.constant 0 : index
    %207 = vector.load %arg7[%c8_130, %c0_131, %c0_132] : memref<9x8x8xbf16, #tpu.memory_space<vmem>>, vector<1x8x8xbf16>
    %208 = vector.shape_cast %207 : vector<1x8x8xbf16> to vector<8x8xbf16>
    %cst_133 = arith.constant dense<0.000000e+00> : vector<64x8xf32>
    %209 = tpu.matmul %206, %208, %cst_133 {dimension_numbers = #tpu.dot_dimension_numbers<[1], [0], [0], [1], [0, 0, 1, 1], [], []>} : vector<64x8xbf16>, vector<8x8xbf16>, vector<64x8xf32> -> vector<64x8xf32>
    %210 = arith.addf %200, %209 : vector<64x8xf32>
    %c0_134 = arith.constant 0 : index
    %c0_135 = arith.constant 0 : index
    %211 = vector.load %arg8[%c0_134, %c0_135] : memref<1x8xf32, #tpu.memory_space<vmem>>, vector<1x8xf32>
    %212 = vector.broadcast %211 : vector<1x8xf32> to vector<64x8xf32>
    %213 = arith.addf %210, %212 : vector<64x8xf32>
    %cst_136 = arith.constant 0.000000e+00 : f32
    %214 = vector.broadcast %cst_136 : f32 to vector<64x8xf32>
    %215 = arith.maximumf %213, %214 : vector<64x8xf32>
    %216 = arith.truncf %215 : vector<64x8xf32> to vector<64x8xbf16>
    %c0_137 = arith.constant 0 : index
    %c0_138 = arith.constant 0 : index
    %c0_139 = arith.constant 0 : index
    %217 = vector.load %arg9[%c0_137, %c0_138, %c0_139] : memref<1x64x8xbf16, #tpu.memory_space<vmem>>, vector<1x64x8xbf16>
    %218 = vector.shape_cast %217 : vector<1x64x8xbf16> to vector<64x8xbf16>
    %219 = vector.shape_cast %216 : vector<64x8xbf16> to vector<1x64x8xbf16>
    tpu.vector_store %arg9[%c0_137, %c0_138, %c0_139], %219 {strides = array<i32>} : memref<1x64x8xbf16, #tpu.memory_space<vmem>>, vector<1x64x8xbf16>,
    return
  }
  func.func @transform_0(%arg0: i32, %arg1: i32, %arg2: i32) -> (i32, i32, i32) {
    %c0_i32 = arith.constant 0 : i32
    %c0_i32_0 = arith.constant 0 : i32
    return %arg0, %arg1, %c0_i32 : i32, i32, i32
  }
  func.func @transform_1(%arg0: i32, %arg1: i32, %arg2: i32) -> (i32, i32, i32) {
    %c1_i32 = arith.constant 1 : i32
    %0 = arith.addi %arg1, %c1_i32 : i32
    %c1_i32_0 = arith.constant 1 : i32
    %1 = arith.muli %0, %c1_i32_0 : i32
    %c0_i32 = arith.constant 0 : i32
    %c0_i32_1 = arith.constant 0 : i32
    return %arg0, %1, %c0_i32 : i32, i32, i32
  }
  func.func @transform_2(%arg0: i32, %arg1: i32, %arg2: i32) -> (i32, i32, i32) {
    %c0_i32 = arith.constant 0 : i32
    %c0_i32_0 = arith.constant 0 : i32
    %c0_i32_1 = arith.constant 0 : i32
    %c0_i32_2 = arith.constant 0 : i32
    return %c0_i32, %c0_i32_0, %c0_i32_1 : i32, i32, i32
  }
  func.func @transform_3(%arg0: i32, %arg1: i32, %arg2: i32) -> (i32, i32) {
    %c0_i32 = arith.constant 0 : i32
    %c0_i32_0 = arith.constant 0 : i32
    %c0_i32_1 = arith.constant 0 : i32
    return %c0_i32, %c0_i32_0 : i32, i32
  }
  func.func @transform_4(%arg0: i32, %arg1: i32, %arg2: i32) -> (i32, i32, i32) {
    %c0_i32 = arith.constant 0 : i32
    %c0_i32_0 = arith.constant 0 : i32
    %c0_i32_1 = arith.constant 0 : i32
    return %c0_i32, %c0_i32_0, %arg2 : i32, i32, i32
  }
  func.func @transform_5(%arg0: i32, %arg1: i32, %arg2: i32) -> (i32, i32) {
    %c0_i32 = arith.constant 0 : i32
    %c0_i32_0 = arith.constant 0 : i32
    return %c0_i32, %arg2 : i32, i32
  }
  func.func @transform_6(%arg0: i32, %arg1: i32, %arg2: i32) -> (i32, i32, i32) {
    %c0_i32 = arith.constant 0 : i32
    return %arg0, %arg1, %arg2 : i32, i32, i32
  }
}

module attributes {stable_mosaic.version = 11 : i64} {
  func.func @_maxpool_kernel(%arg0: i32, %arg1: i32, %arg2: memref<1x4x2x4x16xbf16, #tpu.memory_space<vmem>>, %arg3: memref<1x4x4x8xbf16, #tpu.memory_space<vmem>>) attributes {dimension_semantics = [#tpu.dimension_semantics<parallel>, #tpu.dimension_semantics<parallel>], iteration_bounds = array<i64: 2, 1>, scalar_prefetch = 0 : i64, scratch_operands = 0 : i64, tpu.core_type = #tpu.core_type<tc>, window_params = [{transform_indices = @transform_0, window_bounds = array<i64: 1, 4, 2, 4, 16>}, {transform_indices = @transform_1, window_bounds = array<i64: 1, 4, 4, 8>}]} {
    %c0 = arith.constant 0 : index
    %c0_0 = arith.constant 0 : index
    %c0_1 = arith.constant 0 : index
    %c0_2 = arith.constant 0 : index
    %c0_3 = arith.constant 0 : index
    %0 = vector.load %arg2[%c0, %c0_0, %c0_1, %c0_2, %c0_3] : memref<1x4x2x4x16xbf16, #tpu.memory_space<vmem>>, vector<1x4x1x4x16xbf16>
    %1 = vector.shape_cast %0 : vector<1x4x1x4x16xbf16> to vector<4x4x16xbf16>
    %c0_4 = arith.constant 0 : index
    %c0_5 = arith.constant 0 : index
    %c1 = arith.constant 1 : index
    %c0_6 = arith.constant 0 : index
    %c0_7 = arith.constant 0 : index
    %2 = vector.load %arg2[%c0_4, %c0_5, %c1, %c0_6, %c0_7] : memref<1x4x2x4x16xbf16, #tpu.memory_space<vmem>>, vector<1x4x1x4x16xbf16>
    %3 = vector.shape_cast %2 : vector<1x4x1x4x16xbf16> to vector<4x4x16xbf16>
    %4 = arith.maximumf %1, %3 : vector<4x4x16xbf16>
    %5 = vector.extract_strided_slice %4 {offsets = [0, 0, 0], sizes = [4, 4, 8], strides = [1, 1, 1]} : vector<4x4x16xbf16> to vector<4x4x8xbf16>
    %6 = vector.extract_strided_slice %4 {offsets = [0, 0, 8], sizes = [4, 4, 8], strides = [1, 1, 1]} : vector<4x4x16xbf16> to vector<4x4x8xbf16>
    %7 = arith.maximumf %5, %6 : vector<4x4x8xbf16>
    %c0_8 = arith.constant 0 : index
    %c0_9 = arith.constant 0 : index
    %c0_10 = arith.constant 0 : index
    %c0_11 = arith.constant 0 : index
    %8 = vector.load %arg3[%c0_8, %c0_9, %c0_10, %c0_11] : memref<1x4x4x8xbf16, #tpu.memory_space<vmem>>, vector<1x4x4x8xbf16>
    %9 = vector.shape_cast %8 : vector<1x4x4x8xbf16> to vector<4x4x8xbf16>
    %10 = vector.shape_cast %7 : vector<4x4x8xbf16> to vector<1x4x4x8xbf16>
    tpu.vector_store %arg3[%c0_8, %c0_9, %c0_10, %c0_11], %10 {strides = array<i32>} : memref<1x4x4x8xbf16, #tpu.memory_space<vmem>>, vector<1x4x4x8xbf16>,
    return
  }
  func.func @transform_0(%arg0: i32, %arg1: i32) -> (i32, i32, i32, i32, i32) {
    %c0_i32 = arith.constant 0 : i32
    %c0_i32_0 = arith.constant 0 : i32
    %c0_i32_1 = arith.constant 0 : i32
    %c0_i32_2 = arith.constant 0 : i32
    return %arg0, %arg1, %c0_i32, %c0_i32_0, %c0_i32_1 : i32, i32, i32, i32, i32
  }
  func.func @transform_1(%arg0: i32, %arg1: i32) -> (i32, i32, i32, i32) {
    %c0_i32 = arith.constant 0 : i32
    %c0_i32_0 = arith.constant 0 : i32
    %c0_i32_1 = arith.constant 0 : i32
    return %arg0, %arg1, %c0_i32, %c0_i32_0 : i32, i32, i32, i32
  }
}

module attributes {stable_mosaic.version = 11 : i64} {
  func.func @_maxpool_kernel(%arg0: i32, %arg1: i32, %arg2: memref<1x2x2x2x32xbf16, #tpu.memory_space<vmem>>, %arg3: memref<1x2x2x16xbf16, #tpu.memory_space<vmem>>) attributes {dimension_semantics = [#tpu.dimension_semantics<parallel>, #tpu.dimension_semantics<parallel>], iteration_bounds = array<i64: 2, 1>, scalar_prefetch = 0 : i64, scratch_operands = 0 : i64, tpu.core_type = #tpu.core_type<tc>, window_params = [{transform_indices = @transform_0, window_bounds = array<i64: 1, 2, 2, 2, 32>}, {transform_indices = @transform_1, window_bounds = array<i64: 1, 2, 2, 16>}]} {
    %c0 = arith.constant 0 : index
    %c0_0 = arith.constant 0 : index
    %c0_1 = arith.constant 0 : index
    %c0_2 = arith.constant 0 : index
    %c0_3 = arith.constant 0 : index
    %0 = vector.load %arg2[%c0, %c0_0, %c0_1, %c0_2, %c0_3] : memref<1x2x2x2x32xbf16, #tpu.memory_space<vmem>>, vector<1x2x1x2x32xbf16>
    %1 = vector.shape_cast %0 : vector<1x2x1x2x32xbf16> to vector<2x2x32xbf16>
    %c0_4 = arith.constant 0 : index
    %c0_5 = arith.constant 0 : index
    %c1 = arith.constant 1 : index
    %c0_6 = arith.constant 0 : index
    %c0_7 = arith.constant 0 : index
    %2 = vector.load %arg2[%c0_4, %c0_5, %c1, %c0_6, %c0_7] : memref<1x2x2x2x32xbf16, #tpu.memory_space<vmem>>, vector<1x2x1x2x32xbf16>
    %3 = vector.shape_cast %2 : vector<1x2x1x2x32xbf16> to vector<2x2x32xbf16>
    %4 = arith.maximumf %1, %3 : vector<2x2x32xbf16>
    %5 = vector.extract_strided_slice %4 {offsets = [0, 0, 0], sizes = [2, 2, 16], strides = [1, 1, 1]} : vector<2x2x32xbf16> to vector<2x2x16xbf16>
    %6 = vector.extract_strided_slice %4 {offsets = [0, 0, 16], sizes = [2, 2, 16], strides = [1, 1, 1]} : vector<2x2x32xbf16> to vector<2x2x16xbf16>
    %7 = arith.maximumf %5, %6 : vector<2x2x16xbf16>
    %c0_8 = arith.constant 0 : index
    %c0_9 = arith.constant 0 : index
    %c0_10 = arith.constant 0 : index
    %c0_11 = arith.constant 0 : index
    %8 = vector.load %arg3[%c0_8, %c0_9, %c0_10, %c0_11] : memref<1x2x2x16xbf16, #tpu.memory_space<vmem>>, vector<1x2x2x16xbf16>
    %9 = vector.shape_cast %8 : vector<1x2x2x16xbf16> to vector<2x2x16xbf16>
    %10 = vector.shape_cast %7 : vector<2x2x16xbf16> to vector<1x2x2x16xbf16>
    tpu.vector_store %arg3[%c0_8, %c0_9, %c0_10, %c0_11], %10 {strides = array<i32>} : memref<1x2x2x16xbf16, #tpu.memory_space<vmem>>, vector<1x2x2x16xbf16>,
    return
  }
  func.func @transform_0(%arg0: i32, %arg1: i32) -> (i32, i32, i32, i32, i32) {
    %c0_i32 = arith.constant 0 : i32
    %c0_i32_0 = arith.constant 0 : i32
    %c0_i32_1 = arith.constant 0 : i32
    %c0_i32_2 = arith.constant 0 : i32
    return %arg0, %arg1, %c0_i32, %c0_i32_0, %c0_i32_1 : i32, i32, i32, i32, i32
  }
  func.func @transform_1(%arg0: i32, %arg1: i32) -> (i32, i32, i32, i32) {
    %c0_i32 = arith.constant 0 : i32
    %c0_i32_0 = arith.constant 0 : i32
    %c0_i32_1 = arith.constant 0 : i32
    return %arg0, %arg1, %c0_i32, %c0_i32_0 : i32, i32, i32, i32
  }
}

module attributes {stable_mosaic.version = 11 : i64} {
  func.func @_double_conv_kernel(%arg0: i32, %arg1: i32, %arg2: i32, %arg3: memref<1x48x8xbf16, #tpu.memory_space<vmem>>, %arg4: memref<1x32x8xbf16, #tpu.memory_space<vmem>>, %arg5: memref<9x8x16xbf16, #tpu.memory_space<vmem>>, %arg6: memref<1x16xf32, #tpu.memory_space<vmem>>, %arg7: memref<9x16x16xbf16, #tpu.memory_space<vmem>>, %arg8: memref<1x16xf32, #tpu.memory_space<vmem>>, %arg9: memref<1x16x16xbf16, #tpu.memory_space<vmem>>, %arg10: memref<8x8xbf16, #tpu.memory_space<vmem>>, %arg11: memref<40x16xbf16, #tpu.memory_space<vmem>>) attributes {dimension_semantics = [#tpu.dimension_semantics<parallel>, #tpu.dimension_semantics<parallel>, #tpu.dimension_semantics<arbitrary>], iteration_bounds = array<i64: 2, 1, 1>, scalar_prefetch = 0 : i64, scratch_operands = 2 : i64, tpu.core_type = #tpu.core_type<tc>, window_params = [{transform_indices = @transform_0, window_bounds = array<i64: 1, 48, 8>}, {transform_indices = @transform_1, window_bounds = array<i64: 1, 32, 8>}, {pipeline_mode = #tpu.pipeline_mode<synchronous>, transform_indices = @transform_2, window_bounds = array<i64: 9, 8, 16>}, {pipeline_mode = #tpu.pipeline_mode<synchronous>, transform_indices = @transform_3, window_bounds = array<i64: 1, 16>}, {transform_indices = @transform_4, window_bounds = array<i64: 9, 16, 16>}, {transform_indices = @transform_5, window_bounds = array<i64: 1, 16>}, {transform_indices = @transform_6, window_bounds = array<i64: 1, 16, 16>}]} {
    %0 = tpu.iota {dimensions = array<i32: 0>} : vector<24x1xi32>
    %c4_i32 = arith.constant 4 : i32
    %c0_i32 = arith.constant 0 : i32
    %1 = arith.cmpi eq, %c4_i32, %c0_i32 : i32
    %c1_i32 = arith.constant 1 : i32
    %2 = arith.select %1, %c1_i32, %c4_i32 : i32
    %3 = vector.broadcast %2 : i32 to vector<24x1xi32>
    %4 = arith.remsi %0, %3 : vector<24x1xi32>
    %c0_i32_0 = arith.constant 0 : i32
    %5 = vector.broadcast %c0_i32_0 : i32 to vector<24x1xi32>
    %6 = arith.cmpi ne, %4, %5 : vector<24x1xi32>
    %c0_i32_1 = arith.constant 0 : i32
    %7 = vector.broadcast %c0_i32_1 : i32 to vector<24x1xi32>
    %8 = arith.cmpi slt, %4, %7 : vector<24x1xi32>
    %c0_i32_2 = arith.constant 0 : i32
    %9 = arith.cmpi slt, %2, %c0_i32_2 : i32
    %10 = vector.broadcast %9 : i1 to vector<24x1xi1>
    %11 = vector.broadcast %10 : vector<24x1xi1> to vector<24x1xi1>
    %12 = arith.xori %8, %11 : vector<24x1xi1>
    %13 = arith.andi %12, %6 : vector<24x1xi1>
    %14 = vector.broadcast %2 : i32 to vector<24x1xi32>
    %15 = arith.addi %4, %14 : vector<24x1xi32>
    %16 = arith.select %13, %15, %4 : vector<24x1xi1>, vector<24x1xi32>
    %17 = tpu.iota {dimensions = array<i32: 0>} : vector<16x1xi32>
    %c4_i32_3 = arith.constant 4 : i32
    %c0_i32_4 = arith.constant 0 : i32
    %18 = arith.cmpi eq, %c4_i32_3, %c0_i32_4 : i32
    %c1_i32_5 = arith.constant 1 : i32
    %19 = arith.select %18, %c1_i32_5, %c4_i32_3 : i32
    %20 = vector.broadcast %19 : i32 to vector<16x1xi32>
    %21 = arith.remsi %17, %20 : vector<16x1xi32>
    %c0_i32_6 = arith.constant 0 : i32
    %22 = vector.broadcast %c0_i32_6 : i32 to vector<16x1xi32>
    %23 = arith.cmpi ne, %21, %22 : vector<16x1xi32>
    %c0_i32_7 = arith.constant 0 : i32
    %24 = vector.broadcast %c0_i32_7 : i32 to vector<16x1xi32>
    %25 = arith.cmpi slt, %21, %24 : vector<16x1xi32>
    %c0_i32_8 = arith.constant 0 : i32
    %26 = arith.cmpi slt, %19, %c0_i32_8 : i32
    %27 = vector.broadcast %26 : i1 to vector<16x1xi1>
    %28 = vector.broadcast %27 : vector<16x1xi1> to vector<16x1xi1>
    %29 = arith.xori %25, %28 : vector<16x1xi1>
    %30 = arith.andi %29, %23 : vector<16x1xi1>
    %31 = vector.broadcast %19 : i32 to vector<16x1xi32>
    %32 = arith.addi %21, %31 : vector<16x1xi32>
    %33 = arith.select %30, %32, %21 : vector<16x1xi1>, vector<16x1xi32>
    %c0_i32_9 = arith.constant 0 : i32
    %34 = vector.broadcast %c0_i32_9 : i32 to vector<24x1xi32>
    %35 = arith.cmpi ne, %16, %34 : vector<24x1xi32>
    %c3_i32 = arith.constant 3 : i32
    %36 = vector.broadcast %c3_i32 : i32 to vector<24x1xi32>
    %37 = arith.cmpi ne, %16, %36 : vector<24x1xi32>
    %cst = arith.constant 0.000000e+00 : f32
    %38 = vector.broadcast %cst : f32 to vector<24x16xf32>
    %c0 = arith.constant 0 : index
    %c0_10 = arith.constant 0 : index
    %c0_11 = arith.constant 0 : index
    %39 = vector.load %arg3[%c0, %c0_10, %c0_11] : memref<1x48x8xbf16, #tpu.memory_space<vmem>>, vector<1x24x8xbf16>
    %40 = vector.shape_cast %39 : vector<1x24x8xbf16> to vector<24x8xbf16>
    %c0_i32_12 = arith.constant 0 : i32
    %41 = arith.sitofp %c0_i32_12 : i32 to bf16
    %42 = vector.shape_cast %35 : vector<24x1xi1> to vector<24x1xi1>
    %43 = vector.broadcast %42 : vector<24x1xi1> to vector<24x8xi1>
    %44 = vector.broadcast %41 : bf16 to vector<24x8xbf16>
    %45 = arith.select %43, %40, %44 : vector<24x8xi1>, vector<24x8xbf16>
    %c0_13 = arith.constant 0 : index
    %c0_14 = arith.constant 0 : index
    %c0_15 = arith.constant 0 : index
    %46 = vector.load %arg5[%c0_13, %c0_14, %c0_15] : memref<9x8x16xbf16, #tpu.memory_space<vmem>>, vector<1x8x16xbf16>
    %47 = vector.shape_cast %46 : vector<1x8x16xbf16> to vector<8x16xbf16>
    %cst_16 = arith.constant dense<0.000000e+00> : vector<24x16xf32>
    %48 = tpu.matmul %45, %47, %cst_16 {dimension_numbers = #tpu.dot_dimension_numbers<[1], [0], [0], [1], [0, 0, 1, 1], [], []>} : vector<24x8xbf16>, vector<8x16xbf16>, vector<24x16xf32> -> vector<24x16xf32>
    %49 = arith.addf %38, %48 : vector<24x16xf32>
    %c0_17 = arith.constant 0 : index
    %c1 = arith.constant 1 : index
    %c0_18 = arith.constant 0 : index
    %50 = vector.load %arg3[%c0_17, %c1, %c0_18] : memref<1x48x8xbf16, #tpu.memory_space<vmem>>, vector<1x24x8xbf16>
    %51 = vector.shape_cast %50 : vector<1x24x8xbf16> to vector<24x8xbf16>
    %c1_19 = arith.constant 1 : index
    %c0_20 = arith.constant 0 : index
    %c0_21 = arith.constant 0 : index
    %52 = vector.load %arg5[%c1_19, %c0_20, %c0_21] : memref<9x8x16xbf16, #tpu.memory_space<vmem>>, vector<1x8x16xbf16>
    %53 = vector.shape_cast %52 : vector<1x8x16xbf16> to vector<8x16xbf16>
    %cst_22 = arith.constant dense<0.000000e+00> : vector<24x16xf32>
    %54 = tpu.matmul %51, %53, %cst_22 {dimension_numbers = #tpu.dot_dimension_numbers<[1], [0], [0], [1], [0, 0, 1, 1], [], []>} : vector<24x8xbf16>, vector<8x16xbf16>, vector<24x16xf32> -> vector<24x16xf32>
    %55 = arith.addf %49, %54 : vector<24x16xf32>
    %c0_23 = arith.constant 0 : index
    %c2 = arith.constant 2 : index
    %c0_24 = arith.constant 0 : index
    %56 = vector.load %arg3[%c0_23, %c2, %c0_24] : memref<1x48x8xbf16, #tpu.memory_space<vmem>>, vector<1x24x8xbf16>
    %57 = vector.shape_cast %56 : vector<1x24x8xbf16> to vector<24x8xbf16>
    %c0_i32_25 = arith.constant 0 : i32
    %58 = arith.sitofp %c0_i32_25 : i32 to bf16
    %59 = vector.shape_cast %37 : vector<24x1xi1> to vector<24x1xi1>
    %60 = vector.broadcast %59 : vector<24x1xi1> to vector<24x8xi1>
    %61 = vector.broadcast %58 : bf16 to vector<24x8xbf16>
    %62 = arith.select %60, %57, %61 : vector<24x8xi1>, vector<24x8xbf16>
    %c2_26 = arith.constant 2 : index
    %c0_27 = arith.constant 0 : index
    %c0_28 = arith.constant 0 : index
    %63 = vector.load %arg5[%c2_26, %c0_27, %c0_28] : memref<9x8x16xbf16, #tpu.memory_space<vmem>>, vector<1x8x16xbf16>
    %64 = vector.shape_cast %63 : vector<1x8x16xbf16> to vector<8x16xbf16>
    %cst_29 = arith.constant dense<0.000000e+00> : vector<24x16xf32>
    %65 = tpu.matmul %62, %64, %cst_29 {dimension_numbers = #tpu.dot_dimension_numbers<[1], [0], [0], [1], [0, 0, 1, 1], [], []>} : vector<24x8xbf16>, vector<8x16xbf16>, vector<24x16xf32> -> vector<24x16xf32>
    %66 = arith.addf %55, %65 : vector<24x16xf32>
    %c0_30 = arith.constant 0 : index
    %c4 = arith.constant 4 : index
    %c0_31 = arith.constant 0 : index
    %67 = vector.load %arg3[%c0_30, %c4, %c0_31] : memref<1x48x8xbf16, #tpu.memory_space<vmem>>, vector<1x24x8xbf16>
    %68 = vector.shape_cast %67 : vector<1x24x8xbf16> to vector<24x8xbf16>
    %c0_i32_32 = arith.constant 0 : i32
    %69 = arith.sitofp %c0_i32_32 : i32 to bf16
    %70 = vector.shape_cast %35 : vector<24x1xi1> to vector<24x1xi1>
    %71 = vector.broadcast %70 : vector<24x1xi1> to vector<24x8xi1>
    %72 = vector.broadcast %69 : bf16 to vector<24x8xbf16>
    %73 = arith.select %71, %68, %72 : vector<24x8xi1>, vector<24x8xbf16>
    %c3 = arith.constant 3 : index
    %c0_33 = arith.constant 0 : index
    %c0_34 = arith.constant 0 : index
    %74 = vector.load %arg5[%c3, %c0_33, %c0_34] : memref<9x8x16xbf16, #tpu.memory_space<vmem>>, vector<1x8x16xbf16>
    %75 = vector.shape_cast %74 : vector<1x8x16xbf16> to vector<8x16xbf16>
    %cst_35 = arith.constant dense<0.000000e+00> : vector<24x16xf32>
    %76 = tpu.matmul %73, %75, %cst_35 {dimension_numbers = #tpu.dot_dimension_numbers<[1], [0], [0], [1], [0, 0, 1, 1], [], []>} : vector<24x8xbf16>, vector<8x16xbf16>, vector<24x16xf32> -> vector<24x16xf32>
    %77 = arith.addf %66, %76 : vector<24x16xf32>
    %c0_36 = arith.constant 0 : index
    %c5 = arith.constant 5 : index
    %c0_37 = arith.constant 0 : index
    %78 = vector.load %arg3[%c0_36, %c5, %c0_37] : memref<1x48x8xbf16, #tpu.memory_space<vmem>>, vector<1x24x8xbf16>
    %79 = vector.shape_cast %78 : vector<1x24x8xbf16> to vector<24x8xbf16>
    %c4_38 = arith.constant 4 : index
    %c0_39 = arith.constant 0 : index
    %c0_40 = arith.constant 0 : index
    %80 = vector.load %arg5[%c4_38, %c0_39, %c0_40] : memref<9x8x16xbf16, #tpu.memory_space<vmem>>, vector<1x8x16xbf16>
    %81 = vector.shape_cast %80 : vector<1x8x16xbf16> to vector<8x16xbf16>
    %cst_41 = arith.constant dense<0.000000e+00> : vector<24x16xf32>
    %82 = tpu.matmul %79, %81, %cst_41 {dimension_numbers = #tpu.dot_dimension_numbers<[1], [0], [0], [1], [0, 0, 1, 1], [], []>} : vector<24x8xbf16>, vector<8x16xbf16>, vector<24x16xf32> -> vector<24x16xf32>
    %83 = arith.addf %77, %82 : vector<24x16xf32>
    %c0_42 = arith.constant 0 : index
    %c6 = arith.constant 6 : index
    %c0_43 = arith.constant 0 : index
    %84 = vector.load %arg3[%c0_42, %c6, %c0_43] : memref<1x48x8xbf16, #tpu.memory_space<vmem>>, vector<1x24x8xbf16>
    %85 = vector.shape_cast %84 : vector<1x24x8xbf16> to vector<24x8xbf16>
    %c0_i32_44 = arith.constant 0 : i32
    %86 = arith.sitofp %c0_i32_44 : i32 to bf16
    %87 = vector.shape_cast %37 : vector<24x1xi1> to vector<24x1xi1>
    %88 = vector.broadcast %87 : vector<24x1xi1> to vector<24x8xi1>
    %89 = vector.broadcast %86 : bf16 to vector<24x8xbf16>
    %90 = arith.select %88, %85, %89 : vector<24x8xi1>, vector<24x8xbf16>
    %c5_45 = arith.constant 5 : index
    %c0_46 = arith.constant 0 : index
    %c0_47 = arith.constant 0 : index
    %91 = vector.load %arg5[%c5_45, %c0_46, %c0_47] : memref<9x8x16xbf16, #tpu.memory_space<vmem>>, vector<1x8x16xbf16>
    %92 = vector.shape_cast %91 : vector<1x8x16xbf16> to vector<8x16xbf16>
    %cst_48 = arith.constant dense<0.000000e+00> : vector<24x16xf32>
    %93 = tpu.matmul %90, %92, %cst_48 {dimension_numbers = #tpu.dot_dimension_numbers<[1], [0], [0], [1], [0, 0, 1, 1], [], []>} : vector<24x8xbf16>, vector<8x16xbf16>, vector<24x16xf32> -> vector<24x16xf32>
    %94 = arith.addf %83, %93 : vector<24x16xf32>
    %c0_49 = arith.constant 0 : index
    %c8 = arith.constant 8 : index
    %c0_50 = arith.constant 0 : index
    %95 = vector.load %arg3[%c0_49, %c8, %c0_50] : memref<1x48x8xbf16, #tpu.memory_space<vmem>>, vector<1x24x8xbf16>
    %96 = vector.shape_cast %95 : vector<1x24x8xbf16> to vector<24x8xbf16>
    %c0_i32_51 = arith.constant 0 : i32
    %97 = arith.sitofp %c0_i32_51 : i32 to bf16
    %98 = vector.shape_cast %35 : vector<24x1xi1> to vector<24x1xi1>
    %99 = vector.broadcast %98 : vector<24x1xi1> to vector<24x8xi1>
    %100 = vector.broadcast %97 : bf16 to vector<24x8xbf16>
    %101 = arith.select %99, %96, %100 : vector<24x8xi1>, vector<24x8xbf16>
    %c6_52 = arith.constant 6 : index
    %c0_53 = arith.constant 0 : index
    %c0_54 = arith.constant 0 : index
    %102 = vector.load %arg5[%c6_52, %c0_53, %c0_54] : memref<9x8x16xbf16, #tpu.memory_space<vmem>>, vector<1x8x16xbf16>
    %103 = vector.shape_cast %102 : vector<1x8x16xbf16> to vector<8x16xbf16>
    %cst_55 = arith.constant dense<0.000000e+00> : vector<24x16xf32>
    %104 = tpu.matmul %101, %103, %cst_55 {dimension_numbers = #tpu.dot_dimension_numbers<[1], [0], [0], [1], [0, 0, 1, 1], [], []>} : vector<24x8xbf16>, vector<8x16xbf16>, vector<24x16xf32> -> vector<24x16xf32>
    %105 = arith.addf %94, %104 : vector<24x16xf32>
    %c0_56 = arith.constant 0 : index
    %c9 = arith.constant 9 : index
    %c0_57 = arith.constant 0 : index
    %106 = vector.load %arg3[%c0_56, %c9, %c0_57] : memref<1x48x8xbf16, #tpu.memory_space<vmem>>, vector<1x24x8xbf16>
    %107 = vector.shape_cast %106 : vector<1x24x8xbf16> to vector<24x8xbf16>
    %c7 = arith.constant 7 : index
    %c0_58 = arith.constant 0 : index
    %c0_59 = arith.constant 0 : index
    %108 = vector.load %arg5[%c7, %c0_58, %c0_59] : memref<9x8x16xbf16, #tpu.memory_space<vmem>>, vector<1x8x16xbf16>
    %109 = vector.shape_cast %108 : vector<1x8x16xbf16> to vector<8x16xbf16>
    %cst_60 = arith.constant dense<0.000000e+00> : vector<24x16xf32>
    %110 = tpu.matmul %107, %109, %cst_60 {dimension_numbers = #tpu.dot_dimension_numbers<[1], [0], [0], [1], [0, 0, 1, 1], [], []>} : vector<24x8xbf16>, vector<8x16xbf16>, vector<24x16xf32> -> vector<24x16xf32>
    %111 = arith.addf %105, %110 : vector<24x16xf32>
    %c0_61 = arith.constant 0 : index
    %c10 = arith.constant 10 : index
    %c0_62 = arith.constant 0 : index
    %112 = vector.load %arg3[%c0_61, %c10, %c0_62] : memref<1x48x8xbf16, #tpu.memory_space<vmem>>, vector<1x24x8xbf16>
    %113 = vector.shape_cast %112 : vector<1x24x8xbf16> to vector<24x8xbf16>
    %c0_i32_63 = arith.constant 0 : i32
    %114 = arith.sitofp %c0_i32_63 : i32 to bf16
    %115 = vector.shape_cast %37 : vector<24x1xi1> to vector<24x1xi1>
    %116 = vector.broadcast %115 : vector<24x1xi1> to vector<24x8xi1>
    %117 = vector.broadcast %114 : bf16 to vector<24x8xbf16>
    %118 = arith.select %116, %113, %117 : vector<24x8xi1>, vector<24x8xbf16>
    %c8_64 = arith.constant 8 : index
    %c0_65 = arith.constant 0 : index
    %c0_66 = arith.constant 0 : index
    %119 = vector.load %arg5[%c8_64, %c0_65, %c0_66] : memref<9x8x16xbf16, #tpu.memory_space<vmem>>, vector<1x8x16xbf16>
    %120 = vector.shape_cast %119 : vector<1x8x16xbf16> to vector<8x16xbf16>
    %cst_67 = arith.constant dense<0.000000e+00> : vector<24x16xf32>
    %121 = tpu.matmul %118, %120, %cst_67 {dimension_numbers = #tpu.dot_dimension_numbers<[1], [0], [0], [1], [0, 0, 1, 1], [], []>} : vector<24x8xbf16>, vector<8x16xbf16>, vector<24x16xf32> -> vector<24x16xf32>
    %122 = arith.addf %111, %121 : vector<24x16xf32>
    %c0_68 = arith.constant 0 : index
    %c0_69 = arith.constant 0 : index
    %123 = vector.load %arg6[%c0_68, %c0_69] : memref<1x16xf32, #tpu.memory_space<vmem>>, vector<1x16xf32>
    %124 = vector.broadcast %123 : vector<1x16xf32> to vector<24x16xf32>
    %125 = arith.addf %122, %124 : vector<24x16xf32>
    %cst_70 = arith.constant 0.000000e+00 : f32
    %126 = vector.broadcast %cst_70 : f32 to vector<24x16xf32>
    %127 = arith.maximumf %125, %126 : vector<24x16xf32>
    %128 = arith.truncf %127 : vector<24x16xf32> to vector<24x16xbf16>
    %c8_71 = arith.constant 8 : index
    %c0_72 = arith.constant 0 : index
    %129 = vector.load %arg11[%c8_71, %c0_72] : memref<40x16xbf16, #tpu.memory_space<vmem>>, vector<24x16xbf16>
    tpu.vector_store %arg11[%c8_71, %c0_72], %128 {strides = array<i32>} : memref<40x16xbf16, #tpu.memory_space<vmem>>, vector<24x16xbf16>,
    %cst_73 = arith.constant 0.000000e+00 : bf16
    %130 = vector.broadcast %cst_73 : bf16 to vector<4x16xbf16>
    %c8_74 = arith.constant 8 : index
    %c0_75 = arith.constant 0 : index
    %131 = vector.load %arg11[%c8_74, %c0_75] : memref<40x16xbf16, #tpu.memory_space<vmem>>, vector<4x16xbf16>
    tpu.vector_store %arg11[%c8_74, %c0_75], %130 {strides = array<i32>} : memref<40x16xbf16, #tpu.memory_space<vmem>>, vector<4x16xbf16>,
    %cst_76 = arith.constant 0.000000e+00 : bf16
    %132 = vector.broadcast %cst_76 : bf16 to vector<4x16xbf16>
    %c28 = arith.constant 28 : index
    %c0_77 = arith.constant 0 : index
    %133 = vector.load %arg11[%c28, %c0_77] : memref<40x16xbf16, #tpu.memory_space<vmem>>, vector<4x16xbf16>
    tpu.vector_store %arg11[%c28, %c0_77], %132 {strides = array<i32>} : memref<40x16xbf16, #tpu.memory_space<vmem>>, vector<4x16xbf16>,
    %c0_i32_78 = arith.constant 0 : i32
    %134 = vector.broadcast %c0_i32_78 : i32 to vector<16x1xi32>
    %135 = arith.cmpi ne, %33, %134 : vector<16x1xi32>
    %c3_i32_79 = arith.constant 3 : i32
    %136 = vector.broadcast %c3_i32_79 : i32 to vector<16x1xi32>
    %137 = arith.cmpi ne, %33, %136 : vector<16x1xi32>
    %cst_80 = arith.constant 0.000000e+00 : f32
    %138 = vector.broadcast %cst_80 : f32 to vector<16x16xf32>
    %c7_81 = arith.constant 7 : index
    %c0_82 = arith.constant 0 : index
    %139 = vector.load %arg11[%c7_81, %c0_82] : memref<40x16xbf16, #tpu.memory_space<vmem>>, vector<16x16xbf16>
    %c0_i32_83 = arith.constant 0 : i32
    %140 = arith.sitofp %c0_i32_83 : i32 to bf16
    %141 = vector.shape_cast %135 : vector<16x1xi1> to vector<16x1xi1>
    %142 = vector.broadcast %141 : vector<16x1xi1> to vector<16x16xi1>
    %143 = vector.broadcast %140 : bf16 to vector<16x16xbf16>
    %144 = arith.select %142, %139, %143 : vector<16x16xi1>, vector<16x16xbf16>
    %c0_84 = arith.constant 0 : index
    %c0_85 = arith.constant 0 : index
    %c0_86 = arith.constant 0 : index
    %145 = vector.load %arg7[%c0_84, %c0_85, %c0_86] : memref<9x16x16xbf16, #tpu.memory_space<vmem>>, vector<1x16x16xbf16>
    %146 = vector.shape_cast %145 : vector<1x16x16xbf16> to vector<16x16xbf16>
    %cst_87 = arith.constant dense<0.000000e+00> : vector<16x16xf32>
    %147 = tpu.matmul %144, %146, %cst_87 {dimension_numbers = #tpu.dot_dimension_numbers<[1], [0], [0], [1], [0, 0, 1, 1], [], []>} : vector<16x16xbf16>, vector<16x16xbf16>, vector<16x16xf32> -> vector<16x16xf32>
    %148 = arith.addf %138, %147 : vector<16x16xf32>
    %c8_88 = arith.constant 8 : index
    %c0_89 = arith.constant 0 : index
    %149 = vector.load %arg11[%c8_88, %c0_89] : memref<40x16xbf16, #tpu.memory_space<vmem>>, vector<16x16xbf16>
    %c1_90 = arith.constant 1 : index
    %c0_91 = arith.constant 0 : index
    %c0_92 = arith.constant 0 : index
    %150 = vector.load %arg7[%c1_90, %c0_91, %c0_92] : memref<9x16x16xbf16, #tpu.memory_space<vmem>>, vector<1x16x16xbf16>
    %151 = vector.shape_cast %150 : vector<1x16x16xbf16> to vector<16x16xbf16>
    %cst_93 = arith.constant dense<0.000000e+00> : vector<16x16xf32>
    %152 = tpu.matmul %149, %151, %cst_93 {dimension_numbers = #tpu.dot_dimension_numbers<[1], [0], [0], [1], [0, 0, 1, 1], [], []>} : vector<16x16xbf16>, vector<16x16xbf16>, vector<16x16xf32> -> vector<16x16xf32>
    %153 = arith.addf %148, %152 : vector<16x16xf32>
    %c9_94 = arith.constant 9 : index
    %c0_95 = arith.constant 0 : index
    %154 = vector.load %arg11[%c9_94, %c0_95] : memref<40x16xbf16, #tpu.memory_space<vmem>>, vector<16x16xbf16>
    %c0_i32_96 = arith.constant 0 : i32
    %155 = arith.sitofp %c0_i32_96 : i32 to bf16
    %156 = vector.shape_cast %137 : vector<16x1xi1> to vector<16x1xi1>
    %157 = vector.broadcast %156 : vector<16x1xi1> to vector<16x16xi1>
    %158 = vector.broadcast %155 : bf16 to vector<16x16xbf16>
    %159 = arith.select %157, %154, %158 : vector<16x16xi1>, vector<16x16xbf16>
    %c2_97 = arith.constant 2 : index
    %c0_98 = arith.constant 0 : index
    %c0_99 = arith.constant 0 : index
    %160 = vector.load %arg7[%c2_97, %c0_98, %c0_99] : memref<9x16x16xbf16, #tpu.memory_space<vmem>>, vector<1x16x16xbf16>
    %161 = vector.shape_cast %160 : vector<1x16x16xbf16> to vector<16x16xbf16>
    %cst_100 = arith.constant dense<0.000000e+00> : vector<16x16xf32>
    %162 = tpu.matmul %159, %161, %cst_100 {dimension_numbers = #tpu.dot_dimension_numbers<[1], [0], [0], [1], [0, 0, 1, 1], [], []>} : vector<16x16xbf16>, vector<16x16xbf16>, vector<16x16xf32> -> vector<16x16xf32>
    %163 = arith.addf %153, %162 : vector<16x16xf32>
    %c11 = arith.constant 11 : index
    %c0_101 = arith.constant 0 : index
    %164 = vector.load %arg11[%c11, %c0_101] : memref<40x16xbf16, #tpu.memory_space<vmem>>, vector<16x16xbf16>
    %c0_i32_102 = arith.constant 0 : i32
    %165 = arith.sitofp %c0_i32_102 : i32 to bf16
    %166 = vector.shape_cast %135 : vector<16x1xi1> to vector<16x1xi1>
    %167 = vector.broadcast %166 : vector<16x1xi1> to vector<16x16xi1>
    %168 = vector.broadcast %165 : bf16 to vector<16x16xbf16>
    %169 = arith.select %167, %164, %168 : vector<16x16xi1>, vector<16x16xbf16>
    %c3_103 = arith.constant 3 : index
    %c0_104 = arith.constant 0 : index
    %c0_105 = arith.constant 0 : index
    %170 = vector.load %arg7[%c3_103, %c0_104, %c0_105] : memref<9x16x16xbf16, #tpu.memory_space<vmem>>, vector<1x16x16xbf16>
    %171 = vector.shape_cast %170 : vector<1x16x16xbf16> to vector<16x16xbf16>
    %cst_106 = arith.constant dense<0.000000e+00> : vector<16x16xf32>
    %172 = tpu.matmul %169, %171, %cst_106 {dimension_numbers = #tpu.dot_dimension_numbers<[1], [0], [0], [1], [0, 0, 1, 1], [], []>} : vector<16x16xbf16>, vector<16x16xbf16>, vector<16x16xf32> -> vector<16x16xf32>
    %173 = arith.addf %163, %172 : vector<16x16xf32>
    %c12 = arith.constant 12 : index
    %c0_107 = arith.constant 0 : index
    %174 = vector.load %arg11[%c12, %c0_107] : memref<40x16xbf16, #tpu.memory_space<vmem>>, vector<16x16xbf16>
    %c4_108 = arith.constant 4 : index
    %c0_109 = arith.constant 0 : index
    %c0_110 = arith.constant 0 : index
    %175 = vector.load %arg7[%c4_108, %c0_109, %c0_110] : memref<9x16x16xbf16, #tpu.memory_space<vmem>>, vector<1x16x16xbf16>
    %176 = vector.shape_cast %175 : vector<1x16x16xbf16> to vector<16x16xbf16>
    %cst_111 = arith.constant dense<0.000000e+00> : vector<16x16xf32>
    %177 = tpu.matmul %174, %176, %cst_111 {dimension_numbers = #tpu.dot_dimension_numbers<[1], [0], [0], [1], [0, 0, 1, 1], [], []>} : vector<16x16xbf16>, vector<16x16xbf16>, vector<16x16xf32> -> vector<16x16xf32>
    %178 = arith.addf %173, %177 : vector<16x16xf32>
    %c13 = arith.constant 13 : index
    %c0_112 = arith.constant 0 : index
    %179 = vector.load %arg11[%c13, %c0_112] : memref<40x16xbf16, #tpu.memory_space<vmem>>, vector<16x16xbf16>
    %c0_i32_113 = arith.constant 0 : i32
    %180 = arith.sitofp %c0_i32_113 : i32 to bf16
    %181 = vector.shape_cast %137 : vector<16x1xi1> to vector<16x1xi1>
    %182 = vector.broadcast %181 : vector<16x1xi1> to vector<16x16xi1>
    %183 = vector.broadcast %180 : bf16 to vector<16x16xbf16>
    %184 = arith.select %182, %179, %183 : vector<16x16xi1>, vector<16x16xbf16>
    %c5_114 = arith.constant 5 : index
    %c0_115 = arith.constant 0 : index
    %c0_116 = arith.constant 0 : index
    %185 = vector.load %arg7[%c5_114, %c0_115, %c0_116] : memref<9x16x16xbf16, #tpu.memory_space<vmem>>, vector<1x16x16xbf16>
    %186 = vector.shape_cast %185 : vector<1x16x16xbf16> to vector<16x16xbf16>
    %cst_117 = arith.constant dense<0.000000e+00> : vector<16x16xf32>
    %187 = tpu.matmul %184, %186, %cst_117 {dimension_numbers = #tpu.dot_dimension_numbers<[1], [0], [0], [1], [0, 0, 1, 1], [], []>} : vector<16x16xbf16>, vector<16x16xbf16>, vector<16x16xf32> -> vector<16x16xf32>
    %188 = arith.addf %178, %187 : vector<16x16xf32>
    %c15 = arith.constant 15 : index
    %c0_118 = arith.constant 0 : index
    %189 = vector.load %arg11[%c15, %c0_118] : memref<40x16xbf16, #tpu.memory_space<vmem>>, vector<16x16xbf16>
    %c0_i32_119 = arith.constant 0 : i32
    %190 = arith.sitofp %c0_i32_119 : i32 to bf16
    %191 = vector.shape_cast %135 : vector<16x1xi1> to vector<16x1xi1>
    %192 = vector.broadcast %191 : vector<16x1xi1> to vector<16x16xi1>
    %193 = vector.broadcast %190 : bf16 to vector<16x16xbf16>
    %194 = arith.select %192, %189, %193 : vector<16x16xi1>, vector<16x16xbf16>
    %c6_120 = arith.constant 6 : index
    %c0_121 = arith.constant 0 : index
    %c0_122 = arith.constant 0 : index
    %195 = vector.load %arg7[%c6_120, %c0_121, %c0_122] : memref<9x16x16xbf16, #tpu.memory_space<vmem>>, vector<1x16x16xbf16>
    %196 = vector.shape_cast %195 : vector<1x16x16xbf16> to vector<16x16xbf16>
    %cst_123 = arith.constant dense<0.000000e+00> : vector<16x16xf32>
    %197 = tpu.matmul %194, %196, %cst_123 {dimension_numbers = #tpu.dot_dimension_numbers<[1], [0], [0], [1], [0, 0, 1, 1], [], []>} : vector<16x16xbf16>, vector<16x16xbf16>, vector<16x16xf32> -> vector<16x16xf32>
    %198 = arith.addf %188, %197 : vector<16x16xf32>
    %c16 = arith.constant 16 : index
    %c0_124 = arith.constant 0 : index
    %199 = vector.load %arg11[%c16, %c0_124] : memref<40x16xbf16, #tpu.memory_space<vmem>>, vector<16x16xbf16>
    %c7_125 = arith.constant 7 : index
    %c0_126 = arith.constant 0 : index
    %c0_127 = arith.constant 0 : index
    %200 = vector.load %arg7[%c7_125, %c0_126, %c0_127] : memref<9x16x16xbf16, #tpu.memory_space<vmem>>, vector<1x16x16xbf16>
    %201 = vector.shape_cast %200 : vector<1x16x16xbf16> to vector<16x16xbf16>
    %cst_128 = arith.constant dense<0.000000e+00> : vector<16x16xf32>
    %202 = tpu.matmul %199, %201, %cst_128 {dimension_numbers = #tpu.dot_dimension_numbers<[1], [0], [0], [1], [0, 0, 1, 1], [], []>} : vector<16x16xbf16>, vector<16x16xbf16>, vector<16x16xf32> -> vector<16x16xf32>
    %203 = arith.addf %198, %202 : vector<16x16xf32>
    %c17 = arith.constant 17 : index
    %c0_129 = arith.constant 0 : index
    %204 = vector.load %arg11[%c17, %c0_129] : memref<40x16xbf16, #tpu.memory_space<vmem>>, vector<16x16xbf16>
    %c0_i32_130 = arith.constant 0 : i32
    %205 = arith.sitofp %c0_i32_130 : i32 to bf16
    %206 = vector.shape_cast %137 : vector<16x1xi1> to vector<16x1xi1>
    %207 = vector.broadcast %206 : vector<16x1xi1> to vector<16x16xi1>
    %208 = vector.broadcast %205 : bf16 to vector<16x16xbf16>
    %209 = arith.select %207, %204, %208 : vector<16x16xi1>, vector<16x16xbf16>
    %c8_131 = arith.constant 8 : index
    %c0_132 = arith.constant 0 : index
    %c0_133 = arith.constant 0 : index
    %210 = vector.load %arg7[%c8_131, %c0_132, %c0_133] : memref<9x16x16xbf16, #tpu.memory_space<vmem>>, vector<1x16x16xbf16>
    %211 = vector.shape_cast %210 : vector<1x16x16xbf16> to vector<16x16xbf16>
    %cst_134 = arith.constant dense<0.000000e+00> : vector<16x16xf32>
    %212 = tpu.matmul %209, %211, %cst_134 {dimension_numbers = #tpu.dot_dimension_numbers<[1], [0], [0], [1], [0, 0, 1, 1], [], []>} : vector<16x16xbf16>, vector<16x16xbf16>, vector<16x16xf32> -> vector<16x16xf32>
    %213 = arith.addf %203, %212 : vector<16x16xf32>
    %c0_135 = arith.constant 0 : index
    %c0_136 = arith.constant 0 : index
    %214 = vector.load %arg8[%c0_135, %c0_136] : memref<1x16xf32, #tpu.memory_space<vmem>>, vector<1x16xf32>
    %215 = vector.broadcast %214 : vector<1x16xf32> to vector<16x16xf32>
    %216 = arith.addf %213, %215 : vector<16x16xf32>
    %cst_137 = arith.constant 0.000000e+00 : f32
    %217 = vector.broadcast %cst_137 : f32 to vector<16x16xf32>
    %218 = arith.maximumf %216, %217 : vector<16x16xf32>
    %219 = arith.truncf %218 : vector<16x16xf32> to vector<16x16xbf16>
    %c0_138 = arith.constant 0 : index
    %c0_139 = arith.constant 0 : index
    %c0_140 = arith.constant 0 : index
    %220 = vector.load %arg9[%c0_138, %c0_139, %c0_140] : memref<1x16x16xbf16, #tpu.memory_space<vmem>>, vector<1x16x16xbf16>
    %221 = vector.shape_cast %220 : vector<1x16x16xbf16> to vector<16x16xbf16>
    %222 = vector.shape_cast %219 : vector<16x16xbf16> to vector<1x16x16xbf16>
    tpu.vector_store %arg9[%c0_138, %c0_139, %c0_140], %222 {strides = array<i32>} : memref<1x16x16xbf16, #tpu.memory_space<vmem>>, vector<1x16x16xbf16>,
    return
  }
  func.func @transform_0(%arg0: i32, %arg1: i32, %arg2: i32) -> (i32, i32, i32) {
    %c0_i32 = arith.constant 0 : i32
    %c0_i32_0 = arith.constant 0 : i32
    %c0_i32_1 = arith.constant 0 : i32
    return %arg0, %c0_i32, %c0_i32_0 : i32, i32, i32
  }
  func.func @transform_1(%arg0: i32, %arg1: i32, %arg2: i32) -> (i32, i32, i32) {
    %c0_i32 = arith.constant 0 : i32
    %c0_i32_0 = arith.constant 0 : i32
    %c0_i32_1 = arith.constant 0 : i32
    return %arg0, %c0_i32, %c0_i32_0 : i32, i32, i32
  }
  func.func @transform_2(%arg0: i32, %arg1: i32, %arg2: i32) -> (i32, i32, i32) {
    %c0_i32 = arith.constant 0 : i32
    %c0_i32_0 = arith.constant 0 : i32
    %c0_i32_1 = arith.constant 0 : i32
    %c0_i32_2 = arith.constant 0 : i32
    return %c0_i32, %c0_i32_0, %c0_i32_1 : i32, i32, i32
  }
  func.func @transform_3(%arg0: i32, %arg1: i32, %arg2: i32) -> (i32, i32) {
    %c0_i32 = arith.constant 0 : i32
    %c0_i32_0 = arith.constant 0 : i32
    %c0_i32_1 = arith.constant 0 : i32
    return %c0_i32, %c0_i32_0 : i32, i32
  }
  func.func @transform_4(%arg0: i32, %arg1: i32, %arg2: i32) -> (i32, i32, i32) {
    %c0_i32 = arith.constant 0 : i32
    %c0_i32_0 = arith.constant 0 : i32
    %c0_i32_1 = arith.constant 0 : i32
    return %c0_i32, %c0_i32_0, %arg2 : i32, i32, i32
  }
  func.func @transform_5(%arg0: i32, %arg1: i32, %arg2: i32) -> (i32, i32) {
    %c0_i32 = arith.constant 0 : i32
    %c0_i32_0 = arith.constant 0 : i32
    return %c0_i32, %arg2 : i32, i32
  }
  func.func @transform_6(%arg0: i32, %arg1: i32, %arg2: i32) -> (i32, i32, i32) {
    %c0_i32 = arith.constant 0 : i32
    return %arg0, %arg1, %arg2 : i32, i32, i32
  }
}

module attributes {stable_mosaic.version = 11 : i64} {
  func.func @_double_conv_kernel(%arg0: i32, %arg1: i32, %arg2: i32, %arg3: memref<1x20x16xbf16, #tpu.memory_space<vmem>>, %arg4: memref<1x16x16xbf16, #tpu.memory_space<vmem>>, %arg5: memref<9x16x32xbf16, #tpu.memory_space<vmem>>, %arg6: memref<1x32xf32, #tpu.memory_space<vmem>>, %arg7: memref<9x32x32xbf16, #tpu.memory_space<vmem>>, %arg8: memref<1x32xf32, #tpu.memory_space<vmem>>, %arg9: memref<1x4x32xbf16, #tpu.memory_space<vmem>>, %arg10: memref<8x16xbf16, #tpu.memory_space<vmem>>, %arg11: memref<24x32xbf16, #tpu.memory_space<vmem>>) attributes {dimension_semantics = [#tpu.dimension_semantics<parallel>, #tpu.dimension_semantics<parallel>, #tpu.dimension_semantics<arbitrary>], iteration_bounds = array<i64: 2, 1, 1>, scalar_prefetch = 0 : i64, scratch_operands = 2 : i64, tpu.core_type = #tpu.core_type<tc>, window_params = [{transform_indices = @transform_0, window_bounds = array<i64: 1, 20, 16>}, {transform_indices = @transform_1, window_bounds = array<i64: 1, 16, 16>}, {pipeline_mode = #tpu.pipeline_mode<synchronous>, transform_indices = @transform_2, window_bounds = array<i64: 9, 16, 32>}, {pipeline_mode = #tpu.pipeline_mode<synchronous>, transform_indices = @transform_3, window_bounds = array<i64: 1, 32>}, {transform_indices = @transform_4, window_bounds = array<i64: 9, 32, 32>}, {transform_indices = @transform_5, window_bounds = array<i64: 1, 32>}, {transform_indices = @transform_6, window_bounds = array<i64: 1, 4, 32>}]} {
    %0 = tpu.iota {dimensions = array<i32: 0>} : vector<8x1xi32>
    %c2_i32 = arith.constant 2 : i32
    %c0_i32 = arith.constant 0 : i32
    %1 = arith.cmpi eq, %c2_i32, %c0_i32 : i32
    %c1_i32 = arith.constant 1 : i32
    %2 = arith.select %1, %c1_i32, %c2_i32 : i32
    %3 = vector.broadcast %2 : i32 to vector<8x1xi32>
    %4 = arith.remsi %0, %3 : vector<8x1xi32>
    %c0_i32_0 = arith.constant 0 : i32
    %5 = vector.broadcast %c0_i32_0 : i32 to vector<8x1xi32>
    %6 = arith.cmpi ne, %4, %5 : vector<8x1xi32>
    %c0_i32_1 = arith.constant 0 : i32
    %7 = vector.broadcast %c0_i32_1 : i32 to vector<8x1xi32>
    %8 = arith.cmpi slt, %4, %7 : vector<8x1xi32>
    %c0_i32_2 = arith.constant 0 : i32
    %9 = arith.cmpi slt, %2, %c0_i32_2 : i32
    %10 = vector.broadcast %9 : i1 to vector<8x1xi1>
    %11 = vector.broadcast %10 : vector<8x1xi1> to vector<8x1xi1>
    %12 = arith.xori %8, %11 : vector<8x1xi1>
    %13 = arith.andi %12, %6 : vector<8x1xi1>
    %14 = vector.broadcast %2 : i32 to vector<8x1xi32>
    %15 = arith.addi %4, %14 : vector<8x1xi32>
    %16 = arith.select %13, %15, %4 : vector<8x1xi1>, vector<8x1xi32>
    %17 = tpu.iota {dimensions = array<i32: 0>} : vector<4x1xi32>
    %c2_i32_3 = arith.constant 2 : i32
    %c0_i32_4 = arith.constant 0 : i32
    %18 = arith.cmpi eq, %c2_i32_3, %c0_i32_4 : i32
    %c1_i32_5 = arith.constant 1 : i32
    %19 = arith.select %18, %c1_i32_5, %c2_i32_3 : i32
    %20 = vector.broadcast %19 : i32 to vector<4x1xi32>
    %21 = arith.remsi %17, %20 : vector<4x1xi32>
    %c0_i32_6 = arith.constant 0 : i32
    %22 = vector.broadcast %c0_i32_6 : i32 to vector<4x1xi32>
    %23 = arith.cmpi ne, %21, %22 : vector<4x1xi32>
    %c0_i32_7 = arith.constant 0 : i32
    %24 = vector.broadcast %c0_i32_7 : i32 to vector<4x1xi32>
    %25 = arith.cmpi slt, %21, %24 : vector<4x1xi32>
    %c0_i32_8 = arith.constant 0 : i32
    %26 = arith.cmpi slt, %19, %c0_i32_8 : i32
    %27 = vector.broadcast %26 : i1 to vector<4x1xi1>
    %28 = vector.broadcast %27 : vector<4x1xi1> to vector<4x1xi1>
    %29 = arith.xori %25, %28 : vector<4x1xi1>
    %30 = arith.andi %29, %23 : vector<4x1xi1>
    %31 = vector.broadcast %19 : i32 to vector<4x1xi32>
    %32 = arith.addi %21, %31 : vector<4x1xi32>
    %33 = arith.select %30, %32, %21 : vector<4x1xi1>, vector<4x1xi32>
    %c0_i32_9 = arith.constant 0 : i32
    %34 = vector.broadcast %c0_i32_9 : i32 to vector<8x1xi32>
    %35 = arith.cmpi ne, %16, %34 : vector<8x1xi32>
    %c1_i32_10 = arith.constant 1 : i32
    %36 = vector.broadcast %c1_i32_10 : i32 to vector<8x1xi32>
    %37 = arith.cmpi ne, %16, %36 : vector<8x1xi32>
    %cst = arith.constant 0.000000e+00 : f32
    %38 = vector.broadcast %cst : f32 to vector<8x32xf32>
    %c0 = arith.constant 0 : index
    %c0_11 = arith.constant 0 : index
    %c0_12 = arith.constant 0 : index
    %39 = vector.load %arg3[%c0, %c0_11, %c0_12] : memref<1x20x16xbf16, #tpu.memory_space<vmem>>, vector<1x8x16xbf16>
    %40 = vector.shape_cast %39 : vector<1x8x16xbf16> to vector<8x16xbf16>
    %c0_i32_13 = arith.constant 0 : i32
    %41 = arith.sitofp %c0_i32_13 : i32 to bf16
    %42 = vector.shape_cast %35 : vector<8x1xi1> to vector<8x1xi1>
    %43 = vector.broadcast %42 : vector<8x1xi1> to vector<8x16xi1>
    %44 = vector.broadcast %41 : bf16 to vector<8x16xbf16>
    %45 = arith.select %43, %40, %44 : vector<8x16xi1>, vector<8x16xbf16>
    %c0_14 = arith.constant 0 : index
    %c0_15 = arith.constant 0 : index
    %c0_16 = arith.constant 0 : index
    %46 = vector.load %arg5[%c0_14, %c0_15, %c0_16] : memref<9x16x32xbf16, #tpu.memory_space<vmem>>, vector<1x16x32xbf16>
    %47 = vector.shape_cast %46 : vector<1x16x32xbf16> to vector<16x32xbf16>
    %cst_17 = arith.constant dense<0.000000e+00> : vector<8x32xf32>
    %48 = tpu.matmul %45, %47, %cst_17 {dimension_numbers = #tpu.dot_dimension_numbers<[1], [0], [0], [1], [0, 0, 1, 1], [], []>} : vector<8x16xbf16>, vector<16x32xbf16>, vector<8x32xf32> -> vector<8x32xf32>
    %49 = arith.addf %38, %48 : vector<8x32xf32>
    %c0_18 = arith.constant 0 : index
    %c1 = arith.constant 1 : index
    %c0_19 = arith.constant 0 : index
    %50 = vector.load %arg3[%c0_18, %c1, %c0_19] : memref<1x20x16xbf16, #tpu.memory_space<vmem>>, vector<1x8x16xbf16>
    %51 = vector.shape_cast %50 : vector<1x8x16xbf16> to vector<8x16xbf16>
    %c1_20 = arith.constant 1 : index
    %c0_21 = arith.constant 0 : index
    %c0_22 = arith.constant 0 : index
    %52 = vector.load %arg5[%c1_20, %c0_21, %c0_22] : memref<9x16x32xbf16, #tpu.memory_space<vmem>>, vector<1x16x32xbf16>
    %53 = vector.shape_cast %52 : vector<1x16x32xbf16> to vector<16x32xbf16>
    %cst_23 = arith.constant dense<0.000000e+00> : vector<8x32xf32>
    %54 = tpu.matmul %51, %53, %cst_23 {dimension_numbers = #tpu.dot_dimension_numbers<[1], [0], [0], [1], [0, 0, 1, 1], [], []>} : vector<8x16xbf16>, vector<16x32xbf16>, vector<8x32xf32> -> vector<8x32xf32>
    %55 = arith.addf %49, %54 : vector<8x32xf32>
    %c0_24 = arith.constant 0 : index
    %c2 = arith.constant 2 : index
    %c0_25 = arith.constant 0 : index
    %56 = vector.load %arg3[%c0_24, %c2, %c0_25] : memref<1x20x16xbf16, #tpu.memory_space<vmem>>, vector<1x8x16xbf16>
    %57 = vector.shape_cast %56 : vector<1x8x16xbf16> to vector<8x16xbf16>
    %c0_i32_26 = arith.constant 0 : i32
    %58 = arith.sitofp %c0_i32_26 : i32 to bf16
    %59 = vector.shape_cast %37 : vector<8x1xi1> to vector<8x1xi1>
    %60 = vector.broadcast %59 : vector<8x1xi1> to vector<8x16xi1>
    %61 = vector.broadcast %58 : bf16 to vector<8x16xbf16>
    %62 = arith.select %60, %57, %61 : vector<8x16xi1>, vector<8x16xbf16>
    %c2_27 = arith.constant 2 : index
    %c0_28 = arith.constant 0 : index
    %c0_29 = arith.constant 0 : index
    %63 = vector.load %arg5[%c2_27, %c0_28, %c0_29] : memref<9x16x32xbf16, #tpu.memory_space<vmem>>, vector<1x16x32xbf16>
    %64 = vector.shape_cast %63 : vector<1x16x32xbf16> to vector<16x32xbf16>
    %cst_30 = arith.constant dense<0.000000e+00> : vector<8x32xf32>
    %65 = tpu.matmul %62, %64, %cst_30 {dimension_numbers = #tpu.dot_dimension_numbers<[1], [0], [0], [1], [0, 0, 1, 1], [], []>} : vector<8x16xbf16>, vector<16x32xbf16>, vector<8x32xf32> -> vector<8x32xf32>
    %66 = arith.addf %55, %65 : vector<8x32xf32>
    %c0_31 = arith.constant 0 : index
    %c2_32 = arith.constant 2 : index
    %c0_33 = arith.constant 0 : index
    %67 = vector.load %arg3[%c0_31, %c2_32, %c0_33] : memref<1x20x16xbf16, #tpu.memory_space<vmem>>, vector<1x8x16xbf16>
    %68 = vector.shape_cast %67 : vector<1x8x16xbf16> to vector<8x16xbf16>
    %c0_i32_34 = arith.constant 0 : i32
    %69 = arith.sitofp %c0_i32_34 : i32 to bf16
    %70 = vector.shape_cast %35 : vector<8x1xi1> to vector<8x1xi1>
    %71 = vector.broadcast %70 : vector<8x1xi1> to vector<8x16xi1>
    %72 = vector.broadcast %69 : bf16 to vector<8x16xbf16>
    %73 = arith.select %71, %68, %72 : vector<8x16xi1>, vector<8x16xbf16>
    %c3 = arith.constant 3 : index
    %c0_35 = arith.constant 0 : index
    %c0_36 = arith.constant 0 : index
    %74 = vector.load %arg5[%c3, %c0_35, %c0_36] : memref<9x16x32xbf16, #tpu.memory_space<vmem>>, vector<1x16x32xbf16>
    %75 = vector.shape_cast %74 : vector<1x16x32xbf16> to vector<16x32xbf16>
    %cst_37 = arith.constant dense<0.000000e+00> : vector<8x32xf32>
    %76 = tpu.matmul %73, %75, %cst_37 {dimension_numbers = #tpu.dot_dimension_numbers<[1], [0], [0], [1], [0, 0, 1, 1], [], []>} : vector<8x16xbf16>, vector<16x32xbf16>, vector<8x32xf32> -> vector<8x32xf32>
    %77 = arith.addf %66, %76 : vector<8x32xf32>
    %c0_38 = arith.constant 0 : index
    %c3_39 = arith.constant 3 : index
    %c0_40 = arith.constant 0 : index
    %78 = vector.load %arg3[%c0_38, %c3_39, %c0_40] : memref<1x20x16xbf16, #tpu.memory_space<vmem>>, vector<1x8x16xbf16>
    %79 = vector.shape_cast %78 : vector<1x8x16xbf16> to vector<8x16xbf16>
    %c4 = arith.constant 4 : index
    %c0_41 = arith.constant 0 : index
    %c0_42 = arith.constant 0 : index
    %80 = vector.load %arg5[%c4, %c0_41, %c0_42] : memref<9x16x32xbf16, #tpu.memory_space<vmem>>, vector<1x16x32xbf16>
    %81 = vector.shape_cast %80 : vector<1x16x32xbf16> to vector<16x32xbf16>
    %cst_43 = arith.constant dense<0.000000e+00> : vector<8x32xf32>
    %82 = tpu.matmul %79, %81, %cst_43 {dimension_numbers = #tpu.dot_dimension_numbers<[1], [0], [0], [1], [0, 0, 1, 1], [], []>} : vector<8x16xbf16>, vector<16x32xbf16>, vector<8x32xf32> -> vector<8x32xf32>
    %83 = arith.addf %77, %82 : vector<8x32xf32>
    %c0_44 = arith.constant 0 : index
    %c4_45 = arith.constant 4 : index
    %c0_46 = arith.constant 0 : index
    %84 = vector.load %arg3[%c0_44, %c4_45, %c0_46] : memref<1x20x16xbf16, #tpu.memory_space<vmem>>, vector<1x8x16xbf16>
    %85 = vector.shape_cast %84 : vector<1x8x16xbf16> to vector<8x16xbf16>
    %c0_i32_47 = arith.constant 0 : i32
    %86 = arith.sitofp %c0_i32_47 : i32 to bf16
    %87 = vector.shape_cast %37 : vector<8x1xi1> to vector<8x1xi1>
    %88 = vector.broadcast %87 : vector<8x1xi1> to vector<8x16xi1>
    %89 = vector.broadcast %86 : bf16 to vector<8x16xbf16>
    %90 = arith.select %88, %85, %89 : vector<8x16xi1>, vector<8x16xbf16>
    %c5 = arith.constant 5 : index
    %c0_48 = arith.constant 0 : index
    %c0_49 = arith.constant 0 : index
    %91 = vector.load %arg5[%c5, %c0_48, %c0_49] : memref<9x16x32xbf16, #tpu.memory_space<vmem>>, vector<1x16x32xbf16>
    %92 = vector.shape_cast %91 : vector<1x16x32xbf16> to vector<16x32xbf16>
    %cst_50 = arith.constant dense<0.000000e+00> : vector<8x32xf32>
    %93 = tpu.matmul %90, %92, %cst_50 {dimension_numbers = #tpu.dot_dimension_numbers<[1], [0], [0], [1], [0, 0, 1, 1], [], []>} : vector<8x16xbf16>, vector<16x32xbf16>, vector<8x32xf32> -> vector<8x32xf32>
    %94 = arith.addf %83, %93 : vector<8x32xf32>
    %c0_51 = arith.constant 0 : index
    %c4_52 = arith.constant 4 : index
    %c0_53 = arith.constant 0 : index
    %95 = vector.load %arg3[%c0_51, %c4_52, %c0_53] : memref<1x20x16xbf16, #tpu.memory_space<vmem>>, vector<1x8x16xbf16>
    %96 = vector.shape_cast %95 : vector<1x8x16xbf16> to vector<8x16xbf16>
    %c0_i32_54 = arith.constant 0 : i32
    %97 = arith.sitofp %c0_i32_54 : i32 to bf16
    %98 = vector.shape_cast %35 : vector<8x1xi1> to vector<8x1xi1>
    %99 = vector.broadcast %98 : vector<8x1xi1> to vector<8x16xi1>
    %100 = vector.broadcast %97 : bf16 to vector<8x16xbf16>
    %101 = arith.select %99, %96, %100 : vector<8x16xi1>, vector<8x16xbf16>
    %c6 = arith.constant 6 : index
    %c0_55 = arith.constant 0 : index
    %c0_56 = arith.constant 0 : index
    %102 = vector.load %arg5[%c6, %c0_55, %c0_56] : memref<9x16x32xbf16, #tpu.memory_space<vmem>>, vector<1x16x32xbf16>
    %103 = vector.shape_cast %102 : vector<1x16x32xbf16> to vector<16x32xbf16>
    %cst_57 = arith.constant dense<0.000000e+00> : vector<8x32xf32>
    %104 = tpu.matmul %101, %103, %cst_57 {dimension_numbers = #tpu.dot_dimension_numbers<[1], [0], [0], [1], [0, 0, 1, 1], [], []>} : vector<8x16xbf16>, vector<16x32xbf16>, vector<8x32xf32> -> vector<8x32xf32>
    %105 = arith.addf %94, %104 : vector<8x32xf32>
    %c0_58 = arith.constant 0 : index
    %c5_59 = arith.constant 5 : index
    %c0_60 = arith.constant 0 : index
    %106 = vector.load %arg3[%c0_58, %c5_59, %c0_60] : memref<1x20x16xbf16, #tpu.memory_space<vmem>>, vector<1x8x16xbf16>
    %107 = vector.shape_cast %106 : vector<1x8x16xbf16> to vector<8x16xbf16>
    %c7 = arith.constant 7 : index
    %c0_61 = arith.constant 0 : index
    %c0_62 = arith.constant 0 : index
    %108 = vector.load %arg5[%c7, %c0_61, %c0_62] : memref<9x16x32xbf16, #tpu.memory_space<vmem>>, vector<1x16x32xbf16>
    %109 = vector.shape_cast %108 : vector<1x16x32xbf16> to vector<16x32xbf16>
    %cst_63 = arith.constant dense<0.000000e+00> : vector<8x32xf32>
    %110 = tpu.matmul %107, %109, %cst_63 {dimension_numbers = #tpu.dot_dimension_numbers<[1], [0], [0], [1], [0, 0, 1, 1], [], []>} : vector<8x16xbf16>, vector<16x32xbf16>, vector<8x32xf32> -> vector<8x32xf32>
    %111 = arith.addf %105, %110 : vector<8x32xf32>
    %c0_64 = arith.constant 0 : index
    %c6_65 = arith.constant 6 : index
    %c0_66 = arith.constant 0 : index
    %112 = vector.load %arg3[%c0_64, %c6_65, %c0_66] : memref<1x20x16xbf16, #tpu.memory_space<vmem>>, vector<1x8x16xbf16>
    %113 = vector.shape_cast %112 : vector<1x8x16xbf16> to vector<8x16xbf16>
    %c0_i32_67 = arith.constant 0 : i32
    %114 = arith.sitofp %c0_i32_67 : i32 to bf16
    %115 = vector.shape_cast %37 : vector<8x1xi1> to vector<8x1xi1>
    %116 = vector.broadcast %115 : vector<8x1xi1> to vector<8x16xi1>
    %117 = vector.broadcast %114 : bf16 to vector<8x16xbf16>
    %118 = arith.select %116, %113, %117 : vector<8x16xi1>, vector<8x16xbf16>
    %c8 = arith.constant 8 : index
    %c0_68 = arith.constant 0 : index
    %c0_69 = arith.constant 0 : index
    %119 = vector.load %arg5[%c8, %c0_68, %c0_69] : memref<9x16x32xbf16, #tpu.memory_space<vmem>>, vector<1x16x32xbf16>
    %120 = vector.shape_cast %119 : vector<1x16x32xbf16> to vector<16x32xbf16>
    %cst_70 = arith.constant dense<0.000000e+00> : vector<8x32xf32>
    %121 = tpu.matmul %118, %120, %cst_70 {dimension_numbers = #tpu.dot_dimension_numbers<[1], [0], [0], [1], [0, 0, 1, 1], [], []>} : vector<8x16xbf16>, vector<16x32xbf16>, vector<8x32xf32> -> vector<8x32xf32>
    %122 = arith.addf %111, %121 : vector<8x32xf32>
    %c0_71 = arith.constant 0 : index
    %c0_72 = arith.constant 0 : index
    %123 = vector.load %arg6[%c0_71, %c0_72] : memref<1x32xf32, #tpu.memory_space<vmem>>, vector<1x32xf32>
    %124 = vector.broadcast %123 : vector<1x32xf32> to vector<8x32xf32>
    %125 = arith.addf %122, %124 : vector<8x32xf32>
    %cst_73 = arith.constant 0.000000e+00 : f32
    %126 = vector.broadcast %cst_73 : f32 to vector<8x32xf32>
    %127 = arith.maximumf %125, %126 : vector<8x32xf32>
    %128 = arith.truncf %127 : vector<8x32xf32> to vector<8x32xbf16>
    %c8_74 = arith.constant 8 : index
    %c0_75 = arith.constant 0 : index
    %129 = vector.load %arg11[%c8_74, %c0_75] : memref<24x32xbf16, #tpu.memory_space<vmem>>, vector<8x32xbf16>
    tpu.vector_store %arg11[%c8_74, %c0_75], %128 {strides = array<i32>} : memref<24x32xbf16, #tpu.memory_space<vmem>>, vector<8x32xbf16>,
    %cst_76 = arith.constant 0.000000e+00 : bf16
    %130 = vector.broadcast %cst_76 : bf16 to vector<2x32xbf16>
    %c8_77 = arith.constant 8 : index
    %c0_78 = arith.constant 0 : index
    %131 = vector.load %arg11[%c8_77, %c0_78] : memref<24x32xbf16, #tpu.memory_space<vmem>>, vector<2x32xbf16>
    tpu.vector_store %arg11[%c8_77, %c0_78], %130 {strides = array<i32>} : memref<24x32xbf16, #tpu.memory_space<vmem>>, vector<2x32xbf16>,
    %cst_79 = arith.constant 0.000000e+00 : bf16
    %132 = vector.broadcast %cst_79 : bf16 to vector<2x32xbf16>
    %c14 = arith.constant 14 : index
    %c0_80 = arith.constant 0 : index
    %133 = vector.load %arg11[%c14, %c0_80] : memref<24x32xbf16, #tpu.memory_space<vmem>>, vector<2x32xbf16>
    tpu.vector_store %arg11[%c14, %c0_80], %132 {strides = array<i32>} : memref<24x32xbf16, #tpu.memory_space<vmem>>, vector<2x32xbf16>,
    %c0_i32_81 = arith.constant 0 : i32
    %134 = vector.broadcast %c0_i32_81 : i32 to vector<4x1xi32>
    %135 = arith.cmpi ne, %33, %134 : vector<4x1xi32>
    %c1_i32_82 = arith.constant 1 : i32
    %136 = vector.broadcast %c1_i32_82 : i32 to vector<4x1xi32>
    %137 = arith.cmpi ne, %33, %136 : vector<4x1xi32>
    %cst_83 = arith.constant 0.000000e+00 : f32
    %138 = vector.broadcast %cst_83 : f32 to vector<4x32xf32>
    %c7_84 = arith.constant 7 : index
    %c0_85 = arith.constant 0 : index
    %139 = vector.load %arg11[%c7_84, %c0_85] : memref<24x32xbf16, #tpu.memory_space<vmem>>, vector<4x32xbf16>
    %c0_i32_86 = arith.constant 0 : i32
    %140 = arith.sitofp %c0_i32_86 : i32 to bf16
    %141 = vector.shape_cast %135 : vector<4x1xi1> to vector<4x1xi1>
    %142 = vector.broadcast %141 : vector<4x1xi1> to vector<4x32xi1>
    %143 = vector.broadcast %140 : bf16 to vector<4x32xbf16>
    %144 = arith.select %142, %139, %143 : vector<4x32xi1>, vector<4x32xbf16>
    %c0_87 = arith.constant 0 : index
    %c0_88 = arith.constant 0 : index
    %c0_89 = arith.constant 0 : index
    %145 = vector.load %arg7[%c0_87, %c0_88, %c0_89] : memref<9x32x32xbf16, #tpu.memory_space<vmem>>, vector<1x32x32xbf16>
    %146 = vector.shape_cast %145 : vector<1x32x32xbf16> to vector<32x32xbf16>
    %cst_90 = arith.constant dense<0.000000e+00> : vector<4x32xf32>
    %147 = tpu.matmul %144, %146, %cst_90 {dimension_numbers = #tpu.dot_dimension_numbers<[1], [0], [0], [1], [0, 0, 1, 1], [], []>} : vector<4x32xbf16>, vector<32x32xbf16>, vector<4x32xf32> -> vector<4x32xf32>
    %148 = arith.addf %138, %147 : vector<4x32xf32>
    %c8_91 = arith.constant 8 : index
    %c0_92 = arith.constant 0 : index
    %149 = vector.load %arg11[%c8_91, %c0_92] : memref<24x32xbf16, #tpu.memory_space<vmem>>, vector<4x32xbf16>
    %c1_93 = arith.constant 1 : index
    %c0_94 = arith.constant 0 : index
    %c0_95 = arith.constant 0 : index
    %150 = vector.load %arg7[%c1_93, %c0_94, %c0_95] : memref<9x32x32xbf16, #tpu.memory_space<vmem>>, vector<1x32x32xbf16>
    %151 = vector.shape_cast %150 : vector<1x32x32xbf16> to vector<32x32xbf16>
    %cst_96 = arith.constant dense<0.000000e+00> : vector<4x32xf32>
    %152 = tpu.matmul %149, %151, %cst_96 {dimension_numbers = #tpu.dot_dimension_numbers<[1], [0], [0], [1], [0, 0, 1, 1], [], []>} : vector<4x32xbf16>, vector<32x32xbf16>, vector<4x32xf32> -> vector<4x32xf32>
    %153 = arith.addf %148, %152 : vector<4x32xf32>
    %c9 = arith.constant 9 : index
    %c0_97 = arith.constant 0 : index
    %154 = vector.load %arg11[%c9, %c0_97] : memref<24x32xbf16, #tpu.memory_space<vmem>>, vector<4x32xbf16>
    %c0_i32_98 = arith.constant 0 : i32
    %155 = arith.sitofp %c0_i32_98 : i32 to bf16
    %156 = vector.shape_cast %137 : vector<4x1xi1> to vector<4x1xi1>
    %157 = vector.broadcast %156 : vector<4x1xi1> to vector<4x32xi1>
    %158 = vector.broadcast %155 : bf16 to vector<4x32xbf16>
    %159 = arith.select %157, %154, %158 : vector<4x32xi1>, vector<4x32xbf16>
    %c2_99 = arith.constant 2 : index
    %c0_100 = arith.constant 0 : index
    %c0_101 = arith.constant 0 : index
    %160 = vector.load %arg7[%c2_99, %c0_100, %c0_101] : memref<9x32x32xbf16, #tpu.memory_space<vmem>>, vector<1x32x32xbf16>
    %161 = vector.shape_cast %160 : vector<1x32x32xbf16> to vector<32x32xbf16>
    %cst_102 = arith.constant dense<0.000000e+00> : vector<4x32xf32>
    %162 = tpu.matmul %159, %161, %cst_102 {dimension_numbers = #tpu.dot_dimension_numbers<[1], [0], [0], [1], [0, 0, 1, 1], [], []>} : vector<4x32xbf16>, vector<32x32xbf16>, vector<4x32xf32> -> vector<4x32xf32>
    %163 = arith.addf %153, %162 : vector<4x32xf32>
    %c9_103 = arith.constant 9 : index
    %c0_104 = arith.constant 0 : index
    %164 = vector.load %arg11[%c9_103, %c0_104] : memref<24x32xbf16, #tpu.memory_space<vmem>>, vector<4x32xbf16>
    %c0_i32_105 = arith.constant 0 : i32
    %165 = arith.sitofp %c0_i32_105 : i32 to bf16
    %166 = vector.shape_cast %135 : vector<4x1xi1> to vector<4x1xi1>
    %167 = vector.broadcast %166 : vector<4x1xi1> to vector<4x32xi1>
    %168 = vector.broadcast %165 : bf16 to vector<4x32xbf16>
    %169 = arith.select %167, %164, %168 : vector<4x32xi1>, vector<4x32xbf16>
    %c3_106 = arith.constant 3 : index
    %c0_107 = arith.constant 0 : index
    %c0_108 = arith.constant 0 : index
    %170 = vector.load %arg7[%c3_106, %c0_107, %c0_108] : memref<9x32x32xbf16, #tpu.memory_space<vmem>>, vector<1x32x32xbf16>
    %171 = vector.shape_cast %170 : vector<1x32x32xbf16> to vector<32x32xbf16>
    %cst_109 = arith.constant dense<0.000000e+00> : vector<4x32xf32>
    %172 = tpu.matmul %169, %171, %cst_109 {dimension_numbers = #tpu.dot_dimension_numbers<[1], [0], [0], [1], [0, 0, 1, 1], [], []>} : vector<4x32xbf16>, vector<32x32xbf16>, vector<4x32xf32> -> vector<4x32xf32>
    %173 = arith.addf %163, %172 : vector<4x32xf32>
    %c10 = arith.constant 10 : index
    %c0_110 = arith.constant 0 : index
    %174 = vector.load %arg11[%c10, %c0_110] : memref<24x32xbf16, #tpu.memory_space<vmem>>, vector<4x32xbf16>
    %c4_111 = arith.constant 4 : index
    %c0_112 = arith.constant 0 : index
    %c0_113 = arith.constant 0 : index
    %175 = vector.load %arg7[%c4_111, %c0_112, %c0_113] : memref<9x32x32xbf16, #tpu.memory_space<vmem>>, vector<1x32x32xbf16>
    %176 = vector.shape_cast %175 : vector<1x32x32xbf16> to vector<32x32xbf16>
    %cst_114 = arith.constant dense<0.000000e+00> : vector<4x32xf32>
    %177 = tpu.matmul %174, %176, %cst_114 {dimension_numbers = #tpu.dot_dimension_numbers<[1], [0], [0], [1], [0, 0, 1, 1], [], []>} : vector<4x32xbf16>, vector<32x32xbf16>, vector<4x32xf32> -> vector<4x32xf32>
    %178 = arith.addf %173, %177 : vector<4x32xf32>
    %c11 = arith.constant 11 : index
    %c0_115 = arith.constant 0 : index
    %179 = vector.load %arg11[%c11, %c0_115] : memref<24x32xbf16, #tpu.memory_space<vmem>>, vector<4x32xbf16>
    %c0_i32_116 = arith.constant 0 : i32
    %180 = arith.sitofp %c0_i32_116 : i32 to bf16
    %181 = vector.shape_cast %137 : vector<4x1xi1> to vector<4x1xi1>
    %182 = vector.broadcast %181 : vector<4x1xi1> to vector<4x32xi1>
    %183 = vector.broadcast %180 : bf16 to vector<4x32xbf16>
    %184 = arith.select %182, %179, %183 : vector<4x32xi1>, vector<4x32xbf16>
    %c5_117 = arith.constant 5 : index
    %c0_118 = arith.constant 0 : index
    %c0_119 = arith.constant 0 : index
    %185 = vector.load %arg7[%c5_117, %c0_118, %c0_119] : memref<9x32x32xbf16, #tpu.memory_space<vmem>>, vector<1x32x32xbf16>
    %186 = vector.shape_cast %185 : vector<1x32x32xbf16> to vector<32x32xbf16>
    %cst_120 = arith.constant dense<0.000000e+00> : vector<4x32xf32>
    %187 = tpu.matmul %184, %186, %cst_120 {dimension_numbers = #tpu.dot_dimension_numbers<[1], [0], [0], [1], [0, 0, 1, 1], [], []>} : vector<4x32xbf16>, vector<32x32xbf16>, vector<4x32xf32> -> vector<4x32xf32>
    %188 = arith.addf %178, %187 : vector<4x32xf32>
    %c11_121 = arith.constant 11 : index
    %c0_122 = arith.constant 0 : index
    %189 = vector.load %arg11[%c11_121, %c0_122] : memref<24x32xbf16, #tpu.memory_space<vmem>>, vector<4x32xbf16>
    %c0_i32_123 = arith.constant 0 : i32
    %190 = arith.sitofp %c0_i32_123 : i32 to bf16
    %191 = vector.shape_cast %135 : vector<4x1xi1> to vector<4x1xi1>
    %192 = vector.broadcast %191 : vector<4x1xi1> to vector<4x32xi1>
    %193 = vector.broadcast %190 : bf16 to vector<4x32xbf16>
    %194 = arith.select %192, %189, %193 : vector<4x32xi1>, vector<4x32xbf16>
    %c6_124 = arith.constant 6 : index
    %c0_125 = arith.constant 0 : index
    %c0_126 = arith.constant 0 : index
    %195 = vector.load %arg7[%c6_124, %c0_125, %c0_126] : memref<9x32x32xbf16, #tpu.memory_space<vmem>>, vector<1x32x32xbf16>
    %196 = vector.shape_cast %195 : vector<1x32x32xbf16> to vector<32x32xbf16>
    %cst_127 = arith.constant dense<0.000000e+00> : vector<4x32xf32>
    %197 = tpu.matmul %194, %196, %cst_127 {dimension_numbers = #tpu.dot_dimension_numbers<[1], [0], [0], [1], [0, 0, 1, 1], [], []>} : vector<4x32xbf16>, vector<32x32xbf16>, vector<4x32xf32> -> vector<4x32xf32>
    %198 = arith.addf %188, %197 : vector<4x32xf32>
    %c12 = arith.constant 12 : index
    %c0_128 = arith.constant 0 : index
    %199 = vector.load %arg11[%c12, %c0_128] : memref<24x32xbf16, #tpu.memory_space<vmem>>, vector<4x32xbf16>
    %c7_129 = arith.constant 7 : index
    %c0_130 = arith.constant 0 : index
    %c0_131 = arith.constant 0 : index
    %200 = vector.load %arg7[%c7_129, %c0_130, %c0_131] : memref<9x32x32xbf16, #tpu.memory_space<vmem>>, vector<1x32x32xbf16>
    %201 = vector.shape_cast %200 : vector<1x32x32xbf16> to vector<32x32xbf16>
    %cst_132 = arith.constant dense<0.000000e+00> : vector<4x32xf32>
    %202 = tpu.matmul %199, %201, %cst_132 {dimension_numbers = #tpu.dot_dimension_numbers<[1], [0], [0], [1], [0, 0, 1, 1], [], []>} : vector<4x32xbf16>, vector<32x32xbf16>, vector<4x32xf32> -> vector<4x32xf32>
    %203 = arith.addf %198, %202 : vector<4x32xf32>
    %c13 = arith.constant 13 : index
    %c0_133 = arith.constant 0 : index
    %204 = vector.load %arg11[%c13, %c0_133] : memref<24x32xbf16, #tpu.memory_space<vmem>>, vector<4x32xbf16>
    %c0_i32_134 = arith.constant 0 : i32
    %205 = arith.sitofp %c0_i32_134 : i32 to bf16
    %206 = vector.shape_cast %137 : vector<4x1xi1> to vector<4x1xi1>
    %207 = vector.broadcast %206 : vector<4x1xi1> to vector<4x32xi1>
    %208 = vector.broadcast %205 : bf16 to vector<4x32xbf16>
    %209 = arith.select %207, %204, %208 : vector<4x32xi1>, vector<4x32xbf16>
    %c8_135 = arith.constant 8 : index
    %c0_136 = arith.constant 0 : index
    %c0_137 = arith.constant 0 : index
    %210 = vector.load %arg7[%c8_135, %c0_136, %c0_137] : memref<9x32x32xbf16, #tpu.memory_space<vmem>>, vector<1x32x32xbf16>
    %211 = vector.shape_cast %210 : vector<1x32x32xbf16> to vector<32x32xbf16>
    %cst_138 = arith.constant dense<0.000000e+00> : vector<4x32xf32>
    %212 = tpu.matmul %209, %211, %cst_138 {dimension_numbers = #tpu.dot_dimension_numbers<[1], [0], [0], [1], [0, 0, 1, 1], [], []>} : vector<4x32xbf16>, vector<32x32xbf16>, vector<4x32xf32> -> vector<4x32xf32>
    %213 = arith.addf %203, %212 : vector<4x32xf32>
    %c0_139 = arith.constant 0 : index
    %c0_140 = arith.constant 0 : index
    %214 = vector.load %arg8[%c0_139, %c0_140] : memref<1x32xf32, #tpu.memory_space<vmem>>, vector<1x32xf32>
    %215 = vector.broadcast %214 : vector<1x32xf32> to vector<4x32xf32>
    %216 = arith.addf %213, %215 : vector<4x32xf32>
    %cst_141 = arith.constant 0.000000e+00 : f32
    %217 = vector.broadcast %cst_141 : f32 to vector<4x32xf32>
    %218 = arith.maximumf %216, %217 : vector<4x32xf32>
    %219 = arith.truncf %218 : vector<4x32xf32> to vector<4x32xbf16>
    %c0_142 = arith.constant 0 : index
    %c0_143 = arith.constant 0 : index
    %c0_144 = arith.constant 0 : index
    %220 = vector.load %arg9[%c0_142, %c0_143, %c0_144] : memref<1x4x32xbf16, #tpu.memory_space<vmem>>, vector<1x4x32xbf16>
    %221 = vector.shape_cast %220 : vector<1x4x32xbf16> to vector<4x32xbf16>
    %222 = vector.shape_cast %219 : vector<4x32xbf16> to vector<1x4x32xbf16>
    tpu.vector_store %arg9[%c0_142, %c0_143, %c0_144], %222 {strides = array<i32>} : memref<1x4x32xbf16, #tpu.memory_space<vmem>>, vector<1x4x32xbf16>,
    return
  }
  func.func @transform_0(%arg0: i32, %arg1: i32, %arg2: i32) -> (i32, i32, i32) {
    %c0_i32 = arith.constant 0 : i32
    %c0_i32_0 = arith.constant 0 : i32
    %c0_i32_1 = arith.constant 0 : i32
    return %arg0, %c0_i32, %c0_i32_0 : i32, i32, i32
  }
  func.func @transform_1(%arg0: i32, %arg1: i32, %arg2: i32) -> (i32, i32, i32) {
    %c0_i32 = arith.constant 0 : i32
    %c0_i32_0 = arith.constant 0 : i32
    %c0_i32_1 = arith.constant 0 : i32
    return %arg0, %c0_i32, %c0_i32_0 : i32, i32, i32
  }
  func.func @transform_2(%arg0: i32, %arg1: i32, %arg2: i32) -> (i32, i32, i32) {
    %c0_i32 = arith.constant 0 : i32
    %c0_i32_0 = arith.constant 0 : i32
    %c0_i32_1 = arith.constant 0 : i32
    %c0_i32_2 = arith.constant 0 : i32
    return %c0_i32, %c0_i32_0, %c0_i32_1 : i32, i32, i32
  }
  func.func @transform_3(%arg0: i32, %arg1: i32, %arg2: i32) -> (i32, i32) {
    %c0_i32 = arith.constant 0 : i32
    %c0_i32_0 = arith.constant 0 : i32
    %c0_i32_1 = arith.constant 0 : i32
    return %c0_i32, %c0_i32_0 : i32, i32
  }
  func.func @transform_4(%arg0: i32, %arg1: i32, %arg2: i32) -> (i32, i32, i32) {
    %c0_i32 = arith.constant 0 : i32
    %c0_i32_0 = arith.constant 0 : i32
    %c0_i32_1 = arith.constant 0 : i32
    return %c0_i32, %c0_i32_0, %arg2 : i32, i32, i32
  }
  func.func @transform_5(%arg0: i32, %arg1: i32, %arg2: i32) -> (i32, i32) {
    %c0_i32 = arith.constant 0 : i32
    %c0_i32_0 = arith.constant 0 : i32
    return %c0_i32, %arg2 : i32, i32
  }
  func.func @transform_6(%arg0: i32, %arg1: i32, %arg2: i32) -> (i32, i32, i32) {
    %c0_i32 = arith.constant 0 : i32
    return %arg0, %arg1, %arg2 : i32, i32, i32
  }
}

module attributes {stable_mosaic.version = 11 : i64} {
  func.func @_convt2x2_kernel(%arg0: i32, %arg1: i32, %arg2: memref<1x4x32xbf16, #tpu.memory_space<vmem>>, %arg3: memref<4x32x16xbf16, #tpu.memory_space<vmem>>, %arg4: memref<1x16xf32, #tpu.memory_space<vmem>>, %arg5: memref<1x2x2x4x16xbf16, #tpu.memory_space<vmem>>) attributes {dimension_semantics = [#tpu.dimension_semantics<parallel>, #tpu.dimension_semantics<parallel>], iteration_bounds = array<i64: 2, 1>, scalar_prefetch = 0 : i64, scratch_operands = 0 : i64, tpu.core_type = #tpu.core_type<tc>, window_params = [{transform_indices = @transform_0, window_bounds = array<i64: 1, 4, 32>}, {pipeline_mode = #tpu.pipeline_mode<synchronous>, transform_indices = @transform_1, window_bounds = array<i64: 4, 32, 16>}, {pipeline_mode = #tpu.pipeline_mode<synchronous>, transform_indices = @transform_2, window_bounds = array<i64: 1, 16>}, {transform_indices = @transform_3, window_bounds = array<i64: 1, 2, 2, 4, 16>}]} {
    %c0 = arith.constant 0 : index
    %c0_0 = arith.constant 0 : index
    %c0_1 = arith.constant 0 : index
    %0 = vector.load %arg2[%c0, %c0_0, %c0_1] : memref<1x4x32xbf16, #tpu.memory_space<vmem>>, vector<1x4x32xbf16>
    %1 = vector.shape_cast %0 : vector<1x4x32xbf16> to vector<4x32xbf16>
    %c0_2 = arith.constant 0 : index
    %c0_3 = arith.constant 0 : index
    %c0_4 = arith.constant 0 : index
    %2 = vector.load %arg3[%c0_2, %c0_3, %c0_4] : memref<4x32x16xbf16, #tpu.memory_space<vmem>>, vector<1x32x16xbf16>
    %3 = vector.shape_cast %2 : vector<1x32x16xbf16> to vector<32x16xbf16>
    %cst = arith.constant dense<0.000000e+00> : vector<4x16xf32>
    %4 = tpu.matmul %1, %3, %cst {dimension_numbers = #tpu.dot_dimension_numbers<[1], [0], [0], [1], [0, 0, 1, 1], [], []>} : vector<4x32xbf16>, vector<32x16xbf16>, vector<4x16xf32> -> vector<4x16xf32>
    %c0_5 = arith.constant 0 : index
    %c0_6 = arith.constant 0 : index
    %5 = vector.load %arg4[%c0_5, %c0_6] : memref<1x16xf32, #tpu.memory_space<vmem>>, vector<1x16xf32>
    %6 = vector.broadcast %5 : vector<1x16xf32> to vector<4x16xf32>
    %7 = arith.addf %4, %6 : vector<4x16xf32>
    %8 = arith.truncf %7 : vector<4x16xf32> to vector<4x16xbf16>
    %c0_7 = arith.constant 0 : index
    %c0_8 = arith.constant 0 : index
    %c0_9 = arith.constant 0 : index
    %c0_10 = arith.constant 0 : index
    %c0_11 = arith.constant 0 : index
    %9 = vector.load %arg5[%c0_7, %c0_8, %c0_9, %c0_10, %c0_11] : memref<1x2x2x4x16xbf16, #tpu.memory_space<vmem>>, vector<1x1x1x4x16xbf16>
    %10 = vector.shape_cast %9 : vector<1x1x1x4x16xbf16> to vector<4x16xbf16>
    %11 = vector.shape_cast %8 : vector<4x16xbf16> to vector<1x1x1x4x16xbf16>
    tpu.vector_store %arg5[%c0_7, %c0_8, %c0_9, %c0_10, %c0_11], %11 {strides = array<i32>} : memref<1x2x2x4x16xbf16, #tpu.memory_space<vmem>>, vector<1x1x1x4x16xbf16>,
    %c1 = arith.constant 1 : index
    %c0_12 = arith.constant 0 : index
    %c0_13 = arith.constant 0 : index
    %12 = vector.load %arg3[%c1, %c0_12, %c0_13] : memref<4x32x16xbf16, #tpu.memory_space<vmem>>, vector<1x32x16xbf16>
    %13 = vector.shape_cast %12 : vector<1x32x16xbf16> to vector<32x16xbf16>
    %cst_14 = arith.constant dense<0.000000e+00> : vector<4x16xf32>
    %14 = tpu.matmul %1, %13, %cst_14 {dimension_numbers = #tpu.dot_dimension_numbers<[1], [0], [0], [1], [0, 0, 1, 1], [], []>} : vector<4x32xbf16>, vector<32x16xbf16>, vector<4x16xf32> -> vector<4x16xf32>
    %c0_15 = arith.constant 0 : index
    %c0_16 = arith.constant 0 : index
    %15 = vector.load %arg4[%c0_15, %c0_16] : memref<1x16xf32, #tpu.memory_space<vmem>>, vector<1x16xf32>
    %16 = vector.broadcast %15 : vector<1x16xf32> to vector<4x16xf32>
    %17 = arith.addf %14, %16 : vector<4x16xf32>
    %18 = arith.truncf %17 : vector<4x16xf32> to vector<4x16xbf16>
    %c0_17 = arith.constant 0 : index
    %c0_18 = arith.constant 0 : index
    %c1_19 = arith.constant 1 : index
    %c0_20 = arith.constant 0 : index
    %c0_21 = arith.constant 0 : index
    %19 = vector.load %arg5[%c0_17, %c0_18, %c1_19, %c0_20, %c0_21] : memref<1x2x2x4x16xbf16, #tpu.memory_space<vmem>>, vector<1x1x1x4x16xbf16>
    %20 = vector.shape_cast %19 : vector<1x1x1x4x16xbf16> to vector<4x16xbf16>
    %21 = vector.shape_cast %18 : vector<4x16xbf16> to vector<1x1x1x4x16xbf16>
    tpu.vector_store %arg5[%c0_17, %c0_18, %c1_19, %c0_20, %c0_21], %21 {strides = array<i32>} : memref<1x2x2x4x16xbf16, #tpu.memory_space<vmem>>, vector<1x1x1x4x16xbf16>,
    %c2 = arith.constant 2 : index
    %c0_22 = arith.constant 0 : index
    %c0_23 = arith.constant 0 : index
    %22 = vector.load %arg3[%c2, %c0_22, %c0_23] : memref<4x32x16xbf16, #tpu.memory_space<vmem>>, vector<1x32x16xbf16>
    %23 = vector.shape_cast %22 : vector<1x32x16xbf16> to vector<32x16xbf16>
    %cst_24 = arith.constant dense<0.000000e+00> : vector<4x16xf32>
    %24 = tpu.matmul %1, %23, %cst_24 {dimension_numbers = #tpu.dot_dimension_numbers<[1], [0], [0], [1], [0, 0, 1, 1], [], []>} : vector<4x32xbf16>, vector<32x16xbf16>, vector<4x16xf32> -> vector<4x16xf32>
    %c0_25 = arith.constant 0 : index
    %c0_26 = arith.constant 0 : index
    %25 = vector.load %arg4[%c0_25, %c0_26] : memref<1x16xf32, #tpu.memory_space<vmem>>, vector<1x16xf32>
    %26 = vector.broadcast %25 : vector<1x16xf32> to vector<4x16xf32>
    %27 = arith.addf %24, %26 : vector<4x16xf32>
    %28 = arith.truncf %27 : vector<4x16xf32> to vector<4x16xbf16>
    %c0_27 = arith.constant 0 : index
    %c1_28 = arith.constant 1 : index
    %c0_29 = arith.constant 0 : index
    %c0_30 = arith.constant 0 : index
    %c0_31 = arith.constant 0 : index
    %29 = vector.load %arg5[%c0_27, %c1_28, %c0_29, %c0_30, %c0_31] : memref<1x2x2x4x16xbf16, #tpu.memory_space<vmem>>, vector<1x1x1x4x16xbf16>
    %30 = vector.shape_cast %29 : vector<1x1x1x4x16xbf16> to vector<4x16xbf16>
    %31 = vector.shape_cast %28 : vector<4x16xbf16> to vector<1x1x1x4x16xbf16>
    tpu.vector_store %arg5[%c0_27, %c1_28, %c0_29, %c0_30, %c0_31], %31 {strides = array<i32>} : memref<1x2x2x4x16xbf16, #tpu.memory_space<vmem>>, vector<1x1x1x4x16xbf16>,
    %c3 = arith.constant 3 : index
    %c0_32 = arith.constant 0 : index
    %c0_33 = arith.constant 0 : index
    %32 = vector.load %arg3[%c3, %c0_32, %c0_33] : memref<4x32x16xbf16, #tpu.memory_space<vmem>>, vector<1x32x16xbf16>
    %33 = vector.shape_cast %32 : vector<1x32x16xbf16> to vector<32x16xbf16>
    %cst_34 = arith.constant dense<0.000000e+00> : vector<4x16xf32>
    %34 = tpu.matmul %1, %33, %cst_34 {dimension_numbers = #tpu.dot_dimension_numbers<[1], [0], [0], [1], [0, 0, 1, 1], [], []>} : vector<4x32xbf16>, vector<32x16xbf16>, vector<4x16xf32> -> vector<4x16xf32>
    %c0_35 = arith.constant 0 : index
    %c0_36 = arith.constant 0 : index
    %35 = vector.load %arg4[%c0_35, %c0_36] : memref<1x16xf32, #tpu.memory_space<vmem>>, vector<1x16xf32>
    %36 = vector.broadcast %35 : vector<1x16xf32> to vector<4x16xf32>
    %37 = arith.addf %34, %36 : vector<4x16xf32>
    %38 = arith.truncf %37 : vector<4x16xf32> to vector<4x16xbf16>
    %c0_37 = arith.constant 0 : index
    %c1_38 = arith.constant 1 : index
    %c1_39 = arith.constant 1 : index
    %c0_40 = arith.constant 0 : index
    %c0_41 = arith.constant 0 : index
    %39 = vector.load %arg5[%c0_37, %c1_38, %c1_39, %c0_40, %c0_41] : memref<1x2x2x4x16xbf16, #tpu.memory_space<vmem>>, vector<1x1x1x4x16xbf16>
    %40 = vector.shape_cast %39 : vector<1x1x1x4x16xbf16> to vector<4x16xbf16>
    %41 = vector.shape_cast %38 : vector<4x16xbf16> to vector<1x1x1x4x16xbf16>
    tpu.vector_store %arg5[%c0_37, %c1_38, %c1_39, %c0_40, %c0_41], %41 {strides = array<i32>} : memref<1x2x2x4x16xbf16, #tpu.memory_space<vmem>>, vector<1x1x1x4x16xbf16>,
    return
  }
  func.func @transform_0(%arg0: i32, %arg1: i32) -> (i32, i32, i32) {
    %c0_i32 = arith.constant 0 : i32
    %c0_i32_0 = arith.constant 0 : i32
    return %arg0, %arg1, %c0_i32 : i32, i32, i32
  }
  func.func @transform_1(%arg0: i32, %arg1: i32) -> (i32, i32, i32) {
    %c0_i32 = arith.constant 0 : i32
    %c0_i32_0 = arith.constant 0 : i32
    %c0_i32_1 = arith.constant 0 : i32
    %c0_i32_2 = arith.constant 0 : i32
    return %c0_i32, %c0_i32_0, %c0_i32_1 : i32, i32, i32
  }
  func.func @transform_2(%arg0: i32, %arg1: i32) -> (i32, i32) {
    %c0_i32 = arith.constant 0 : i32
    %c0_i32_0 = arith.constant 0 : i32
    %c0_i32_1 = arith.constant 0 : i32
    return %c0_i32, %c0_i32_0 : i32, i32
  }
  func.func @transform_3(%arg0: i32, %arg1: i32) -> (i32, i32, i32, i32, i32) {
    %c0_i32 = arith.constant 0 : i32
    %c0_i32_0 = arith.constant 0 : i32
    %c0_i32_1 = arith.constant 0 : i32
    %c0_i32_2 = arith.constant 0 : i32
    return %arg0, %c0_i32, %c0_i32_0, %arg1, %c0_i32_1 : i32, i32, i32, i32, i32
  }
}

module attributes {stable_mosaic.version = 11 : i64} {
  func.func @_convt2x2_kernel(%arg0: i32, %arg1: i32, %arg2: memref<1x16x16xbf16, #tpu.memory_space<vmem>>, %arg3: memref<1x16x16xbf16, #tpu.memory_space<vmem>>, %arg4: memref<4x16x8xbf16, #tpu.memory_space<vmem>>, %arg5: memref<1x8xf32, #tpu.memory_space<vmem>>, %arg6: memref<1x2x2x16x8xbf16, #tpu.memory_space<vmem>>) attributes {dimension_semantics = [#tpu.dimension_semantics<parallel>, #tpu.dimension_semantics<parallel>], iteration_bounds = array<i64: 2, 1>, scalar_prefetch = 0 : i64, scratch_operands = 0 : i64, tpu.core_type = #tpu.core_type<tc>, window_params = [{transform_indices = @transform_0, window_bounds = array<i64: 1, 16, 16>}, {transform_indices = @transform_1, window_bounds = array<i64: 1, 16, 16>}, {pipeline_mode = #tpu.pipeline_mode<synchronous>, transform_indices = @transform_2, window_bounds = array<i64: 4, 16, 8>}, {pipeline_mode = #tpu.pipeline_mode<synchronous>, transform_indices = @transform_3, window_bounds = array<i64: 1, 8>}, {transform_indices = @transform_4, window_bounds = array<i64: 1, 2, 2, 16, 8>}]} {
    %c0 = arith.constant 0 : index
    %c0_0 = arith.constant 0 : index
    %c0_1 = arith.constant 0 : index
    %0 = vector.load %arg2[%c0, %c0_0, %c0_1] : memref<1x16x16xbf16, #tpu.memory_space<vmem>>, vector<1x16x16xbf16>
    %1 = vector.shape_cast %0 : vector<1x16x16xbf16> to vector<16x16xbf16>
    %2 = arith.extf %1 : vector<16x16xbf16> to vector<16x16xf32>
    %c0_2 = arith.constant 0 : index
    %c0_3 = arith.constant 0 : index
    %c0_4 = arith.constant 0 : index
    %3 = vector.load %arg3[%c0_2, %c0_3, %c0_4] : memref<1x16x16xbf16, #tpu.memory_space<vmem>>, vector<1x16x16xbf16>
    %4 = vector.shape_cast %3 : vector<1x16x16xbf16> to vector<16x16xbf16>
    %5 = arith.extf %4 : vector<16x16xbf16> to vector<16x16xf32>
    %6 = arith.addf %2, %5 : vector<16x16xf32>
    %7 = arith.truncf %6 : vector<16x16xf32> to vector<16x16xbf16>
    %c0_5 = arith.constant 0 : index
    %c0_6 = arith.constant 0 : index
    %c0_7 = arith.constant 0 : index
    %8 = vector.load %arg4[%c0_5, %c0_6, %c0_7] : memref<4x16x8xbf16, #tpu.memory_space<vmem>>, vector<1x16x8xbf16>
    %9 = vector.shape_cast %8 : vector<1x16x8xbf16> to vector<16x8xbf16>
    %cst = arith.constant dense<0.000000e+00> : vector<16x8xf32>
    %10 = tpu.matmul %7, %9, %cst {dimension_numbers = #tpu.dot_dimension_numbers<[1], [0], [0], [1], [0, 0, 1, 1], [], []>} : vector<16x16xbf16>, vector<16x8xbf16>, vector<16x8xf32> -> vector<16x8xf32>
    %c0_8 = arith.constant 0 : index
    %c0_9 = arith.constant 0 : index
    %11 = vector.load %arg5[%c0_8, %c0_9] : memref<1x8xf32, #tpu.memory_space<vmem>>, vector<1x8xf32>
    %12 = vector.broadcast %11 : vector<1x8xf32> to vector<16x8xf32>
    %13 = arith.addf %10, %12 : vector<16x8xf32>
    %14 = arith.truncf %13 : vector<16x8xf32> to vector<16x8xbf16>
    %c0_10 = arith.constant 0 : index
    %c0_11 = arith.constant 0 : index
    %c0_12 = arith.constant 0 : index
    %c0_13 = arith.constant 0 : index
    %c0_14 = arith.constant 0 : index
    %15 = vector.load %arg6[%c0_10, %c0_11, %c0_12, %c0_13, %c0_14] : memref<1x2x2x16x8xbf16, #tpu.memory_space<vmem>>, vector<1x1x1x16x8xbf16>
    %16 = vector.shape_cast %15 : vector<1x1x1x16x8xbf16> to vector<16x8xbf16>
    %17 = vector.shape_cast %14 : vector<16x8xbf16> to vector<1x1x1x16x8xbf16>
    tpu.vector_store %arg6[%c0_10, %c0_11, %c0_12, %c0_13, %c0_14], %17 {strides = array<i32>} : memref<1x2x2x16x8xbf16, #tpu.memory_space<vmem>>, vector<1x1x1x16x8xbf16>,
    %c1 = arith.constant 1 : index
    %c0_15 = arith.constant 0 : index
    %c0_16 = arith.constant 0 : index
    %18 = vector.load %arg4[%c1, %c0_15, %c0_16] : memref<4x16x8xbf16, #tpu.memory_space<vmem>>, vector<1x16x8xbf16>
    %19 = vector.shape_cast %18 : vector<1x16x8xbf16> to vector<16x8xbf16>
    %cst_17 = arith.constant dense<0.000000e+00> : vector<16x8xf32>
    %20 = tpu.matmul %7, %19, %cst_17 {dimension_numbers = #tpu.dot_dimension_numbers<[1], [0], [0], [1], [0, 0, 1, 1], [], []>} : vector<16x16xbf16>, vector<16x8xbf16>, vector<16x8xf32> -> vector<16x8xf32>
    %c0_18 = arith.constant 0 : index
    %c0_19 = arith.constant 0 : index
    %21 = vector.load %arg5[%c0_18, %c0_19] : memref<1x8xf32, #tpu.memory_space<vmem>>, vector<1x8xf32>
    %22 = vector.broadcast %21 : vector<1x8xf32> to vector<16x8xf32>
    %23 = arith.addf %20, %22 : vector<16x8xf32>
    %24 = arith.truncf %23 : vector<16x8xf32> to vector<16x8xbf16>
    %c0_20 = arith.constant 0 : index
    %c0_21 = arith.constant 0 : index
    %c1_22 = arith.constant 1 : index
    %c0_23 = arith.constant 0 : index
    %c0_24 = arith.constant 0 : index
    %25 = vector.load %arg6[%c0_20, %c0_21, %c1_22, %c0_23, %c0_24] : memref<1x2x2x16x8xbf16, #tpu.memory_space<vmem>>, vector<1x1x1x16x8xbf16>
    %26 = vector.shape_cast %25 : vector<1x1x1x16x8xbf16> to vector<16x8xbf16>
    %27 = vector.shape_cast %24 : vector<16x8xbf16> to vector<1x1x1x16x8xbf16>
    tpu.vector_store %arg6[%c0_20, %c0_21, %c1_22, %c0_23, %c0_24], %27 {strides = array<i32>} : memref<1x2x2x16x8xbf16, #tpu.memory_space<vmem>>, vector<1x1x1x16x8xbf16>,
    %c2 = arith.constant 2 : index
    %c0_25 = arith.constant 0 : index
    %c0_26 = arith.constant 0 : index
    %28 = vector.load %arg4[%c2, %c0_25, %c0_26] : memref<4x16x8xbf16, #tpu.memory_space<vmem>>, vector<1x16x8xbf16>
    %29 = vector.shape_cast %28 : vector<1x16x8xbf16> to vector<16x8xbf16>
    %cst_27 = arith.constant dense<0.000000e+00> : vector<16x8xf32>
    %30 = tpu.matmul %7, %29, %cst_27 {dimension_numbers = #tpu.dot_dimension_numbers<[1], [0], [0], [1], [0, 0, 1, 1], [], []>} : vector<16x16xbf16>, vector<16x8xbf16>, vector<16x8xf32> -> vector<16x8xf32>
    %c0_28 = arith.constant 0 : index
    %c0_29 = arith.constant 0 : index
    %31 = vector.load %arg5[%c0_28, %c0_29] : memref<1x8xf32, #tpu.memory_space<vmem>>, vector<1x8xf32>
    %32 = vector.broadcast %31 : vector<1x8xf32> to vector<16x8xf32>
    %33 = arith.addf %30, %32 : vector<16x8xf32>
    %34 = arith.truncf %33 : vector<16x8xf32> to vector<16x8xbf16>
    %c0_30 = arith.constant 0 : index
    %c1_31 = arith.constant 1 : index
    %c0_32 = arith.constant 0 : index
    %c0_33 = arith.constant 0 : index
    %c0_34 = arith.constant 0 : index
    %35 = vector.load %arg6[%c0_30, %c1_31, %c0_32, %c0_33, %c0_34] : memref<1x2x2x16x8xbf16, #tpu.memory_space<vmem>>, vector<1x1x1x16x8xbf16>
    %36 = vector.shape_cast %35 : vector<1x1x1x16x8xbf16> to vector<16x8xbf16>
    %37 = vector.shape_cast %34 : vector<16x8xbf16> to vector<1x1x1x16x8xbf16>
    tpu.vector_store %arg6[%c0_30, %c1_31, %c0_32, %c0_33, %c0_34], %37 {strides = array<i32>} : memref<1x2x2x16x8xbf16, #tpu.memory_space<vmem>>, vector<1x1x1x16x8xbf16>,
    %c3 = arith.constant 3 : index
    %c0_35 = arith.constant 0 : index
    %c0_36 = arith.constant 0 : index
    %38 = vector.load %arg4[%c3, %c0_35, %c0_36] : memref<4x16x8xbf16, #tpu.memory_space<vmem>>, vector<1x16x8xbf16>
    %39 = vector.shape_cast %38 : vector<1x16x8xbf16> to vector<16x8xbf16>
    %cst_37 = arith.constant dense<0.000000e+00> : vector<16x8xf32>
    %40 = tpu.matmul %7, %39, %cst_37 {dimension_numbers = #tpu.dot_dimension_numbers<[1], [0], [0], [1], [0, 0, 1, 1], [], []>} : vector<16x16xbf16>, vector<16x8xbf16>, vector<16x8xf32> -> vector<16x8xf32>
    %c0_38 = arith.constant 0 : index
    %c0_39 = arith.constant 0 : index
    %41 = vector.load %arg5[%c0_38, %c0_39] : memref<1x8xf32, #tpu.memory_space<vmem>>, vector<1x8xf32>
    %42 = vector.broadcast %41 : vector<1x8xf32> to vector<16x8xf32>
    %43 = arith.addf %40, %42 : vector<16x8xf32>
    %44 = arith.truncf %43 : vector<16x8xf32> to vector<16x8xbf16>
    %c0_40 = arith.constant 0 : index
    %c1_41 = arith.constant 1 : index
    %c1_42 = arith.constant 1 : index
    %c0_43 = arith.constant 0 : index
    %c0_44 = arith.constant 0 : index
    %45 = vector.load %arg6[%c0_40, %c1_41, %c1_42, %c0_43, %c0_44] : memref<1x2x2x16x8xbf16, #tpu.memory_space<vmem>>, vector<1x1x1x16x8xbf16>
    %46 = vector.shape_cast %45 : vector<1x1x1x16x8xbf16> to vector<16x8xbf16>
    %47 = vector.shape_cast %44 : vector<16x8xbf16> to vector<1x1x1x16x8xbf16>
    tpu.vector_store %arg6[%c0_40, %c1_41, %c1_42, %c0_43, %c0_44], %47 {strides = array<i32>} : memref<1x2x2x16x8xbf16, #tpu.memory_space<vmem>>, vector<1x1x1x16x8xbf16>,
    return
  }
  func.func @transform_0(%arg0: i32, %arg1: i32) -> (i32, i32, i32) {
    %c0_i32 = arith.constant 0 : i32
    %c0_i32_0 = arith.constant 0 : i32
    return %arg0, %arg1, %c0_i32 : i32, i32, i32
  }
  func.func @transform_1(%arg0: i32, %arg1: i32) -> (i32, i32, i32) {
    %c0_i32 = arith.constant 0 : i32
    %c0_i32_0 = arith.constant 0 : i32
    return %arg0, %arg1, %c0_i32 : i32, i32, i32
  }
  func.func @transform_2(%arg0: i32, %arg1: i32) -> (i32, i32, i32) {
    %c0_i32 = arith.constant 0 : i32
    %c0_i32_0 = arith.constant 0 : i32
    %c0_i32_1 = arith.constant 0 : i32
    %c0_i32_2 = arith.constant 0 : i32
    return %c0_i32, %c0_i32_0, %c0_i32_1 : i32, i32, i32
  }
  func.func @transform_3(%arg0: i32, %arg1: i32) -> (i32, i32) {
    %c0_i32 = arith.constant 0 : i32
    %c0_i32_0 = arith.constant 0 : i32
    %c0_i32_1 = arith.constant 0 : i32
    return %c0_i32, %c0_i32_0 : i32, i32
  }
  func.func @transform_4(%arg0: i32, %arg1: i32) -> (i32, i32, i32, i32, i32) {
    %c0_i32 = arith.constant 0 : i32
    %c0_i32_0 = arith.constant 0 : i32
    %c0_i32_1 = arith.constant 0 : i32
    %c0_i32_2 = arith.constant 0 : i32
    return %arg0, %c0_i32, %c0_i32_0, %arg1, %c0_i32_1 : i32, i32, i32, i32, i32
  }
}

module attributes {stable_mosaic.version = 11 : i64} {
  func.func @_convt2x2_kernel(%arg0: i32, %arg1: i32, %arg2: memref<1x64x8xbf16, #tpu.memory_space<vmem>>, %arg3: memref<1x64x8xbf16, #tpu.memory_space<vmem>>, %arg4: memref<4x8x8xbf16, #tpu.memory_space<vmem>>, %arg5: memref<1x8xf32, #tpu.memory_space<vmem>>, %arg6: memref<8x3xbf16, #tpu.memory_space<vmem>>, %arg7: memref<1x3xf32, #tpu.memory_space<vmem>>, %arg8: memref<1x2x2x64x3xf32, #tpu.memory_space<vmem>>) attributes {dimension_semantics = [#tpu.dimension_semantics<parallel>, #tpu.dimension_semantics<parallel>], iteration_bounds = array<i64: 2, 1>, scalar_prefetch = 0 : i64, scratch_operands = 0 : i64, tpu.core_type = #tpu.core_type<tc>, window_params = [{transform_indices = @transform_0, window_bounds = array<i64: 1, 64, 8>}, {transform_indices = @transform_1, window_bounds = array<i64: 1, 64, 8>}, {pipeline_mode = #tpu.pipeline_mode<synchronous>, transform_indices = @transform_2, window_bounds = array<i64: 4, 8, 8>}, {pipeline_mode = #tpu.pipeline_mode<synchronous>, transform_indices = @transform_3, window_bounds = array<i64: 1, 8>}, {pipeline_mode = #tpu.pipeline_mode<synchronous>, transform_indices = @transform_4, window_bounds = array<i64: 8, 3>}, {pipeline_mode = #tpu.pipeline_mode<synchronous>, transform_indices = @transform_5, window_bounds = array<i64: 1, 3>}, {transform_indices = @transform_6, window_bounds = array<i64: 1, 2, 2, 64, 3>}]} {
    %c0 = arith.constant 0 : index
    %c0_0 = arith.constant 0 : index
    %c0_1 = arith.constant 0 : index
    %0 = vector.load %arg2[%c0, %c0_0, %c0_1] : memref<1x64x8xbf16, #tpu.memory_space<vmem>>, vector<1x64x8xbf16>
    %1 = vector.shape_cast %0 : vector<1x64x8xbf16> to vector<64x8xbf16>
    %2 = arith.extf %1 : vector<64x8xbf16> to vector<64x8xf32>
    %c0_2 = arith.constant 0 : index
    %c0_3 = arith.constant 0 : index
    %c0_4 = arith.constant 0 : index
    %3 = vector.load %arg3[%c0_2, %c0_3, %c0_4] : memref<1x64x8xbf16, #tpu.memory_space<vmem>>, vector<1x64x8xbf16>
    %4 = vector.shape_cast %3 : vector<1x64x8xbf16> to vector<64x8xbf16>
    %5 = arith.extf %4 : vector<64x8xbf16> to vector<64x8xf32>
    %6 = arith.addf %2, %5 : vector<64x8xf32>
    %7 = arith.truncf %6 : vector<64x8xf32> to vector<64x8xbf16>
    %c0_5 = arith.constant 0 : index
    %c0_6 = arith.constant 0 : index
    %c0_7 = arith.constant 0 : index
    %8 = vector.load %arg4[%c0_5, %c0_6, %c0_7] : memref<4x8x8xbf16, #tpu.memory_space<vmem>>, vector<1x8x8xbf16>
    %9 = vector.shape_cast %8 : vector<1x8x8xbf16> to vector<8x8xbf16>
    %cst = arith.constant dense<0.000000e+00> : vector<64x8xf32>
    %10 = tpu.matmul %7, %9, %cst {dimension_numbers = #tpu.dot_dimension_numbers<[1], [0], [0], [1], [0, 0, 1, 1], [], []>} : vector<64x8xbf16>, vector<8x8xbf16>, vector<64x8xf32> -> vector<64x8xf32>
    %c0_8 = arith.constant 0 : index
    %c0_9 = arith.constant 0 : index
    %11 = vector.load %arg5[%c0_8, %c0_9] : memref<1x8xf32, #tpu.memory_space<vmem>>, vector<1x8xf32>
    %12 = vector.broadcast %11 : vector<1x8xf32> to vector<64x8xf32>
    %13 = arith.addf %10, %12 : vector<64x8xf32>
    %14 = arith.truncf %13 : vector<64x8xf32> to vector<64x8xbf16>
    %c0_10 = arith.constant 0 : index
    %c0_11 = arith.constant 0 : index
    %15 = vector.load %arg6[%c0_10, %c0_11] : memref<8x3xbf16, #tpu.memory_space<vmem>>, vector<8x3xbf16>
    %cst_12 = arith.constant dense<0.000000e+00> : vector<64x3xf32>
    %16 = tpu.matmul %14, %15, %cst_12 {dimension_numbers = #tpu.dot_dimension_numbers<[1], [0], [0], [1], [0, 0, 1, 1], [], []>} : vector<64x8xbf16>, vector<8x3xbf16>, vector<64x3xf32> -> vector<64x3xf32>
    %c0_13 = arith.constant 0 : index
    %c0_14 = arith.constant 0 : index
    %17 = vector.load %arg7[%c0_13, %c0_14] : memref<1x3xf32, #tpu.memory_space<vmem>>, vector<1x3xf32>
    %18 = vector.broadcast %17 : vector<1x3xf32> to vector<64x3xf32>
    %19 = arith.addf %16, %18 : vector<64x3xf32>
    %c0_15 = arith.constant 0 : index
    %c0_16 = arith.constant 0 : index
    %c0_17 = arith.constant 0 : index
    %c0_18 = arith.constant 0 : index
    %c0_19 = arith.constant 0 : index
    %20 = vector.load %arg8[%c0_15, %c0_16, %c0_17, %c0_18, %c0_19] : memref<1x2x2x64x3xf32, #tpu.memory_space<vmem>>, vector<1x1x1x64x3xf32>
    %21 = vector.shape_cast %20 : vector<1x1x1x64x3xf32> to vector<64x3xf32>
    %22 = vector.shape_cast %19 : vector<64x3xf32> to vector<1x1x1x64x3xf32>
    tpu.vector_store %arg8[%c0_15, %c0_16, %c0_17, %c0_18, %c0_19], %22 {strides = array<i32>} : memref<1x2x2x64x3xf32, #tpu.memory_space<vmem>>, vector<1x1x1x64x3xf32>,
    %c1 = arith.constant 1 : index
    %c0_20 = arith.constant 0 : index
    %c0_21 = arith.constant 0 : index
    %23 = vector.load %arg4[%c1, %c0_20, %c0_21] : memref<4x8x8xbf16, #tpu.memory_space<vmem>>, vector<1x8x8xbf16>
    %24 = vector.shape_cast %23 : vector<1x8x8xbf16> to vector<8x8xbf16>
    %cst_22 = arith.constant dense<0.000000e+00> : vector<64x8xf32>
    %25 = tpu.matmul %7, %24, %cst_22 {dimension_numbers = #tpu.dot_dimension_numbers<[1], [0], [0], [1], [0, 0, 1, 1], [], []>} : vector<64x8xbf16>, vector<8x8xbf16>, vector<64x8xf32> -> vector<64x8xf32>
    %c0_23 = arith.constant 0 : index
    %c0_24 = arith.constant 0 : index
    %26 = vector.load %arg5[%c0_23, %c0_24] : memref<1x8xf32, #tpu.memory_space<vmem>>, vector<1x8xf32>
    %27 = vector.broadcast %26 : vector<1x8xf32> to vector<64x8xf32>
    %28 = arith.addf %25, %27 : vector<64x8xf32>
    %29 = arith.truncf %28 : vector<64x8xf32> to vector<64x8xbf16>
    %c0_25 = arith.constant 0 : index
    %c0_26 = arith.constant 0 : index
    %30 = vector.load %arg6[%c0_25, %c0_26] : memref<8x3xbf16, #tpu.memory_space<vmem>>, vector<8x3xbf16>
    %cst_27 = arith.constant dense<0.000000e+00> : vector<64x3xf32>
    %31 = tpu.matmul %29, %30, %cst_27 {dimension_numbers = #tpu.dot_dimension_numbers<[1], [0], [0], [1], [0, 0, 1, 1], [], []>} : vector<64x8xbf16>, vector<8x3xbf16>, vector<64x3xf32> -> vector<64x3xf32>
    %c0_28 = arith.constant 0 : index
    %c0_29 = arith.constant 0 : index
    %32 = vector.load %arg7[%c0_28, %c0_29] : memref<1x3xf32, #tpu.memory_space<vmem>>, vector<1x3xf32>
    %33 = vector.broadcast %32 : vector<1x3xf32> to vector<64x3xf32>
    %34 = arith.addf %31, %33 : vector<64x3xf32>
    %c0_30 = arith.constant 0 : index
    %c0_31 = arith.constant 0 : index
    %c1_32 = arith.constant 1 : index
    %c0_33 = arith.constant 0 : index
    %c0_34 = arith.constant 0 : index
    %35 = vector.load %arg8[%c0_30, %c0_31, %c1_32, %c0_33, %c0_34] : memref<1x2x2x64x3xf32, #tpu.memory_space<vmem>>, vector<1x1x1x64x3xf32>
    %36 = vector.shape_cast %35 : vector<1x1x1x64x3xf32> to vector<64x3xf32>
    %37 = vector.shape_cast %34 : vector<64x3xf32> to vector<1x1x1x64x3xf32>
    tpu.vector_store %arg8[%c0_30, %c0_31, %c1_32, %c0_33, %c0_34], %37 {strides = array<i32>} : memref<1x2x2x64x3xf32, #tpu.memory_space<vmem>>, vector<1x1x1x64x3xf32>,
    %c2 = arith.constant 2 : index
    %c0_35 = arith.constant 0 : index
    %c0_36 = arith.constant 0 : index
    %38 = vector.load %arg4[%c2, %c0_35, %c0_36] : memref<4x8x8xbf16, #tpu.memory_space<vmem>>, vector<1x8x8xbf16>
    %39 = vector.shape_cast %38 : vector<1x8x8xbf16> to vector<8x8xbf16>
    %cst_37 = arith.constant dense<0.000000e+00> : vector<64x8xf32>
    %40 = tpu.matmul %7, %39, %cst_37 {dimension_numbers = #tpu.dot_dimension_numbers<[1], [0], [0], [1], [0, 0, 1, 1], [], []>} : vector<64x8xbf16>, vector<8x8xbf16>, vector<64x8xf32> -> vector<64x8xf32>
    %c0_38 = arith.constant 0 : index
    %c0_39 = arith.constant 0 : index
    %41 = vector.load %arg5[%c0_38, %c0_39] : memref<1x8xf32, #tpu.memory_space<vmem>>, vector<1x8xf32>
    %42 = vector.broadcast %41 : vector<1x8xf32> to vector<64x8xf32>
    %43 = arith.addf %40, %42 : vector<64x8xf32>
    %44 = arith.truncf %43 : vector<64x8xf32> to vector<64x8xbf16>
    %c0_40 = arith.constant 0 : index
    %c0_41 = arith.constant 0 : index
    %45 = vector.load %arg6[%c0_40, %c0_41] : memref<8x3xbf16, #tpu.memory_space<vmem>>, vector<8x3xbf16>
    %cst_42 = arith.constant dense<0.000000e+00> : vector<64x3xf32>
    %46 = tpu.matmul %44, %45, %cst_42 {dimension_numbers = #tpu.dot_dimension_numbers<[1], [0], [0], [1], [0, 0, 1, 1], [], []>} : vector<64x8xbf16>, vector<8x3xbf16>, vector<64x3xf32> -> vector<64x3xf32>
    %c0_43 = arith.constant 0 : index
    %c0_44 = arith.constant 0 : index
    %47 = vector.load %arg7[%c0_43, %c0_44] : memref<1x3xf32, #tpu.memory_space<vmem>>, vector<1x3xf32>
    %48 = vector.broadcast %47 : vector<1x3xf32> to vector<64x3xf32>
    %49 = arith.addf %46, %48 : vector<64x3xf32>
    %c0_45 = arith.constant 0 : index
    %c1_46 = arith.constant 1 : index
    %c0_47 = arith.constant 0 : index
    %c0_48 = arith.constant 0 : index
    %c0_49 = arith.constant 0 : index
    %50 = vector.load %arg8[%c0_45, %c1_46, %c0_47, %c0_48, %c0_49] : memref<1x2x2x64x3xf32, #tpu.memory_space<vmem>>, vector<1x1x1x64x3xf32>
    %51 = vector.shape_cast %50 : vector<1x1x1x64x3xf32> to vector<64x3xf32>
    %52 = vector.shape_cast %49 : vector<64x3xf32> to vector<1x1x1x64x3xf32>
    tpu.vector_store %arg8[%c0_45, %c1_46, %c0_47, %c0_48, %c0_49], %52 {strides = array<i32>} : memref<1x2x2x64x3xf32, #tpu.memory_space<vmem>>, vector<1x1x1x64x3xf32>,
    %c3 = arith.constant 3 : index
    %c0_50 = arith.constant 0 : index
    %c0_51 = arith.constant 0 : index
    %53 = vector.load %arg4[%c3, %c0_50, %c0_51] : memref<4x8x8xbf16, #tpu.memory_space<vmem>>, vector<1x8x8xbf16>
    %54 = vector.shape_cast %53 : vector<1x8x8xbf16> to vector<8x8xbf16>
    %cst_52 = arith.constant dense<0.000000e+00> : vector<64x8xf32>
    %55 = tpu.matmul %7, %54, %cst_52 {dimension_numbers = #tpu.dot_dimension_numbers<[1], [0], [0], [1], [0, 0, 1, 1], [], []>} : vector<64x8xbf16>, vector<8x8xbf16>, vector<64x8xf32> -> vector<64x8xf32>
    %c0_53 = arith.constant 0 : index
    %c0_54 = arith.constant 0 : index
    %56 = vector.load %arg5[%c0_53, %c0_54] : memref<1x8xf32, #tpu.memory_space<vmem>>, vector<1x8xf32>
    %57 = vector.broadcast %56 : vector<1x8xf32> to vector<64x8xf32>
    %58 = arith.addf %55, %57 : vector<64x8xf32>
    %59 = arith.truncf %58 : vector<64x8xf32> to vector<64x8xbf16>
    %c0_55 = arith.constant 0 : index
    %c0_56 = arith.constant 0 : index
    %60 = vector.load %arg6[%c0_55, %c0_56] : memref<8x3xbf16, #tpu.memory_space<vmem>>, vector<8x3xbf16>
    %cst_57 = arith.constant dense<0.000000e+00> : vector<64x3xf32>
    %61 = tpu.matmul %59, %60, %cst_57 {dimension_numbers = #tpu.dot_dimension_numbers<[1], [0], [0], [1], [0, 0, 1, 1], [], []>} : vector<64x8xbf16>, vector<8x3xbf16>, vector<64x3xf32> -> vector<64x3xf32>
    %c0_58 = arith.constant 0 : index
    %c0_59 = arith.constant 0 : index
    %62 = vector.load %arg7[%c0_58, %c0_59] : memref<1x3xf32, #tpu.memory_space<vmem>>, vector<1x3xf32>
    %63 = vector.broadcast %62 : vector<1x3xf32> to vector<64x3xf32>
    %64 = arith.addf %61, %63 : vector<64x3xf32>
    %c0_60 = arith.constant 0 : index
    %c1_61 = arith.constant 1 : index
    %c1_62 = arith.constant 1 : index
    %c0_63 = arith.constant 0 : index
    %c0_64 = arith.constant 0 : index
    %65 = vector.load %arg8[%c0_60, %c1_61, %c1_62, %c0_63, %c0_64] : memref<1x2x2x64x3xf32, #tpu.memory_space<vmem>>, vector<1x1x1x64x3xf32>
    %66 = vector.shape_cast %65 : vector<1x1x1x64x3xf32> to vector<64x3xf32>
    %67 = vector.shape_cast %64 : vector<64x3xf32> to vector<1x1x1x64x3xf32>
    tpu.vector_store %arg8[%c0_60, %c1_61, %c1_62, %c0_63, %c0_64], %67 {strides = array<i32>} : memref<1x2x2x64x3xf32, #tpu.memory_space<vmem>>, vector<1x1x1x64x3xf32>,
    return
  }
  func.func @transform_0(%arg0: i32, %arg1: i32) -> (i32, i32, i32) {
    %c0_i32 = arith.constant 0 : i32
    %c0_i32_0 = arith.constant 0 : i32
    return %arg0, %arg1, %c0_i32 : i32, i32, i32
  }
  func.func @transform_1(%arg0: i32, %arg1: i32) -> (i32, i32, i32) {
    %c0_i32 = arith.constant 0 : i32
    %c0_i32_0 = arith.constant 0 : i32
    return %arg0, %arg1, %c0_i32 : i32, i32, i32
  }
  func.func @transform_2(%arg0: i32, %arg1: i32) -> (i32, i32, i32) {
    %c0_i32 = arith.constant 0 : i32
    %c0_i32_0 = arith.constant 0 : i32
    %c0_i32_1 = arith.constant 0 : i32
    %c0_i32_2 = arith.constant 0 : i32
    return %c0_i32, %c0_i32_0, %c0_i32_1 : i32, i32, i32
  }
  func.func @transform_3(%arg0: i32, %arg1: i32) -> (i32, i32) {
    %c0_i32 = arith.constant 0 : i32
    %c0_i32_0 = arith.constant 0 : i32
    %c0_i32_1 = arith.constant 0 : i32
    return %c0_i32, %c0_i32_0 : i32, i32
  }
  func.func @transform_4(%arg0: i32, %arg1: i32) -> (i32, i32) {
    %c0_i32 = arith.constant 0 : i32
    %c0_i32_0 = arith.constant 0 : i32
    %c0_i32_1 = arith.constant 0 : i32
    return %c0_i32, %c0_i32_0 : i32, i32
  }
  func.func @transform_5(%arg0: i32, %arg1: i32) -> (i32, i32) {
    %c0_i32 = arith.constant 0 : i32
    %c0_i32_0 = arith.constant 0 : i32
    %c0_i32_1 = arith.constant 0 : i32
    return %c0_i32, %c0_i32_0 : i32, i32
  }
  func.func @transform_6(%arg0: i32, %arg1: i32) -> (i32, i32, i32, i32, i32) {
    %c0_i32 = arith.constant 0 : i32
    %c0_i32_0 = arith.constant 0 : i32
    %c0_i32_1 = arith.constant 0 : i32
    %c0_i32_2 = arith.constant 0 : i32
    return %arg0, %c0_i32, %c0_i32_0, %arg1, %c0_i32_1 : i32, i32, i32, i32, i32
  }
}

</mosaic_0001>

<bundles_post_ra>
// kernel: unet_forward.11
= control target key start
LH: loop header
LB: loop body
LE: loop exit
PB: predicated region body
PF: predicated region fallthrough
CT: control target
= control target key end

     0   :  { %s464_s6 = smov 0   ;;  %s466_s7 = smov 0   ;;  %s509_s0 = inlined_call_operand.vmem [shape: bf16[2,8,2,8,16], index: 0, kind: input, shape index: {}]   ;;  %s510_s1 = inlined_call_operand.vmem [shape: bf16[2,8,8,8], index: 1, kind: output, shape index: {}]  }
   0x1   :  { %s468_s8 = smov 0  }
   0x2 LB: > { %s23_s9 = sadd.s32 1, %s447_s7  ;;  %p367_p0 = scmp.ge.s32.totalorder %s451_s8, 1  ;;  %s451_s8 = sphi %s468_s8, %s11_s8   ;;  %s447_s7 = sphi %s466_s7, %s512_s7   ;;  %s443_s6 = sphi %s464_s6, %s511_s6  }
   0x3   : > { %p25_p1 = scmp.ge.s32.totalorder %s23_s9, 2  ;;  %p109_p2 = scmp.lt.s32.totalorder %s451_s8, 3 }
   0x5   : > { %s514_s9 = smov (%p25_p1, %s23_s9), 0  ;;  %p110_p3 = pnand %p367_p0, %p109_p2 }
   0x6   : > { %p139_p4 = scmp.lt.s32.totalorder (!%p110_p3), %s443_s6, 1  ;;  %s453_s14 = smov (!%p110_p3), 120  }
   0x7   : > { %113 = sbr.rel (%p110_p3) target bundleno = 156 (0x9c), region = 24 }
   0xc   : > { %s516_s6 = smov (!%p139_p4, %s443_s6), 1  ;;  %vm264_vm0 = vcmask 60416  }
   0xd   : > { %s382_s10 = sshll.u32 %s516_s6, 6  ;;  %s383_s15 = sshll.u32 %s516_s6, 5 }
   0xe   : > { %s147_s13 = scalar_lea.vmem %s509_s0, %s382_s10  ;;  %s157_s18 = scalar_lea.vmem %s510_s1, %s383_s15 }
   0xf   : > { %v163_v0 = vld [vmem:[%s147_s13 + $0x20] sm:$0xff]   ;;  %v164_v1 = vld [vmem:[%s147_s13 + $0x28] sm:$0xff]   ;;  %v165_v8 = vld [vmem:[%s147_s13 + $0x30] sm:$0xff]  }
  0x10   : > { %v159_v2 = vld [vmem:[%s147_s13] sm:$0xff]   ;;  %v180_v3 = vunpack.c.l.bf16 %v163_v0  ;;  %v181_v4 = vunpack.c.l.bf16 %v164_v1  ;;  %v188_v5 = vunpack.c.h.bf16 %v163_v0  ;;  %v189_v6 = vunpack.c.h.bf16 %v164_v1  ;;  %v160_v7 = vld [vmem:[%s147_s13 + $0x8] sm:$0xff]   ;;  %v166_v9 = vld [vmem:[%s147_s13 + $0x38] sm:$0xff]  }
  0x11   : > { %v176_v10 = vunpack.c.l.bf16 %v159_v2  ;;  %v177_v11 = vunpack.c.l.bf16 %v160_v7  ;;  %v184_v12 = vunpack.c.h.bf16 %v159_v2  ;;  %v185_v13 = vunpack.c.h.bf16 %v160_v7  ;;  %v161_v14 = vld [vmem:[%s147_s13 + $0x10] sm:$0xff]   ;;  %v162_v15 = vld [vmem:[%s147_s13 + $0x18] sm:$0xff]  }
  0x12   : > { %v196_v16 = vmax.f32 %v180_v3, %v188_v5  ;;  %v197_v17 = vmax.f32 %v181_v4, %v189_v6  ;;  %v182_v18 = vunpack.c.l.bf16 %v165_v8  ;;  %v183_v19 = vunpack.c.l.bf16 %v166_v9 }
  0x13   : > { %v192_v20 = vmax.f32 %v176_v10, %v184_v12  ;;  %v193_v21 = vmax.f32 %v177_v11, %v185_v13  ;;  %v190_v22 = vunpack.c.h.bf16 %v165_v8  ;;  %v191_v23 = vunpack.c.h.bf16 %v166_v9 }
  0x14   : > { %v178_v24 = vunpack.c.l.bf16 %v161_v14  ;;  %v179_v25 = vunpack.c.l.bf16 %v162_v15  ;;  %v186_v28 = vunpack.c.h.bf16 %v161_v14  ;;  %v187_v29 = vunpack.c.h.bf16 %v162_v15 }
  0x15   : > { %v198_v26 = vmax.f32 %v182_v18, %v190_v22  ;;  %v199_v27 = vmax.f32 %v183_v19, %v191_v23  ;;  %v419_v30 = vpack.i.bf16 %v197_v17, %v196_v16  ;;  %v409_v33 = vpack.i.bf16 %v193_v21, %v192_v20 }
  0x16   : > { %v194_v31 = vmax.f32 %v178_v24, %v186_v28  ;;  %v195_v32 = vmax.f32 %v179_v25, %v187_v29 }
  0x17   : > { %420 = vrot.lane.b32.xlu1 %v419_v30, %s453_s14  ;;  %410 = vrot.lane.b32.xlu0 %v409_v33, %s453_s14  ;;  %v424_v34 = vpack.i.bf16 %v199_v27, %v198_v26 }
  0x18   : > { %v414_v35 = vpack.i.bf16 %v195_v32, %v194_v31 }
  0x1f   : > { %425 = vrot.lane.b32.xlu1 %v424_v34, %s453_s14  ;;  %415 = vrot.lane.b32.xlu0 %v414_v35, %s453_s14 }
  0x89   : > { %v421_v36 = vpop.permute.xlu1 %420  ;;  %v411_v39 = vpop.permute.xlu0 %410 }
  0x8a   : > { %v423_v37 = vunpack.i.h.bf16 %v421_v36  ;;  %v422_v38 = vunpack.i.l.bf16 %v421_v36  ;;  %v413_v40 = vunpack.i.h.bf16 %v411_v39  ;;  %v412_v41 = vunpack.i.l.bf16 %v411_v39 }
  0x8c   : > { %v253_v42 = vmax.f32 %v197_v17, %v423_v37  ;;  %v252_v43 = vmax.f32 %v196_v16, %v422_v38  ;;  %v249_v44 = vmax.f32 %v193_v21, %v413_v40  ;;  %v248_v45 = vmax.f32 %v192_v20, %v412_v41 }
  0x8e   : > { %v261_v46 = vpack.c.bf16 %v253_v42, %v253_v42  ;;  %v260_v47 = vpack.c.bf16 %v252_v43, %v252_v43  ;;  %v257_v48 = vpack.c.bf16 %v249_v44, %v249_v44  ;;  %v256_v49 = vpack.c.bf16 %v248_v45, %v248_v45 }
  0x90   : > { %270 = vst.msk [vmem:[%s157_s18 + $0x14] sm:$0xf] %vm264_vm0, %v261_v46 }
  0x91   : > { %269 = vst.msk [vmem:[%s157_s18 + $0x10] sm:$0xf] %vm264_vm0, %v260_v47  ;;  %v426_v50 = vpop.permute.xlu1 %425  ;;  %v416_v53 = vpop.permute.xlu0 %415 }
  0x92   : > { %266 = vst.msk [vmem:[%s157_s18 + $0x4] sm:$0xf] %vm264_vm0, %v257_v48  ;;  %v428_v51 = vunpack.i.h.bf16 %v426_v50  ;;  %v427_v52 = vunpack.i.l.bf16 %v426_v50  ;;  %v418_v54 = vunpack.i.h.bf16 %v416_v53  ;;  %v417_v55 = vunpack.i.l.bf16 %v416_v53 }
  0x93   : > { %265 = vst.msk [vmem:[%s157_s18] sm:$0xf] %vm264_vm0, %v256_v49 }
  0x94   : > { %v255_v56 = vmax.f32 %v199_v27, %v428_v51  ;;  %v254_v57 = vmax.f32 %v198_v26, %v427_v52  ;;  %v251_v58 = vmax.f32 %v195_v32, %v418_v54  ;;  %v250_v59 = vmax.f32 %v194_v31, %v417_v55 }
  0x96   : > { %v263_v60 = vpack.c.bf16 %v255_v56, %v255_v56  ;;  %v262_v61 = vpack.c.bf16 %v254_v57, %v254_v57  ;;  %v259_v62 = vpack.c.bf16 %v251_v58, %v251_v58  ;;  %v258_v63 = vpack.c.bf16 %v250_v59, %v250_v59 }
  0x98   : > { %272 = vst.msk [vmem:[%s157_s18 + $0x1c] sm:$0xf] %vm264_vm0, %v263_v60 }
  0x99   : > { %271 = vst.msk [vmem:[%s157_s18 + $0x18] sm:$0xf] %vm264_vm0, %v262_v61 }
  0x9a   : > { %268 = vst.msk [vmem:[%s157_s18 + $0xc] sm:$0xf] %vm264_vm0, %v259_v62 }
  0x9b   : > { %267 = vst.msk [vmem:[%s157_s18 + $0x8] sm:$0xf] %vm264_vm0, %v258_v63 }
  0x9c PF: > { %s11_s8 = sadd.s32 1, %s451_s8   ;;  %s511_s6 = smov %s447_s7 }
  0x9d   : > { %p8_p5 = scmp.ge.s32.totalorder %s11_s8, 4   ;;  %s512_s7 = smov %s514_s9 }
  0x9f   :  { %10 = sbr.rel (!%p8_p5) target bundleno = 2 (0x2), region = 55 }

// kernel: unet_forward.10
= control target key start
LH: loop header
LB: loop body
LE: loop exit
PB: predicated region body
PF: predicated region fallthrough
CT: control target
= control target key end

     0   :  { %s835_s12 = smov 0   ;;  %s837_s13 = smov 0   ;;  %s1021_s0 = inlined_call_operand.vmem [shape: bf16[2,256,27], index: 0, kind: input, shape index: {}]   ;;  %s1022_s1 = inlined_call_operand.vmem [shape: bf16[27,8], index: 1, kind: input, shape index: {}]   ;;  %s1023_s2 = inlined_call_operand.vmem [shape: f32[1,8], index: 2, kind: input, shape index: {}]   ;;  %s1024_s3 = inlined_call_operand.vmem [shape: bf16[2,256,8], index: 3, kind: output, shape index: {}]  }
   0x1   :  { %s839_s14 = smov 0  }
   0x2 LB: > { %s25_s15 = sadd.s32 1, %s808_s13  ;;  %p643_p0 = scmp.ge.s32.totalorder %s812_s14, 1  ;;  %s812_s14 = sphi %s839_s14, %s13_s14   ;;  %s808_s13 = sphi %s837_s13, %s1026_s13   ;;  %s804_s12 = sphi %s835_s12, %s1025_s12  }
   0x3   : > { %p27_p1 = scmp.ge.s32.totalorder %s25_s15, 2  ;;  %p158_p2 = scmp.lt.s32.totalorder %s812_s14, 3 }
   0x5   : > { %s1028_s15 = smov (%p27_p1, %s25_s15), 0  ;;  %p159_p3 = pnand %p643_p0, %p158_p2 }
   0x6   : > { %p191_p4 = scmp.lt.s32.totalorder (!%p159_p3), %s804_s12, 1 }
   0x7   : > { %162 = sbr.rel (%p159_p3) target bundleno = 220 (0xdc), region = 32 }
   0xc   : > { %v718_v0 = vld [vmem:[%s1022_s1 + $0x8] sm:$0xf]  ;;  %v757_v1 = vld [vmem:[%s1022_s1 + $0x8] sm:$0x30]  ;;  %vm391_vm0 = vcmask 1044480   ;;  %vm392_vm1 = vcmask 1045504  }
   0xd   : > { %v719_v2 = vor.u32 %v757_v1, %v718_v0  ;;  %v814_v3 = vmov 65535   ;;  %s1030_s12 = smov (!%p191_p4, %s804_s12), 1  ;;  %v756_v7 = vld [vmem:[%s1022_s1] sm:$0xff]  ;;  %vm342_vm2 = vcmask 220160   ;;  %vm519_vm3 = vcmask 60416  }
   0xe   : > { %v393_v4 = vsel %vm391_vm0, 4294967295, %v814_v3  ;;  %s738_s20 = sshll.u32 %s1030_s12, 7  ;;  %v907_v24 = vld [vmem:[%s1023_s2] ss:$0 sm:$0xff] }
   0xf   : > { %v394_v5 = vsel %vm392_vm1, %v393_v4, 0  ;;  %s870_s25 = scalar_lea.vmem %s1021_s0, %s738_s20  ;;  %s916_s30 = scalar_lea.vmem %s1024_s3, %s738_s20 }
  0x10   : > { %v396_v6 = vand.u32 %v719_v2, %v394_v5  ;;  %v740_v8 = vld [vmem:[%s870_s25] sm:$0xff]  ;;  %v741_v12 = vld [vmem:[%s870_s25 + $0x8] sm:$0xff]  ;;  %v742_v16 = vld [vmem:[%s870_s25 + $0x10] sm:$0xff] }
  0x11   : > { %v744_v9 = vld [vmem:[%s870_s25 + $0x20] sm:$0xff]  ;;  %v745_v13 = vld [vmem:[%s870_s25 + $0x28] sm:$0xff]  ;;  %v746_v17 = vld [vmem:[%s870_s25 + $0x30] sm:$0xff] }
  0x12   : > { %404 = vmatpush.bf16.msra.mxu0 %v396_v6  ;;  %758 = vmatpush.bf16.msra.mxu1 %v396_v6  ;;  %v748_v10 = vld [vmem:[%s870_s25 + $0x40] sm:$0xff]  ;;  %v749_v14 = vld [vmem:[%s870_s25 + $0x48] sm:$0xff]  ;;  %v750_v18 = vld [vmem:[%s870_s25 + $0x50] sm:$0xff] }
  0x13   : > { %759 = vmatpush.bf16.msra.mxu2 %v396_v6  ;;  %760 = vmatpush.bf16.msra.mxu3 %v396_v6  ;;  %v752_v11 = vld [vmem:[%s870_s25 + $0x60] sm:$0xff]  ;;  %v753_v15 = vld [vmem:[%s870_s25 + $0x68] sm:$0xff]  ;;  %v754_v19 = vld [vmem:[%s870_s25 + $0x70] sm:$0xff] }
  0x14   : > { %v743_v20 = vld [vmem:[%s870_s25 + $0x18] sm:$0xff] }
  0x15   : > { %v747_v21 = vld [vmem:[%s870_s25 + $0x38] sm:$0xff] }
  0x16   : > { %405 = vmatpush.bf16.msra.mxu0 %v756_v7  ;;  %761 = vmatpush.bf16.msra.mxu1 %v756_v7  ;;  %v751_v22 = vld [vmem:[%s870_s25 + $0x58] sm:$0xff] }
  0x17   : > { %762 = vmatpush.bf16.msra.mxu2 %v756_v7  ;;  %763 = vmatpush.bf16.msra.mxu3 %v756_v7  ;;  %v755_v23 = vld [vmem:[%s870_s25 + $0x78] sm:$0xff] }
  0x19   : > { %720 = vmatmul.msk.bf16.vlgmr.msra.gmra.mxu0 %vm342_vm2, %v740_v8  ;;  %724 = vmatmul.msk.bf16.vlgmr.msra.gmra.mxu1 %vm342_vm2, %v744_v9 }
  0x1a   : > { %728 = vmatmul.msk.bf16.vlgmr.msra.gmra.mxu2 %vm342_vm2, %v748_v10  ;;  %732 = vmatmul.msk.bf16.vlgmr.msra.gmra.mxu3 %vm342_vm2, %v752_v11 }
  0x29   : > { %721 = vmatmul.msk.bf16.gmra.mxu0 %vm342_vm2, %v741_v12  ;;  %725 = vmatmul.msk.bf16.gmra.mxu1 %vm342_vm2, %v745_v13 }
  0x2a   : > { %729 = vmatmul.msk.bf16.gmra.mxu2 %vm342_vm2, %v749_v14  ;;  %733 = vmatmul.msk.bf16.gmra.mxu3 %vm342_vm2, %v753_v15 }
  0x39   : > { %722 = vmatmul.msk.bf16.gmra.mxu0 %vm342_vm2, %v742_v16  ;;  %726 = vmatmul.msk.bf16.gmra.mxu1 %vm342_vm2, %v746_v17 }
  0x3a   : > { %730 = vmatmul.msk.bf16.gmra.mxu2 %vm342_vm2, %v750_v18  ;;  %734 = vmatmul.msk.bf16.gmra.mxu3 %vm342_vm2, %v754_v19 }
  0x49   : > { %723 = vmatmul.msk.bf16.gmra.mxu0 %vm342_vm2, %v743_v20  ;;  %727 = vmatmul.msk.bf16.gmra.mxu1 %vm342_vm2, %v747_v21 }
  0x4a   : > { %731 = vmatmul.msk.bf16.gmra.mxu2 %vm342_vm2, %v751_v22  ;;  %735 = vmatmul.msk.bf16.gmra.mxu3 %vm342_vm2, %v755_v23 }
  0x96   : > { %v407_v25 = vpop.f32.mrf.mxu0  ;;  %v427_v26 = vpop.f32.mrf.mxu1 }
  0x97   : > { %v408_v27 = vadd.f32 %v907_v24, %v407_v25  ;;  %v428_v28 = vadd.f32 %v907_v24, %v427_v26 }
  0x99   : > { %v487_v29 = vpack.c.bf16 %v408_v27, %v408_v27  ;;  %v495_v30 = vpack.c.bf16 %v428_v28, %v428_v28 }
  0x9b   : > { %520 = vst.msk [vmem:[%s916_s30] sm:$0xf] %vm519_vm3, %v487_v29 }
  0x9c   : > { %528 = vst.msk [vmem:[%s916_s30 + $0x20] sm:$0xf] %vm519_vm3, %v495_v30 }
  0x9d   : > { %v447_v31 = vpop.f32.mrf.mxu2  ;;  %v467_v32 = vpop.f32.mrf.mxu3 }
  0x9e   : > { %v448_v33 = vadd.f32 %v907_v24, %v447_v31  ;;  %v468_v34 = vadd.f32 %v907_v24, %v467_v32  ;;  %v409_v35 = vpop.f32.mrf.mxu0  ;;  %v429_v36 = vpop.f32.mrf.mxu1 }
  0x9f   : > { %v410_v37 = vadd.f32 %v907_v24, %v409_v35  ;;  %v430_v38 = vadd.f32 %v907_v24, %v429_v36 }
  0xa0   : > { %v503_v39 = vpack.c.bf16 %v448_v33, %v448_v33  ;;  %v511_v40 = vpack.c.bf16 %v468_v34, %v468_v34 }
  0xa1   : > { %v488_v41 = vpack.c.bf16 %v410_v37, %v410_v37  ;;  %v496_v42 = vpack.c.bf16 %v430_v38, %v430_v38 }
  0xa2   : > { %536 = vst.msk [vmem:[%s916_s30 + $0x40] sm:$0xf] %vm519_vm3, %v503_v39 }
  0xa3   : > { %544 = vst.msk [vmem:[%s916_s30 + $0x60] sm:$0xf] %vm519_vm3, %v511_v40 }
  0xa4   : > { %521 = vst.msk [vmem:[%s916_s30 + $0x4] sm:$0xf] %vm519_vm3, %v488_v41 }
  0xa5   : > { %529 = vst.msk [vmem:[%s916_s30 + $0x24] sm:$0xf] %vm519_vm3, %v496_v42  ;;  %v449_v43 = vpop.f32.mrf.mxu2  ;;  %v469_v44 = vpop.f32.mrf.mxu3 }
  0xa6   : > { %v450_v45 = vadd.f32 %v907_v24, %v449_v43  ;;  %v470_v46 = vadd.f32 %v907_v24, %v469_v44  ;;  %v412_v47 = vpop.f32.mrf.mxu0  ;;  %v432_v48 = vpop.f32.mrf.mxu1 }
  0xa7   : > { %v413_v49 = vadd.f32 %v907_v24, %v412_v47  ;;  %v433_v50 = vadd.f32 %v907_v24, %v432_v48 }
  0xa8   : > { %v504_v51 = vpack.c.bf16 %v450_v45, %v450_v45  ;;  %v512_v52 = vpack.c.bf16 %v470_v46, %v470_v46 }
  0xa9   : > { %v489_v53 = vpack.c.bf16 %v413_v49, %v413_v49  ;;  %v497_v54 = vpack.c.bf16 %v433_v50, %v433_v50 }
  0xaa   : > { %537 = vst.msk [vmem:[%s916_s30 + $0x44] sm:$0xf] %vm519_vm3, %v504_v51 }
  0xab   : > { %545 = vst.msk [vmem:[%s916_s30 + $0x64] sm:$0xf] %vm519_vm3, %v512_v52 }
  0xac   : > { %522 = vst.msk [vmem:[%s916_s30 + $0x8] sm:$0xf] %vm519_vm3, %v489_v53 }
  0xad   : > { %530 = vst.msk [vmem:[%s916_s30 + $0x28] sm:$0xf] %vm519_vm3, %v497_v54  ;;  %v452_v55 = vpop.f32.mrf.mxu2  ;;  %v472_v56 = vpop.f32.mrf.mxu3 }
  0xae   : > { %v453_v57 = vadd.f32 %v907_v24, %v452_v55  ;;  %v473_v58 = vadd.f32 %v907_v24, %v472_v56  ;;  %v414_v59 = vpop.f32.mrf.mxu0  ;;  %v434_v60 = vpop.f32.mrf.mxu1 }
  0xaf   : > { %v415_v61 = vadd.f32 %v907_v24, %v414_v59  ;;  %v435_v62 = vadd.f32 %v907_v24, %v434_v60 }
  0xb0   : > { %v505_v63 = vpack.c.bf16 %v453_v57, %v453_v57  ;;  %v513_v0 = vpack.c.bf16 %v473_v58, %v473_v58 }
  0xb1   : > { %v490_v1 = vpack.c.bf16 %v415_v61, %v415_v61  ;;  %v498_v2 = vpack.c.bf16 %v435_v62, %v435_v62 }
  0xb2   : > { %538 = vst.msk [vmem:[%s916_s30 + $0x48] sm:$0xf] %vm519_vm3, %v505_v63 }
  0xb3   : > { %546 = vst.msk [vmem:[%s916_s30 + $0x68] sm:$0xf] %vm519_vm3, %v513_v0 }
  0xb4   : > { %523 = vst.msk [vmem:[%s916_s30 + $0xc] sm:$0xf] %vm519_vm3, %v490_v1 }
  0xb5   : > { %531 = vst.msk [vmem:[%s916_s30 + $0x2c] sm:$0xf] %vm519_vm3, %v498_v2  ;;  %v454_v3 = vpop.f32.mrf.mxu2  ;;  %v474_v4 = vpop.f32.mrf.mxu3 }
  0xb6   : > { %v455_v5 = vadd.f32 %v907_v24, %v454_v3  ;;  %v475_v6 = vadd.f32 %v907_v24, %v474_v4  ;;  %v417_v7 = vpop.f32.mrf.mxu0  ;;  %v437_v8 = vpop.f32.mrf.mxu1 }
  0xb7   : > { %v418_v9 = vadd.f32 %v907_v24, %v417_v7  ;;  %v438_v10 = vadd.f32 %v907_v24, %v437_v8 }
  0xb8   : > { %v506_v11 = vpack.c.bf16 %v455_v5, %v455_v5  ;;  %v514_v12 = vpack.c.bf16 %v475_v6, %v475_v6 }
  0xb9   : > { %v491_v13 = vpack.c.bf16 %v418_v9, %v418_v9  ;;  %v499_v14 = vpack.c.bf16 %v438_v10, %v438_v10 }
  0xba   : > { %539 = vst.msk [vmem:[%s916_s30 + $0x4c] sm:$0xf] %vm519_vm3, %v506_v11 }
  0xbb   : > { %547 = vst.msk [vmem:[%s916_s30 + $0x6c] sm:$0xf] %vm519_vm3, %v514_v12 }
  0xbc   : > { %524 = vst.msk [vmem:[%s916_s30 + $0x10] sm:$0xf] %vm519_vm3, %v491_v13 }
  0xbd   : > { %532 = vst.msk [vmem:[%s916_s30 + $0x30] sm:$0xf] %vm519_vm3, %v499_v14  ;;  %v457_v15 = vpop.f32.mrf.mxu2  ;;  %v477_v16 = vpop.f32.mrf.mxu3 }
  0xbe   : > { %v458_v17 = vadd.f32 %v907_v24, %v457_v15  ;;  %v478_v18 = vadd.f32 %v907_v24, %v477_v16  ;;  %v419_v19 = vpop.f32.mrf.mxu0  ;;  %v439_v20 = vpop.f32.mrf.mxu1 }
  0xbf   : > { %v420_v21 = vadd.f32 %v907_v24, %v419_v19  ;;  %v440_v22 = vadd.f32 %v907_v24, %v439_v20 }
  0xc0   : > { %v507_v23 = vpack.c.bf16 %v458_v17, %v458_v17  ;;  %v515_v25 = vpack.c.bf16 %v478_v18, %v478_v18 }
  0xc1   : > { %v492_v26 = vpack.c.bf16 %v420_v21, %v420_v21  ;;  %v500_v27 = vpack.c.bf16 %v440_v22, %v440_v22 }
  0xc2   : > { %540 = vst.msk [vmem:[%s916_s30 + $0x50] sm:$0xf] %vm519_vm3, %v507_v23 }
  0xc3   : > { %548 = vst.msk [vmem:[%s916_s30 + $0x70] sm:$0xf] %vm519_vm3, %v515_v25 }
  0xc4   : > { %525 = vst.msk [vmem:[%s916_s30 + $0x14] sm:$0xf] %vm519_vm3, %v492_v26 }
  0xc5   : > { %533 = vst.msk [vmem:[%s916_s30 + $0x34] sm:$0xf] %vm519_vm3, %v500_v27  ;;  %v459_v28 = vpop.f32.mrf.mxu2  ;;  %v479_v29 = vpop.f32.mrf.mxu3 }
  0xc6   : > { %v460_v30 = vadd.f32 %v907_v24, %v459_v28  ;;  %v480_v31 = vadd.f32 %v907_v24, %v479_v29  ;;  %v422_v32 = vpop.f32.mrf.mxu0  ;;  %v442_v33 = vpop.f32.mrf.mxu1 }
  0xc7   : > { %v423_v34 = vadd.f32 %v907_v24, %v422_v32  ;;  %v443_v35 = vadd.f32 %v907_v24, %v442_v33 }
  0xc8   : > { %v508_v36 = vpack.c.bf16 %v460_v30, %v460_v30  ;;  %v516_v37 = vpack.c.bf16 %v480_v31, %v480_v31 }
  0xc9   : > { %v493_v38 = vpack.c.bf16 %v423_v34, %v423_v34  ;;  %v501_v39 = vpack.c.bf16 %v443_v35, %v443_v35 }
  0xca   : > { %541 = vst.msk [vmem:[%s916_s30 + $0x54] sm:$0xf] %vm519_vm3, %v508_v36 }
  0xcb   : > { %549 = vst.msk [vmem:[%s916_s30 + $0x74] sm:$0xf] %vm519_vm3, %v516_v37 }
  0xcc   : > { %526 = vst.msk [vmem:[%s916_s30 + $0x18] sm:$0xf] %vm519_vm3, %v493_v38 }
  0xcd   : > { %534 = vst.msk [vmem:[%s916_s30 + $0x38] sm:$0xf] %vm519_vm3, %v501_v39  ;;  %v462_v40 = vpop.f32.mrf.mxu2  ;;  %v482_v41 = vpop.f32.mrf.mxu3 }
  0xce   : > { %v463_v42 = vadd.f32 %v907_v24, %v462_v40  ;;  %v483_v43 = vadd.f32 %v907_v24, %v482_v41  ;;  %v424_v44 = vpop.f32.mrf.mxu0  ;;  %v444_v45 = vpop.f32.mrf.mxu1 }
  0xcf   : > { %v425_v46 = vadd.f32 %v907_v24, %v424_v44  ;;  %v445_v47 = vadd.f32 %v907_v24, %v444_v45 }
  0xd0   : > { %v509_v48 = vpack.c.bf16 %v463_v42, %v463_v42  ;;  %v517_v49 = vpack.c.bf16 %v483_v43, %v483_v43 }
  0xd1   : > { %v494_v50 = vpack.c.bf16 %v425_v46, %v425_v46  ;;  %v502_v51 = vpack.c.bf16 %v445_v47, %v445_v47 }
  0xd2   : > { %542 = vst.msk [vmem:[%s916_s30 + $0x58] sm:$0xf] %vm519_vm3, %v509_v48 }
  0xd3   : > { %550 = vst.msk [vmem:[%s916_s30 + $0x78] sm:$0xf] %vm519_vm3, %v517_v49 }
  0xd4   : > { %527 = vst.msk [vmem:[%s916_s30 + $0x1c] sm:$0xf] %vm519_vm3, %v494_v50 }
  0xd5   : > { %535 = vst.msk [vmem:[%s916_s30 + $0x3c] sm:$0xf] %vm519_vm3, %v502_v51  ;;  %v464_v52 = vpop.f32.mrf.mxu2  ;;  %v484_v53 = vpop.f32.mrf.mxu3 }
  0xd6   : > { %v465_v54 = vadd.f32 %v907_v24, %v464_v52  ;;  %v485_v55 = vadd.f32 %v907_v24, %v484_v53 }
  0xd8   : > { %v510_v56 = vpack.c.bf16 %v465_v54, %v465_v54  ;;  %v518_v57 = vpack.c.bf16 %v485_v55, %v485_v55 }
  0xda   : > { %543 = vst.msk [vmem:[%s916_s30 + $0x5c] sm:$0xf] %vm519_vm3, %v510_v56 }
  0xdb   : > { %551 = vst.msk [vmem:[%s916_s30 + $0x7c] sm:$0xf] %vm519_vm3, %v518_v57 }
  0xdc PF: > { %s13_s14 = sadd.s32 1, %s812_s14   ;;  %s1025_s12 = smov %s808_s13 }
  0xdd   : > { %p10_p5 = scmp.ge.s32.totalorder %s13_s14, 4   ;;  %s1026_s13 = smov %s1028_s15 }
  0xdf   :  { %12 = sbr.rel (!%p10_p5) target bundleno = 2 (0x2), region = 62 }

// kernel: unet_forward.13
= control target key start
LH: loop header
LB: loop body
LE: loop exit
PB: predicated region body
PF: predicated region fallthrough
CT: control target
= control target key end

     0   :  { %s394_s6 = smov 0   ;;  %s396_s7 = smov 0   ;;  %s431_s0 = inlined_call_operand.vmem [shape: bf16[2,4,2,4,16], index: 0, kind: input, shape index: {}]   ;;  %s432_s1 = inlined_call_operand.vmem [shape: bf16[2,4,4,8], index: 1, kind: output, shape index: {}]  }
   0x1   :  { %s398_s8 = smov 0  }
   0x2 LB: > { %s23_s9 = sadd.s32 1, %s377_s7  ;;  %p311_p0 = scmp.ge.s32.totalorder %s381_s8, 1  ;;  %s381_s8 = sphi %s398_s8, %s11_s8   ;;  %s377_s7 = sphi %s396_s7, %s434_s7   ;;  %s373_s6 = sphi %s394_s6, %s433_s6  }
   0x3   : > { %p25_p1 = scmp.ge.s32.totalorder %s23_s9, 2  ;;  %p109_p2 = scmp.lt.s32.totalorder %s381_s8, 3 }
   0x5   : > { %s436_s9 = smov (%p25_p1, %s23_s9), 0  ;;  %p110_p3 = pnand %p311_p0, %p109_p2 }
   0x6   : > { %p139_p4 = scmp.lt.s32.totalorder (!%p110_p3), %s373_s6, 1  ;;  %s383_s14 = smov (!%p110_p3), 120  }
   0x7   : > { %113 = sbr.rel (%p110_p3) target bundleno = 154 (0x9a), region = 24 }
   0xc   : > { %s438_s6 = smov (!%p139_p4, %s373_s6), 1  ;;  %vm212_vm0 = vcmask 58368  }
   0xd   : > { %s322_s10 = sshll.u32 %s438_s6, 4  ;;  %s323_s15 = sshll.u32 %s438_s6, 3 }
   0xe   : > { %s147_s13 = scalar_lea.vmem %s431_s0, %s322_s10  ;;  %s157_s18 = scalar_lea.vmem %s432_s1, %s323_s15 }
   0xf   : > { %v159_v0 = vld [vmem:[%s147_s13] sm:$0x3]  ;;  %v160_v1 = vld [vmem:[%s147_s13 + $0x4] sm:$0x3]  ;;  %v316_v2 = vld [vmem:[%s147_s13 + $0x2] sm:$0x3] }
  0x10   : > { %v317_v3 = vld [vmem:[%s147_s13 + $0x6] sm:$0x3]  ;;  %v168_v4 = vunpack.c.l.bf16 %v159_v0  ;;  %v169_v5 = vunpack.c.l.bf16 %v160_v1  ;;  %v172_v6 = vunpack.c.l.bf16 %v316_v2  ;;  %v161_v7 = vld [vmem:[%s147_s13 + $0x8] sm:$0x3]  ;;  %v162_v8 = vld [vmem:[%s147_s13 + $0xc] sm:$0x3] }
  0x11   : > { %v173_v9 = vunpack.c.l.bf16 %v317_v3  ;;  %v318_v10 = vld [vmem:[%s147_s13 + $0xa] sm:$0x3]  ;;  %v319_v11 = vld [vmem:[%s147_s13 + $0xe] sm:$0x3]  ;;  %v170_v12 = vunpack.c.l.bf16 %v161_v7  ;;  %v171_v13 = vunpack.c.l.bf16 %v162_v8 }
  0x12   : > { %v176_v14 = vmax.f32 %v168_v4, %v172_v6  ;;  %v174_v15 = vunpack.c.l.bf16 %v318_v10  ;;  %v175_v16 = vunpack.c.l.bf16 %v319_v11 }
  0x13   : > { %v177_v17 = vmax.f32 %v169_v5, %v173_v9 }
  0x14   : > { %v178_v18 = vmax.f32 %v170_v12, %v174_v15  ;;  %v179_v19 = vmax.f32 %v171_v13, %v175_v16 }
  0x15   : > { %v349_v20 = vpack.i.bf16 %v177_v17, %v176_v14 }
  0x16   : > { %v354_v21 = vpack.i.bf16 %v179_v19, %v178_v18 }
  0x17   : > { %350 = vrot.lane.b32.xlu0 %v349_v20, %s383_s14 }
  0x1f   : > { %355 = vrot.lane.b32.xlu0 %v354_v21, %s383_s14 }
  0x89   : > { %v351_v22 = vpop.permute.xlu0 %350 }
  0x8a   : > { %v353_v23 = vunpack.i.h.bf16 %v351_v22  ;;  %v352_v24 = vunpack.i.l.bf16 %v351_v22 }
  0x8c   : > { %v205_v25 = vmax.f32 %v177_v17, %v353_v23  ;;  %v204_v26 = vmax.f32 %v176_v14, %v352_v24 }
  0x8e   : > { %v209_v27 = vpack.c.bf16 %v205_v25, %v205_v25  ;;  %v208_v28 = vpack.c.bf16 %v204_v26, %v204_v26 }
  0x90   : > { %214 = vst.msk [vmem:[%s157_s18 + $0x2] sm:$0x3] %vm212_vm0, %v209_v27 }
  0x91   : > { %213 = vst.msk [vmem:[%s157_s18] sm:$0x3] %vm212_vm0, %v208_v28  ;;  %v356_v29 = vpop.permute.xlu0 %355 }
  0x92   : > { %v358_v30 = vunpack.i.h.bf16 %v356_v29  ;;  %v357_v31 = vunpack.i.l.bf16 %v356_v29 }
  0x94   : > { %v207_v32 = vmax.f32 %v179_v19, %v358_v30  ;;  %v206_v33 = vmax.f32 %v178_v18, %v357_v31 }
  0x96   : > { %v211_v34 = vpack.c.bf16 %v207_v32, %v207_v32  ;;  %v210_v35 = vpack.c.bf16 %v206_v33, %v206_v33 }
  0x98   : > { %216 = vst.msk [vmem:[%s157_s18 + $0x6] sm:$0x3] %vm212_vm0, %v211_v34 }
  0x99   : > { %215 = vst.msk [vmem:[%s157_s18 + $0x4] sm:$0x3] %vm212_vm0, %v210_v35 }
  0x9a PF: > { %s11_s8 = sadd.s32 1, %s381_s8   ;;  %s433_s6 = smov %s377_s7 }
  0x9b   : > { %p8_p5 = scmp.ge.s32.totalorder %s11_s8, 4   ;;  %s434_s7 = smov %s436_s9 }
  0x9d   :  { %10 = sbr.rel (!%p8_p5) target bundleno = 2 (0x2), region = 55 }

// kernel: unet_forward.15
= control target key start
LH: loop header
LB: loop body
LE: loop exit
PB: predicated region body
PF: predicated region fallthrough
CT: control target
= control target key end

     0   :  { %s341_s6 = smov 0   ;;  %s343_s7 = smov 0   ;;  %s374_s0 = inlined_call_operand.vmem [shape: bf16[2,2,2,2,32], index: 0, kind: input, shape index: {}]   ;;  %s375_s1 = inlined_call_operand.vmem [shape: bf16[2,2,2,16], index: 1, kind: output, shape index: {}]  }
   0x1   :  { %s345_s8 = smov 0  }
   0x2 LB: > { %s23_s9 = sadd.s32 1, %s324_s7  ;;  %p269_p0 = scmp.ge.s32.totalorder %s328_s8, 1  ;;  %s328_s8 = sphi %s345_s8, %s11_s8   ;;  %s324_s7 = sphi %s343_s7, %s377_s7   ;;  %s320_s6 = sphi %s341_s6, %s376_s6  }
   0x3   : > { %p25_p1 = scmp.ge.s32.totalorder %s23_s9, 2  ;;  %p108_p2 = scmp.lt.s32.totalorder %s328_s8, 3 }
   0x5   : > { %s379_s9 = smov (%p25_p1, %s23_s9), 0  ;;  %p109_p3 = pnand %p269_p0, %p108_p2 }
   0x6   : > { %p136_p4 = scmp.lt.s32.totalorder (!%p109_p3), %s320_s6, 1  ;;  %s330_s14 = smov (!%p109_p3), 112  }
   0x7   : > { %112 = sbr.rel (%p109_p3) target bundleno = 146 (0x92), region = 24 }
   0xc   : > { %s381_s6 = smov (!%p136_p4, %s320_s6), 1  ;;  %vm181_vm0 = vcmask 122880  }
   0xd   : > { %s270_s10 = sshll.u32 %s381_s6, 2  ;;  %s271_s15 = sshll.u32 %s381_s6, 1 }
   0xe   : > { %s143_s13 = scalar_lea.vmem %s374_s0, %s270_s10  ;;  %s152_s18 = scalar_lea.vmem %s375_s1, %s271_s15 }
   0xf   : > { %v154_v0 = vld [vmem:[%s143_s13] sm:$0x1]  ;;  %v155_v1 = vld [vmem:[%s143_s13 + $0x2] sm:$0x1]  ;;  %v272_v2 = vld [vmem:[%s143_s13 + $0x1] sm:$0x1] }
  0x10   : > { %v273_v3 = vld [vmem:[%s143_s13 + $0x3] sm:$0x1]  ;;  %v159_v4 = vunpack.c.l.bf16 %v154_v0  ;;  %v160_v5 = vunpack.c.l.bf16 %v155_v1  ;;  %v161_v6 = vunpack.c.l.bf16 %v272_v2 }
  0x11   : > { %v162_v7 = vunpack.c.l.bf16 %v273_v3 }
  0x12   : > { %v163_v8 = vmax.f32 %v159_v4, %v161_v6 }
  0x13   : > { %v164_v9 = vmax.f32 %v160_v5, %v162_v7 }
  0x15   : > { %v301_v10 = vpack.i.bf16 %v164_v9, %v163_v8 }
  0x17   : > { %302 = vrot.lane.b32.xlu0 %v301_v10, %s330_s14 }
  0x89   : > { %v303_v11 = vpop.permute.xlu0 %302 }
  0x8a   : > { %v305_v12 = vunpack.i.h.bf16 %v303_v11  ;;  %v304_v13 = vunpack.i.l.bf16 %v303_v11 }
  0x8c   : > { %v178_v14 = vmax.f32 %v164_v9, %v305_v12  ;;  %v177_v15 = vmax.f32 %v163_v8, %v304_v13 }
  0x8e   : > { %v180_v16 = vpack.c.bf16 %v178_v14, %v178_v14  ;;  %v179_v17 = vpack.c.bf16 %v177_v15, %v177_v15 }
  0x90   : > { %183 = vst.msk [vmem:[%s152_s18 + $0x1] sm:$0x1] %vm181_vm0, %v180_v16 }
  0x91   : > { %182 = vst.msk [vmem:[%s152_s18] sm:$0x1] %vm181_vm0, %v179_v17 }
  0x92 PF: > { %s11_s8 = sadd.s32 1, %s328_s8   ;;  %s376_s6 = smov %s324_s7 }
  0x93   : > { %p8_p5 = scmp.ge.s32.totalorder %s11_s8, 4   ;;  %s377_s7 = smov %s379_s9 }
  0x95   :  { %10 = sbr.rel (!%p8_p5) target bundleno = 2 (0x2), region = 55 }

// kernel: unet_forward.14
= control target key start
LH: loop header
LB: loop body
LE: loop exit
PB: predicated region body
PF: predicated region fallthrough
CT: control target
= control target key end

     0   :  { %s1967_s21 = smov 0   ;;  %s1969_s22 = smov 0   ;;  %s2773_s0 = inlined_call_operand.vmem [shape: bf16[2,48,8], index: 0, kind: input, shape index: {}, may-alias: {0,1}]   ;;  %s2774_s1 = inlined_call_operand.vmem [shape: bf16[2,48,8], index: 1, kind: input, shape index: {}, may-alias: {0,1}]   ;;  %s2775_s2 = inlined_call_operand.vmem [shape: bf16[9,8,16], index: 2, kind: input, shape index: {}]   ;;  %s2776_s3 = inlined_call_operand.vmem [shape: f32[1,16], index: 3, kind: input, shape index: {}]   ;;  %s2777_s4 = inlined_call_operand.vmem [shape: bf16[9,16,16], index: 4, kind: input, shape index: {}]   ;;  %s2778_s5 = inlined_call_operand.vmem [shape: f32[1,16], index: 5, kind: input, shape index: {}]   ;;  %s2779_s6 = inlined_call_operand.vmem [shape: bf16[2,16,16], index: 6, kind: output, shape index: {}]  }
   0x1   :  { %s1971_s1 = smov 0  }
   0x2 LB: > { %s35_s23 = sadd.s32 1, %s1925_s22  ;;  %p1761_p0 = scmp.ge.s32.totalorder %s1929_s1, 1  ;;  %s1929_s1 = sphi %s1971_s1, %s16_s1   ;;  %s1925_s22 = sphi %s1969_s22, %s2962_s22   ;;  %s1921_s21 = sphi %s1967_s21, %s2961_s21  }
   0x3   : > { %p37_p1 = scmp.ge.s32.totalorder %s35_s23, 2  ;;  %p262_p2 = scmp.lt.s32.totalorder %s1929_s1, 3 }
   0x5   : > { %s2964_s23 = smov (%p37_p1, %s35_s23), 0  ;;  %p263_p3 = pnand %p1761_p0, %p262_p2 }
   0x6   : > { %p311_p4 = scmp.lt.s32.totalorder (!%p263_p3), %s1921_s21, 1 }
   0x7   : > { %266 = sbr.rel (%p263_p3) target bundleno = 450 (0x1c2), region = 44 }
   0xc   : > { %v1765_v0 = vld [vmem:[%s2775_s2 + $0x4] sm:$0xf]  ;;  %vm2782_vm0 = vcmask 1043456   ;;  %v405_v1 = vld [vmem:[%s2775_s2] sm:$0xf]  ;;  %v344_v2 = vlaneseq  ;;  %s2966_s21 = smov (!%p311_p4, %s1921_s21), 1 }
   0xd   : > { %v444_v3 = vsel %vm2782_vm0, %v1765_v0, 0  ;;  %v479_v4 = vsel %vm2782_vm0, %v405_v1, 0  ;;  %v1776_v6 = vld [vmem:[%s2775_s2 + $0x10] sm:$0xf]  ;;  %s1879_s30 = smul.u32 24, %s2966_s21  ;;  %vm2786_vm5 = vcmask 64512  }
   0xe   : > { %453 = vmatpush.bf16.msra.mxu0 %v444_v3  ;;  %488 = vmatpush.bf16.msra.mxu1 %v479_v4  ;;  %v345_v5 = vshrl.u32 %v344_v2, 7  ;;  %v729_v9 = vsel %vm2782_vm0, %v1776_v6, 0  ;;  %vm2780_vm6 = vsmask.f32 7424  ;;  %v1931_v33 = vmov 0   ;;  %s1866_s26 = sshll.u32 %s2966_s21, 3 }
   0xf   : > { %s2003_s9 = scalar_lea.vmem %s2773_s0, %s1879_s30  ;;  %vm1021_vm8 = vsmask.f32 3328  ;;  %vm1022_vm9 = vsmask.f32 7440  ;;  %vm1247_vm14 = vsmask.f32 1280  ;;  %v2109_v4 = vunpack.c.l.b16 %v1931_v33  ;;  %s339_s29 = scalar_lea.vmem %s2779_s6, %s1866_s26 }
  0x10   : > { %v346_v7 = vadd.s32 8, %v345_v5  ;;  %v352_v8 = vand.u32 3, %v345_v5  ;;  %v390_v11 = vld [vmem:[%s2003_s9] sm:$0xf]  ;;  %v2007_v12 = vld [vmem:[%s2003_s9 + $0x4] sm:$0xf]  ;;  %vm2067_vm12 = vmor %vm1021_vm8, %vm1022_vm9 }
  0x11   : > { %v2010_v13 = vld [vmem:[%s2003_s9 + $0x8] sm:$0xf]  ;;  %v2013_v14 = vld [vmem:[%s2003_s9 + $0xc] sm:$0x1]  ;;  %v413_v15 = vunpack.c.l.b16 %v390_v11  ;;  %v414_v16 = vunpack.c.l.b16 %v2007_v12  ;;  %v347_v46 = vadd.s32 16, %v345_v5  ;;  %v2112_v5 = vunpack.c.h.b16 %v1931_v33 }
  0x12   : > { %v359_v10 = vand.u32 3, %v346_v7  ;;  %vm384_vm1 = vcmp.ne.s32.totalorder %v352_v8, 0  ;;  %738 = vmatpush.bf16.msrb.mxu0 %v729_v9  ;;  %v415_v17 = vunpack.c.l.b16 %v2010_v13  ;;  %v416_v19 = vunpack.c.l.b16 %v2013_v14  ;;  %v1770_v55 = vld [vmem:[%s2775_s2 + $0x8] sm:$0xf]  ;;  %v1773_v58 = vld [vmem:[%s2775_s2 + $0xc] sm:$0xf] }
  0x13   : > { %vm2017_vm3 = vmpackc.low %vm384_vm1, %vm384_vm1  ;;  %v417_v22 = vpack.c.b16 %v414_v16, %v413_v15  ;;  %vm2054_vm10 = vcmp.ne.s32.totalorder %v352_v8, 3  ;;  %vm1248_vm15 = vsmask.f32 5392  ;;  %v366_v56 = vand.u32 3, %v347_v46 }
  0x14   : > { %vm385_vm2 = vcmp.ne.s32.totalorder %v359_v10, 0  ;;  %v402_v21 = vsel %vm2017_vm3, %v390_v11, 0  ;;  %v2035_v25 = vpack.c.b16 %v416_v19, %v415_v17  ;;  %vm2038_vm7 = vcmp.ne.s32.totalorder %v359_v10, 3  ;;  %vm506_vm13 = vmpackc.low %vm2054_vm10, %vm2054_vm10 }
  0x15   : > { %vm2022_vm4 = vmpackc.low %vm385_vm2, %vm385_vm2  ;;  %v467_v24 = vunpack.c.l.b16 %v402_v21  ;;  %v421_v27 = vshrl.u32 %v417_v22, 16  ;;  %v423_v28 = vshll.u32 %v417_v22, 16  ;;  %v603_v34 = vsel %vm2017_vm3, 65537, %v1931_v33 }
  0x16   : > { %v403_v23 = vsel %vm2022_vm4, %v2007_v12, 0  ;;  %v428_v29 = vshll.u32 %v2035_v25, 16  ;;  %v2048_v35 = vsel %vm2022_vm4, 65537, %v1931_v33  ;;  %v1025_v37 = vshll.u32 %v603_v34, 16  ;;  %vm507_vm11 = vmpackc.low %vm2038_vm7, %vm2038_vm7 }
  0x17   : > { %v468_v26 = vunpack.c.l.b16 %v403_v23  ;;  %v425_v31 = vrot.slane %v423_v28, 1  ;;  %v1028_v38 = vshrl.u32 %v603_v34, 16  ;;  %v1034_v39 = vshll.u32 %v2048_v35, 16  ;;  %vm1249_vm7 = vmor %vm1247_vm14, %vm1248_vm15  ;;  %v499_v23 = vld [vmem:[%s2003_s9] sm:$0xe] }
  0x18   : > { %v2050_v36 = vrot.slane %v428_v29, 1  ;;  %v2061_v42 = vrot.slane %v1025_v37, 5  ;;  %v1038_v44 = vshrl.u32 %v2048_v35, 16  ;;  %v2078_v50 = vsel %vm507_vm11, 65537, %v1931_v33 }
  0x19   : > { %v470_v30 = vpack.c.b16 %v468_v26, %v467_v24  ;;  %v426_v40 = vor.u32 %v425_v31, %v421_v27  ;;  %v1030_v43 = vrot.slane %v1028_v38, 4  ;;  %v2072_v49 = vrot.slane %v1034_v39, 5 }
  0x1a   : > { %v1250_v52 = vrot.slane %v1028_v38, 6  ;;  %v1251_v53 = vrot.slane %v1025_v37, 7  ;;  %v1254_v54 = vrot.slane %v1038_v44, 6  ;;  %v1255_v57 = vrot.slane %v1034_v39, 7 }
  0x1b   : > { %1768 = vmatmul.msk.bf16.vlgmr.msra.gmra.mxu1 %vm2786_vm5, %v470_v30  ;;  %v431_v45 = vsel %vm2780_vm6, %v426_v40, %v2050_v36  ;;  %v1031_v48 = vor.u32 %v1030_v43, %v2061_v42  ;;  %vm512_vm1 = vcmask 1040384   ;;  %vm513_vm2 = vcmask 1044484  }
  0x1c   : > { %1766 = vmatmul.msk.bf16.vlgmr.msra.gmra.mxu0 %vm2786_vm5, %v431_v45  ;;  %v2089_v59 = vsel %vm506_vm13, 65537, %v1931_v33  ;;  %v517_v60 = vrot.slane %v2078_v50, 7  ;;  %v2097_v62 = vor.u32 %v1251_v53, %v1250_v52  ;;  %v2101_v63 = vor.u32 %v1255_v57, %v1254_v54  ;;  %vm2116_vm9 = vmor %vm512_vm1, %vm513_vm2 }
  0x1d   : > { %v1032_v51 = vrot.slane %v1031_v48, 4  ;;  %v2103_v0 = vrot.slane %v603_v34, 6  ;;  %v578_v2 = vsel %vm2782_vm0, %v1770_v55, 0  ;;  %v672_v3 = vsel %vm2782_vm0, %v1773_v58, 0 }
  0x1e   : > { %v1253_v1 = vrot.slane %v2097_v62, 4  ;;  %587 = vmatpush.bf16.msra.mxu2 %v578_v2  ;;  %681 = vmatpush.bf16.msra.mxu3 %v672_v3  ;;  %vm389_vm8 = vcmp.ne.s32.totalorder %v366_v56, 3  ;;  %v515_v7 = vrot.slane %v2089_v59, 7  ;;  %v519_v9 = vrot.slane %v517_v60, 4 }
  0x1f   : > { %v2095_v61 = vsel %vm2067_vm12, %v1032_v51, %v2072_v49  ;;  %vm508_vm10 = vmpackc.low %vm389_vm8, %vm389_vm8  ;;  %vm386_vm11 = vcmp.ne.s32.totalorder %v366_v56, 0  ;;  %v610_v21 = vrot.slane %v2103_v0, 4  ;;  %v611_v22 = vrot.slane %v2048_v35, 6 }
  0x20   : > { %v2122_v8 = vsel %vm1249_vm7, %v1253_v1, %v2101_v63  ;;  %v2125_v10 = vsel %vm508_vm10, 65537, %v1931_v33  ;;  %v516_v11 = vrot.slane %v515_v7, 4  ;;  %v523_v15 = vunpack.c.l.b16 %v515_v7  ;;  %vm2131_vm12 = vmpackc.low %vm386_vm11, %vm386_vm11 }
  0x21   : > { %v524_v19 = vunpack.c.h.b16 %v515_v7  ;;  %v520_v24 = vrot.slane %v2125_v10, 7  ;;  %v2819_v26 = vmov 0  ;;  %vm606_vm13 = vcmask 1041408  }
  0x22   : > { %v2820_v26 = vsel %vm2131_vm12, 4294967295, %v2819_v26  ;;  %v518_v27 = vsel %vm2116_vm9, %v516_v11, %v517_v60  ;;  %vm2138_vm14 = vcmp.ne.s32.totalorder %v523_v15, %v2109_v4  ;;  %vm607_vm1 = vcmask 1045508  }
  0x23   : > { %vm2143_vm15 = vcmp.ne.s32.totalorder %v524_v19, %v2112_v5  ;;  %v521_v30 = vsel %vm2116_vm9, %v519_v9, %v520_v24  ;;  %v522_v31 = vrot.slane %v520_v24, 4  ;;  %v530_v32 = vunpack.c.l.b16 %v518_v27  ;;  %vm2172_vm9 = vmor %vm606_vm13, %vm607_vm1 }
  0x24   : > { %vm2781_vm2 = vmpackc.low %vm2143_vm15, %vm2138_vm14  ;;  %v531_v34 = vunpack.c.h.b16 %v518_v27  ;;  %v537_v37 = vunpack.c.l.b16 %v521_v30  ;;  %v538_v38 = vunpack.c.h.b16 %v521_v30  ;;  %v605_v40 = vsel %vm2131_vm12, 65537, %v1931_v33 }
  0x25   : > { %v551_v39 = vsel %vm2781_vm2, %v499_v23, 0  ;;  %vm2162_vm7 = vcmp.ne.s32.totalorder %v530_v32, %v2109_v4  ;;  %v2825_v41 = vmov 0  ;;  %v2827_v43 = vmov 0 }
  0x26   : > { %v2826_v41 = vsel %vm2162_vm7, 4294967295, %v2825_v41  ;;  %vm2167_vm8 = vcmp.ne.s32.totalorder %v531_v34, %v2112_v5  ;;  %v544_v45 = vunpack.c.l.b16 %v522_v31  ;;  %v545_v46 = vunpack.c.h.b16 %v522_v31  ;;  %v601_v31 = vld [vmem:[%s2003_s9] sm:$0xc] }
  0x27   : > { %v2828_v43 = vsel %vm2167_vm8, 4294967295, %v2827_v43  ;;  %v613_v48 = vrot.slane %v611_v22, 4  ;;  %vm2783_vm10 = vmpackc.low %vm2167_vm8, %vm2162_vm7  ;;  %vm2181_vm11 = vcmp.ne.s32.totalorder %v537_v37, %v2109_v4  ;;  %v2831_v51 = vmov 0 }
  0x28   : > { %v2832_v51 = vsel %vm2181_vm11, 4294967295, %v2831_v51  ;;  %vm2186_vm6 = vcmp.ne.s32.totalorder %v538_v38, %v2112_v5  ;;  %v2833_v52 = vmov 0  ;;  %v561_v53 = vunpack.c.l.b16 %v551_v39 }
  0x29   : > { %v2834_v52 = vsel %vm2186_vm6, 4294967295, %v2833_v52  ;;  %vm2785_vm13 = vmpackc.low %vm2186_vm6, %vm2181_vm11  ;;  %vm2195_vm1 = vcmp.ne.s32.totalorder %v544_v45, %v2109_v4  ;;  %v2835_v54 = vmov 0  ;;  %vm2200_vm2 = vcmp.ne.s32.totalorder %v545_v46, %v2112_v5 }
  0x2a   : > { %v2836_v54 = vsel %vm2195_vm1, 4294967295, %v2835_v54  ;;  %v2837_v55 = vmov 0  ;;  %v552_v56 = vsel %vm2783_vm10, %v2007_v12, 0  ;;  %v614_v57 = vrot.slane %v605_v40, 6  ;;  %vm2784_vm0 = vmpackc.low %vm2200_vm2, %vm2195_vm1  ;;  %v602_v40 = vld [vmem:[%s2003_s9 + $0xc] sm:$0x3] }
  0x2b   : > { %v2838_v55 = vsel %vm2200_vm2, 4294967295, %v2837_v55  ;;  %v553_v58 = vsel %vm2785_vm13, %v2010_v13, 0  ;;  %v562_v60 = vunpack.c.l.b16 %v552_v56  ;;  %v2221_v1 = vrot.slane %v2089_v59, 5 }
  0x2c   : > { %v758_v2 = vrot.slane %v2078_v50, 5  ;;  %v554_v3 = vsel %vm2784_vm0, %v2013_v14, 0  ;;  %v563_v6 = vunpack.c.l.b16 %v553_v58  ;;  %v612_v11 = vsel %vm2172_vm9, %v610_v21, %v611_v22  ;;  %v1785_v58 = vld [vmem:[%s2775_s2 + $0x1c] sm:$0xf] }
  0x2d   : > { %v564_v7 = vunpack.c.l.b16 %v554_v3  ;;  %v565_v9 = vpack.c.b16 %v562_v60, %v561_v53  ;;  %v615_v15 = vsel %vm2172_vm9, %v613_v48, %v614_v57  ;;  %v616_v19 = vrot.slane %v614_v57, 4  ;;  %v1782_v48 = vld [vmem:[%s2775_s2 + $0x18] sm:$0xf]  ;;  %v1779_v60 = vld [vmem:[%s2775_s2 + $0x14] sm:$0xf] }
  0x2e   : > { %v617_v23 = vunpack.c.l.b16 %v2103_v0  ;;  %v618_v24 = vunpack.c.h.b16 %v2103_v0  ;;  %v624_v14 = vunpack.c.l.b16 %v612_v11  ;;  %v625_v32 = vunpack.c.h.b16 %v612_v11  ;;  %v2277_v11 = vld [vmem:[%s2003_s9 + $0xc] sm:$0x7] }
  0x2f   : > { %v2236_v27 = vpack.c.b16 %v564_v7, %v563_v6  ;;  %v568_v30 = vrot.slane %v565_v9, 1  ;;  %v631_v21 = vunpack.c.l.b16 %v615_v15  ;;  %v632_v22 = vunpack.c.h.b16 %v615_v15 }
  0x30   : > { %vm621_vm0 = vcmp.ne.s32.totalorder %v617_v23, %v2109_v4  ;;  %vm622_vm13 = vcmp.ne.s32.totalorder %v618_v24, %v2112_v5  ;;  %vm628_vm5 = vcmp.ne.s32.totalorder %v624_v14, %v2109_v4  ;;  %vm629_vm10 = vcmp.ne.s32.totalorder %v625_v32, %v2112_v5 }
  0x31   : > { %v569_v34 = vrot.slane %v2236_v27, 1  ;;  %vm623_vm9 = vmpackc.low %vm622_vm13, %vm621_vm0  ;;  %v638_v0 = vunpack.c.l.b16 %v616_v19  ;;  %vm635_vm2 = vcmp.ne.s32.totalorder %v631_v21, %v2109_v4  ;;  %vm636_vm11 = vcmp.ne.s32.totalorder %v632_v22, %v2112_v5 }
  0x32   : > { %vm630_vm1 = vmpackc.low %vm629_vm10, %vm628_vm5  ;;  %v639_v37 = vunpack.c.h.b16 %v616_v19  ;;  %v645_v38 = vsel %vm623_vm9, %v601_v31, 0  ;;  %vm2839_vm6 = vcmask 1046528   ;;  %v760_v53 = vrot.slane %v758_v2, 4 }
  0x33   : > { %v570_v39 = vsel %vm2839_vm6, %v568_v30, %v569_v34  ;;  %vm637_vm7 = vmpackc.low %vm636_vm11, %vm635_vm2  ;;  %vm2251_vm0 = vcmp.ne.s32.totalorder %v638_v0, %v2109_v4  ;;  %v646_v46 = vsel %vm630_vm1, %v2007_v12, 0  ;;  %v655_v47 = vunpack.c.l.b16 %v645_v38  ;;  %v1796_v30 = vld [vmem:[%s2775_s2 + $0x20] sm:$0xf] }
  0x34   : > { %vm2842_vm5 = vcmask 64512   ;;  %vm643_vm6 = vcmp.ne.s32.totalorder %v639_v37, %v2112_v5  ;;  %v647_v56 = vsel %vm637_vm7, %v2010_v13, 0  ;;  %v656_v57 = vunpack.c.l.b16 %v646_v46 }
  0x35   : > { %1771 = vmatmul.msk.bf16.vlgmr.msra.gmra.mxu2 %vm2842_vm5, %v570_v39  ;;  %vm644_vm2 = vmpackc.low %vm643_vm6, %vm2251_vm0  ;;  %v657_v3 = vunpack.c.l.b16 %v647_v56  ;;  %v700_v6 = vunpack.c.l.b16 %v601_v31  ;;  %v432_v7 = vshrl.u32 %v2035_v25, 16  ;;  %v404_v9 = vsel %vm2131_vm12, %v2010_v13, 0 }
  0x36   : > { %v648_v15 = vsel %vm644_vm2, %v602_v40, 0  ;;  %v659_v19 = vpack.c.b16 %v656_v57, %v655_v47  ;;  %v469_v23 = vunpack.c.l.b16 %v404_v9  ;;  %vm2843_vm7 = vcmask 1043456   ;;  %vm2846_vm1 = vmmov %vm2842_vm5 }
  0x37   : > { %v863_v24 = vsel %vm2843_vm7, %v1782_v48, 0  ;;  %v658_v14 = vunpack.c.l.b16 %v648_v15  ;;  %v434_v31 = vor.u32 %v432_v7, %v2050_v36  ;;  %vm2844_vm10 = vmmov %vm2843_vm7  ;;  %vm2792_vm13 = vcmask 1045504  }
  0x38   : > { %872 = vmatpush.bf16.msrb.mxu2 %v863_v24  ;;  %v924_v25 = vsel %vm2844_vm10, %v1785_v58, 0  ;;  %vm2845_vm11 = vmmov %vm2843_vm7  ;;  %v471_v21 = vpack.c.b16 %v469_v23, %v469_v23  ;;  %v701_v22 = vunpack.c.l.b16 %v2277_v11  ;;  %v702_v0 = vpack.c.b16 %v414_v16, %v700_v6  ;;  %v842_v23 = vld [vmem:[%s2003_s9 + $0xc] sm:$0xf] }
  0x39   : > { %v819_v32 = vsel %vm2845_vm11, %v1779_v60, 0  ;;  %933 = vmatpush.bf16.msrb.mxu3 %v924_v25  ;;  %v2289_v37 = vpack.c.b16 %v658_v14, %v657_v3  ;;  %v662_v38 = vrot.slane %v659_v19, 2  ;;  %1767 = vmatmul.msk.bf16.gmra.mxu0 %vm2846_vm1, %v434_v31  ;;  %vm2847_vm9 = vmmov %vm2843_vm7  ;;  %vm753_vm0 = vcmask 1042432   ;;  %v752_v19 = vld [vmem:[%s2003_s9] sm:$0x8] }
  0x3a   : > { %828 = vmatpush.bf16.msrb.mxu1 %v819_v32  ;;  %v974_v36 = vsel %vm2847_vm9, %v1796_v30, 0  ;;  %vm2848_vm5 = vmmov %vm2846_vm1  ;;  %v703_v39 = vpack.c.b16 %v701_v22, %v415_v17  ;;  %v706_v40 = vshrl.u32 %v702_v0, 16  ;;  %v709_v45 = vshll.u32 %v702_v0, 16 }
  0x3b   : > { %1769 = vmatmul.msk.bf16.gmra.mxu1 %vm2848_vm5, %v471_v21  ;;  %983 = vmatpush.bf16.msra.mxu0 %v974_v36  ;;  %vm754_vm6 = vcmask 1046532   ;;  %v663_v46 = vrot.slane %v2289_v37, 2  ;;  %v757_v16 = vrot.slane %v2221_v1, 4  ;;  %v761_v47 = vrot.slane %v2125_v10, 5  ;;  %vm2849_vm7 = vmmov %vm2846_vm1 }
  0x3c   : > { %vm755_vm2 = vmor %vm753_vm0, %vm754_vm6  ;;  %v764_v48 = vunpack.c.l.b16 %v2221_v1  ;;  %v708_v56 = vrot.slane %v706_v40, 2  ;;  %v711_v57 = vrot.slane %v709_v45, 3  ;;  %v714_v58 = vshrl.u32 %v703_v39, 16 }
  0x3d   : > { %v717_v60 = vshll.u32 %v703_v39, 16  ;;  %v664_v17 = vsel %vm2792_vm13, %v662_v38, %v663_v46  ;;  %v759_v3 = vsel %vm755_vm2, %v757_v16, %v758_v2  ;;  %v762_v6 = vsel %vm755_vm2, %v760_v53, %v761_v47 }
  0x3e   : > { %v763_v7 = vrot.slane %v761_v47, 4  ;;  %1774 = vmatmul.msk.bf16.vlgmr.msra.gmra.mxu3 %vm2849_vm7, %v664_v17  ;;  %v716_v9 = vrot.slane %v714_v58, 2  ;;  %v765_v10 = vunpack.c.h.b16 %v2221_v1  ;;  %vm2309_vm10 = vcmp.ne.s32.totalorder %v764_v48, %v2109_v4  ;;  %v1792_v17 = vld [vmem:[%s2003_s9 + $0xc] sm:$0xf] }
  0x3f   : > { %v719_v15 = vrot.slane %v717_v60, 3  ;;  %v771_v24 = vunpack.c.l.b16 %v759_v3  ;;  %v772_v30 = vunpack.c.h.b16 %v759_v3  ;;  %v778_v14 = vunpack.c.l.b16 %v762_v6  ;;  %v1868_v3 = vld [vmem:[%s2003_s9 + $0xc] sm:$0x10] }
  0x40   : > { %v712_v31 = vor.u32 %v711_v57, %v708_v56  ;;  %vm769_vm11 = vcmp.ne.s32.totalorder %v765_v10, %v2112_v5  ;;  %v779_v2 = vunpack.c.h.b16 %v762_v6  ;;  %v785_v53 = vunpack.c.l.b16 %v763_v7  ;;  %v1867_v56 = vld [vmem:[%s2003_s9 + $0x4] sm:$0xff]  ;;  %v888_v10 = vld [vmem:[%s2003_s9 + $0xc] sm:$0xf] }
  0x41   : > { %vm770_vm1 = vmpackc.low %vm769_vm11, %vm2309_vm10  ;;  %vm775_vm9 = vcmp.ne.s32.totalorder %v771_v24, %v2109_v4  ;;  %vm776_vm0 = vcmp.ne.s32.totalorder %v772_v30, %v2112_v5  ;;  %vm782_vm5 = vcmp.ne.s32.totalorder %v778_v14, %v2109_v4  ;;  %v786_v1 = vunpack.c.h.b16 %v763_v7  ;;  %v947_v6 = vld [vmem:[%s2003_s9 + $0x4] sm:$0xe] }
  0x42   : > { %v720_v25 = vor.u32 %v719_v15, %v716_v9  ;;  %vm777_vm6 = vmpackc.low %vm776_vm0, %vm775_vm9  ;;  %vm783_vm2 = vcmp.ne.s32.totalorder %v779_v2, %v2112_v5  ;;  %vm789_vm7 = vcmp.ne.s32.totalorder %v785_v53, %v2109_v4  ;;  %v792_v32 = vsel %vm770_vm1, %v752_v19, 0  ;;  %v889_v19 = vld [vmem:[%s2003_s9 + $0x10] sm:$0x1] }
  0x43   : > { %vm2795_vm13 = vsmask.f32 5376  ;;  %vm784_vm12 = vmpackc.low %vm783_vm2, %vm782_vm5  ;;  %vm790_vm8 = vcmp.ne.s32.totalorder %v786_v1, %v2112_v5  ;;  %v793_v21 = vsel %vm777_vm6, %v2007_v12, 0  ;;  %v802_v22 = vunpack.c.l.b16 %v792_v32 }
  0x44   : > { %vm2852_vm10 = vcmask 64512   ;;  %vm791_vm11 = vmpackc.low %vm790_vm8, %vm789_vm7  ;;  %v794_v0 = vsel %vm784_vm12, %v2010_v13, 0  ;;  %v803_v38 = vunpack.c.l.b16 %v793_v21  ;;  %v721_v40 = vsel %vm2795_vm13, %v712_v31, %v720_v25 }
  0x45   : > { %1772 = vmatmul.msk.bf16.gmra.mxu2 %vm2852_vm10, %v569_v34  ;;  %v795_v36 = vsel %vm791_vm11, %v2277_v11, 0  ;;  %v804_v39 = vunpack.c.l.b16 %v794_v0  ;;  %vm2853_vm1 = vmmov %vm2852_vm10  ;;  %vm808_vm9 = vcmask 1044480   ;;  %v843_v27 = vsel %vm2017_vm3, %v2007_v12, 0 }
  0x46   : > { %v805_v45 = vunpack.c.l.b16 %v795_v36  ;;  %v806_v16 = vpack.c.b16 %v803_v38, %v802_v22  ;;  %v844_v34 = vsel %vm2022_vm4, %v2010_v13, 0  ;;  %v851_v58 = vunpack.c.l.b16 %v843_v27  ;;  %vm2854_vm12 = vmmov %vm2853_vm1  ;;  %v887_v13 = vld [vmem:[%s2003_s9 + $0x8] sm:$0xf] }
  0x47   : > { %v852_v60 = vunpack.c.l.b16 %v844_v34  ;;  %vm2855_vm8 = vmmov %vm2853_vm1  ;;  %v1793_v12 = vor.u32 %v1868_v3, %v1792_v17  ;;  %v905_v18 = vshll.u32 %v1867_v56, 16  ;;  %v903_v7 = vshrl.u32 %v1867_v56, 16 }
  0x48   : > { %v807_v47 = vpack.c.b16 %v805_v45, %v804_v39  ;;  %v809_v48 = vrot.slane %v806_v16, 3  ;;  %vm2856_vm3 = vmmov %vm2853_vm1  ;;  %vm2858_vm0 = vnez %v2828_v43  ;;  %vm2859_vm5 = vnez %v2826_v41 }
  0x49   : > { %1777 = vmatmul.msk.bf16.vlgmr.msrb.gmra.mxu0 %vm2853_vm1, %v721_v40  ;;  %v854_v20 = vpack.c.b16 %v852_v60, %v851_v58  ;;  %v907_v9 = vrot.slane %v905_v18, 1  ;;  %v910_v15 = vshll.u32 %v1793_v12, 16  ;;  %vm2857_vm4 = vmpackc.low %vm2143_vm15, %vm2138_vm14  ;;  %vm2861_vm2 = vnez %v2834_v52 }
  0x4a   : > { %v810_v11 = vrot.slane %v807_v47, 3  ;;  %v948_v37 = vsel %vm2857_vm4, %v947_v6, 0  ;;  %vm2860_vm6 = vmpackc.low %vm2858_vm0, %vm2859_vm5  ;;  %vm2862_vm7 = vnez %v2832_v51  ;;  %vm2864_vm11 = vnez %v2838_v55 }
  0x4b   : > { %vm2863_vm10 = vmpackc.low %vm2861_vm2, %vm2862_vm7  ;;  %vm2865_vm1 = vnez %v2836_v54  ;;  %v908_v29 = vor.u32 %v907_v9, %v903_v7  ;;  %v912_v30 = vrot.slane %v910_v15, 1  ;;  %vm2868_vm15 = vnez %v2820_v26  ;;  %v1871_v7 = vld [vmem:[%s2777_s4 + $0x8] sm:$0xff]  ;;  %v1872_v9 = vld [vmem:[%s2777_s4 + $0x10] sm:$0xff] }
  0x4c   : > { %v811_v57 = vsel %vm808_vm9, %v809_v48, %v810_v11  ;;  %v950_v24 = vsel %vm2863_vm10, %v888_v10, 0  ;;  %vm2866_vm9 = vmpackc.low %vm2864_vm11, %vm2865_vm1  ;;  %v845_v41 = vsel %vm2868_vm15, %v842_v23, 0  ;;  %v958_v43 = vunpack.c.l.b16 %v948_v37  ;;  %1094 = vmatpush.bf16.msra.mxu1 %v1871_v7  ;;  %1236 = vmatpush.bf16.msra.mxu3 %v1872_v9 }
  0x4d   : > { %1780 = vmatmul.msk.bf16.vlgmr.msrb.gmra.mxu1 %vm2854_vm12, %v811_v57  ;;  %v951_v28 = vsel %vm2866_vm9, %v889_v19, 0  ;;  %vm2867_vm14 = vmmov %vm2856_vm3  ;;  %v960_v52 = vunpack.c.l.b16 %v950_v24  ;;  %vm2869_vm12 = vsmask.f32 7424  ;;  %v853_v2 = vunpack.c.l.b16 %v845_v41 }
  0x4e   : > { %1775 = vmatmul.msk.bf16.gmra.mxu3 %vm2855_vm8, %v663_v46  ;;  %v949_v46 = vsel %vm2860_vm6, %v887_v13, 0  ;;  %v961_v31 = vunpack.c.l.b16 %v951_v28  ;;  %v913_v51 = vsel %vm2869_vm12, %v908_v29, %v912_v30  ;;  %vm2870_vm8 = vmmov %vm2856_vm3  ;;  %v914_v26 = vshrl.u32 %v1793_v12, 16  ;;  %v1870_v12 = vld [vmem:[%s2777_s4] sm:$0xff] }
  0x4f   : > { %v959_v14 = vunpack.c.l.b16 %v949_v46  ;;  %v855_v53 = vpack.c.b16 %v853_v2, %v853_v2  ;;  %vm2871_vm4 = vmmov %vm2856_vm3  ;;  %vm2872_vm0 = vcmask 1046528   ;;  %1143 = vmatpush.bf16.msra.mxu2 %v1870_v12  ;;  %v1165_v19 = vshrl.u32 %v2078_v50, 16 }
  0x50   : > { %v963_v55 = vpack.c.b16 %v961_v31, %v960_v52  ;;  %vm2873_vm5 = vmmov %vm2856_vm3  ;;  %v916_v21 = vor.u32 %v914_v26, %v912_v30  ;;  %v1157_v24 = vshrl.u32 %v2089_v59, 16  ;;  %v1160_v52 = vshll.u32 %v2089_v59, 16 }
  0x51   : > { %v962_v54 = vpack.c.b16 %v959_v14, %v958_v43  ;;  %vm2874_vm6 = vmmov %vm2856_vm3  ;;  %v2393_v29 = vrot.slane %v1165_v19, 7  ;;  %v1168_v31 = vshll.u32 %v2078_v50, 16  ;;  %vm1153_vm7 = vsmask.f32 256  ;;  %v2403_v50 = vld [vmem:[%s2776_s3] ss:$0 sm:$0xff] }
  0x52   : > { %v965_v32 = vrot.slane %v963_v55, 1  ;;  %vm2875_vm2 = vmmov %vm2856_vm3  ;;  %v1159_v14 = vrot.slane %v1157_v24, 7  ;;  %v1040_v26 = vrot.slane %v1038_v44, 4  ;;  %vm1154_vm10 = vsmask.f32 4368 }
  0x53   : > { %v964_v1 = vrot.slane %v962_v54, 1  ;;  %vm1155_vm11 = vmor %vm1153_vm7, %vm1154_vm10  ;;  %vm1378_vm1 = vsmask.f32 2304  ;;  %vm1379_vm9 = vsmask.f32 6416 }
  0x54   : > { %v1163_v55 = vrot.slane %v1159_v14, 4  ;;  %v1041_v35 = vor.u32 %v1040_v26, %v2072_v49  ;;  %v2884_v26 = vmov 0 }
  0x55   : > { %1783 = vmatmul.msk.bf16.vlgmr.msrb.gmra.mxu2 %vm2856_vm3, %v854_v20 }
  0x59   : > { %1778 = vmatmul.msk.bf16.gmra.mxu0 %vm2867_vm14, %v720_v25  ;;  %v966_v25 = vsel %vm2872_vm0, %v964_v1, %v965_v32  ;;  %vm2797_vm14 = vcmask 125952  }
  0x5d   : > { %1781 = vmatmul.msk.bf16.gmra.mxu1 %vm2870_vm8, %v810_v11  ;;  %vm1380_vm8 = vmor %vm1378_vm1, %vm1379_vm9 }
  0x5e   : > { %1794 = vmatmul.msk.bf16.vlgmr.msrb.gmra.mxu3 %vm2856_vm3, %v913_v51  ;;  %vm1014_vm3 = vcmask 123904  }
  0x65   : > { %1784 = vmatmul.msk.bf16.gmra.mxu2 %vm2871_vm4, %v855_v53  ;;  %v1170_v53 = vor.u32 %v1168_v31, %v2393_v29 }
  0x69   : > { %1797 = vmatmul.msk.bf16.vlgmr.msra.gmra.mxu0 %vm2873_vm5, %v966_v25 }
  0x6e   : > { %1795 = vmatmul.msk.bf16.gmra.mxu3 %vm2874_vm6, %v916_v21  ;;  %v1381_v21 = vrot.slane %v1157_v24, 5 }
  0x79   : > { %1798 = vmatmul.msk.bf16.gmra.mxu0 %vm2875_vm2, %v965_v32 }
  0x98   : > { %v490_v0 = vpop.f32.mrf.mxu1 }
  0x99   : > { %v455_v22 = vpop.f32.mrf.mxu0 }
  0x9a   : > { %v491_v18 = vadd.f32 %v490_v0, %v455_v22  ;;  %v1382_v22 = vrot.slane %v1160_v52, 6 }
  0xa0   : > { %v492_v36 = vpop.f32.mrf.mxu1 }
  0xa1   : > { %v457_v38 = vpop.f32.mrf.mxu0 }
  0xa2   : > { %v493_v46 = vadd.f32 %v492_v36, %v457_v38  ;;  %v1385_v38 = vrot.slane %v1165_v19, 5  ;;  %v1386_v36 = vrot.slane %v1168_v31, 6  ;;  %v1051_v19 = vunpack.c.h.b16 %v2095_v61 }
  0xa4   : > { %vm2467_vm6 = vcmp.ne.s32.totalorder %v1051_v19, %v2112_v5 }
  0xa5   : > { %v2885_v26 = vsel %vm2467_vm6, 4294967295, %v2884_v26 }
  0xb6   : > { %v460_v39 = vpop.f32.mrf.mxu0 }
  0xb8   : > { %v589_v40 = vpop.f32.mrf.mxu2  ;;  %v495_v45 = vpop.f32.mrf.mxu1 }
  0xb9   : > { %v598_v20 = vadd.f32 %v589_v40, %v491_v18  ;;  %v496_v1 = vadd.f32 %v495_v45, %v460_v39  ;;  %v2405_v40 = vsel %vm1155_vm11, %v1163_v55, %v1170_v53  ;;  %v1172_v53 = vrot.slane %v2393_v29, 4 }
  0xbe   : > { %v462_v16 = vpop.f32.mrf.mxu0 }
  0xc0   : > { %v591_v47 = vpop.f32.mrf.mxu2  ;;  %v497_v48 = vpop.f32.mrf.mxu1 }
  0xc1   : > { %v683_v27 = vpop.f32.mrf.mxu3  ;;  %v599_v28 = vadd.f32 %v591_v47, %v493_v46  ;;  %v1043_v47 = vunpack.c.l.b16 %v2061_v42  ;;  %v1044_v48 = vunpack.c.h.b16 %v2061_v42  ;;  %v1874_v42 = vld [vmem:[%s2777_s4 + $0x20] sm:$0xff]  ;;  %v1258_v46 = vrot.slane %v2101_v63, 4 }
  0xc2   : > { %v692_v15 = vadd.f32 %v683_v27, %v598_v20  ;;  %v2410_v27 = vor.u32 %v1382_v22, %v1381_v21  ;;  %v1873_v20 = vld [vmem:[%s2777_s4 + $0x18] sm:$0xff]  ;;  %1368 = vmatpush.bf16.msrb.mxu2 %v1874_v42  ;;  %v2888_v21 = vmov 0  ;;  %v1180_v22 = vunpack.c.l.b16 %v2405_v40 }
  0xc3   : > { %vm2427_vm15 = vcmp.ne.s32.totalorder %v1043_v47, %v2109_v4  ;;  %vm2432_vm12 = vcmp.ne.s32.totalorder %v1044_v48, %v2112_v5  ;;  %1328 = vmatpush.bf16.msrb.mxu1 %v1873_v20 }
  0xc4   : > { %v1384_v49 = vrot.slane %v2410_v27, 4  ;;  %vm2796_vm4 = vmpackc.low %vm2432_vm12, %vm2427_vm15  ;;  %v1391_v63 = vunpack.c.h.b16 %v2410_v27 }
  0xc6   : > { %v740_v34 = vpop.f32.mrf.mxu0 }
  0xc7   : > { %v749_v23 = vadd.f32 %v740_v34, %v692_v15 }
  0xc8   : > { %v594_v11 = vpop.f32.mrf.mxu2 }
  0xc9   : > { %v685_v56 = vpop.f32.mrf.mxu3  ;;  %v600_v0 = vadd.f32 %v594_v11, %v496_v1  ;;  %v2880_v1 = vmov 0 }
  0xca   : > { %v830_v57 = vpop.f32.mrf.mxu1  ;;  %v693_v51 = vadd.f32 %v685_v56, %v599_v28 }
  0xcb   : > { %v839_v41 = vadd.f32 %v830_v57, %v749_v23 }
  0xce   : > { %v742_v58 = vpop.f32.mrf.mxu0 }
  0xcf   : > { %v750_v25 = vadd.f32 %v742_v58, %v693_v51  ;;  %v1162_v58 = vor.u32 %v1160_v52, %v1159_v14  ;;  %v1018_v14 = vld [vmem:[#allocation3] sm:$0x8]  ;;  %v1260_v51 = vunpack.c.h.b16 %v2097_v62 }
  0xd0   : > { %v596_v60 = vpop.f32.mrf.mxu2 }
  0xd1   : > { %v688_v17 = vpop.f32.mrf.mxu3  ;;  %v2413_v60 = vor.u32 %v1386_v36, %v1385_v38  ;;  %v1173_v24 = vunpack.c.l.b16 %v1162_v58  ;;  %v1174_v31 = vunpack.c.h.b16 %v1162_v58  ;;  %vm2512_vm13 = vcmp.ne.s32.totalorder %v1260_v51, %v2112_v5  ;;  %v1877_v51 = vld [vmem:[%s2777_s4 + $0x38] sm:$0xff] }
  0xd2   : > { %v832_v3 = vpop.f32.mrf.mxu1  ;;  %v694_v34 = vadd.f32 %v688_v17, %v600_v0  ;;  %v1876_v17 = vld [vmem:[%s2777_s4 + $0x30] sm:$0xff]  ;;  %v1181_v0 = vunpack.c.h.b16 %v2405_v40  ;;  %v1187_v40 = vunpack.c.l.b16 %v1172_v53 }
  0xd3   : > { %v840_v44 = vadd.f32 %v832_v3, %v750_v25  ;;  %v1042_v3 = vrot.slane %v1041_v35, 4  ;;  %1516 = vmatpush.bf16.msrb.mxu0 %v1876_v17  ;;  %v2441_v28 = vsel %vm1380_vm8, %v1384_v49, %v2413_v60  ;;  %vm2477_vm2 = vcmp.ne.s32.totalorder %v1173_v24, %v2109_v4 }
  0xd4   : > { %vm2494_vm11 = vcmp.ne.s32.totalorder %v1174_v31, %v2112_v5  ;;  %vm2519_vm8 = vcmp.ne.s32.totalorder %v1391_v63, %v2112_v5  ;;  %v1397_v19 = vunpack.c.l.b16 %v2441_v28 }
  0xd5   : > { %v1058_v52 = vunpack.c.h.b16 %v1042_v3 }
  0xd6   : > { %v745_v13 = vpop.f32.mrf.mxu0 }
  0xd7   : > { %v751_v12 = vadd.f32 %v745_v13, %v694_v34  ;;  %vm2489_vm10 = vcmp.ne.s32.totalorder %v1058_v52, %v2112_v5  ;;  %v1267_v34 = vunpack.c.h.b16 %v2122_v8 }
  0xd8   : > { %v874_v6 = vpop.f32.mrf.mxu2 }
  0xd9   : > { %v690_v10 = vpop.f32.mrf.mxu3  ;;  %v883_v2 = vadd.f32 %v874_v6, %v839_v41  ;;  %v1050_v6 = vunpack.c.l.b16 %v2095_v61  ;;  %v1057_v61 = vunpack.c.l.b16 %v1042_v3 }
  0xda   : > { %v2390_v37 = vpop.f32.mrf.mxu1  ;;  %v1390_v10 = vunpack.c.l.b16 %v2410_v27  ;;  %v1266_v27 = vunpack.c.l.b16 %v2122_v8 }
  0xdb   : > { %vm2462_vm5 = vcmp.ne.s32.totalorder %v1050_v6, %v2109_v4  ;;  %vm2482_vm7 = vcmp.ne.s32.totalorder %v1057_v61, %v2109_v4 }
  0xdc   : > { %vm2457_vm0 = vcmp.ne.s32.totalorder %v1390_v10, %v2109_v4  ;;  %v2889_v21 = vsel %vm2482_vm7, 4294967295, %v2888_v21  ;;  %vm2909_vm7 = vmpackc.low %vm2494_vm11, %vm2477_vm2 }
  0xdd   : > { %v2881_v1 = vsel %vm2457_vm0, 4294967295, %v2880_v1 }
  0xde   : > { %v747_v30 = vpop.f32.mrf.mxu0 }
  0xdf   : > { %v841_v30 = vadd.f32 %v2390_v37, %v751_v12  ;;  %v1259_v37 = vunpack.c.l.b16 %v2097_v62  ;;  %v1064_v62 = vsel %vm2796_vm4, %v1018_v14, 0  ;;  %vm2529_vm4 = vcmp.ne.s32.totalorder %v1180_v22, %v2109_v4 }
  0xe0   : > { %v876_v43 = vpop.f32.mrf.mxu2  ;;  %v1104_v58 = vunpack.c.l.b16 %v1064_v62  ;;  %v2547_v12 = vunpack.c.l.b16 %v1258_v46 }
  0xe1   : > { %v935_v54 = vpop.f32.mrf.mxu3  ;;  %v884_v11 = vadd.f32 %v876_v43, %v840_v44  ;;  %vm2499_vm1 = vcmp.ne.s32.totalorder %v1259_v37, %v2109_v4 }
  0xe2   : > { %v837_v32 = vpop.f32.mrf.mxu1  ;;  %v944_v59 = vadd.f32 %v935_v54, %v883_v2 }
  0xe3   : > { %v2882_v32 = vmov 0 }
  0xe4   : > { %v2883_v32 = vsel %vm2462_vm5, 4294967295, %v2882_v32 }
  0xe6   : > { %v985_v39 = vpop.f32.mrf.mxu0 }
  0xe7   : > { %v994_v16 = vadd.f32 %v985_v39, %v944_v59  ;;  %v2890_v59 = vmov 0  ;;  %v1389_v39 = vrot.slane %v2413_v60, 4  ;;  %v2900_v60 = vmov 0 }
  0xe8   : > { %v879_v45 = vpop.f32.mrf.mxu2  ;;  %v2891_v59 = vsel %vm2489_vm10, 4294967295, %v2890_v59  ;;  %v2901_v60 = vsel %vm2529_vm4, 4294967295, %v2900_v60  ;;  %vm2924_vm4 = vnez %v2889_v21 }
  0xe9   : > { %v937_v56 = vpop.f32.mrf.mxu3  ;;  %v1001_v57 = vadd.f32 %v2403_v50, %v994_v16  ;;  %v885_v2 = vadd.f32 %v879_v45, %v841_v30  ;;  %v1188_v45 = vunpack.c.h.b16 %v1172_v53  ;;  %v1875_v16 = vld [vmem:[%s2777_s4 + $0x28] sm:$0xff]  ;;  %v2551_v42 = vunpack.c.l.b16 %v1389_v39 }
  0xea   : > { %v945_v9 = vadd.f32 %v937_v56, %v884_v11  ;;  %1458 = vmatpush.bf16.msrb.mxu3 %v1875_v16  ;;  %v2587_v14 = vunpack.c.h.b16 %v1389_v39 }
  0xeb   : > { %v1004_v18 = vmax.f32 %v1001_v57, 0.0  ;;  %vm2911_vm10 = vcmp.ne.s32.totalorder %v1188_v45, %v2112_v5 }
  0xed   : > { %v1007_v15 = vpack.c.bf16 %v1004_v18, %v1004_v18  ;;  %v2549_v18 = vunpack.c.h.b16 %v1258_v46  ;;  %v1398_v46 = vunpack.c.h.b16 %v2441_v28 }
  0xee   : > { %v987_v23 = vpop.f32.mrf.mxu0 }
  0xef   : > { %1011 = vst.msk [vmem:[#allocation3 + $0x4] sm:$0xf] %vm2797_vm14, %v1007_v15  ;;  %v995_v41 = vadd.f32 %v987_v23, %v945_v9  ;;  %v1558_v23 = vld [vmem:[#allocation3 + $0x10] sm:$0x1] }
  0xf0   : > { %v881_v43 = vpop.f32.mrf.mxu2  ;;  %1015 = vst.msk [vmem:[#allocation3 + $0x4] sm:$0x3] %vm1014_vm3, %v1931_v33  ;;  %vm2534_vm3 = vcmp.ne.s32.totalorder %v1181_v0, %v2112_v5 }
  0xf1   : > { %v940_v54 = vpop.f32.mrf.mxu3  ;;  %v1002_v55 = vadd.f32 %v2403_v50, %v995_v41 }
  0xf2   : > { %v946_v35 = vadd.f32 %v940_v54, %v885_v2 }
  0xf3   : > { %v1005_v25 = vmax.f32 %v1002_v55, 0.0 }
  0xf5   : > { %v1008_v44 = vpack.c.bf16 %v1005_v25, %v1005_v25 }
  0xf6   : > { %v990_v47 = vpop.f32.mrf.mxu0  ;;  %v1467_v15 = vld [vmem:[#allocation3 + $0x4] sm:$0x8] }
  0xf7   : > { %1012 = vst.msk [vmem:[#allocation3 + $0x8] sm:$0xf] %vm2797_vm14, %v1008_v44  ;;  %v996_v56 = vadd.f32 %v990_v47, %v946_v35  ;;  %v1019_v57 = vld [vmem:[#allocation3 + $0x4] sm:$0xf]  ;;  %vm2904_vm14 = vmpackc.low %vm2467_vm6, %vm2462_vm5  ;;  %vm2561_vm5 = vcmp.ne.s32.totalorder %v1266_v27, %v2109_v4  ;;  %vm2566_vm6 = vcmp.ne.s32.totalorder %v1267_v34, %v2112_v5 }
  0xf8   : > { %v1065_v49 = vsel %vm2904_vm14, %v1019_v57, 0  ;;  %v1150_v3 = vld [vmem:[#allocation3 + $0x4] sm:$0xf]  ;;  %vm2910_vm14 = vcmp.ne.s32.totalorder %v1187_v40, %v2109_v4 }
  0xf9   : > { %v1003_v17 = vadd.f32 %v2403_v50, %v996_v56  ;;  %v942_v20 = vpop.f32.mrf.mxu3  ;;  %v1105_v6 = vunpack.c.l.b16 %v1065_v49  ;;  %v1245_v9 = vld [vmem:[#allocation3 + $0x4] sm:$0xe]  ;;  %v1194_v41 = vsel %vm2909_vm7, %v1150_v3, 0  ;;  %vm2593_vm0 = vmpackc.low %vm2911_vm10, %vm2910_vm14  ;;  %vm2928_vm14 = vcmask 125954  }
  0xfa   : > { %v2585_v43 = vld [vmem:[#allocation3 + $0x4] sm:$0xc]  ;;  %vm2914_vm7 = vmpackc.low %vm2512_vm13, %vm2499_vm1  ;;  %v1561_v7 = vsel %vm2593_vm0, %v1558_v23, 0  ;;  %v1203_v53 = vunpack.c.l.b16 %v1194_v41  ;;  %vm2633_vm1 = vcmp.ne.s32.totalorder %v1397_v19, %v2109_v4  ;;  %vm2923_vm13 = vnez %v2891_v59 }
  0xfb   : > { %v1006_v24 = vmax.f32 %v1003_v17, 0.0  ;;  %v1107_v30 = vpack.c.b16 %v1105_v6, %v1104_v58  ;;  %v1280_v61 = vsel %vm2914_vm7, %v1245_v9, 0  ;;  %vm2915_vm10 = vmpackc.low %vm2432_vm12, %vm2427_vm15  ;;  %vm2916_vm15 = vnez %v2881_v1 }
  0xfc   : > { %v1469_v63 = vsel %vm2915_vm10, %v1467_v15, 0  ;;  %vm2917_vm12 = vmpackc.low %vm2519_vm8, %vm2916_vm15  ;;  %vm2638_vm7 = vcmp.ne.s32.totalorder %v1398_v46, %v2112_v5  ;;  %vm2922_vm10 = vcmask 125952   ;;  %vm2926_vm15 = vnez %v2901_v60 }
  0xfd   : > { %v1009_v52 = vpack.c.bf16 %v1006_v24, %v1006_v24  ;;  %v1111_v31 = vshrl.u32 %v1107_v30, 16  ;;  %v1114_v37 = vshll.u32 %v1107_v30, 16  ;;  %v2630_v62 = vsel %vm2917_vm12, %v2585_v43, 0  ;;  %vm2925_vm9 = vmpackc.low %vm2923_vm13, %vm2924_vm4 }
  0xfe   : > { %v992_v13 = vpop.f32.mrf.mxu0  ;;  %v1869_v2 = vld [vmem:[#allocation3 + $0x4] sm:$0xff]  ;;  %vm2927_vm12 = vmpackc.low %vm2534_vm3, %vm2926_vm15  ;;  %v1289_v36 = vunpack.c.l.b16 %v1280_v61  ;;  %v1478_v39 = vunpack.c.l.b16 %v1469_v63  ;;  %vm2931_vm8 = vnez %v2885_v26  ;;  %v1344_v11 = vunpack.c.l.b16 %v2585_v43 }
  0xff   : > { %v1020_v54 = vld [vmem:[#allocation3 + $0x8] sm:$0xf]  ;;  %1013 = vst.msk [vmem:[#allocation3 + $0xc] sm:$0xf] %vm2922_vm10, %v1009_v52  ;;  %vm2929_vm10 = vcmask 130048   ;;  %v1113_v16 = vrot.slane %v1111_v31, 3  ;;  %v1420_v56 = vunpack.c.l.b16 %v2630_v62  ;;  %v2677_v58 = vunpack.c.l.b16 %v1561_v7 }
 0x100   : > { %v2622_v55 = vld [vmem:[#allocation3 + $0x8] sm:$0xf]  ;;  %v1066_v1 = vsel %vm2925_vm9, %v1020_v54, 0  ;;  %1017 = vst.msk [vmem:[#allocation3 + $0xc] sm:$0xc] %vm2928_vm14, %v1931_v33  ;;  %1809 = vmatmul.msk.bf16.vlgmr.msra.gmra.mxu1 %vm2929_vm10, %v1869_v2  ;;  %vm2930_vm9 = vmpackc.low %vm2566_vm6, %vm2561_vm5  ;;  %v1116_v33 = vrot.slane %v1114_v37, 4  ;;  %vm1409_vm5 = vcmp.ne.s32.totalorder %v2587_v14, %v2112_v5  ;;  %vm2934_vm6 = vcmp.ne.s32.totalorder %v2547_v12, %v2109_v4 }
 0x101   : > { %v1195_v0 = vsel %vm2927_vm12, %v2622_v55, 0  ;;  %v1106_v35 = vunpack.c.l.b16 %v1066_v1  ;;  %v1281_v40 = vsel %vm2930_vm9, %v2622_v55, 0  ;;  %vm2932_vm12 = vnez %v2883_v32  ;;  %1547 = vmatpush.bf16.msra.mxu1 %v1877_v51  ;;  %vm1403_vm14 = vmpackc.low %vm2638_vm7, %vm2633_vm1  ;;  %v1556_v57 = vld [vmem:[#allocation3 + $0x8] sm:$0xf]  ;;  %v1878_v63 = vld [vmem:[%s2777_s4 + $0x40] sm:$0xff] }
 0x102   : > { %v1204_v44 = vunpack.c.l.b16 %v1195_v0  ;;  %vm2933_vm15 = vmpackc.low %vm2931_vm8, %vm2932_vm12  ;;  %v1290_v47 = vunpack.c.l.b16 %v1281_v40  ;;  %v1412_v20 = vsel %vm1403_vm14, %v2622_v55, 0  ;;  %v1117_v6 = vor.u32 %v1116_v33, %v1113_v16 }
 0x103   : > { %v1470_v45 = vsel %vm2933_vm15, %v2622_v55, 0  ;;  %v1108_v27 = vpack.c.b16 %v1106_v35, %v1106_v35  ;;  %vm2935_vm1 = vcmp.ne.s32.totalorder %v2549_v18, %v2112_v5  ;;  %v1345_v50 = vunpack.c.l.b16 %v2622_v55  ;;  %vm2938_vm8 = vmpackc.low %vm2494_vm11, %vm2477_vm2 }
 0x104   : > { %v1479_v48 = vunpack.c.l.b16 %v1470_v45  ;;  %v1206_v34 = vpack.c.b16 %v1204_v44, %v1203_v53  ;;  %v1292_v32 = vpack.c.b16 %v1290_v47, %v1289_v36  ;;  %vm2686_vm7 = vmpackc.low %vm2935_vm1, %vm2934_vm6  ;;  %v2696_v12 = vsel %vm2938_vm8, %v1556_v57, 0 }
 0x105   : > { %v1119_v49 = vshrl.u32 %v1108_v27, 16  ;;  %v1122_v3 = vshll.u32 %v1108_v27, 16  ;;  %v1421_v52 = vunpack.c.l.b16 %v1412_v20  ;;  %vm1294_vm15 = vsmask.f32 6400  ;;  %vm2942_vm11 = vmpackc.low %vm2923_vm13, %vm2924_vm4 }
 0x106   : > { %v1481_v26 = vpack.c.b16 %v1479_v48, %v1478_v39  ;;  %v1211_v17 = vshll.u32 %v1206_v34, 16  ;;  %v1296_v15 = vshrl.u32 %v1292_v32, 16  ;;  %v1299_v10 = vshll.u32 %v1292_v32, 16  ;;  %v1152_v23 = vld [vmem:[#allocation3 + $0xc] sm:$0x1] }
 0x107   : > { %v1121_v19 = vrot.slane %v1119_v49, 3  ;;  %v1124_v46 = vrot.slane %v1122_v3, 4  ;;  %v1196_v18 = vsel %vm2593_vm0, %v1152_v23, 0  ;;  %v1209_v30 = vshrl.u32 %v1206_v34, 16  ;;  %v1246_v61 = vld [vmem:[#allocation3 + $0xc] sm:$0x3] }
 0x108   : > { %v1484_v24 = vshrl.u32 %v1481_v26, 16  ;;  %v1213_v41 = vrot.slane %v1211_v17, 1  ;;  %v1205_v37 = vunpack.c.l.b16 %v1196_v18  ;;  %v1282_v38 = vsel %vm2686_vm7, %v1246_v61, 0  ;;  %v2705_v29 = vld [vmem:[#allocation3 + $0xc] sm:$0xf] }
 0x109   : > { %v1125_v31 = vor.u32 %v1124_v46, %v1121_v19  ;;  %v1487_v51 = vshll.u32 %v1481_v26, 16  ;;  %v1377_v7 = vld [vmem:[#allocation3 + $0xc] sm:$0x7]  ;;  %vm2939_vm0 = vcmp.ne.s32.totalorder %v2551_v42, %v2109_v4  ;;  %v1291_v13 = vunpack.c.l.b16 %v1282_v38 }
 0x10a   : > { %vm2713_vm2 = vmpackc.low %vm1409_vm5, %vm2939_vm0  ;;  %v1298_v2 = vrot.slane %v1296_v15, 1  ;;  %v1301_v54 = vrot.slane %v1299_v10, 2  ;;  %v1471_v53 = vsel %vm2942_vm11, %v2705_v29, 0  ;;  %vm2943_vm10 = vsmask.f32 4352 }
 0x10b   : > { %v1126_v62 = vsel %vm2943_vm10, %v1117_v6, %v1125_v31  ;;  %v1207_v4 = vpack.c.b16 %v1205_v37, %v1205_v37  ;;  %v1480_v42 = vunpack.c.l.b16 %v1471_v53  ;;  %v1486_v25 = vrot.slane %v1484_v24, 3  ;;  %v1557_v26 = vld [vmem:[#allocation3 + $0xc] sm:$0xf]  ;;  %vm2950_vm6 = vmmov %vm2943_vm10 }
 0x10c   : > { %vm2944_vm9 = vcmask 130048   ;;  %v1214_v5 = vor.u32 %v1213_v41, %v1209_v30  ;;  %v1293_v14 = vpack.c.b16 %v1291_v13, %v1291_v13  ;;  %v1413_v22 = vsel %vm2713_vm2, %v1377_v7, 0 }
 0x10d   : > { %1814 = vmatmul.msk.bf16.vlgmr.msra.gmra.mxu2 %vm2944_vm9, %v1126_v62  ;;  %v1423_v1 = vpack.c.b16 %v1421_v52, %v1420_v56  ;;  %v1216_v0 = vshll.u32 %v1207_v4, 16  ;;  %v1482_v36 = vpack.c.b16 %v1480_v42, %v1480_v42  ;;  %v1489_v59 = vrot.slane %v1487_v51, 4  ;;  %vm2946_vm13 = vmmov %vm2944_vm9 }
 0x10e   : > { %1601 = vmatpush.bf16.msra.mxu2 %v1878_v63  ;;  %v1422_v21 = vunpack.c.l.b16 %v1413_v22  ;;  %v1304_v39 = vshrl.u32 %v1293_v14, 16  ;;  %v1307_v35 = vshll.u32 %v1293_v14, 16  ;;  %v1346_v47 = vunpack.c.l.b16 %v1246_v61  ;;  %vm2949_vm5 = vmmov %vm2944_vm9 }
 0x10f   : > { %v1426_v44 = vshrl.u32 %v1423_v1, 16  ;;  %v1429_v40 = vshll.u32 %v1423_v1, 16  ;;  %v1218_v45 = vrot.slane %v1216_v0, 1  ;;  %v1492_v16 = vshrl.u32 %v1482_v36, 16 }
 0x110   : > { %v1495_v33 = vshll.u32 %v1482_v36, 16  ;;  %v1302_v48 = vor.u32 %v1301_v54, %v1298_v2  ;;  %v1306_v27 = vrot.slane %v1304_v39, 1  ;;  %v1309_v34 = vrot.slane %v1307_v35, 2 }
 0x111   : > { %v1424_v32 = vpack.c.b16 %v1422_v21, %v1422_v21  ;;  %vm2945_vm4 = vsmask.f32 7424  ;;  %v1494_v57 = vrot.slane %v1492_v16, 3  ;;  %v1428_v3 = vrot.slane %v1426_v44, 2 }
 0x112   : > { %v1219_v56 = vsel %vm2945_vm4, %v1214_v5, %v1218_v45  ;;  %v1497_v49 = vrot.slane %v1495_v33, 4  ;;  %v1310_v17 = vor.u32 %v1309_v34, %v1306_v27  ;;  %v1431_v20 = vrot.slane %v1429_v40, 3 }
 0x113   : > { %1821 = vmatmul.msk.bf16.vlgmr.msra.gmra.mxu3 %vm2946_vm13, %v1219_v56  ;;  %v1434_v6 = vshrl.u32 %v1424_v32, 16  ;;  %v1437_v9 = vshll.u32 %v1424_v32, 16  ;;  %v1490_v15 = vor.u32 %v1489_v59, %v1486_v25  ;;  %v1348_v19 = vpack.c.b16 %v1346_v47, %v1346_v47  ;;  %v1906_v32 = vld [vmem:[%s2778_s5] ss:$0 sm:$0xff] }
 0x114   : > { %v1498_v10 = vor.u32 %v1497_v49, %v1494_v57  ;;  %vm2947_vm12 = vnez %v2901_v60  ;;  %v1311_v23 = vsel %vm1294_vm15, %v1302_v48, %v1310_v17  ;;  %v1347_v24 = vpack.c.b16 %v1345_v50, %v1344_v11  ;;  %vm2955_vm15 = vmmov %vm2945_vm4 }
 0x115   : > { %vm2948_vm14 = vmpackc.low %vm2534_vm3, %vm2947_vm12  ;;  %v1436_v18 = vrot.slane %v1434_v6, 2  ;;  %v1439_v30 = vrot.slane %v1437_v9, 3  ;;  %1828 = vmatmul.msk.bf16.vlgmr.msrb.gmra.mxu1 %vm2949_vm5, %v1311_v23  ;;  %v1568_v61 = vunpack.c.l.b16 %v2696_v12  ;;  %v1572_v60 = vpack.c.b16 %v2677_v58, %v2677_v58 }
 0x116   : > { %v1560_v46 = vsel %vm2948_vm14, %v1557_v26, 0  ;;  %v1499_v41 = vsel %vm2950_vm6, %v1490_v15, %v1498_v10  ;;  %vm2951_vm3 = vmmov %vm2949_vm5  ;;  %v1432_v63 = vor.u32 %v1431_v20, %v1428_v3  ;;  %v1350_v43 = vrot.slane %v1348_v19, 2 }
 0x117   : > { %v1569_v8 = vunpack.c.l.b16 %v1560_v46  ;;  %1849 = vmatmul.msk.bf16.vlgmr.msrb.gmra.mxu0 %vm2951_vm3, %v1499_v41  ;;  %v1440_v52 = vor.u32 %v1439_v30, %v1436_v18  ;;  %v1581_v37 = vshll.u32 %v1572_v60, 16  ;;  %vm2952_vm1 = vsmask.f32 5376  ;;  %vm2954_vm8 = vmmov %vm2951_vm3 }
 0x118   : > { %v1349_v38 = vrot.slane %v1347_v24, 2  ;;  %vm2953_vm7 = vcmask 1045504   ;;  %v1529_v58 = vunpack.c.l.b16 %v2705_v29  ;;  %vm2956_vm0 = vmmov %vm2951_vm3  ;;  %vm2959_vm10 = vcmask 125952  }
 0x119   : > { %v1571_v31 = vpack.c.b16 %v1569_v8, %v1568_v61  ;;  %v1441_v11 = vsel %vm2952_vm1, %v1432_v63, %v1440_v52  ;;  %v1583_v12 = vrot.slane %v1581_v37, 1  ;;  %vm2957_vm2 = vmmov %vm2956_vm0 }
 0x11a   : > { %v1351_v7 = vsel %vm2953_vm7, %v1349_v38, %v1350_v43  ;;  %v1530_v53 = vpack.c.b16 %v1529_v58, %v1345_v50  ;;  %vm2958_vm11 = vmmov %vm2956_vm0 }
 0x11b   : > { %v1576_v51 = vshll.u32 %v1571_v31, 16  ;;  %v1574_v28 = vshrl.u32 %v1571_v31, 16  ;;  %vm2960_vm9 = vmmov %vm2959_vm10 }
 0x11d   : > { %v1578_v13 = vrot.slane %v1576_v51, 1  ;;  %1835 = vmatmul.msk.bf16.vlgmr.msrb.gmra.mxu2 %vm2954_vm8, %v1351_v7 }
 0x11f   : > { %v1579_v2 = vor.u32 %v1578_v13, %v1574_v28 }
 0x121   : > { %v1584_v54 = vsel %vm2955_vm15, %v1579_v2, %v1583_v12 }
 0x123   : > { %1842 = vmatmul.msk.bf16.vlgmr.msrb.gmra.mxu3 %vm2956_vm0, %v1441_v11 }
 0x125   : > { %1856 = vmatmul.msk.bf16.vlgmr.msra.gmra.mxu1 %vm2957_vm2, %v1530_v53 }
 0x12d   : > { %1863 = vmatmul.msk.bf16.vlgmr.msra.gmra.mxu2 %vm2958_vm11, %v1584_v54 }
 0x17d   : > { %v1096_v62 = vpop.f32.mrf.mxu1 }
 0x185   : > { %v1098_v4 = vpop.f32.mrf.mxu1 }
 0x190   : > { %v1145_v42 = vpop.f32.mrf.mxu2 }
 0x191   : > { %v1146_v22 = vadd.f32 %v1145_v42, %v1096_v62 }
 0x192   : > { %v1330_v5 = vpop.f32.mrf.mxu1 }
 0x194   : > { %v1518_v44 = vpop.f32.mrf.mxu0 }
 0x196   : > { %v1238_v25 = vpop.f32.mrf.mxu3 }
 0x197   : > { %v1243_v29 = vadd.f32 %v1238_v25, %v1146_v22 }
 0x198   : > { %v1147_v14 = vpop.f32.mrf.mxu2 }
 0x199   : > { %v1335_v59 = vadd.f32 %v1330_v5, %v1243_v29  ;;  %v1148_v21 = vadd.f32 %v1147_v14, %v1098_v4 }
 0x19a   : > { %v1332_v36 = vpop.f32.mrf.mxu1 }
 0x19c   : > { %v1520_v57 = vpop.f32.mrf.mxu0 }
 0x19e   : > { %v1240_v1 = vpop.f32.mrf.mxu3 }
 0x19f   : > { %v1244_v50 = vadd.f32 %v1240_v1, %v1148_v21 }
 0x1a0   : > { %v1370_v0 = vpop.f32.mrf.mxu2 }
 0x1a1   : > { %v1375_v39 = vadd.f32 %v1370_v0, %v1335_v59  ;;  %v1336_v16 = vadd.f32 %v1332_v36, %v1244_v50 }
 0x1a2   : > { %v1549_v33 = vpop.f32.mrf.mxu1 }
 0x1a6   : > { %v1460_v55 = vpop.f32.mrf.mxu3 }
 0x1a7   : > { %v1465_v35 = vadd.f32 %v1460_v55, %v1375_v39 }
 0x1a8   : > { %v1372_v40 = vpop.f32.mrf.mxu2 }
 0x1a9   : > { %v1523_v45 = vadd.f32 %v1518_v44, %v1465_v35  ;;  %v1376_v47 = vadd.f32 %v1372_v40, %v1336_v16 }
 0x1aa   : > { %v1551_v20 = vpop.f32.mrf.mxu1 }
 0x1ab   : > { %v1554_v34 = vadd.f32 %v1549_v33, %v1523_v45 }
 0x1ae   : > { %v1462_v48 = vpop.f32.mrf.mxu3 }
 0x1af   : > { %v1466_v27 = vadd.f32 %v1462_v48, %v1376_v47 }
 0x1b0   : > { %v1603_v26 = vpop.f32.mrf.mxu2 }
 0x1b1   : > { %v1608_v56 = vadd.f32 %v1603_v26, %v1554_v34  ;;  %v1524_v49 = vadd.f32 %v1520_v57, %v1466_v27 }
 0x1b3   : > { %v1614_v3 = vadd.f32 %v1906_v32, %v1608_v56  ;;  %v1555_v9 = vadd.f32 %v1551_v20, %v1524_v49 }
 0x1b5   : > { %v1616_v17 = vmax.f32 %v1614_v3, 0.0 }
 0x1b7   : > { %v1618_v6 = vpack.c.bf16 %v1616_v17, %v1616_v17 }
 0x1b8   : > { %v1605_v15 = vpop.f32.mrf.mxu2 }
 0x1b9   : > { %1620 = vst.msk [vmem:[%s339_s29] sm:$0xf] %vm2959_vm10, %v1618_v6  ;;  %v1609_v10 = vadd.f32 %v1605_v15, %v1555_v9 }
 0x1bb   : > { %v1615_v19 = vadd.f32 %v1906_v32, %v1609_v10 }
 0x1bd   : > { %v1617_v46 = vmax.f32 %v1615_v19, 0.0 }
 0x1bf   : > { %v1619_v23 = vpack.c.bf16 %v1617_v46, %v1617_v46 }
 0x1c1   : > { %1621 = vst.msk [vmem:[%s339_s29 + $0x4] sm:$0xf] %vm2960_vm9, %v1619_v23 }
 0x1c2 PF: > { %s16_s1 = sadd.s32 1, %s1929_s1   ;;  %s2961_s21 = smov %s1925_s22 }
 0x1c3   : > { %p13_p5 = scmp.ge.s32.totalorder %s16_s1, 4   ;;  %s2962_s22 = smov %s2964_s23 }
 0x1c5   :  { %15 = sbr.rel (!%p13_p5) target bundleno = 2 (0x2), region = 99 }

// kernel: unet_forward.12
= control target key start
LH: loop header
LB: loop body
LE: loop exit
PB: predicated region body
PF: predicated region fallthrough
CT: control target
= control target key end

     0   :  { %s3674_s21 = smov 0   ;;  %s3676_s22 = smov 0   ;;  %s5549_s0 = inlined_call_operand.vmem [shape: bf16[2,128,8], index: 0, kind: input, shape index: {}, may-alias: {0,1}]   ;;  %s5550_s1 = inlined_call_operand.vmem [shape: bf16[2,128,8], index: 1, kind: input, shape index: {}, may-alias: {0,1}]   ;;  %s5551_s2 = inlined_call_operand.vmem [shape: bf16[9,8,8], index: 2, kind: input, shape index: {}]   ;;  %s5552_s3 = inlined_call_operand.vmem [shape: f32[1,8], index: 3, kind: input, shape index: {}]   ;;  %s5553_s4 = inlined_call_operand.vmem [shape: bf16[9,8,8], index: 4, kind: input, shape index: {}]   ;;  %s5554_s5 = inlined_call_operand.vmem [shape: f32[1,8], index: 5, kind: input, shape index: {}]   ;;  %s5555_s6 = inlined_call_operand.vmem [shape: bf16[2,64,8], index: 6, kind: output, shape index: {}]  }
   0x1   :  { %s3678_s23 = smov 0  }
   0x2 LB: > { %s35_s24 = sadd.s32 1, %s3632_s22  ;;  %p3339_p0 = scmp.ge.s32.totalorder %s3636_s23, 1  ;;  %s3636_s23 = sphi %s3678_s23, %s16_s23   ;;  %s3632_s22 = sphi %s3676_s22, %s5981_s22   ;;  %s3628_s21 = sphi %s3674_s21, %s5980_s21  }
   0x3   : > { %p37_p1 = scmp.ge.s32.totalorder %s35_s24, 2  ;;  %p280_p2 = scmp.lt.s32.totalorder %s3636_s23, 3 }
   0x5   : > { %s5983_s24 = smov (%p37_p1, %s35_s24), 0  ;;  %p281_p3 = pnand %p3339_p0, %p280_p2 }
   0x7   : > { %284 = sbr.rel (%p281_p3) target bundleno = 713 (0x2c9), region = 44 }
   0xc   : > { %v617_v0 = vld [vmem:[%s5551_s2] sm:$0xf]  ;;  %vm5556_vm0 = vcmask 1043456   ;;  %v3346_v1 = vld [vmem:[%s5551_s2 + $0x4] sm:$0xf]  ;;  %p339_p4 = scmp.lt.s32.totalorder %s3628_s21, 1  ;;  %v383_v2 = vlaneseq }
   0xd   : > { %v789_v3 = vsel %vm5556_vm0, %v617_v0, 0  ;;  %v712_v4 = vsel %vm5556_vm0, %v3346_v1, 0  ;;  %v3377_v5 = vld [vmem:[%s5551_s2 + $0x8] sm:$0xf]  ;;  %v3383_v8 = vld [vmem:[%s5551_s2 + $0xc] sm:$0xf] }
   0xe   : > { %3585 = vmatpush.bf16.msra.mxu3 %v789_v3  ;;  %721 = vmatpush.bf16.msra.mxu0 %v712_v4  ;;  %s5985_s21 = smov (!%p339_p4, %s3628_s21), 1  ;;  %v3705_v6 = vshrl.u32 %v383_v2, 7  ;;  %v1044_v7 = vsel %vm5556_vm0, %v3377_v5, 0  ;;  %vm5557_vm1 = vcmask 60416   ;;  %v1144_v11 = vsel %vm5556_vm0, %v3383_v8, 0 }
   0xf   : > { %798 = vmatpush.bf16.msra.mxu1 %v789_v3  ;;  %s3553_s9 = sshll.u32 %s5985_s21, 6  ;;  %3586 = vmatpush.bf16.msra.mxu2 %v1044_v7  ;;  %v5611_v34 = vmov 0  ;;  %vm5565_vm10 = vcmask 64512   ;;  %v5613_v35 = vmov 0  ;;  %v5569_v51 = vmov 0  }
  0x10   : > { %v3713_v9 = vadd.s32 64, %v3705_v6  ;;  %v3716_v10 = vadd.s32 72, %v3705_v6  ;;  %s3555_s10 = sadd.s32 32, %s3553_s9  ;;  %s3731_s16 = scalar_lea.vmem %s5549_s0, %s3553_s9  ;;  %v385_v16 = vadd.s32 8, %v3705_v6  ;;  %v398_v18 = vand.u32 7, %v3705_v6 }
  0x11   : > { %s3722_s13 = scalar_lea.vmem %s5550_s1, %s3555_s10  ;;  %v514_v17 = vld [vmem:[%s3731_s16] sm:$0xf]  ;;  %v515_v19 = vld [vmem:[%s3731_s16 + $0x4] sm:$0xf]  ;;  %v516_v20 = vld [vmem:[%s3731_s16 + $0x8] sm:$0xf] }
  0x12   : > { %1053 = vmatpush.bf16.msrb.mxu0 %v1044_v7  ;;  %v454_v12 = vand.u32 7, %v3713_v9  ;;  %v461_v13 = vand.u32 7, %v3716_v10  ;;  %1153 = vmatpush.bf16.msrb.mxu3 %v1144_v11  ;;  %v531_v14 = vld [vmem:[%s3722_s13] sm:$0xf]  ;;  %v532_v15 = vld [vmem:[%s3722_s13 + $0x4] sm:$0xf]  ;;  %v3856_v11 = vunpack.c.l.b16 %v5569_v51 }
  0x13   : > { %539 = vst.msk [vmem:[#allocation2 + $0x20] sm:$0xf] %vm5557_vm1, %v531_v14  ;;  %v405_v21 = vand.u32 7, %v385_v16  ;;  %v517_v23 = vld [vmem:[%s3731_s16 + $0xc] sm:$0xf]  ;;  %vm547_vm6 = vcmp.ne.s32.totalorder %v398_v18, 0 }
  0x14   : > { %540 = vst.msk [vmem:[#allocation2 + $0x24] sm:$0xf] %vm5557_vm1, %v532_v15  ;;  %vm555_vm2 = vcmp.ne.s32.totalorder %v454_v12, 0  ;;  %vm556_vm3 = vcmp.ne.s32.totalorder %v461_v13, 0  ;;  %v518_v26 = vld [vmem:[%s3731_s16 + $0x10] sm:$0xf]  ;;  %vm3775_vm9 = vmpackc.low %vm547_vm6, %vm547_vm6 }
  0x15   : > { %vm3744_vm4 = vmpackc.low %vm555_vm2, %vm555_vm2  ;;  %523 = vst.msk [vmem:[#allocation2] sm:$0xf] %vm5557_vm1, %v514_v17  ;;  %vm548_vm7 = vcmp.ne.s32.totalorder %v405_v21, 0  ;;  %vm3770_vm8 = vcmp.ne.s32.totalorder %v405_v21, 7  ;;  %v519_v32 = vld [vmem:[%s3731_s16 + $0x14] sm:$0xf] }
  0x16   : > { %vm3750_vm5 = vmpackc.low %vm556_vm3, %vm556_vm3  ;;  %524 = vst.msk [vmem:[#allocation2 + $0x4] sm:$0xf] %vm5557_vm1, %v515_v19  ;;  %v5612_v34 = vsel %vm3775_vm9, 4294967295, %v5611_v34  ;;  %v3789_v38 = vadd.s32 16, %v3705_v6  ;;  %v3792_v39 = vadd.s32 24, %v3705_v6  ;;  %v3799_v43 = vadd.s32 32, %v3705_v6 }
  0x17   : > { %525 = vst.msk [vmem:[#allocation2 + $0x8] sm:$0xf] %vm5557_vm1, %v516_v20  ;;  %vm3780_vm11 = vmpackc.low %vm548_vm7, %vm548_vm7  ;;  %v3806_v46 = vadd.s32 40, %v3705_v6  ;;  %v520_v55 = vld [vmem:[%s3731_s16 + $0x18] sm:$0xf]  ;;  %vm866_vm6 = vcmask 1040384   ;;  %v3868_v19 = vunpack.c.h.b16 %v5569_v51 }
  0x18   : > { %526 = vst.msk [vmem:[#allocation2 + $0xc] sm:$0xf] %vm5557_vm1, %v517_v23  ;;  %v5614_v35 = vsel %vm3780_vm11, 4294967295, %v5613_v35  ;;  %vm847_vm12 = vmpackc.low %vm3770_vm8, %vm3770_vm8  ;;  %v412_v53 = vand.u32 7, %v3789_v38  ;;  %v419_v54 = vand.u32 7, %v3792_v39  ;;  %v426_v59 = vand.u32 7, %v3799_v43 }
  0x19   : > { %527 = vst.msk [vmem:[#allocation2 + $0x10] sm:$0xf] %vm5557_vm1, %v518_v26  ;;  %v3816_v52 = vsel %vm847_vm12, 65537, %v5569_v51  ;;  %v521_v60 = vld [vmem:[%s3731_s16 + $0x1c] sm:$0xf]  ;;  %v433_v62 = vand.u32 7, %v3806_v46 }
  0x1a   : > { %v3757_v25 = vld [vmem:[#allocation2 + $0x20] sm:$0xf]  ;;  %528 = vst.msk [vmem:[#allocation2 + $0x14] sm:$0xf] %vm5557_vm1, %v519_v32  ;;  %vm5558_vm13 = vsmask.f32 7424 }
  0x1b   : > { %v3761_v27 = vld [vmem:[#allocation2 + $0x24] sm:$0xf]  ;;  %v615_v28 = vsel %vm3744_vm4, %v3757_v25, 0  ;;  %v5568_v61 = vrot.slane %v3816_v52, 7  ;;  %529 = vst.msk [vmem:[#allocation2 + $0x18] sm:$0xf] %vm5557_vm1, %v520_v55 }
  0x1c   : > { %v616_v29 = vsel %vm3750_vm5, %v3761_v27, 0  ;;  %v766_v30 = vunpack.c.l.b16 %v615_v28  ;;  %v567_v37 = vld [vmem:[#allocation2] sm:$0xf]  ;;  %vm559_vm14 = vcmp.ne.s32.totalorder %v412_v53, 7  ;;  %530 = vst.msk [vmem:[#allocation2 + $0x1c] sm:$0xf] %vm5557_vm1, %v521_v60 }
  0x1d   : > { %v767_v33 = vunpack.c.l.b16 %v616_v29  ;;  %v3557_v40 = vld [vmem:[#allocation2] sm:$0xff]  ;;  %v607_v42 = vsel %vm3775_vm9, %v567_v37, 0  ;;  %vm560_vm15 = vcmp.ne.s32.totalorder %v419_v54, 7  ;;  %vm561_vm2 = vcmp.ne.s32.totalorder %v426_v59, 7  ;;  %vm848_vm3 = vmpackc.low %vm559_vm14, %vm559_vm14  ;;  %5615 = vst [vmem:[#allocation4_spill] sm:$0xff] %v3856_v11  ;;  %s3556_s9 = sshll.u32 %s5985_s21, 5 }
  0x1e   : > { %v3794_v41 = vld [vmem:[#allocation2 + $0x4] sm:$0xf]  ;;  %v758_v45 = vunpack.c.l.b16 %v607_v42  ;;  %v651_v48 = vshrl.u32 %v3557_v40, 16  ;;  %v653_v49 = vshll.u32 %v3557_v40, 16  ;;  %vm562_vm7 = vcmp.ne.s32.totalorder %v433_v62, 7  ;;  %vm849_vm8 = vmpackc.low %vm560_vm15, %vm560_vm15  ;;  %5619 = vst [vmem:[#allocation6_spill] sm:$0xff] %v3868_v19  ;;  %s5498_s12 = scalar_lea.vmem %s5555_s6, %s3556_s9 }
  0x1f   : > { %v772_v36 = vpack.c.b16 %v767_v33, %v766_v30  ;;  %v608_v44 = vsel %vm3780_vm11, %v3794_v41, 0  ;;  %v3808_v47 = vld [vmem:[#allocation2 + $0x8] sm:$0xff]  ;;  %v3843_v2 = vsel %vm848_vm3, 65537, %v5569_v51  ;;  %vm867_vm12 = vcmask 1044484   ;;  %vm850_vm0 = vmpackc.low %vm561_vm2, %vm561_vm2  ;;  %v3415_v15 = vld [vmem:[%s5551_s2 + $0x14] sm:$0xf] }
  0x20   : > { %v759_v50 = vunpack.c.l.b16 %v608_v44  ;;  %v655_v56 = vrot.slane %v653_v49, 1  ;;  %v658_v57 = vshll.u32 %v3808_v47, 16  ;;  %v873_v3 = vrot.slane %v5568_v61, 4  ;;  %vm851_vm14 = vmpackc.low %vm562_vm7, %vm562_vm7  ;;  %v569_v31 = vld [vmem:[#allocation2 + $0x8] sm:$0xf] }
  0x21   : > { %3376 = vmatmul.msk.bf16.vlgmr.msra.gmra.mxu3 %vm5565_vm10, %v772_v36  ;;  %v3848_v4 = vsel %vm849_vm8, 65537, %v5569_v51  ;;  %v874_v5 = vrot.slane %v3843_v2, 7  ;;  %v3852_v7 = vsel %vm850_vm0, 65537, %v5569_v51  ;;  %v3859_v14 = vsel %vm851_vm14, 65537, %v5569_v51  ;;  %vm3862_vm15 = vmor %vm866_vm6, %vm867_vm12  ;;  %v3877_v37 = vld [vmem:[#allocation2 + $0xc] sm:$0xf] }
  0x22   : > { %v768_v58 = vpack.c.b16 %v759_v50, %v758_v45  ;;  %v656_v63 = vor.u32 %v655_v56, %v651_v48  ;;  %v3826_v0 = vrot.slane %v658_v57, 1  ;;  %v877_v8 = vrot.slane %v3848_v4, 7  ;;  %5616 = vst [vmem:[#allocation5_spill] sm:$0xff] %v3859_v14  ;;  %v3891_v49 = vld [vmem:[#allocation2 + $0x10] sm:$0xf] }
  0x23   : > { %v876_v16 = vrot.slane %v874_v5, 4  ;;  %v880_v17 = vrot.slane %v3852_v7, 7  ;;  %v875_v20 = vsel %vm3862_vm15, %v873_v3, %v874_v5  ;;  %v883_v23 = vrot.slane %v3859_v14, 7  ;;  %v3900_v57 = vld [vmem:[#allocation2 + $0x14] sm:$0xf] }
  0x24   : > { %3372 = vmatmul.msk.bf16.vlgmr.msra.gmra.mxu1 %vm5565_vm10, %v768_v58  ;;  %v661_v1 = vsel %vm5558_vm13, %v656_v63, %v3826_v0  ;;  %v879_v21 = vrot.slane %v877_v8, 4  ;;  %v912_v29 = vunpack.c.l.b16 %v875_v20  ;;  %v913_v30 = vunpack.c.h.b16 %v875_v20  ;;  %v3912_v3 = vld [vmem:[#allocation2 + $0x10] sm:$0xff] }
  0x25   : > { %3367 = vmatmul.msk.bf16.vlgmr.msra.gmra.mxu0 %vm5565_vm10, %v661_v1  ;;  %v878_v26 = vsel %vm3862_vm15, %v876_v16, %v877_v8  ;;  %v882_v28 = vrot.slane %v880_v17, 4  ;;  %v5624_v63 = vmov 0  ;;  %v5628_v8 = vmov 0 }
  0x26   : > { %v881_v32 = vsel %vm3862_vm15, %v879_v21, %v880_v17  ;;  %v919_v33 = vunpack.c.l.b16 %v878_v26  ;;  %v920_v36 = vunpack.c.h.b16 %v878_v26  ;;  %vm916_vm0 = vcmp.ne.s32.totalorder %v912_v29, %v3856_v11 }
  0x27   : > { %v884_v40 = vsel %vm3862_vm15, %v882_v28, %v883_v23  ;;  %vm917_vm2 = vcmp.ne.s32.totalorder %v913_v30, %v3868_v19  ;;  %v926_v42 = vunpack.c.l.b16 %v881_v32  ;;  %v927_v45 = vunpack.c.h.b16 %v881_v32 }
  0x28   : > { %vm3885_vm3 = vmpackc.low %vm917_vm2, %vm916_vm0  ;;  %vm923_vm6 = vcmp.ne.s32.totalorder %v919_v33, %v3856_v11  ;;  %vm924_vm7 = vcmp.ne.s32.totalorder %v920_v36, %v3868_v19  ;;  %v933_v48 = vunpack.c.l.b16 %v884_v40  ;;  %v934_v55 = vunpack.c.h.b16 %v884_v40 }
  0x29   : > { %vm3893_vm8 = vmpackc.low %vm924_vm7, %vm923_vm6  ;;  %vm930_vm12 = vcmp.ne.s32.totalorder %v926_v42, %v3856_v11  ;;  %v977_v56 = vsel %vm3885_vm3, %v569_v31, 0  ;;  %vm931_vm14 = vcmp.ne.s32.totalorder %v927_v45, %v3868_v19  ;;  %vm3916_vm7 = vcmp.ne.s32.totalorder %v454_v12, 7 }
  0x2a   : > { %vm937_vm0 = vcmp.ne.s32.totalorder %v933_v48, %v3856_v11  ;;  %v978_v58 = vsel %vm3893_vm8, %v3877_v37, 0  ;;  %v1001_v60 = vunpack.c.l.b16 %v977_v56  ;;  %vm3907_vm2 = vmpackc.low %vm931_vm14, %vm930_vm12  ;;  %vm938_vm6 = vcmp.ne.s32.totalorder %v934_v55, %v3868_v19 }
  0x2b   : > { %v5625_v63 = vsel %vm3907_vm2, 4294967295, %v5624_v63  ;;  %v1002_v1 = vunpack.c.l.b16 %v978_v58  ;;  %vm3920_vm1 = vmpackc.low %vm938_vm6, %vm937_vm0  ;;  %v979_v16 = vsel %vm3907_vm2, %v3891_v49, 0  ;;  %v1091_v17 = vsel %vm3775_vm9, %v3794_v41, 0 }
  0x2c   : > { %v5629_v8 = vsel %vm3920_vm1, 4294967295, %v5628_v8  ;;  %v980_v9 = vsel %vm3920_vm1, %v3900_v57, 0  ;;  %v1003_v12 = vunpack.c.l.b16 %v979_v16  ;;  %v1092_v21 = vsel %vm3780_vm11, %v569_v31, 0  ;;  %v4052_v16 = vld [vmem:[#allocation2 + $0x18] sm:$0xff] }
  0x2d   : > { %v1011_v20 = vpack.c.b16 %v1002_v1, %v1001_v60  ;;  %v1004_v26 = vunpack.c.l.b16 %v980_v9  ;;  %v1113_v28 = vunpack.c.l.b16 %v1091_v17  ;;  %v1114_v29 = vunpack.c.l.b16 %v1092_v21 }
  0x2e   : > { %v662_v32 = vshrl.u32 %v3808_v47, 16  ;;  %v666_v33 = vshll.u32 %v3912_v3, 16  ;;  %vm549_vm14 = vcmp.ne.s32.totalorder %v412_v53, 0  ;;  %vm550_vm0 = vcmp.ne.s32.totalorder %v419_v54, 0 }
  0x2f   : > { %v3935_v30 = vrot.slane %v1011_v20, 1  ;;  %v1012_v36 = vpack.c.b16 %v1004_v26, %v1003_v12  ;;  %v1123_v40 = vpack.c.b16 %v1114_v29, %v1113_v28  ;;  %vm3943_vm6 = vmpackc.low %vm549_vm14, %vm549_vm14  ;;  %v3948_v45 = vadd.s32 48, %v3705_v6 }
  0x30   : > { %v664_v48 = vor.u32 %v662_v32, %v3826_v0  ;;  %v3951_v47 = vrot.slane %v666_v33, 1  ;;  %vm3953_vm12 = vmpackc.low %vm550_vm0, %vm550_vm0  ;;  %v5632_v55 = vmov 0  ;;  %v609_v38 = vsel %vm3943_vm6, %v569_v31, 0 }
  0x31   : > { %v5633_v55 = vsel %vm3953_vm12, 4294967295, %v5632_v55  ;;  %v1871_v39 = vsel %vm3943_vm6, 65537, %v5569_v51  ;;  %v3962_v53 = vrot.slane %v1012_v36, 1  ;;  %3384 = vmatmul.msk.bf16.vlgmr.msrb.gmra.mxu3 %vm5565_vm10, %v1123_v40  ;;  %v610_v54 = vsel %vm3953_vm12, %v3877_v37, 0 }
  0x32   : > { %v760_v0 = vunpack.c.l.b16 %v609_v38  ;;  %v3971_v56 = vsel %vm3953_vm12, 65537, %v5569_v51  ;;  %v669_v31 = vsel %vm5558_vm13, %v664_v48, %v3951_v47  ;;  %v761_v58 = vunpack.c.l.b16 %v610_v54  ;;  %v533_v54 = vld [vmem:[%s3722_s13 + $0x8] sm:$0xf] }
  0x33   : > { %v1900_v60 = vshll.u32 %v1871_v39, 16  ;;  %v1904_v1 = vshrl.u32 %v1871_v39, 16  ;;  %vm3977_vm14 = vcmp.ne.s32.totalorder %v461_v13, 7  ;;  %vm5636_vm0 = vcmask 1046528  }
  0x34   : > { %v1021_v17 = vsel %vm5636_vm0, %v3935_v30, %v3962_v53  ;;  %v1910_v9 = vshll.u32 %v3971_v56, 16  ;;  %v3987_v12 = vadd.s32 56, %v3705_v6  ;;  %v769_v20 = vpack.c.b16 %v761_v58, %v760_v0 }
  0x35   : > { %3368 = vmatmul.msk.bf16.gmra.mxu0 %vm5565_vm10, %v669_v31  ;;  %3379 = vmatmul.msk.bf16.vlgmr.msra.gmra.mxu2 %vm5565_vm10, %v1021_v17  ;;  %v3990_v21 = vrot.slane %v1900_v60, 5  ;;  %v1906_v10 = vrot.slane %v1904_v1, 4  ;;  %v5572_v13 = vand.u32 7, %v3948_v45  ;;  %vm1878_vm2 = vsmask.f32 7440 }
  0x36   : > { %v5571_v26 = vand.u32 7, %v3987_v12  ;;  %3373 = vmatmul.msk.bf16.gmra.mxu1 %vm5565_vm10, %v769_v20  ;;  %v4002_v29 = vrot.slane %v1910_v9, 5  ;;  %v885_v32 = vrot.slane %v883_v23, 4  ;;  %v1093_v40 = vsel %vm3943_vm6, %v3877_v37, 0  ;;  %vm5638_vm10 = vmpackc.low %vm3916_vm7, %vm3916_vm7 }
  0x37   : > { %v1907_v28 = vor.u32 %v1906_v10, %v3990_v21  ;;  %vm563_vm11 = vcmp.ne.s32.totalorder %v5572_v13, 7  ;;  %v864_v48 = vsel %vm5638_vm10, 65537, %v5569_v51  ;;  %v5640_v38 = vmov 0 }
  0x38   : > { %vm564_vm0 = vcmp.ne.s32.totalorder %v5571_v26, 7  ;;  %vm852_vm13 = vmpackc.low %vm563_vm11, %vm563_vm11  ;;  %vm5639_vm11 = vsmask.f32 3328  ;;  %v1094_v31 = vsel %vm3953_vm12, %v3891_v49, 0  ;;  %v1115_v1 = vunpack.c.l.b16 %v1093_v40 }
  0x39   : > { %v1908_v33 = vrot.slane %v1907_v28, 4  ;;  %vm853_vm1 = vmpackc.low %vm564_vm0, %vm564_vm0  ;;  %v4011_v36 = vsel %vm852_vm13, 65537, %v5569_v51  ;;  %v892_v17 = vrot.slane %v864_v48, 7  ;;  %v4055_v28 = vld [vmem:[#allocation2 + $0x18] sm:$0xf]  ;;  %v1116_v61 = vunpack.c.l.b16 %v1094_v31 }
  0x3a   : > { %5637 = vst [vmem:[#allocation7_spill] sm:$0xff] %v4011_v36  ;;  %vm4023_vm9 = vmor %vm5639_vm11, %vm1878_vm2  ;;  %v4028_v23 = vsel %vm853_vm1, 65537, %v5569_v51  ;;  %v886_v39 = vrot.slane %v4011_v36, 7  ;;  %vm5643_vm1 = vcmask 60416   ;;  %v5644_v48 = vmov 0 }
  0x3b   : > { %v5641_v38 = vsel %vm4023_vm9, 4294967295, %v5640_v38  ;;  %vm5642_vm13 = vmpackc.low %vm3977_vm14, %vm3977_vm14  ;;  %v4043_v5 = vsel %vm4023_vm9, %v1908_v33, %v4002_v29  ;;  %v889_v0 = vrot.slane %v4028_v23, 7  ;;  %541 = vst.msk [vmem:[#allocation2 + $0x28] sm:$0xf] %vm5643_vm1, %v533_v54  ;;  %v670_v54 = vshrl.u32 %v3912_v3, 16 }
  0x3c   : > { %v4038_v37 = vsel %vm5642_vm13, 65537, %v5569_v51  ;;  %v887_v58 = vsel %vm3862_vm15, %v885_v32, %v886_v39  ;;  %v888_v60 = vrot.slane %v886_v39, 4  ;;  %v4062_v39 = vld [vmem:[#allocation2 + $0x1c] sm:$0xf]  ;;  %vm551_vm14 = vcmp.ne.s32.totalorder %v426_v59, 0 }
  0x3d   : > { %v940_v9 = vunpack.c.l.b16 %v887_v58  ;;  %v941_v20 = vunpack.c.h.b16 %v887_v58  ;;  %v895_v10 = vrot.slane %v4038_v37, 7  ;;  %v1124_v58 = vpack.c.b16 %v1116_v61, %v1115_v1  ;;  %vm4079_vm1 = vmpackc.low %vm551_vm14, %vm551_vm14 }
  0x3e   : > { %v890_v33 = vsel %vm3862_vm15, %v888_v60, %v889_v0  ;;  %v672_v51 = vor.u32 %v670_v54, %v3951_v47  ;;  %v674_v60 = vshll.u32 %v4052_v16, 16  ;;  %vm552_vm13 = vcmp.ne.s32.totalorder %v433_v62, 0 }
  0x3f   : > { %vm944_vm10 = vcmp.ne.s32.totalorder %v940_v9, %v3856_v11  ;;  %vm945_vm2 = vcmp.ne.s32.totalorder %v941_v20, %v3868_v19  ;;  %v947_v32 = vunpack.c.l.b16 %v890_v33  ;;  %v948_v40 = vunpack.c.h.b16 %v890_v33  ;;  %vm4094_vm14 = vmpackc.low %vm552_vm13, %vm552_vm13 }
  0x40   : > { %vm4064_vm7 = vmpackc.low %vm945_vm2, %vm944_vm10  ;;  %v5646_v61 = vmov 0  ;;  %v894_v47 = vrot.slane %v892_v17, 4  ;;  %v5648_v31 = vmov 0  ;;  %vm5650_vm2 = vcmask 64512  }
  0x41   : > { %v5645_v48 = vsel %vm4064_vm7, 4294967295, %v5644_v48  ;;  %vm951_vm0 = vcmp.ne.s32.totalorder %v947_v32, %v3856_v11  ;;  %vm952_vm11 = vcmp.ne.s32.totalorder %v948_v40, %v3868_v19  ;;  %v981_v3 = vsel %vm4064_vm7, %v4055_v28, 0  ;;  %3385 = vmatmul.msk.bf16.gmra.mxu3 %vm5650_vm2, %v1124_v58  ;;  %vm5655_vm13 = vmmov %vm5650_vm2 }
  0x42   : > { %v5647_v61 = vsel %vm4079_vm1, 4294967295, %v5646_v61  ;;  %vm4083_vm10 = vmpackc.low %vm952_vm11, %vm951_vm0  ;;  %v1005_v43 = vunpack.c.l.b16 %v981_v3  ;;  %v676_v59 = vrot.slane %v674_v60, 1  ;;  %v611_v1 = vsel %vm4079_vm1, %v3891_v49, 0 }
  0x43   : > { %v5649_v31 = vsel %vm4083_vm10, 4294967295, %v5648_v31  ;;  %v982_v46 = vsel %vm4083_vm10, %v4062_v39, 0  ;;  %v5651_v62 = vmov 0  ;;  %v762_v9 = vunpack.c.l.b16 %v611_v1  ;;  %vm5654_vm11 = vmmov %vm5650_vm2 }
  0x44   : > { %v5652_v62 = vsel %vm4094_vm14, 4294967295, %v5651_v62  ;;  %v1006_v20 = vunpack.c.l.b16 %v982_v46  ;;  %vm5653_vm0 = vsmask.f32 7424  ;;  %v612_v54 = vsel %vm4094_vm14, %v3900_v57, 0 }
  0x45   : > { %v677_v33 = vsel %vm5653_vm0, %v672_v51, %v676_v59  ;;  %v763_v32 = vunpack.c.l.b16 %v612_v54  ;;  %v891_v40 = vrot.slane %v889_v0, 4  ;;  %v896_v58 = vsel %vm3862_vm15, %v894_v47, %v895_v10 }
  0x46   : > { %3369 = vmatmul.msk.bf16.gmra.mxu0 %vm5654_vm11, %v677_v33  ;;  %v1013_v49 = vpack.c.b16 %v1006_v20, %v1005_v43  ;;  %v961_v3 = vunpack.c.l.b16 %v896_v58  ;;  %v962_v46 = vunpack.c.h.b16 %v896_v58  ;;  %v4111_v43 = vld [vmem:[#allocation2 + $0x20] sm:$0xff]  ;;  %vm4115_vm0 = vcmp.ne.s32.totalorder %v398_v18, 7 }
  0x47   : > { %v770_v60 = vpack.c.b16 %v763_v32, %v762_v9  ;;  %v893_v51 = vsel %vm3862_vm15, %v891_v40, %v892_v17  ;;  %vm5658_vm11 = vcmask 1046528   ;;  %v1095_v17 = vsel %vm4079_vm1, %v3900_v57, 0 }
  0x48   : > { %v1022_v1 = vrot.slane %v1013_v49, 1  ;;  %v954_v26 = vunpack.c.l.b16 %v893_v51  ;;  %v955_v13 = vunpack.c.h.b16 %v893_v51  ;;  %vm965_vm2 = vcmp.ne.s32.totalorder %v961_v3, %v3856_v11 }
  0x49   : > { %3374 = vmatmul.msk.bf16.gmra.mxu1 %vm5655_vm13, %v770_v60  ;;  %vm966_vm9 = vcmp.ne.s32.totalorder %v962_v46, %v3868_v19  ;;  %v5659_v6 = vmov 0  ;;  %v1096_v18 = vsel %vm4094_vm14, %v4055_v28, 0  ;;  %v5661_v9 = vmov 0 }
  0x4a   : > { %v1023_v47 = vsel %vm5658_vm11, %v3962_v53, %v1022_v1  ;;  %vm958_vm10 = vcmp.ne.s32.totalorder %v954_v26, %v3856_v11  ;;  %vm959_vm7 = vcmp.ne.s32.totalorder %v955_v13, %v3868_v19  ;;  %vm4128_vm12 = vmpackc.low %vm966_vm9, %vm965_vm2  ;;  %v1117_v53 = vunpack.c.l.b16 %v1095_v17 }
  0x4b   : > { %3380 = vmatmul.msk.bf16.gmra.mxu2 %vm5655_vm13, %v1023_v47  ;;  %v5660_v6 = vsel %vm4128_vm12, 4294967295, %v5659_v6  ;;  %vm4135_vm11 = vmpackc.low %vm959_vm7, %vm958_vm10  ;;  %v984_v57 = vsel %vm4128_vm12, %v3761_v27, 0  ;;  %v1118_v26 = vunpack.c.l.b16 %v1096_v18  ;;  %v678_v13 = vshrl.u32 %v4052_v16, 16 }
  0x4c   : > { %v5662_v9 = vsel %vm4135_vm11, 4294967295, %v5661_v9  ;;  %vm846_vm9 = vmpackc.low %vm4115_vm0, %vm4115_vm0  ;;  %v983_v20 = vsel %vm4135_vm11, %v3757_v25, 0  ;;  %v1008_v33 = vunpack.c.l.b16 %v984_v57  ;;  %v682_v54 = vshll.u32 %v4111_v43, 16 }
  0x4d   : > { %v5663_v32 = vand.u32 7, %v3948_v45  ;;  %v1007_v49 = vunpack.c.l.b16 %v983_v20  ;;  %v1125_v40 = vpack.c.b16 %v1118_v26, %v1117_v53  ;;  %v680_v58 = vor.u32 %v678_v13, %v676_v59  ;;  %v618_v20 = vld [vmem:[#allocation2 + $0x28] sm:$0x1] }
  0x4e   : > { %v5664_v60 = vand.u32 7, %v3987_v12  ;;  %v5665_v16 = vmov 0  ;;  %v684_v3 = vrot.slane %v682_v54, 1  ;;  %v5667_v51 = vmov 0 }
  0x4f   : > { %vm553_vm7 = vcmp.ne.s32.totalorder %v5663_v32, 0  ;;  %v897_v46 = vrot.slane %v895_v10, 4  ;;  %v1014_v59 = vpack.c.b16 %v1008_v33, %v1007_v49  ;;  %v5669_v18 = vmov 0  }
  0x50   : > { %vm554_vm10 = vcmp.ne.s32.totalorder %v5664_v60, 0  ;;  %vm4154_vm2 = vmpackc.low %vm553_vm7, %vm553_vm7  ;;  %v4176_v53 = vsel %vm846_vm9, 65537, %v5669_v18  ;;  %vm5670_vm7 = vcmask 64512   ;;  %v5673_v0 = vmov 0  ;;  %v3427_v60 = vld [vmem:[%s5551_s2 + $0x1c] sm:$0xf] }
  0x51   : > { %v5666_v16 = vsel %vm4154_vm2, 4294967295, %v5665_v16  ;;  %vm4158_vm13 = vmpackc.low %vm554_vm10, %vm554_vm10  ;;  %v613_v45 = vsel %vm4154_vm2, %v4055_v28, 0  ;;  %3386 = vmatmul.msk.bf16.gmra.mxu3 %vm5670_vm7, %v1125_v40  ;;  %vm5671_vm10 = vsmask.f32 7424  ;;  %v968_v10 = vunpack.c.l.b16 %v897_v46 }
  0x52   : > { %v5668_v51 = vsel %vm4158_vm13, 4294967295, %v5667_v51  ;;  %v614_v12 = vsel %vm4158_vm13, %v4062_v39, 0  ;;  %v764_v47 = vunpack.c.l.b16 %v613_v45  ;;  %v685_v37 = vsel %vm5671_vm10, %v680_v58, %v684_v3  ;;  %vm5672_vm11 = vmmov %vm5670_vm7  ;;  %v3389_v58 = vld [vmem:[%s5551_s2 + $0x10] sm:$0xf] }
  0x53   : > { %v765_v17 = vunpack.c.l.b16 %v614_v12  ;;  %v969_v28 = vunpack.c.h.b16 %v897_v46  ;;  %v4180_v57 = vrot.slane %v1014_v59, 1  ;;  %vm972_vm12 = vcmp.ne.s32.totalorder %v968_v10, %v3856_v11 }
  0x54   : > { %v869_v26 = vrot.slane %v4176_v53, 7  ;;  %v1097_v33 = vsel %vm4154_vm2, %v4062_v39, 0  ;;  %v642_v54 = vunpack.c.l.b16 %v618_v20  ;;  %v1098_v32 = vsel %vm4158_vm13, %v3757_v25, 0 }
  0x55   : > { %v771_v13 = vpack.c.b16 %v765_v17, %v764_v47  ;;  %vm973_vm0 = vcmp.ne.s32.totalorder %v969_v28, %v3868_v19  ;;  %vm5675_vm7 = vcmask 1046528   ;;  %v1119_v45 = vunpack.c.l.b16 %v1097_v33  ;;  %v3421_v47 = vld [vmem:[%s5551_s2 + $0x18] sm:$0xf] }
  0x56   : > { %3370 = vmatmul.msk.bf16.gmra.mxu0 %vm5672_vm11, %v685_v37  ;;  %vm4186_vm9 = vmpackc.low %vm973_vm0, %vm972_vm12  ;;  %v1025_v49 = vsel %vm5675_vm7, %v1022_v1, %v4180_v57  ;;  %v648_v40 = vpack.c.b16 %v642_v54, %v642_v54  ;;  %v870_v46 = vrot.slane %v869_v26, 4  ;;  %v1120_v25 = vunpack.c.l.b16 %v1098_v32 }
  0x57   : > { %v5674_v0 = vsel %vm4186_vm9, 4294967295, %v5673_v0  ;;  %vm5676_vm12 = vmmov %vm5672_vm11  ;;  %v985_v39 = vsel %vm4186_vm9, %v618_v20, 0  ;;  %v686_v59 = vshrl.u32 %v4111_v43, 16  ;;  %v898_v12 = vunpack.c.l.b16 %v869_v26 }
  0x58   : > { %v690_v1 = vshll.u32 %v648_v40, 16  ;;  %v5677_v17 = vrot.slane %v3816_v52, 7  ;;  %v899_v10 = vunpack.c.h.b16 %v869_v26  ;;  %vm5678_vm10 = vcmask 1043456  }
  0x59   : > { %3375 = vmatmul.msk.bf16.gmra.mxu1 %vm5676_vm12, %v771_v13  ;;  %v1291_v28 = vsel %vm5678_vm10, %v3389_v58, 0  ;;  %vm5679_vm0 = vmmov %vm5678_vm10  ;;  %v1009_v20 = vunpack.c.l.b16 %v985_v39  ;;  %vm902_vm7 = vcmp.ne.s32.totalorder %v898_v12, %v3856_v11  ;;  %v1126_v26 = vpack.c.b16 %v1120_v25, %v1119_v45  ;;  %v1191_v45 = vld [vmem:[#allocation2 + $0x8] sm:$0xf]  ;;  %v1192_v25 = vld [vmem:[#allocation2 + $0xc] sm:$0xf] }
  0x5a   : > { %v872_v37 = vsel %vm3862_vm15, %v870_v46, %v5677_v17  ;;  %v1653_v13 = vsel %vm5679_vm0, %v3427_v60, 0  ;;  %1300 = vmatpush.bf16.msra.mxu0 %v1291_v28  ;;  %vm903_vm12 = vcmp.ne.s32.totalorder %v899_v10, %v3868_v19  ;;  %v688_v32 = vor.u32 %v686_v59, %v684_v3  ;;  %v825_v60 = vld [vmem:[#allocation2] sm:$0xe] }
  0x5b   : > { %3381 = vmatmul.msk.bf16.gmra.mxu2 %vm5672_vm11, %v1025_v49  ;;  %1662 = vmatpush.bf16.msra.mxu3 %v1653_v13  ;;  %v905_v43 = vunpack.c.l.b16 %v872_v37  ;;  %v906_v33 = vunpack.c.h.b16 %v872_v37  ;;  %vm5680_vm11 = vmmov %vm5679_vm0  ;;  %v692_v49 = vrot.slane %v690_v1, 1  ;;  %v1015_v58 = vpack.c.b16 %v1009_v20, %v1009_v20  ;;  %v1193_v20 = vld [vmem:[#allocation2 + $0x10] sm:$0xf] }
  0x5c   : > { %v1506_v54 = vsel %vm5680_vm11, %v3421_v47, 0  ;;  %vm4224_vm15 = vmpackc.low %vm903_vm12, %vm902_vm7  ;;  %v1406_v46 = vsel %vm5680_vm11, %v3415_v15, 0  ;;  %vm5685_vm13 = vcmask 64512   ;;  %vm5686_vm2 = vsmask.f32 7424 }
  0x5d   : > { %1515 = vmatpush.bf16.msrb.mxu2 %v1506_v54  ;;  %vm909_vm10 = vcmp.ne.s32.totalorder %v905_v43, %v3856_v11  ;;  %vm910_vm0 = vcmp.ne.s32.totalorder %v906_v33, %v3868_v19  ;;  %1415 = vmatpush.bf16.msrb.mxu1 %v1406_v46  ;;  %v693_v3 = vsel %vm5686_vm2, %v688_v32, %v692_v49  ;;  %v975_v59 = vsel %vm4224_vm15, %v825_v60, 0  ;;  %v1090_v47 = vld [vmem:[#allocation2 + $0x28] sm:$0xf]  ;;  %vm5687_vm7 = vmmov %vm5685_vm13  ;;  %v1337_v43 = vld [vmem:[#allocation2 + $0x4] sm:$0xe] }
  0x5e   : > { %vm4230_vm9 = vmpackc.low %vm910_vm0, %vm909_vm10  ;;  %v1026_v12 = vrot.slane %v1015_v58, 1  ;;  %v1340_v37 = vsel %vm3885_vm3, %v1192_v25, 0  ;;  %v1099_v10 = vsel %vm3744_vm4, %v3761_v27, 0  ;;  %v999_v28 = vunpack.c.l.b16 %v975_v59  ;;  %v1194_v15 = vld [vmem:[#allocation2 + $0x14] sm:$0xf] }
  0x5f   : > { %v976_v1 = vsel %vm4230_vm9, %v3794_v41, 0  ;;  %v1339_v17 = vsel %vm4230_vm9, %v1191_v45, 0  ;;  %v1100_v41 = vsel %vm3750_vm5, %v1090_v47, 0  ;;  %v1364_v54 = vunpack.c.l.b16 %v1340_v37  ;;  %vm5690_vm12 = vmmov %vm5687_vm7 }
  0x60   : > { %v1000_v13 = vunpack.c.l.b16 %v976_v1  ;;  %v1363_v33 = vunpack.c.l.b16 %v1339_v17  ;;  %vm5688_vm2 = vcmask 1046528   ;;  %v1338_v32 = vsel %vm4224_vm15, %v1337_v43, 0  ;;  %vm5694_vm11 = vmmov %vm5687_vm7 }
  0x61   : > { %3387 = vmatmul.msk.bf16.gmra.mxu3 %vm5685_vm13, %v1126_v26  ;;  %v1027_v26 = vsel %vm5688_vm2, %v4180_v57, %v1026_v12  ;;  %v1341_v49 = vsel %vm3893_vm8, %v1193_v20, 0  ;;  %v1121_v27 = vunpack.c.l.b16 %v1099_v10  ;;  %v1362_v58 = vunpack.c.l.b16 %v1338_v32  ;;  %vm5693_vm0 = vmmov %vm5688_vm2 }
  0x62   : > { %v1365_v60 = vunpack.c.l.b16 %v1341_v49  ;;  %v1122_v46 = vunpack.c.l.b16 %v1100_v41  ;;  %v1455_v59 = vsel %vm3943_vm6, %v1193_v20, 0  ;;  %vm5689_vm13 = vnez %v5633_v55  ;;  %v3453_v41 = vld [vmem:[%s5551_s2 + $0x20] sm:$0xf]  ;;  %vm5695_vm2 = vmmov %vm5693_vm0  ;;  %v3568_v49 = vld [vmem:[#allocation2 + $0x10] sm:$0xff] }
  0x63   : > { %v1456_v1 = vsel %vm5689_vm13, %v1194_v15, 0  ;;  %v1373_v57 = vpack.c.b16 %v1363_v33, %v1362_v58  ;;  %v4263_v47 = vunpack.c.l.b16 %v1455_v59  ;;  %vm5691_vm6 = vnez %v5612_v34  ;;  %v3563_v59 = vld [vmem:[#allocation2 + $0xc] sm:$0xff] }
  0x64   : > { %v1374_v12 = vpack.c.b16 %v1365_v60, %v1364_v54  ;;  %v4265_v17 = vunpack.c.l.b16 %v1456_v1  ;;  %v1127_v43 = vpack.c.b16 %v1122_v46, %v1121_v27  ;;  %v1453_v42 = vsel %vm5691_vm6, %v1191_v45, 0  ;;  %v3562_v45 = vld [vmem:[#allocation2 + $0x4] sm:$0xff]  ;;  %v1195_v46 = vld [vmem:[#allocation2 + $0x18] sm:$0xf] }
  0x65   : > { %v1379_v37 = vrot.slane %v1373_v57, 1  ;;  %vm5692_vm10 = vnez %v5614_v35  ;;  %v1475_v54 = vunpack.c.l.b16 %v1453_v42  ;;  %vm5696_vm13 = vnez %v5625_v63 }
  0x66   : > { %3371 = vmatmul.msk.bf16.gmra.mxu0 %vm5687_vm7, %v693_v3  ;;  %v1010_v3 = vpack.c.b16 %v1000_v13, %v999_v28  ;;  %v1380_v10 = vrot.slane %v1374_v12, 1  ;;  %v1486_v28 = vpack.c.b16 %v4265_v17, %v4263_v47  ;;  %v1454_v55 = vsel %vm5692_vm10, %v1192_v25, 0  ;;  %v3567_v13 = vld [vmem:[#allocation2 + $0x8] sm:$0xff] }
  0x67   : > { %v1342_v25 = vsel %vm5696_vm13, %v1194_v15, 0  ;;  %v1596_v27 = vshll.u32 %v3567_v13, 16  ;;  %v1234_v1 = vshll.u32 %v3562_v45, 16  ;;  %v1594_v57 = vshrl.u32 %v3567_v13, 16 }
  0x68   : > { %v1017_v32 = vrot.slane %v1010_v3, 1  ;;  %v1381_v20 = vsel %vm5693_vm0, %v1379_v37, %v1380_v10  ;;  %vm5698_vm0 = vmmov %vm5687_vm7  ;;  %v1366_v60 = vunpack.c.l.b16 %v1342_v25  ;;  %v1601_v47 = vshll.u32 %v3568_v49, 16 }
  0x69   : > { %3416 = vmatmul.msk.bf16.vlgmr.msrb.gmra.mxu1 %vm5694_vm11, %v1381_v20  ;;  %vm5699_vm11 = vnez %v5629_v8  ;;  %v1598_v12 = vrot.slane %v1596_v27, 1  ;;  %v1232_v37 = vshrl.u32 %v3562_v45, 16  ;;  %v1457_v13 = vsel %vm4079_vm1, %v1195_v46, 0  ;;  %vm5703_vm10 = vmmov %vm5698_vm0 }
  0x6a   : > { %v1019_v33 = vsel %vm5695_vm2, %v1017_v32, %v3935_v30  ;;  %v1343_v30 = vsel %vm5699_vm11, %v1195_v46, 0  ;;  %v1239_v32 = vshll.u32 %v3563_v59, 16  ;;  %v1479_v27 = vunpack.c.l.b16 %v1457_v13  ;;  %vm5705_vm6 = vmmov %vm5698_vm0 }
  0x6b   : > { %3382 = vmatmul.msk.bf16.gmra.mxu2 %vm5690_vm12, %v1027_v26  ;;  %v1476_v26 = vunpack.c.l.b16 %v1454_v55  ;;  %vm5697_vm12 = vcmask 1043456   ;;  %v1367_v17 = vunpack.c.l.b16 %v1343_v30  ;;  %v1599_v42 = vor.u32 %v1598_v12, %v1594_v57  ;;  %v1197_v30 = vld [vmem:[#allocation2 + $0x20] sm:$0xf]  ;;  %v3564_v57 = vld [vmem:[#allocation2 + $0x14] sm:$0xff] }
  0x6c   : > { %v1768_v58 = vsel %vm5697_vm12, %v3453_v41, 0  ;;  %v1603_v55 = vrot.slane %v1601_v47, 1  ;;  %vm5701_vm12 = vsmask.f32 7424  ;;  %v1605_v47 = vshrl.u32 %v3568_v49, 16 }
  0x6d   : > { %v1485_v3 = vpack.c.b16 %v1476_v26, %v1475_v54  ;;  %v1375_v15 = vpack.c.b16 %v1367_v17, %v1366_v60  ;;  %v1241_v54 = vrot.slane %v1239_v32, 1  ;;  %v1196_v26 = vld [vmem:[#allocation2 + $0x1c] sm:$0xf]  ;;  %v1247_v32 = vshll.u32 %v3564_v57, 16 }
  0x6e   : > { %v1604_v25 = vsel %vm5701_vm12, %v1599_v42, %v1603_v55  ;;  %v1458_v45 = vsel %vm4094_vm14, %v1196_v26, 0  ;;  %v1607_v42 = vor.u32 %v1605_v47, %v1603_v55  ;;  %vm5711_vm14 = vcmask 60416   ;;  %v3565_v55 = vld [vmem:[#allocation2 + $0x1c] sm:$0xff] }
  0x6f   : > { %v1382_v20 = vrot.slane %v1375_v15, 1  ;;  %v1255_v47 = vshll.u32 %v3565_v55, 16 }
  0x71   : > { %3388 = vmatmul.msk.bf16.gmra.mxu3 %vm5687_vm7, %v1127_v43  ;;  %v1236_v43 = vrot.slane %v1234_v1, 1  ;;  %vm5700_vm7 = vmmov %vm5698_vm0  ;;  %v1383_v41 = vsel %vm5695_vm2, %v1380_v10, %v1382_v20  ;;  %vm5704_vm2 = vnez %v5645_v48  ;;  %v3569_v1 = vld [vmem:[#allocation2 + $0x18] sm:$0xff] }
  0x72   : > { %v1344_v10 = vsel %vm5704_vm2, %v1196_v26, 0  ;;  %v1609_v17 = vshll.u32 %v3569_v1, 16 }
  0x73   : > { %v1368_v46 = vunpack.c.l.b16 %v1344_v10  ;;  %v1199_v10 = vld [vmem:[#allocation2 + $0x28] sm:$0xf] }
  0x76   : > { %3378 = vmatmul.msk.bf16.vlgmr.msrb.gmra.mxu0 %vm5698_vm0, %v1019_v33  ;;  %v1237_v33 = vor.u32 %v1236_v43, %v1232_v37  ;;  %v1243_v43 = vshrl.u32 %v3563_v59, 16  ;;  %v3570_v59 = vld [vmem:[#allocation2 + $0x20] sm:$0xff] }
  0x77   : > { %1777 = vmatpush.bf16.msrb.mxu0 %v1768_v58  ;;  %v1480_v58 = vunpack.c.l.b16 %v1458_v45 }
  0x78   : > { %v1245_v13 = vor.u32 %v1243_v43, %v1241_v54 }
  0x79   : > { %3417 = vmatmul.msk.bf16.gmra.mxu1 %vm5698_vm0, %v1383_v41  ;;  %v1611_v41 = vrot.slane %v1609_v17, 1 }
  0x7b   : > { %3422 = vmatmul.msk.bf16.vlgmr.msrb.gmra.mxu2 %vm5700_vm7, %v1485_v3  ;;  %vm5702_vm7 = vmmov %vm5701_vm12  ;;  %v1487_v3 = vpack.c.b16 %v1480_v58, %v1479_v27  ;;  %vm5706_vm12 = vnez %v5649_v31  ;;  %v534_v27 = vld [vmem:[%s3722_s13 + $0xc] sm:$0xf]  ;;  %v1617_v58 = vshll.u32 %v3570_v59, 16 }
  0x7c   : > { %v1242_v60 = vsel %vm5702_vm7, %v1237_v33, %v1241_v54  ;;  %v1345_v12 = vsel %vm5706_vm12, %v1197_v30, 0  ;;  %542 = vst.msk [vmem:[#allocation2 + $0x2c] sm:$0xf] %vm5711_vm14, %v534_v27  ;;  %v1613_v54 = vshrl.u32 %v3569_v1, 16 }
  0x7d   : > { %v1369_v15 = vunpack.c.l.b16 %v1345_v12  ;;  %v1251_v12 = vshrl.u32 %v3564_v57, 16 }
  0x7f   : > { %v1376_v37 = vpack.c.b16 %v1369_v15, %v1368_v46  ;;  %v1615_v15 = vor.u32 %v1613_v54, %v1611_v41 }
  0x81   : > { %3448 = vmatmul.msk.bf16.vlgmr.msra.gmra.mxu3 %vm5703_vm10, %v1604_v25  ;;  %vm5707_vm10 = vmmov %vm5698_vm0  ;;  %v1384_v33 = vrot.slane %v1376_v37, 1  ;;  %vm5708_vm0 = vcmask 1046528   ;;  %v1249_v25 = vrot.slane %v1247_v32, 1  ;;  %v1619_v37 = vrot.slane %v1617_v58, 1 }
  0x83   : > { %v1385_v26 = vsel %vm5708_vm0, %v1382_v20, %v1384_v33  ;;  %vm5715_vm0 = vnez %v5662_v9  ;;  %v3571_v58 = vld [vmem:[#allocation2 + $0x28] sm:$0xff] }
  0x86   : > { %3410 = vmatmul.msk.bf16.vlgmr.msra.gmra.mxu0 %vm5705_vm6, %v1242_v60  ;;  %vm5709_vm6 = vmmov %vm5702_vm7 }
  0x87   : > { %v1612_v45 = vsel %vm5709_vm6, %v1607_v42, %v1611_v41  ;;  %vm5710_vm7 = vmmov %vm5707_vm10  ;;  %v535_v42 = vld [vmem:[%s3722_s13 + $0x10] sm:$0xf] }
  0x88   : > { %vm5712_vm1 = vmmov %vm5709_vm6  ;;  %vm5716_vm6 = vnez %v5660_v6  ;;  %543 = vst.msk [vmem:[#allocation2 + $0x30] sm:$0xf] %vm5711_vm14, %v535_v42 }
  0x89   : > { %3418 = vmatmul.msk.bf16.gmra.mxu1 %vm5710_vm7, %v1385_v26  ;;  %v1250_v49 = vsel %vm5712_vm1, %v1245_v13, %v1249_v25  ;;  %vm5713_vm12 = vmmov %vm5710_vm7  ;;  %v1347_v46 = vsel %vm5716_vm6, %v1199_v10, 0  ;;  %v1253_v26 = vor.u32 %v1251_v12, %v1249_v25  ;;  %v1257_v13 = vrot.slane %v1255_v47, 1 }
  0x8a   : > { %v1371_v17 = vunpack.c.l.b16 %v1347_v46  ;;  %vm5717_vm1 = vmmov %vm5710_vm7  ;;  %vm5722_vm6 = vcmask 64512   ;;  %v1625_v12 = vshll.u32 %v3571_v58, 16 }
  0x8b   : > { %3423 = vmatmul.msk.bf16.gmra.mxu2 %vm5707_vm10, %v1486_v28  ;;  %vm5714_vm10 = vmmov %vm5710_vm7  ;;  %v1198_v28 = vld [vmem:[#allocation2 + $0x24] sm:$0xf]  ;;  %vm5719_vm7 = vnez %v5666_v16 }
  0x8c   : > { %v1346_v20 = vsel %vm5715_vm0, %v1198_v28, 0  ;;  %v1459_v57 = vsel %vm5719_vm7, %v1197_v30, 0  ;;  %vm5724_vm2 = vmmov %vm5722_vm6 }
  0x8d   : > { %v1370_v60 = vunpack.c.l.b16 %v1346_v20  ;;  %v1481_v20 = vunpack.c.l.b16 %v1459_v57  ;;  %vm5725_vm14 = vmmov %vm5724_vm2 }
  0x8f   : > { %v1377_v43 = vpack.c.b16 %v1371_v17, %v1370_v60  ;;  %v3566_v60 = vld [vmem:[#allocation2 + $0x24] sm:$0xff] }
  0x91   : > { %3449 = vmatmul.msk.bf16.gmra.mxu3 %vm5713_vm12, %v1612_v45  ;;  %v1386_v1 = vrot.slane %v1377_v43, 1  ;;  %vm5718_vm12 = vsmask.f32 7424  ;;  %v1263_v43 = vshll.u32 %v3566_v60, 16 }
  0x92   : > { %v1620_v45 = vsel %vm5718_vm12, %v1615_v15, %v1619_v37  ;;  %vm5723_vm0 = vmmov %vm5718_vm12  ;;  %vm5726_vm12 = vnez %v5674_v0  ;;  %v1259_v15 = vshrl.u32 %v3565_v55, 16  ;;  %v1461_v55 = vsel %vm3744_vm4, %v1199_v10, 0  ;;  %v2031_v0 = vld [vmem:[%s5553_s4] sm:$0xf] }
  0x93   : > { %v1258_v25 = vsel %vm5723_vm0, %v1253_v26, %v1257_v13  ;;  %vm5730_vm4 = vmmov %vm5724_vm2 }
  0x96   : > { %3411 = vmatmul.msk.bf16.gmra.mxu0 %vm5714_vm10, %v1250_v49  ;;  %vm5720_vm10 = vnez %v5668_v51 }
  0x9b   : > { %3424 = vmatmul.msk.bf16.gmra.mxu2 %vm5717_vm1, %v1487_v3  ;;  %v1460_v3 = vsel %vm5720_vm10, %v1198_v28, 0  ;;  %vm5721_vm1 = vcmask 1046528   ;;  %v1621_v28 = vshrl.u32 %v3570_v59, 16 }
  0x9c   : > { %v1387_v41 = vsel %vm5721_vm1, %v1384_v33, %v1386_v1  ;;  %v1482_v54 = vunpack.c.l.b16 %v1460_v3  ;;  %v1200_v33 = vld [vmem:[#allocation2 + $0x2c] sm:$0x1]  ;;  %v4343_v3 = vld [vmem:[#allocation2 + $0x30] sm:$0x1] }
  0x9d   : > { %3419 = vmatmul.msk.bf16.gmra.mxu1 %vm5722_vm6, %v1387_v41  ;;  %v1348_v47 = vsel %vm5726_vm12, %v1200_v33, 0  ;;  %v1623_v26 = vor.u32 %v1621_v28, %v1619_v37  ;;  %v1452_v41 = vld [vmem:[#allocation2 + $0x2c] sm:$0xf]  ;;  %v1586_v19 = vunpack.c.l.b16 %v4343_v3  ;;  %vm5727_vm6 = vmmov %vm5721_vm1 }
  0x9e   : > { %v1488_v46 = vpack.c.b16 %v1482_v54, %v1481_v20  ;;  %v1372_v57 = vunpack.c.l.b16 %v1348_v47  ;;  %v1265_v20 = vrot.slane %v1263_v43, 1  ;;  %vm5728_vm1 = vmmov %vm5723_vm0  ;;  %v1483_v47 = vunpack.c.l.b16 %v1461_v55 }
  0x9f   : > { %v1592_v43 = vpack.c.b16 %v1586_v19, %v1586_v19 }
  0xa0   : > { %v1378_v59 = vpack.c.b16 %v1372_v57, %v1372_v57 }
  0xa1   : > { %v4321_v27 = vpop.f32.mrf.mxu1  ;;  %3450 = vmatmul.msk.bf16.gmra.mxu3 %vm5724_vm2, %v1620_v45  ;;  %v1627_v45 = vrot.slane %v1625_v12, 1 }
  0xa2   : > { %v4316_v32 = vpop.f32.mrf.mxu0  ;;  %v1388_v11 = vrot.slane %v1378_v59, 1 }
  0xa3   : > { %v1628_v54 = vsel %vm5723_vm0, %v1623_v26, %v1627_v45 }
  0xa4   : > { %v4328_v49 = vpop.f32.mrf.mxu3  ;;  %v1389_v28 = vsel %vm5727_vm6, %v1386_v1, %v1388_v11  ;;  %v1633_v11 = vshll.u32 %v1592_v43, 16  ;;  %v1699_v43 = vld [vmem:[#allocation2 + $0x8] sm:$0xe]  ;;  %vm5732_vm6 = vmmov %vm5723_vm0 }
  0xa6   : > { %3412 = vmatmul.msk.bf16.gmra.mxu0 %vm5725_vm14, %v1258_v25  ;;  %v1261_v25 = vor.u32 %v1259_v15, %v1257_v13  ;;  %vm5729_vm14 = vmmov %vm5724_vm2  ;;  %v1224_v13 = vunpack.c.l.b16 %v1200_v33  ;;  %v1267_v33 = vshrl.u32 %v3566_v60, 16  ;;  %v1635_v19 = vrot.slane %v1633_v11, 1 }
  0xa8   : > { %v1266_v12 = vsel %vm5728_vm1, %v1261_v25, %v1265_v20  ;;  %v1230_v24 = vpack.c.b16 %v1224_v13, %v1224_v13  ;;  %vm5733_vm1 = vmmov %vm5724_vm2 }
  0xa9   : > { %v4338_v17 = vpop.f32.mrf.mxu1 }
  0xaa   : > { %v4334_v30 = vpop.f32.mrf.mxu0 }
  0xab   : > { %3425 = vmatmul.msk.bf16.gmra.mxu2 %vm5724_vm2, %v1488_v46  ;;  %v1462_v46 = vsel %vm3750_vm5, %v1452_v41, 0  ;;  %v1629_v41 = vshrl.u32 %v3571_v58, 16  ;;  %vm5731_vm5 = vmmov %vm5724_vm2  ;;  %v1553_v58 = vld [vmem:[#allocation2 + $0xc] sm:$0xf] }
  0xac   : > { %v4340_v42 = vpop.f32.mrf.mxu3  ;;  %v1484_v15 = vunpack.c.l.b16 %v1462_v46 }
  0xad   : > { %3420 = vmatmul.msk.bf16.gmra.mxu1 %vm5724_vm2, %v1389_v28  ;;  %v1631_v55 = vor.u32 %v1629_v41, %v1627_v45  ;;  %v1269_v28 = vor.u32 %v1267_v33, %v1265_v20  ;;  %v1701_v45 = vsel %vm4230_vm9, %v1553_v58, 0 }
  0xae   : > { %v1489_v10 = vpack.c.b16 %v1484_v15, %v1483_v47  ;;  %v1554_v47 = vld [vmem:[#allocation2 + $0x10] sm:$0xf]  ;;  %v1555_v15 = vld [vmem:[#allocation2 + $0x14] sm:$0xf]  ;;  %v1725_v11 = vunpack.c.l.b16 %v1701_v45 }
  0xaf   : > { %v1636_v13 = vsel %vm5723_vm0, %v1631_v55, %v1635_v19  ;;  %v1702_v20 = vsel %vm3885_vm3, %v1554_v47, 0  ;;  %vm5735_vm3 = vcmask 1046528   ;;  %vm5744_vm0 = vmmov %vm5733_vm1 }
  0xb0   : > { %vm5737_vm9 = vmmov %vm5735_vm3 }
  0xb1   : > { %3451 = vmatmul.msk.bf16.gmra.mxu3 %vm5729_vm14, %v1628_v54  ;;  %v1271_v54 = vshll.u32 %v1230_v24, 16  ;;  %v1703_v24 = vsel %vm3893_vm8, %v1555_v15, 0  ;;  %vm5734_vm14 = vmmov %vm5733_vm1 }
  0xb2   : > { %v728_v37 = vpop.f32.mrf.mxu0  ;;  %v1727_v55 = vunpack.c.l.b16 %v1703_v24  ;;  %vm5736_vm8 = vmmov %vm5733_vm1 }
  0xb3   : > { %v805_v26 = vpop.f32.mrf.mxu1  ;;  %vm5741_vm2 = vmmov %vm5735_vm3 }
  0xb4   : > { %v806_v57 = vadd.f32 %v805_v26, %v728_v37  ;;  %v4355_v22 = vpop.f32.mrf.mxu3 }
  0xb6   : > { %3413 = vmatmul.msk.bf16.gmra.mxu0 %vm5730_vm4, %v1266_v12  ;;  %v1273_v12 = vrot.slane %v1271_v54, 1  ;;  %v1726_v54 = vunpack.c.l.b16 %v1702_v20  ;;  %vm5742_vm4 = vnez %v5662_v9 }
  0xb8   : > { %v1060_v1 = vpop.f32.mrf.mxu2  ;;  %v1274_v60 = vsel %vm5732_vm6, %v1269_v28, %v1273_v12  ;;  %v1736_v44 = vpack.c.b16 %v1727_v55, %v1726_v54  ;;  %vm5746_vm6 = vmmov %vm5741_vm2 }
  0xb9   : > { %v1082_v59 = vadd.f32 %v1060_v1, %v806_v57  ;;  %v1700_v57 = vsel %vm4224_vm15, %v1699_v43, 0  ;;  %v1556_v43 = vld [vmem:[#allocation2 + $0x18] sm:$0xf]  ;;  %vm5738_vm15 = vnez %v5645_v48 }
  0xba   : > { %v4358_v25 = vpop.f32.mrf.mxu0  ;;  %v1724_v39 = vunpack.c.l.b16 %v1700_v57  ;;  %v1742_v47 = vrot.slane %v1736_v44, 1  ;;  %v1704_v57 = vsel %vm5696_vm13, %v1556_v43, 0  ;;  %vm5739_vm13 = vnez %v5649_v31  ;;  %v1561_v31 = vld [vmem:[#allocation2 + $0x2c] sm:$0xf] }
  0xbb   : > { %3426 = vmatmul.msk.bf16.gmra.mxu2 %vm5731_vm5, %v1489_v10  ;;  %v4361_v46 = vpop.f32.mrf.mxu1  ;;  %vm5743_vm5 = vnez %v5660_v6 }
  0xbc   : > { %v4363_v37 = vpop.f32.mrf.mxu3  ;;  %v1735_v19 = vpack.c.b16 %v1725_v11, %v1724_v39  ;;  %v1728_v11 = vunpack.c.l.b16 %v1704_v57 }
  0xbe   : > { %v1741_v58 = vrot.slane %v1735_v19, 1 }
  0xc0   : > { %v4376_v10 = vpop.f32.mrf.mxu2  ;;  %v1743_v45 = vsel %vm5735_vm3, %v1741_v58, %v1742_v47  ;;  %v1559_v58 = vld [vmem:[#allocation2 + $0x24] sm:$0xf] }
  0xc1   : > { %3452 = vmatmul.msk.bf16.gmra.mxu3 %vm5733_vm1, %v1636_v13  ;;  %v1707_v57 = vsel %vm5739_vm13, %v1559_v58, 0  ;;  %vm5764_vm13 = vnez %v5641_v38 }
  0xc3   : > { %v733_v26 = vpop.f32.mrf.mxu0 }
  0xc4   : > { %v1160_v41 = vpop.f32.mrf.mxu3 }
  0xc5   : > { %v4379_v33 = vadd.f32 %v1160_v41, %v1082_v59 }
  0xc6   : > { %3414 = vmatmul.msk.bf16.gmra.mxu0 %vm5734_vm14, %v1274_v60  ;;  %v810_v1 = vpop.f32.mrf.mxu1  ;;  %v1557_v60 = vld [vmem:[#allocation2 + $0x1c] sm:$0xf]  ;;  %vm5750_vm14 = vmmov %vm5741_vm2 }
  0xc7   : > { %v811_v28 = vadd.f32 %v810_v1, %v733_v26  ;;  %v1705_v20 = vsel %vm5699_vm11, %v1557_v60, 0  ;;  %vm5740_vm11 = vmmov %vm5733_vm1 }
  0xc8   : > { %v1729_v1 = vunpack.c.l.b16 %v1705_v20  ;;  %vm5748_vm1 = vmmov %vm5744_vm0 }
  0xca   : > { %v1737_v55 = vpack.c.b16 %v1729_v1, %v1728_v11  ;;  %v1731_v1 = vunpack.c.l.b16 %v1707_v57 }
  0xcb   : > { %v4381_v40 = vpop.f32.mrf.mxu0 }
  0xcc   : > { %v4383_v12 = vpop.f32.mrf.mxu3 }
  0xce   : > { %v1065_v50 = vpop.f32.mrf.mxu2  ;;  %v4385_v13 = vpop.f32.mrf.mxu1 }
  0xcf   : > { %v1084_v15 = vadd.f32 %v1065_v50, %v811_v28  ;;  %v1744_v28 = vrot.slane %v1737_v55, 1  ;;  %v1558_v50 = vld [vmem:[#allocation2 + $0x20] sm:$0xf] }
  0xd1   : > { %v1745_v60 = vsel %vm5737_vm9, %v1742_v47, %v1744_v28  ;;  %vm5758_vm9 = vnez %v5612_v34 }
  0xd3   : > { %v738_v59 = vpop.f32.mrf.mxu0 }
  0xd4   : > { %v1165_v26 = vpop.f32.mrf.mxu3 }
  0xd5   : > { %v4395_v41 = vadd.f32 %v1165_v26, %v1084_v15 }
  0xd6   : > { %3454 = vmatmul.msk.bf16.vlgmr.msrb.gmra.mxu0 %vm5736_vm8, %v1743_v45  ;;  %v4393_v24 = vpop.f32.mrf.mxu2  ;;  %v815_v39 = vpop.f32.mrf.mxu1  ;;  %v1706_v45 = vsel %vm5738_vm15, %v1558_v50, 0  ;;  %v801_v50 = vadd.f32 %v4321_v27, %v4316_v32  ;;  %vm5752_vm8 = vmmov %vm5744_vm0  ;;  %vm5760_vm15 = vnez %v5614_v35 }
  0xd7   : > { %v816_v19 = vadd.f32 %v815_v39, %v738_v59  ;;  %v1730_v11 = vunpack.c.l.b16 %v1706_v45  ;;  %v1709_v45 = vsel %vm5743_vm5, %v1561_v31, 0  ;;  %vm2219_vm5 = vsmask.f32 256 }
  0xd9   : > { %v1738_v47 = vpack.c.b16 %v1731_v1, %v1730_v11  ;;  %v1733_v1 = vunpack.c.l.b16 %v1709_v45 }
  0xdb   : > { %v4397_v54 = vpop.f32.mrf.mxu0  ;;  %v1746_v48 = vrot.slane %v1738_v47, 1 }
  0xdc   : > { %v4399_v44 = vpop.f32.mrf.mxu3 }
  0xde   : > { %v1070_v63 = vpop.f32.mrf.mxu2 }
  0xdf   : > { %v1086_v8 = vadd.f32 %v1070_v63, %v816_v19  ;;  %v1560_v63 = vld [vmem:[#allocation2 + $0x28] sm:$0xf] }
  0xe3   : > { %v743_v43 = vpop.f32.mrf.mxu0 }
  0xe4   : > { %v821_v15 = vadd.f32 %v4328_v49, %v743_v43  ;;  %v1170_v20 = vpop.f32.mrf.mxu3  ;;  %v1747_v43 = vsel %vm5741_vm2, %v1744_v28, %v1746_v48  ;;  %v817_v28 = vpop.f32.mrf.mxu1 }
  0xe5   : > { %v4410_v26 = vadd.f32 %v1170_v20, %v1086_v8 }
  0xe6   : > { %3455 = vmatmul.msk.bf16.gmra.mxu0 %vm5740_vm11, %v1745_v60  ;;  %v4408_v59 = vpop.f32.mrf.mxu2  ;;  %v1708_v60 = vsel %vm5742_vm4, %v1560_v63, 0  ;;  %vm5768_vm11 = vnez %v5647_v61  ;;  %vm5770_vm4 = vnez %v5652_v62  ;;  %v1875_v61 = vsel %vm5719_vm7, 65537, %v5669_v18 }
  0xe7   : > { %v1732_v11 = vunpack.c.l.b16 %v1708_v60  ;;  %v2285_v62 = vshrl.u32 %v4028_v23, 16 }
  0xe9   : > { %v1739_v27 = vpack.c.b16 %v1733_v1, %v1732_v11 }
  0xeb   : > { %v4412_v39 = vpop.f32.mrf.mxu0  ;;  %v1748_v47 = vrot.slane %v1739_v27, 1  ;;  %v3459_v27 = vld [vmem:[%s5553_s4 + $0x4] sm:$0xf] }
  0xec   : > { %v4414_v55 = vpop.f32.mrf.mxu3  ;;  %v4439_v31 = vpop.f32.mrf.mxu1 }
  0xed   : > { %v1749_v6 = vsel %vm5746_vm6, %v1746_v48, %v1748_v47 }
  0xee   : > { %v1075_v49 = vpop.f32.mrf.mxu2 }
  0xef   : > { %v1088_v19 = vadd.f32 %v1075_v49, %v821_v15 }
  0xf3   : > { %v1055_v58 = vpop.f32.mrf.mxu0 }
  0xf4   : > { %v1080_v8 = vadd.f32 %v1055_v58, %v801_v50  ;;  %v1175_v57 = vpop.f32.mrf.mxu3  ;;  %v4448_v48 = vpop.f32.mrf.mxu1 }
  0xf5   : > { %v4425_v20 = vadd.f32 %v1175_v57, %v1088_v19 }
  0xf6   : > { %3456 = vmatmul.msk.bf16.gmra.mxu0 %vm5744_vm0, %v1747_v43  ;;  %v1180_v15 = vadd.f32 %v4355_v22, %v1080_v8  ;;  %v4429_v49 = vpop.f32.mrf.mxu2  ;;  %v1710_v22 = vsel %vm5726_vm12, %v4343_v3, 0  ;;  %vm5749_vm12 = vcmask 1043456   ;;  %vm2220_vm0 = vsmask.f32 4368 }
  0xf7   : > { %5745 = vst [vmem:[#allocation8_spill] sm:$0xff] %v4429_v49  ;;  %v1734_v50 = vunpack.c.l.b16 %v1710_v22  ;;  %v2179_v3 = vsel %vm5749_vm12, %v2031_v0, 0  ;;  %vm5751_vm3 = vmmov %vm5749_vm12  ;;  %v813_v0 = vadd.f32 %v4385_v13, %v4381_v40  ;;  %v1869_v40 = vsel %vm5758_vm9, 65537, %v5669_v18 }
  0xf8   : > { %2188 = vmatpush.bf16.msra.mxu2 %v2179_v3  ;;  %vm5769_vm2 = vmmov %vm5751_vm3 }
  0xf9   : > { %v1740_v8 = vpack.c.b16 %v1734_v50, %v1734_v50  ;;  %vm4612_vm7 = vmor %vm2219_vm5, %vm2220_vm0 }
  0xfb   : > { %v4427_v32 = vpop.f32.mrf.mxu0  ;;  %v1750_v45 = vrot.slane %v1740_v8, 1 }
  0xfc   : > { %v4437_v19 = vpop.f32.mrf.mxu3  ;;  %v4467_v22 = vpop.f32.mrf.mxu1 }
  0xfd   : > { %5747 = vst [vmem:[#allocation9_spill] sm:$0xff] %v4437_v19  ;;  %v1751_v11 = vsel %vm5750_vm14, %v1748_v47, %v1750_v45 }
  0xfe   : > { %v4442_v58 = vpop.f32.mrf.mxu2 }
 0x103   : > { %v1302_v9 = vpop.f32.mrf.mxu0 }
 0x104   : > { %v4432_v63 = vadd.f32 %v1302_v9, %v1180_v15  ;;  %v4446_v60 = vpop.f32.mrf.mxu3  ;;  %v2067_v9 = vsel %vm5751_vm3, %v3459_v27, 0 }
 0x105   : > { %2076 = vmatpush.bf16.msra.mxu1 %v2067_v9 }
 0x106   : > { %3457 = vmatmul.msk.bf16.gmra.mxu0 %vm5748_vm1, %v1749_v6  ;;  %v4454_v57 = vpop.f32.mrf.mxu2 }
 0x10b   : > { %v4444_v43 = vpop.f32.mrf.mxu0 }
 0x10c   : > { %v4465_v6 = vpop.f32.mrf.mxu3 }
 0x10d   : > { %5753 = vst [vmem:[#allocation10_spill] sm:$0xff] %v4465_v6 }
 0x10e   : > { %v4471_v8 = vpop.f32.mrf.mxu2 }
 0x113   : > { %v1307_v15 = vpop.f32.mrf.mxu0 }
 0x114   : > { %v4458_v1 = vadd.f32 %v1307_v15, %v4379_v33  ;;  %v4473_v47 = vpop.f32.mrf.mxu3  ;;  %v4475_v33 = vpop.f32.mrf.mxu1 }
 0x115   : > { %5754 = vst [vmem:[#allocation11_spill] sm:$0xff] %v4473_v47 }
 0x116   : > { %3458 = vmatmul.msk.bf16.gmra.mxu0 %vm5752_vm8, %v1751_v11  ;;  %v4482_v15 = vpop.f32.mrf.mxu2  ;;  %v1085_v11 = vadd.f32 %v4393_v24, %v813_v0  ;;  %v818_v0 = vadd.f32 %v817_v28, %v4397_v54 }
 0x117   : > { %5755 = vst [vmem:[#allocation12_spill] sm:$0xff] %v4482_v15 }
 0x118   : > { %v1185_v27 = vadd.f32 %v4399_v44, %v1085_v11  ;;  %v1884_v44 = vshrl.u32 %v1869_v40, 16  ;;  %v1087_v35 = vadd.f32 %v4408_v59, %v818_v0  ;;  %v2231_v59 = vshrl.u32 %v3816_v52, 16 }
 0x11a   : > { %v1187_v49 = vadd.f32 %v4414_v55, %v1087_v35 }
 0x11b   : > { %v4469_v50 = vpop.f32.mrf.mxu0 }
 0x11c   : > { %v4486_v9 = vpop.f32.mrf.mxu3  ;;  %v4490_v47 = vpop.f32.mrf.mxu1 }
 0x11d   : > { %5756 = vst [vmem:[#allocation13_spill] sm:$0xff] %v4486_v9 }
 0x11e   : > { %v4495_v13 = vpop.f32.mrf.mxu2 }
 0x11f   : > { %5759 = vst [vmem:[#allocation15_spill] sm:$0xff] %v4495_v13  ;;  %v1886_v13 = vrot.slane %v1884_v44, 4 }
 0x123   : > { %v1312_v45 = vpop.f32.mrf.mxu0 }
 0x124   : > { %v4480_v3 = vadd.f32 %v1312_v45, %v4395_v41  ;;  %v1870_v41 = vsel %vm5760_vm15, 65537, %v5669_v18  ;;  %v1881_v45 = vshll.u32 %v1869_v40, 16  ;;  %v4504_v11 = vpop.f32.mrf.mxu3  ;;  %v4506_v9 = vpop.f32.mrf.mxu1 }
 0x125   : > { %5762 = vst [vmem:[#allocation17_spill] sm:$0xff] %v4504_v11  ;;  %v1894_v15 = vshrl.u32 %v1870_v41, 16  ;;  %v2223_v11 = vshrl.u32 %v4176_v53, 16 }
 0x126   : > { %v4508_v34 = vrot.slane %v1881_v45, 5 }
 0x127   : > { %v1896_v28 = vrot.slane %v1894_v15, 4  ;;  %v4524_v0 = vrot.slane %v2223_v11, 7  ;;  %v2240_v11 = vshrl.u32 %v3843_v2, 16 }
 0x128   : > { %v1887_v54 = vor.u32 %v1886_v13, %v4508_v34  ;;  %v2226_v13 = vshll.u32 %v4176_v53, 16  ;;  %v2249_v53 = vshrl.u32 %v3848_v4, 16 }
 0x12a   : > { %v1888_v45 = vrot.slane %v1887_v54, 4 }
 0x12b   : > { %v1314_v19 = vpop.f32.mrf.mxu0 }
 0x12c   : > { %v4488_v6 = vadd.f32 %v1314_v19, %v1185_v27  ;;  %v1890_v27 = vshll.u32 %v1870_v41, 16  ;;  %v1914_v41 = vshrl.u32 %v3971_v56, 16  ;;  %v4522_v55 = vpop.f32.mrf.mxu1  ;;  %v4535_v56 = vrot.slane %v2231_v59, 7 }
 0x12d   : > { %v2267_v59 = vshrl.u32 %v3859_v14, 16  ;;  %v4627_v14 = vld [vmem:[%s5552_s3] ss:$0 sm:$0xff] }
 0x12e   : > { %5757 = vst [vmem:[#allocation14_spill] sm:$0xff] %v4488_v6  ;;  %v4512_v6 = vpop.f32.mrf.mxu2 }
 0x133   : > { %v1317_v24 = vpop.f32.mrf.mxu0 }
 0x134   : > { %v4502_v19 = vadd.f32 %v1317_v24, %v4410_v26  ;;  %v1892_v26 = vrot.slane %v1890_v27, 5 }
 0x136   : > { %5761 = vst [vmem:[#allocation16_spill] sm:$0xff] %v4502_v19  ;;  %v4518_v19 = vpop.f32.mrf.mxu3  ;;  %v1897_v44 = vor.u32 %v1896_v28, %v1892_v26  ;;  %v4530_v27 = vsel %vm5764_vm13, %v1888_v45, %v1892_v26  ;;  %v2234_v28 = vshll.u32 %v3816_v52, 16  ;;  %v4544_v26 = vor.u32 %v2226_v13, %v4524_v0 }
 0x137   : > { %5763 = vst [vmem:[#allocation18_spill] sm:$0xff] %v4518_v19  ;;  %v4540_v19 = vpop.f32.mrf.mxu2  ;;  %v2258_v45 = vshrl.u32 %v3852_v7, 16 }
 0x138   : > { %5765 = vst [vmem:[#allocation19_spill] sm:$0xff] %v4530_v27  ;;  %v1898_v35 = vrot.slane %v1897_v44, 4 }
 0x139   : > { %5766 = vst [vmem:[#allocation20_spill] sm:$0xff] %v4544_v26  ;;  %v4570_v27 = vrot.slane %v2258_v45, 7  ;;  %v2276_v45 = vshrl.u32 %v4011_v36, 16 }
 0x13a   : > { %v4557_v13 = vsel %vm5764_vm13, %v1898_v35, %v3990_v21  ;;  %v1874_v21 = vsel %vm5770_vm4, 65537, %v5669_v18  ;;  %vm5808_vm4 = vcmask 1043456  }
 0x13b   : > { %v1319_v40 = vpop.f32.mrf.mxu0  ;;  %v1934_v35 = vshrl.u32 %v1874_v21, 16 }
 0x13c   : > { %v4515_v24 = vadd.f32 %v1319_v40, %v1187_v49  ;;  %v1916_v40 = vrot.slane %v1914_v41, 4  ;;  %v2229_v41 = vrot.slane %v4524_v0, 4  ;;  %v4565_v0 = vrot.slane %v2249_v53, 7 }
 0x13e   : > { %v1917_v15 = vor.u32 %v1916_v40, %v4002_v29  ;;  %v4567_v44 = vpop.f32.mrf.mxu3  ;;  %v1442_v29 = vadd.f32 %v4439_v31, %v4432_v63  ;;  %v1873_v63 = vsel %vm5768_vm11, 65537, %v5669_v18  ;;  %v808_v40 = vadd.f32 %v4361_v46, %v4358_v25 }
 0x13f   : > { %v1876_v25 = vsel %vm5720_vm10, 65537, %v5669_v18  ;;  %v4609_v46 = vpop.f32.mrf.mxu2  ;;  %vm5780_vm10 = vcmask 60416  }
 0x140   : > { %v1954_v16 = vshrl.u32 %v1876_v25, 16  ;;  %vm5784_vm6 = vmmov %vm5780_vm10 }
 0x141   : > { %vm5803_vm9 = vmmov %vm5784_vm6 }
 0x143   : > { %v1322_v49 = vpop.f32.mrf.mxu0 }
 0x144   : > { %v4533_v54 = vadd.f32 %v1322_v49, %v4425_v20  ;;  %v803_v20 = vadd.f32 %v4338_v17, %v4334_v30  ;;  %v2236_v30 = vor.u32 %v2234_v28, %v4535_v56  ;;  %v4562_v17 = vrot.slane %v2240_v11, 7  ;;  %v4580_v11 = vpop.f32.mrf.mxu1 }
 0x145   : > { %v1924_v28 = vshrl.u32 %v1873_v63, 16  ;;  %v1944_v49 = vshrl.u32 %v1875_v61, 16 }
 0x146   : > { %v1081_v26 = vadd.f32 %v4427_v32, %v803_v20  ;;  %v4575_v32 = vrot.slane %v2267_v59, 7  ;;  %v4584_v20 = vrot.slane %v1917_v15, 4  ;;  %v3484_v59 = vld [vmem:[%s5553_s4 + $0x8] sm:$0xf]  ;;  %v4619_v51 = vsel %vm4612_vm7, %v2229_v41, %v2236_v30  ;;  %v4631_v41 = vpop.f32.mrf.mxu3 }
 0x147   : > { %v2439_v15 = vsel %vm5769_vm2, %v3484_v59, 0  ;;  %v1920_v59 = vshll.u32 %v1873_v63, 16 }
 0x148   : > { %5767 = vst [vmem:[#allocation21_spill] sm:$0xff] %v4575_v32  ;;  %v1181_v31 = vadd.f32 %v4363_v37, %v1081_v26  ;;  %v1542_v37 = vadd.f32 %v4442_v58, %v1442_v29  ;;  %2448 = vmatpush.bf16.msrb.mxu3 %v2439_v15  ;;  %v1930_v58 = vshll.u32 %v1874_v21, 16  ;;  %v1083_v29 = vadd.f32 %v4376_v10, %v808_v40 }
 0x149   : > { %v1950_v15 = vshll.u32 %v1876_v25, 16  ;;  %v1936_v10 = vrot.slane %v1934_v35, 4  ;;  %v1956_v25 = vrot.slane %v1954_v16, 4 }
 0x14a   : > { %v1328_v26 = vadd.f32 %v4444_v43, %v1181_v31  ;;  %v1940_v43 = vshll.u32 %v1875_v61, 16  ;;  %v1689_v36 = vadd.f32 %v4446_v60, %v1542_v37  ;;  %v1926_v61 = vrot.slane %v1924_v28, 4 }
 0x14b   : > { %v4582_v53 = vpop.f32.mrf.mxu0  ;;  %v1183_v40 = vadd.f32 %v4383_v12, %v1083_v29  ;;  %v1946_v31 = vrot.slane %v1944_v49, 4  ;;  %v1444_v60 = vadd.f32 %v4467_v22, %v4458_v1  ;;  %v1922_v37 = vrot.slane %v1920_v59, 5 }
 0x14c   : > { %v1443_v63 = vadd.f32 %v4448_v48, %v1328_v26  ;;  %v4635_v26 = vrot.slane %v1930_v58, 5  ;;  %v4637_v32 = vrot.slane %v1940_v43, 5  ;;  %v1437_v28 = vpop.f32.mrf.mxu1  ;;  %v4640_v35 = vrot.slane %v1950_v15, 5 }
 0x14d   : > { %v1330_v21 = vadd.f32 %v4469_v50, %v1183_v40  ;;  %v823_v12 = vadd.f32 %v4340_v42, %v4412_v39  ;;  %v4646_v29 = vrot.slane %v2276_v45, 7  ;;  %v5773_v22 = vshll.u32 %v3843_v2, 16  ;;  %v5774_v45 = vld [vmem:[#allocation14_spill] sm:$0xff] }
 0x14e   : > { %v1543_v49 = vadd.f32 %v4454_v57, %v1443_v63  ;;  %v1937_v1 = vor.u32 %v1936_v10, %v4635_v26  ;;  %v1947_v50 = vor.u32 %v1946_v31, %v4637_v32  ;;  %v1957_v58 = vor.u32 %v1956_v25, %v4640_v35  ;;  %v1537_v63 = vpop.f32.mrf.mxu2  ;;  %v5776_v10 = vld [vmem:[#allocation8_spill] sm:$0xff]  ;;  %v5777_v40 = vld [vmem:[#allocation10_spill] sm:$0xff] }
 0x14f   : > { %v2245_v59 = vor.u32 %v5773_v22, %v4562_v17  ;;  %v1544_v43 = vadd.f32 %v4471_v8, %v1444_v60  ;;  %v1445_v39 = vadd.f32 %v4475_v33, %v1330_v21  ;;  %v1446_v57 = vadd.f32 %v4490_v47, %v4480_v3 }
 0x150   : > { %v1447_v15 = vadd.f32 %v4506_v9, %v5774_v45  ;;  %v4666_v31 = vrot.slane %v2285_v62, 7  ;;  %v1089_v8 = vadd.f32 %v5776_v10, %v823_v12  ;;  %v2288_v21 = vshll.u32 %v4028_v23, 16  ;;  %v5778_v9 = vld [vmem:[#allocation16_spill] sm:$0xff]  ;;  %v5779_v62 = vld [vmem:[#allocation9_spill] sm:$0xff] }
 0x151   : > { %v4673_v3 = vrot.slane %v1937_v1, 4  ;;  %v4677_v60 = vrot.slane %v1947_v50, 4  ;;  %v5786_v10 = vunpack.c.l.b16 %v4508_v34 }
 0x152   : > { %v1547_v45 = vadd.f32 %v4512_v6, %v1447_v15  ;;  %v1449_v6 = vadd.f32 %v4580_v11, %v4515_v24  ;;  %v1860_v15 = vld [vmem:[#allocation3] sm:$0x8]  ;;  %v5793_v24 = vld [vmem:[#allocation19_spill] sm:$0xff] }
 0x153   : > { %v1779_v30 = vpop.f32.mrf.mxu0  ;;  %v5794_v11 = vunpack.c.l.b16 %v5793_v24 }
 0x154   : > { %v1804_v48 = vadd.f32 %v1779_v30, %v1689_v36  ;;  %v1927_v36 = vor.u32 %v1926_v61, %v1922_v37  ;;  %v5775_v61 = vrot.slane %v4535_v56, 4  ;;  %v1690_v30 = vadd.f32 %v5777_v40, %v1543_v49  ;;  %v5781_v49 = vld [vmem:[#allocation11_spill] sm:$0xff] }
 0x155   : > { %v1448_v56 = vadd.f32 %v4522_v55, %v5778_v9  ;;  %v1691_v22 = vadd.f32 %v5781_v49, %v1544_v43  ;;  %v5788_v43 = vunpack.c.h.b16 %v4508_v34  ;;  %v2247_v40 = vrot.slane %v4562_v17, 4 }
 0x156   : > { %v1818_v16 = vadd.f32 %v4627_v14, %v1804_v48  ;;  %v4664_v2 = vsel %vm4612_vm7, %v5775_v61, %v2245_v59  ;;  %v4671_v47 = vrot.slane %v1927_v36, 4  ;;  %v4679_v48 = vrot.slane %v1957_v58, 4  ;;  %v5782_v59 = vld [vmem:[#allocation12_spill] sm:$0xff]  ;;  %v1684_v61 = vpop.f32.mrf.mxu3 }
 0x157   : > { %v1545_v36 = vadd.f32 %v5782_v59, %v1445_v39  ;;  %v5785_v58 = vld [vmem:[#allocation4_spill] sm:$0xff]  ;;  %v1548_v39 = vadd.f32 %v4540_v19, %v1448_v56  ;;  %v4732_v56 = vsel %vm5764_vm13, %v4584_v20, %v1922_v37  ;;  %v2301_v20 = vunpack.c.h.b16 %v4619_v51  ;;  %v3520_v19 = vld [vmem:[%s5553_s4 + $0x18] sm:$0xf] }
 0x158   : > { %v1828_v42 = vmax.f32 %v1818_v16, 0.0  ;;  %v1189_v16 = vadd.f32 %v5779_v62, %v1089_v8  ;;  %vm1963_vm1 = vcmp.ne.s32.totalorder %v5786_v10, %v5785_v58  ;;  %v5787_v8 = vld [vmem:[#allocation6_spill] sm:$0xff]  ;;  %vm4714_vm3 = vcmp.ne.s32.totalorder %v5794_v11, %v5785_v58 }
 0x159   : > { %vm1964_vm12 = vcmp.ne.s32.totalorder %v5788_v43, %v5787_v8  ;;  %v5802_v43 = vld [vmem:[#allocation18_spill] sm:$0xff]  ;;  %v4746_v37 = vadd.f32 %v4567_v44, %v1548_v39  ;;  %vm4777_vm0 = vcmp.ne.s32.totalorder %v2301_v20, %v5787_v8  ;;  %v5824_v20 = vunpack.c.l.b16 %v4043_v5 }
 0x15a   : > { %v1838_v33 = vpack.c.bf16 %v1828_v42, %v1828_v42  ;;  %v5783_v42 = vld [vmem:[#allocation15_spill] sm:$0xff]  ;;  %v1336_v55 = vadd.f32 %v4582_v53, %v1189_v16  ;;  %v5789_v53 = vshll.u32 %v3848_v4, 16  ;;  %vm4707_vm14 = vmpackc.low %vm1964_vm12, %vm1963_vm1  ;;  %v5797_v4 = vunpack.c.h.b16 %v5793_v24  ;;  %v5800_v16 = vld [vmem:[#allocation13_spill] sm:$0xff] }
 0x15b   : > { %v1781_v25 = vpop.f32.mrf.mxu0  ;;  %v1546_v1 = vadd.f32 %v5783_v42, %v1446_v57  ;;  %v1439_v57 = vpop.f32.mrf.mxu1  ;;  %v2022_v42 = vsel %vm4707_vm14, %v1860_v15, 0  ;;  %v5813_v24 = vshll.u32 %v3852_v7, 16  ;;  %v4802_v7 = vsel %vm5764_vm13, %v4671_v47, %v4635_v26 }
 0x15c   : > { %1848 = vst.msk [vmem:[#allocation3 + $0x4] sm:$0xf] %vm5780_vm10, %v1838_v33  ;;  %v1805_v12 = vadd.f32 %v1781_v25, %v1690_v30  ;;  %v2254_v30 = vor.u32 %v5789_v53, %v4565_v0  ;;  %v1450_v33 = vadd.f32 %v1437_v28, %v4533_v54  ;;  %v5790_v25 = vld [vmem:[#allocation20_spill] sm:$0xff]  ;;  %vm4721_vm8 = vcmp.ne.s32.totalorder %v5797_v4, %v5787_v8 }
 0x15d   : > { %1858 = vst.msk [vmem:[#allocation3 + $0x4] sm:$0xf] %vm5784_vm6, %v5669_v18  ;;  %v2293_v62 = vunpack.c.l.b16 %v5790_v25  ;;  %v2294_v34 = vunpack.c.h.b16 %v5790_v25  ;;  %v1451_v49 = vadd.f32 %v1439_v57, %v1336_v55  ;;  %v4741_v53 = vadd.f32 %v5802_v43, %v1547_v45  ;;  %vm4754_vm15 = vmpackc.low %vm4721_vm8, %vm4714_vm3 }
 0x15e   : > { %v1819_v50 = vadd.f32 %v4627_v14, %v1805_v12  ;;  %v4727_v28 = vsel %vm4612_vm7, %v2247_v40, %v2254_v30  ;;  %v1692_v12 = vadd.f32 %v5800_v16, %v1545_v36  ;;  %v1539_v40 = vpop.f32.mrf.mxu2  ;;  %v2300_v25 = vunpack.c.l.b16 %v4619_v51  ;;  %vm5827_vm8 = vmmov %vm5803_vm9 }
 0x15f   : > { %v1549_v36 = vadd.f32 %v4609_v46, %v1449_v6  ;;  %v1550_v55 = vadd.f32 %v1537_v63, %v1450_v33  ;;  %v2107_v44 = vunpack.c.l.b16 %v2022_v42  ;;  %v3494_v46 = vld [vmem:[%s5553_s4 + $0x10] sm:$0xf]  ;;  %vm4764_vm11 = vcmp.ne.s32.totalorder %v2293_v62, %v5785_v58  ;;  %v1686_v33 = vpop.f32.mrf.mxu3 }
 0x160   : > { %v1829_v9 = vmax.f32 %v1819_v50, 0.0  ;;  %v5801_v50 = vld [vmem:[#allocation17_spill] sm:$0xff]  ;;  %vm2298_vm2 = vcmp.ne.s32.totalorder %v2294_v34, %v5787_v8  ;;  %v2645_v15 = vsel %vm5808_vm4, %v3494_v46, 0  ;;  %vm4772_vm5 = vcmp.ne.s32.totalorder %v2300_v25, %v5785_v58 }
 0x161   : > { %v4738_v10 = vadd.f32 %v5801_v50, %v1546_v1  ;;  %2654 = vmatpush.bf16.msrb.mxu2 %v2645_v15  ;;  %v2256_v34 = vrot.slane %v4565_v0, 4  ;;  %v2263_v11 = vor.u32 %v5813_v24, %v4570_v27  ;;  %v4786_v17 = vadd.f32 %v4631_v41, %v1549_v36  ;;  %vm4790_vm10 = vmpackc.low %vm2298_vm2, %vm4764_vm11 }
 0x162   : > { %v1839_v59 = vpack.c.bf16 %v1829_v9, %v1829_v9  ;;  %v4796_v0 = vadd.f32 %v1684_v61, %v1550_v55  ;;  %v5819_v61 = vunpack.c.h.b16 %v4557_v13  ;;  %vm4828_vm12 = vmpackc.low %vm4777_vm0, %vm4772_vm5  ;;  %v5822_v47 = vmov 0 }
 0x163   : > { %v1784_v30 = vpop.f32.mrf.mxu0  ;;  %v4806_v41 = vsel %vm4612_vm7, %v2256_v34, %v2263_v11  ;;  %v5823_v47 = vsel %vm4828_vm12, 4294967295, %v5822_v47  ;;  %vm4835_vm3 = vcmp.ne.s32.totalorder %v5824_v20, %v5785_v58  ;;  %v2314_v55 = vunpack.c.l.b16 %v4727_v28 }
 0x164   : > { %1849 = vst.msk [vmem:[#allocation3 + $0x8] sm:$0xf] %vm5803_vm9, %v1839_v59  ;;  %v1806_v57 = vadd.f32 %v1784_v30, %v1691_v22  ;;  %v1861_v1 = vld [vmem:[#allocation3 + $0x4] sm:$0xf]  ;;  %v1551_v22 = vadd.f32 %v1539_v40, %v1451_v49  ;;  %v2307_v49 = vunpack.c.l.b16 %v4664_v2  ;;  %v2308_v59 = vunpack.c.h.b16 %v4664_v2  ;;  %v5844_v2 = vld [vmem:[#allocation5_spill] sm:$0xff] }
 0x165   : > { %v2023_v51 = vsel %vm4754_vm15, %v1861_v1, 0  ;;  %v2210_v54 = vld [vmem:[#allocation3 + $0x4] sm:$0xf]  ;;  %v5816_v40 = vunpack.c.l.b16 %v4557_v13  ;;  %vm4820_vm1 = vcmp.ne.s32.totalorder %v5819_v61, %v5787_v8  ;;  %vm5835_vm4 = vcmask 64512  }
 0x166   : > { %v1820_v39 = vadd.f32 %v4627_v14, %v1806_v57  ;;  %v2108_v6 = vunpack.c.l.b16 %v2023_v51  ;;  %v4808_v50 = vadd.f32 %v1686_v33, %v1551_v22  ;;  %v2315_v57 = vunpack.c.h.b16 %v4727_v28  ;;  %v2478_v22 = vld [vmem:[#allocation3 + $0x4] sm:$0x8] }
 0x167   : > { %vm4813_vm6 = vcmp.ne.s32.totalorder %v5816_v40, %v5785_v58  ;;  %v2356_v1 = vsel %vm4790_vm10, %v2210_v54, 0  ;;  %vm4852_vm11 = vcmp.ne.s32.totalorder %v2307_v49, %v5785_v58  ;;  %vm4857_vm2 = vcmp.ne.s32.totalorder %v2308_v59, %v5787_v8  ;;  %v5843_v40 = vld [vmem:[#allocation21_spill] sm:$0xff] }
 0x168   : > { %v1830_v4 = vmax.f32 %v1820_v39, 0.0  ;;  %v2116_v42 = vpack.c.b16 %v2108_v6, %v2107_v44  ;;  %v5828_v44 = vunpack.c.h.b16 %v4043_v5  ;;  %v3489_v5 = vld [vmem:[%s5553_s4 + $0xc] sm:$0xf]  ;;  %v1987_v15 = vunpack.c.l.b16 %v4732_v56  ;;  %vm4874_vm0 = vmpackc.low %vm4820_vm1, %vm4813_vm6 }
 0x169   : > { %vm5836_vm5 = vcmask 1043456   ;;  %v2376_v62 = vunpack.c.l.b16 %v2356_v1  ;;  %v1988_v49 = vunpack.c.h.b16 %v4732_v56  ;;  %v2265_v59 = vrot.slane %v4570_v27, 4 }
 0x16a   : > { %v1840_v43 = vpack.c.bf16 %v1830_v4, %v1830_v4  ;;  %vm4847_vm9 = vcmp.ne.s32.totalorder %v5828_v44, %v5787_v8  ;;  %v2126_v39 = vshll.u32 %v2116_v42, 16  ;;  %v2571_v9 = vsel %vm5836_vm5, %v3489_v5, 0 }
 0x16b   : > { %v1786_v30 = vpop.f32.mrf.mxu0  ;;  %v3572_v25 = vld [vmem:[#allocation3 + $0x4] sm:$0xff]  ;;  %2580 = vmatpush.bf16.msrb.mxu1 %v2571_v9  ;;  %v5845_v61 = vshll.u32 %v5844_v2, 16  ;;  %vm4901_vm6 = vmpackc.low %vm4847_vm9, %vm4835_vm3  ;;  %v1994_v20 = vunpack.c.l.b16 %v4802_v7  ;;  %vm4920_vm1 = vcmp.ne.s32.totalorder %v1987_v15, %v5785_v58  ;;  %vm4925_vm3 = vcmp.ne.s32.totalorder %v1988_v49, %v5787_v8 }
 0x16c   : > { %v2211_v13 = vld [vmem:[#allocation3 + $0x8] sm:$0xf]  ;;  %1850 = vst.msk [vmem:[#allocation3 + $0xc] sm:$0xf] %vm5827_vm8, %v1840_v43  ;;  %v1807_v51 = vadd.f32 %v1786_v30, %v1692_v12  ;;  %3476 = vmatmul.msk.bf16.vlgmr.msra.gmra.mxu1 %vm5835_vm4, %v3572_v25  ;;  %v2123_v12 = vshrl.u32 %v2116_v42, 16  ;;  %vm4879_vm8 = vcmp.ne.s32.totalorder %v2314_v55, %v5785_v58  ;;  %vm4884_vm4 = vcmp.ne.s32.totalorder %v2315_v57, %v5787_v8 }
 0x16d   : > { %v2357_v6 = vsel %vm4828_vm12, %v2211_v13, 0  ;;  %v1862_v24 = vld [vmem:[#allocation3 + $0x8] sm:$0xf]  ;;  %v2481_v43 = vsel %vm4754_vm15, %v2211_v13, 0  ;;  %v2272_v26 = vor.u32 %v5845_v61, %v5843_v40  ;;  %v2480_v30 = vsel %vm4707_vm14, %v2478_v22, 0 }
 0x16e   : > { %v1821_v33 = vadd.f32 %v4627_v14, %v1807_v51  ;;  %v2377_v34 = vunpack.c.l.b16 %v2357_v6  ;;  %v4905_v27 = vrot.slane %v2123_v12, 3  ;;  %v4907_v56 = vrot.slane %v2126_v39, 4  ;;  %v2815_v55 = vld [vmem:[#allocation3 + $0x8] sm:$0x8] }
 0x16f   : > { %v1995_v13 = vunpack.c.h.b16 %v4802_v7  ;;  %v2024_v1 = vsel %vm4874_vm0, %v1862_v24, 0  ;;  %v4917_v51 = vsel %vm4612_vm7, %v2265_v59, %v2272_v26  ;;  %v2501_v22 = vunpack.c.l.b16 %v2481_v43 }
 0x170   : > { %v1831_v42 = vmax.f32 %v1821_v33, 0.0  ;;  %v4913_v36 = vpack.c.b16 %v2377_v34, %v2376_v62  ;;  %v2321_v5 = vunpack.c.l.b16 %v4806_v41  ;;  %v2500_v6 = vunpack.c.l.b16 %v2480_v30 }
 0x171   : > { %vm5852_vm9 = vcmask 60416   ;;  %vm5604_vm5 = vsmask.f32 4352  ;;  %v2817_v9 = vsel %vm4707_vm14, %v2815_v55, 0  ;;  %v2322_v62 = vunpack.c.h.b16 %v4806_v41 }
 0x172   : > { %v1841_v57 = vpack.c.bf16 %v1831_v42, %v1831_v42  ;;  %v2109_v34 = vunpack.c.l.b16 %v2024_v1  ;;  %v2129_v49 = vor.u32 %v4907_v56, %v4905_v27  ;;  %v4956_v41 = vsel %vm5764_vm13, %v4673_v3, %v4637_v32 }
 0x173   : > { %v1789_v44 = vpop.f32.mrf.mxu0  ;;  %v1863_v46 = vld [vmem:[#allocation3 + $0xc] sm:$0xf]  ;;  %v2393_v63 = vshll.u32 %v4913_v36, 16  ;;  %vm5855_vm14 = vcmask 1043456   ;;  %v2391_v61 = vshrl.u32 %v4913_v36, 16  ;;  %v2837_v26 = vunpack.c.l.b16 %v2817_v9 }
 0x174   : > { %v4929_v39 = vld [vmem:[#allocation3 + $0xc] sm:$0xf]  ;;  %1851 = vst.msk [vmem:[#allocation3 + $0x10] sm:$0xf] %vm5852_vm9, %v1841_v57  ;;  %v1808_v33 = vadd.f32 %v1789_v44, %v4738_v10  ;;  %v2025_v15 = vsel %vm4901_vm6, %v1863_v46, 0  ;;  %vm4945_vm9 = vmpackc.low %vm4857_vm2, %vm4852_vm11  ;;  %v2908_v28 = vsel %vm5855_vm14, %v3520_v19, 0  ;;  %vm4962_vm11 = vcmp.ne.s32.totalorder %v1994_v20, %v5785_v58 }
 0x175   : > { %v2110_v24 = vunpack.c.l.b16 %v2025_v15  ;;  %v2212_v59 = vld [vmem:[#allocation3 + $0xc] sm:$0xf]  ;;  %vm4967_vm2 = vcmp.ne.s32.totalorder %v1995_v13, %v5787_v8  ;;  %v2818_v32 = vsel %vm4754_vm15, %v4929_v39, 0  ;;  %2917 = vmatpush.bf16.msra.mxu0 %v2908_v28  ;;  %v4975_v30 = vpack.c.b16 %v2501_v22, %v2500_v6  ;;  %vm4985_vm15 = vmpackc.low %vm4884_vm4, %vm4879_vm8 }
 0x176   : > { %v1822_v42 = vadd.f32 %v4627_v14, %v1808_v33  ;;  %v2358_v56 = vsel %vm4945_vm9, %v2212_v59, 0  ;;  %v2328_v20 = vunpack.c.l.b16 %v4917_v51  ;;  %v2329_v13 = vunpack.c.h.b16 %v4917_v51 }
 0x177   : > { %v2117_v3 = vpack.c.b16 %v2110_v24, %v2109_v34  ;;  %v2838_v1 = vunpack.c.l.b16 %v2818_v32  ;;  %v2001_v36 = vunpack.c.l.b16 %v4956_v41  ;;  %v2395_v46 = vrot.slane %v2393_v63, 1 }
 0x178   : > { %v1832_v27 = vmax.f32 %v1822_v42, 0.0  ;;  %v2482_v22 = vsel %vm4874_vm0, %v2212_v59, 0  ;;  %v2002_v51 = vunpack.c.h.b16 %v4956_v41  ;;  %v2378_v54 = vunpack.c.l.b16 %v2358_v56 }
 0x179   : > { %v2131_v55 = vshrl.u32 %v2117_v3, 16  ;;  %v2134_v57 = vshll.u32 %v2117_v3, 16  ;;  %v2274_v34 = vrot.slane %v5843_v40, 4  ;;  %vm5862_vm8 = vcmask 60416   ;;  %v5867_v40 = vld [vmem:[#allocation7_spill] sm:$0xff] }
 0x17a   : > { %v1842_v44 = vpack.c.bf16 %v1832_v27, %v1832_v27  ;;  %vm5001_vm4 = vcmp.ne.s32.totalorder %v2321_v5, %v5785_v58  ;;  %vm5006_vm14 = vcmp.ne.s32.totalorder %v2322_v62, %v5787_v8  ;;  %v5868_v63 = vshll.u32 %v5867_v40, 16 }
 0x17b   : > { %v1791_v6 = vpop.f32.mrf.mxu0  ;;  %v3573_v33 = vld [vmem:[#allocation3 + $0xc] sm:$0xff]  ;;  %v2133_v15 = vrot.slane %v2131_v55, 3  ;;  %v2136_v4 = vrot.slane %v2134_v57, 4  ;;  %v2846_v3 = vpack.c.b16 %v2838_v1, %v2837_v26  ;;  %v1953_v5 = vsel %vm5764_vm13, %v4677_v60, %v4640_v35 }
 0x17c   : > { %v2213_v9 = vld [vmem:[#allocation3 + $0x10] sm:$0xf]  ;;  %1852 = vst.msk [vmem:[#allocation3 + $0x14] sm:$0xf] %vm5862_vm8, %v1842_v44  ;;  %v1809_v24 = vadd.f32 %v1791_v6, %v4741_v53  ;;  %v2281_v53 = vor.u32 %v5868_v63, %v4646_v29  ;;  %vm5869_vm8 = vcmask 64512   ;;  %v2396_v27 = vor.u32 %v2395_v46, %v2391_v61 }
 0x17d   : > { %v2359_v19 = vsel %vm4985_vm15, %v2213_v9, 0  ;;  %v2483_v59 = vsel %vm4901_vm6, %v2213_v9, 0  ;;  %3477 = vmatmul.msk.bf16.gmra.mxu1 %vm5869_vm8, %v3573_v33  ;;  %v5014_v28 = vor.u32 %v2136_v4, %v2133_v15  ;;  %v2502_v56 = vunpack.c.l.b16 %v2482_v22  ;;  %v1864_v57 = vld [vmem:[#allocation3 + $0x10] sm:$0xf]  ;;  %vm5025_vm8 = vmpackc.low %vm4925_vm3, %vm4920_vm1  ;;  %v3515_v44 = vld [vmem:[%s5553_s4 + $0x14] sm:$0xf] }
 0x17e   : > { %v2379_v32 = vunpack.c.l.b16 %v2359_v19  ;;  %v1823_v62 = vadd.f32 %v4627_v14, %v1809_v24  ;;  %v2503_v55 = vunpack.c.l.b16 %v2483_v59  ;;  %v5033_v38 = vld [vmem:[#allocation3 + $0x10] sm:$0xf]  ;;  %vm5036_vm13 = vcmp.ne.s32.totalorder %v2328_v20, %v5785_v58 }
 0x17f   : > { %v2138_v26 = vsel %vm5604_vm5, %v2129_v49, %v5014_v28  ;;  %vm5041_vm12 = vcmp.ne.s32.totalorder %v2329_v13, %v5787_v8  ;;  %vm5876_vm1 = vcmask 64512   ;;  %vm5047_vm3 = vcmp.ne.s32.totalorder %v2001_v36, %v5785_v58  ;;  %vm5061_vm5 = vmpackc.low %vm4967_vm2, %vm4962_vm11 }
 0x180   : > { %v5031_v1 = vpack.c.b16 %v2379_v32, %v2378_v54  ;;  %v1833_v12 = vmax.f32 %v1823_v62, 0.0  ;;  %3480 = vmatmul.msk.bf16.vlgmr.msra.gmra.mxu2 %vm5876_vm1, %v2138_v26  ;;  %v2008_v49 = vunpack.c.l.b16 %v1953_v5  ;;  %v5053_v61 = vsel %vm4612_vm7, %v2274_v34, %v2281_v53 }
 0x181   : > { %v2283_v20 = vrot.slane %v4646_v29, 4  ;;  %v2026_v36 = vsel %vm5025_vm8, %v1864_v57, 0  ;;  %v2852_v22 = vshrl.u32 %v2846_v3, 16  ;;  %v2290_v6 = vor.u32 %v2288_v21, %v4666_v31 }
 0x182   : > { %v2398_v13 = vshll.u32 %v5031_v1, 16  ;;  %v1843_v33 = vpack.c.bf16 %v1833_v12, %v1833_v12  ;;  %v2819_v29 = vsel %vm4874_vm0, %v5033_v38, 0  ;;  %v2855_v43 = vshll.u32 %v2846_v3, 16 }
 0x183   : > { %v5073_v15 = vpack.c.b16 %v2503_v55, %v2502_v56  ;;  %v1794_v2 = vpop.f32.mrf.mxu0  ;;  %v1865_v9 = vld [vmem:[#allocation3 + $0x14] sm:$0xf]  ;;  %vm5080_vm11 = vcmp.ne.s32.totalorder %v2002_v51, %v5787_v8  ;;  %v2009_v23 = vunpack.c.h.b16 %v1953_v5  ;;  %v5086_v21 = vsel %vm4612_vm7, %v2283_v20, %v2290_v6  ;;  %vm5885_vm7 = vmmov %vm5876_vm1 }
 0x184   : > { %v5075_v4 = vrot.slane %v2398_v13, 1  ;;  %v5077_v54 = vld [vmem:[#allocation3 + $0x14] sm:$0xf]  ;;  %vm5883_vm0 = vcmask 60416   ;;  %v1810_v11 = vadd.f32 %v1794_v2, %v4746_v37  ;;  %v2027_v24 = vsel %vm5061_vm5, %v1865_v9, 0 }
 0x185   : > { %1853 = vst.msk [vmem:[#allocation3 + $0x18] sm:$0xf] %vm5883_vm0, %v1843_v33  ;;  %v2111_v19 = vunpack.c.l.b16 %v2026_v36  ;;  %v2820_v51 = vsel %vm4901_vm6, %v5077_v54, 0  ;;  %vm5884_vm2 = vsmask.f32 7424  ;;  %v2112_v40 = vunpack.c.l.b16 %v2027_v24  ;;  %vm5111_vm6 = vmpackc.low %vm5006_vm14, %vm5001_vm4 }
 0x186   : > { %v2401_v59 = vsel %vm5884_vm2, %v2396_v27, %v5075_v4  ;;  %v2839_v63 = vunpack.c.l.b16 %v2819_v29  ;;  %v2840_v52 = vunpack.c.l.b16 %v2820_v51  ;;  %v1824_v53 = vadd.f32 %v4627_v14, %v1810_v11  ;;  %v5105_v56 = vld [vmem:[#allocation3 + $0x14] sm:$0xf]  ;;  %vm5128_vm4 = vmpackc.low %vm5041_vm12, %vm5036_vm13 }
 0x187   : > { %3485 = vmatmul.msk.bf16.vlgmr.msrb.gmra.mxu3 %vm5885_vm7, %v2401_v59  ;;  %v2854_v32 = vrot.slane %v2852_v22, 3  ;;  %v2857_v37 = vrot.slane %v2855_v43, 4  ;;  %vm5100_vm1 = vcmp.ne.s32.totalorder %v2008_v49, %v5785_v58  ;;  %v2515_v25 = vshrl.u32 %v4975_v30, 16  ;;  %vm5141_vm12 = vmpackc.low %vm5080_vm11, %vm5047_vm3 }
 0x188   : > { %v2118_v5 = vpack.c.b16 %v2112_v40, %v2111_v19  ;;  %v2847_v62 = vpack.c.b16 %v2840_v52, %v2839_v63  ;;  %v2402_v55 = vshrl.u32 %v5031_v1, 16  ;;  %vm5117_vm0 = vcmp.ne.s32.totalorder %v2009_v23, %v5787_v8  ;;  %vm5899_vm3 = vmmov %vm5885_vm7 }
 0x189   : > { %v1834_v26 = vmax.f32 %v1824_v53, 0.0  ;;  %v2335_v12 = vunpack.c.l.b16 %v5053_v61  ;;  %v2336_v49 = vunpack.c.h.b16 %v5053_v61  ;;  %v2518_v41 = vshll.u32 %v4975_v30, 16  ;;  %vm5902_vm7 = vmmov %vm5899_vm3 }
 0x18a   : > { %v2140_v20 = vshrl.u32 %v2118_v5, 16  ;;  %v2143_v42 = vshll.u32 %v2118_v5, 16  ;;  %v2860_v13 = vshrl.u32 %v2847_v62, 16  ;;  %v2863_v36 = vshll.u32 %v2847_v62, 16 }
 0x18b   : > { %v1844_v22 = vpack.c.bf16 %v1834_v26, %v1834_v26  ;;  %v2858_v6 = vor.u32 %v2857_v37, %v2854_v32  ;;  %v2360_v61 = vsel %vm5111_vm6, %v5105_v56, 0  ;;  %v5135_v33 = vrot.slane %v2515_v25, 3  ;;  %v1796_v30 = vpop.f32.mrf.mxu0 }
 0x18c   : > { %v3574_v29 = vld [vmem:[#allocation3 + $0x14] sm:$0xff]  ;;  %v2142_v43 = vrot.slane %v2140_v20, 3  ;;  %v2145_v2 = vrot.slane %v2143_v42, 4  ;;  %v2862_v9 = vrot.slane %v2860_v13, 3  ;;  %v2865_v23 = vrot.slane %v2863_v36, 4 }
 0x18d   : > { %vm5896_vm14 = vcmask 60416   ;;  %v1811_v60 = vadd.f32 %v1796_v30, %v4786_v17  ;;  %v5147_v11 = vld [vmem:[#allocation3 + $0x18] sm:$0xf]  ;;  %vm5150_vm13 = vcmp.ne.s32.totalorder %v2335_v12, %v5785_v58  ;;  %v2342_v7 = vunpack.c.l.b16 %v5086_v21  ;;  %3478 = vmatmul.msk.bf16.gmra.mxu1 %vm5899_vm3, %v3574_v29 }
 0x18e   : > { %1854 = vst.msk [vmem:[#allocation3 + $0x1c] sm:$0xf] %vm5896_vm14, %v1844_v22  ;;  %v1866_v24 = vld [vmem:[#allocation3 + $0x18] sm:$0xf]  ;;  %v2343_v34 = vunpack.c.h.b16 %v5086_v21  ;;  %v5157_v51 = vor.u32 %v2145_v2, %v2142_v43  ;;  %v5159_v59 = vor.u32 %v2865_v23, %v2862_v9  ;;  %v2361_v17 = vsel %vm5128_vm4, %v5147_v11, 0  ;;  %vm5903_vm14 = vmmov %vm5899_vm3 }
 0x18f   : > { %v5164_v40 = vld [vmem:[#allocation3 + $0x18] sm:$0xf]  ;;  %v5166_v63 = vrot.slane %v2518_v41, 4  ;;  %v1825_v52 = vadd.f32 %v4627_v14, %v1811_v60  ;;  %v2380_v53 = vunpack.c.l.b16 %v2360_v61  ;;  %v2381_v32 = vunpack.c.l.b16 %v2361_v17 }
 0x190   : > { %v2028_v21 = vsel %vm5141_vm12, %v1866_v24, 0  ;;  %vm5900_vm11 = vsmask.f32 4352  ;;  %v2821_v5 = vsel %vm5025_vm8, %v5164_v40, 0  ;;  %v2523_v62 = vshrl.u32 %v5073_v15, 16 }
 0x191   : > { %v2147_v37 = vsel %vm5900_vm11, %v5014_v28, %v5157_v51  ;;  %vm5901_vm2 = vmmov %vm5900_vm11  ;;  %v1835_v26 = vmax.f32 %v1825_v52, 0.0  ;;  %v5182_v12 = vpack.c.b16 %v2381_v32, %v2380_v53  ;;  %v2404_v41 = vor.u32 %v2402_v55, %v5075_v4 }
 0x192   : > { %v2867_v25 = vsel %vm5901_vm2, %v2858_v6, %v5159_v59  ;;  %3481 = vmatmul.msk.bf16.gmra.mxu2 %vm5902_vm7, %v2147_v37  ;;  %vm5186_vm3 = vcmp.ne.s32.totalorder %v2336_v49, %v5787_v8  ;;  %vm5194_vm11 = vmpackc.low %vm5117_vm0, %vm5100_vm1  ;;  %v2113_v42 = vunpack.c.l.b16 %v2028_v21  ;;  %vm5199_vm2 = vcmp.ne.s32.totalorder %v2342_v7, %v5785_v58 }
 0x193   : > { %3521 = vmatmul.msk.bf16.vlgmr.msra.gmra.mxu0 %vm5903_vm14, %v2867_v25  ;;  %vm5204_vm7 = vcmp.ne.s32.totalorder %v2343_v34, %v5787_v8  ;;  %v2521_v3 = vor.u32 %v5166_v63, %v5135_v33  ;;  %v1845_v55 = vpack.c.bf16 %v1835_v26, %v1835_v26  ;;  %v2406_v57 = vshll.u32 %v5182_v12, 16  ;;  %v1799_v22 = vpop.f32.mrf.mxu0  ;;  %vm5234_vm0 = vmpackc.low %vm5186_vm3, %vm5150_vm13 }
 0x194   : > { %v2841_v49 = vunpack.c.l.b16 %v2821_v5  ;;  %v2526_v36 = vshll.u32 %v5073_v15, 16  ;;  %v5214_v30 = vrot.slane %v2523_v62, 3  ;;  %v2015_v29 = vunpack.c.l.b16 %v4679_v48 }
 0x195   : > { %v1867_v6 = vld [vmem:[#allocation3 + $0x1c] sm:$0xf]  ;;  %v2016_v43 = vunpack.c.h.b16 %v4679_v48  ;;  %v2292_v2 = vrot.slane %v4666_v31, 4  ;;  %vm5912_vm1 = vcmask 60416   ;;  %v1812_v9 = vadd.f32 %v1799_v22, %v4796_v0 }
 0x196   : > { %v5212_v61 = vld [vmem:[#allocation3 + $0x1c] sm:$0xf]  ;;  %1855 = vst.msk [vmem:[#allocation3 + $0x20] sm:$0xf] %vm5912_vm1, %v1845_v55  ;;  %v5221_v23 = vrot.slane %v2406_v57, 1  ;;  %v2029_v15 = vsel %vm5194_vm11, %v1867_v6, 0  ;;  %vm2019_vm3 = vcmp.ne.s32.totalorder %v2015_v29, %v5785_v58  ;;  %vm5262_vm1 = vmpackc.low %vm5204_vm7, %vm5199_vm2 }
 0x197   : > { %v2822_v60 = vsel %vm5061_vm5, %v5212_v61, 0  ;;  %v2114_v24 = vunpack.c.l.b16 %v2029_v15  ;;  %v5228_v34 = vld [vmem:[#allocation3 + $0x1c] sm:$0xf]  ;;  %v2484_v48 = vsel %vm5025_vm8, %v5105_v56, 0  ;;  %v2485_v0 = vsel %vm5061_vm5, %v5147_v11, 0 }
 0x198   : > { %v2842_v7 = vunpack.c.l.b16 %v2822_v60  ;;  %v1826_v17 = vadd.f32 %v4627_v14, %v1812_v9  ;;  %vm5915_vm14 = vsmask.f32 7424  ;;  %v2410_v19 = vshrl.u32 %v5182_v12, 16 }
 0x199   : > { %v2409_v52 = vsel %vm5915_vm14, %v2404_v41, %v5221_v23  ;;  %v2528_v53 = vrot.slane %v2526_v36, 4  ;;  %vm5916_vm13 = vcmask 64512   ;;  %v2119_v32 = vpack.c.b16 %v2114_v24, %v2113_v42 }
 0x19a   : > { %3486 = vmatmul.msk.bf16.gmra.mxu3 %vm5916_vm13, %v2409_v52  ;;  %v2848_v21 = vpack.c.b16 %v2842_v7, %v2841_v49  ;;  %vm2020_vm8 = vcmp.ne.s32.totalorder %v2016_v43, %v5787_v8  ;;  %v1836_v46 = vmax.f32 %v1826_v17, 0.0  ;;  %v2362_v56 = vsel %vm5234_vm0, %v5228_v34, 0 }
 0x19b   : > { %v2349_v11 = vunpack.c.l.b16 %v2292_v2  ;;  %vm5917_vm5 = vcmask 1043456   ;;  %v2149_v25 = vshrl.u32 %v2119_v32, 16  ;;  %v2152_v5 = vshll.u32 %v2119_v32, 16  ;;  %vm5266_vm14 = vmpackc.low %vm2020_vm8, %vm2019_vm3  ;;  %v1801_v36 = vpop.f32.mrf.mxu0 }
 0x19c   : > { %v2776_v37 = vsel %vm5917_vm5, %v3515_v44, 0  ;;  %v2869_v62 = vshrl.u32 %v2848_v21, 16  ;;  %v2872_v26 = vshll.u32 %v2848_v21, 16  ;;  %v1846_v28 = vpack.c.bf16 %v1836_v46, %v1836_v46 }
 0x19d   : > { %2785 = vmatpush.bf16.msra.mxu3 %v2776_v37  ;;  %v2350_v55 = vunpack.c.h.b16 %v2292_v2  ;;  %v2504_v57 = vunpack.c.l.b16 %v2484_v48  ;;  %v2505_v49 = vunpack.c.l.b16 %v2485_v0  ;;  %v3575_v22 = vld [vmem:[#allocation3 + $0x1c] sm:$0xff]  ;;  %v2151_v6 = vrot.slane %v2149_v25, 3 }
 0x19e   : > { %v2154_v29 = vrot.slane %v2152_v5, 4  ;;  %v2871_v13 = vrot.slane %v2869_v62, 3  ;;  %v2874_v43 = vrot.slane %v2872_v26, 4  ;;  %vm5922_vm13 = vcmask 60416   ;;  %v5272_v9 = vld [vmem:[#allocation3 + $0x20] sm:$0xf] }
 0x19f   : > { %1856 = vst.msk [vmem:[#allocation3 + $0x24] sm:$0xf] %vm5922_vm13, %v1846_v28  ;;  %v1813_v4 = vadd.f32 %v1801_v36, %v4808_v50  ;;  %v2382_v15 = vunpack.c.l.b16 %v2362_v56  ;;  %v1868_v60 = vld [vmem:[#allocation3 + $0x20] sm:$0xf]  ;;  %vm2353_vm2 = vcmp.ne.s32.totalorder %v2349_v11, %v5785_v58  ;;  %v2511_v24 = vpack.c.b16 %v2505_v49, %v2504_v57 }
 0x1a0   : > { %vm5923_vm7 = vcmask 64512   ;;  %v5276_v2 = vor.u32 %v2154_v29, %v2151_v6  ;;  %v5278_v7 = vor.u32 %v2874_v43, %v2871_v13  ;;  %v2363_v48 = vsel %vm5262_vm1, %v5272_v9, 0  ;;  %v5285_v0 = vld [vmem:[#allocation3 + $0x20] sm:$0xf]  ;;  %v3578_v29 = vld [vmem:[#allocation3 + $0x18] sm:$0xff] }
 0x1a1   : > { %3479 = vmatmul.msk.bf16.gmra.mxu1 %vm5923_vm7, %v3575_v22  ;;  %v2030_v50 = vsel %vm5266_vm14, %v1868_v60, 0  ;;  %v1827_v17 = vadd.f32 %v4627_v14, %v1813_v4  ;;  %v2383_v52 = vunpack.c.l.b16 %v2363_v48  ;;  %vm2354_vm3 = vcmp.ne.s32.totalorder %v2350_v55, %v5787_v8  ;;  %vm5926_vm13 = vmmov %vm5923_vm7 }
 0x1a2   : > { %v2115_v32 = vunpack.c.l.b16 %v2030_v50  ;;  %vm5924_vm8 = vsmask.f32 4352  ;;  %v2823_v46 = vsel %vm5141_vm12, %v5285_v0, 0  ;;  %v2532_v56 = vshrl.u32 %v2511_v24, 16 }
 0x1a3   : > { %v2156_v21 = vsel %vm5924_vm8, %v5157_v51, %v5276_v2  ;;  %vm5925_vm5 = vmmov %vm5924_vm8  ;;  %v1837_v37 = vmax.f32 %v1827_v17, 0.0  ;;  %v2388_v14 = vpack.c.b16 %v2383_v52, %v2382_v15  ;;  %v2535_v5 = vshll.u32 %v2511_v24, 16  ;;  %v3546_v51 = vld [vmem:[%s5553_s4 + $0x20] sm:$0xf] }
 0x1a4   : > { %v2876_v44 = vsel %vm5925_vm5, %v5159_v59, %v5278_v7  ;;  %3482 = vmatmul.msk.bf16.gmra.mxu2 %vm5926_vm13, %v2156_v21  ;;  %v2120_v25 = vpack.c.b16 %v2115_v32, %v2115_v32  ;;  %v3525_v59 = vld [vmem:[%s5553_s4 + $0x1c] sm:$0xf]  ;;  %v2529_v62 = vor.u32 %v2528_v53, %v5214_v30  ;;  %v2534_v26 = vrot.slane %v2532_v56, 3  ;;  %vm5313_vm13 = vmpackc.low %vm2354_vm3, %vm2353_vm2  ;;  %v5317_v30 = vld [vmem:[#allocation3 + $0x8] sm:$0xf] }
 0x1a5   : > { %3522 = vmatmul.msk.bf16.gmra.mxu0 %vm5923_vm7, %v2876_v44  ;;  %vm5927_vm8 = vcmask 1043456   ;;  %v1847_v49 = vpack.c.bf16 %v1837_v37, %v1837_v37  ;;  %v2414_v36 = vshll.u32 %v2388_v14, 16  ;;  %v2412_v53 = vor.u32 %v2410_v19, %v5221_v23 }
 0x1a6   : > { %v3113_v28 = vsel %vm5927_vm8, %v3546_v51, 0  ;;  %vm5928_vm5 = vmmov %vm5927_vm8  ;;  %v2158_v22 = vshrl.u32 %v2120_v25, 16  ;;  %v2161_v6 = vshll.u32 %v2120_v25, 16  ;;  %v5322_v13 = vld [vmem:[#allocation3 + $0x24] sm:$0xf]  ;;  %v2843_v43 = vunpack.c.l.b16 %v2823_v46 }
 0x1a7   : > { %v2982_v57 = vsel %vm5928_vm5, %v3525_v59, 0  ;;  %3122 = vmatpush.bf16.msra.mxu2 %v3113_v28  ;;  %v2218_v4 = vld [vmem:[#allocation3 + $0x24] sm:$0x1]  ;;  %v2537_v15 = vrot.slane %v2535_v5, 4  ;;  %v2695_v58 = vsel %vm4945_vm9, %v5033_v38, 0  ;;  %vm5931_vm2 = vcmask 60416  }
 0x1a8   : > { %2991 = vmatpush.bf16.msra.mxu1 %v2982_v57  ;;  %1857 = vst.msk [vmem:[#allocation3 + $0x28] sm:$0xf] %vm5931_vm2, %v1847_v49  ;;  %v2416_v8 = vrot.slane %v2414_v36, 1  ;;  %v2160_v11 = vrot.slane %v2158_v22, 3  ;;  %v2163_v55 = vrot.slane %v2161_v6, 4  ;;  %v2824_v60 = vsel %vm5194_vm11, %v5322_v13, 0  ;;  %vm5932_vm3 = vmmov %vm5931_vm2 }
 0x1a9   : > { %1859 = vst.msk [vmem:[#allocation3 + $0x28] sm:$0xf] %vm5932_vm3, %v5669_v18  ;;  %v2844_v12 = vunpack.c.l.b16 %v2824_v60  ;;  %v2364_v23 = vsel %vm5313_vm13, %v2218_v4, 0  ;;  %v5335_v19 = vor.u32 %v2537_v15, %v2534_v26  ;;  %v2696_v38 = vsel %vm4985_vm15, %v5077_v54, 0 }
 0x1aa   : > { %vm5933_vm7 = vsmask.f32 7424  ;;  %vm5934_vm8 = vsmask.f32 4352  ;;  %v2384_v50 = vunpack.c.l.b16 %v2364_v23  ;;  %v2693_v18 = vsel %vm4790_vm10, %v5317_v30, 0 }
 0x1ab   : > { %v2417_v24 = vsel %vm5933_vm7, %v2412_v53, %v2416_v8  ;;  %v2530_v48 = vsel %vm5934_vm8, %v2521_v3, %v2529_v62  ;;  %vm5935_vm5 = vcmask 64512   ;;  %v2849_v17 = vpack.c.b16 %v2844_v12, %v2843_v43  ;;  %vm5936_vm2 = vmmov %vm5934_vm8  ;;  %v3023_v23 = vld [vmem:[#allocation3 + $0x14] sm:$0xf] }
 0x1ac   : > { %3487 = vmatmul.msk.bf16.gmra.mxu3 %vm5935_vm5, %v2417_v24  ;;  %v5351_v52 = vsel %vm5936_vm2, %v2529_v62, %v5335_v19  ;;  %v2715_v54 = vunpack.c.l.b16 %v2695_v58  ;;  %v2716_v32 = vunpack.c.l.b16 %v2696_v38  ;;  %v2164_v21 = vor.u32 %v2163_v55, %v2160_v11  ;;  %vm5940_vm8 = vmmov %vm5936_vm2 }
 0x1ad   : > { %v2389_v44 = vpack.c.b16 %v2384_v50, %v2384_v50  ;;  %v2418_v46 = vshrl.u32 %v2388_v14, 16  ;;  %v2486_v33 = vsel %vm5141_vm12, %v5228_v34, 0  ;;  %v2878_v63 = vshrl.u32 %v2849_v17, 16  ;;  %vm5938_vm12 = vmmov %vm5935_vm5  ;;  %v2479_v50 = vld [vmem:[#allocation3 + $0x24] sm:$0xf] }
 0x1ae   : > { %v2881_v3 = vshll.u32 %v2849_v17, 16  ;;  %v2723_v56 = vpack.c.b16 %v2716_v32, %v2715_v54  ;;  %v2487_v37 = vsel %vm5194_vm11, %v5272_v9, 0  ;;  %vm5937_vm3 = vnez %v5823_v47  ;;  %vm5939_vm11 = vmmov %vm5936_vm2  ;;  %v3024_v17 = vld [vmem:[#allocation3 + $0x18] sm:$0xf] }
 0x1af   : > { %v2422_v25 = vshll.u32 %v2389_v44, 16  ;;  %v2694_v5 = vsel %vm5937_vm3, %v4929_v39, 0  ;;  %v2506_v51 = vunpack.c.l.b16 %v2486_v33  ;;  %v2507_v59 = vunpack.c.l.b16 %v2487_v37  ;;  %vm5941_vm2 = vmmov %vm5935_vm5  ;;  %v3581_v47 = vld [vmem:[#allocation3 + $0x14] sm:$0xff] }
 0x1b0   : > { %v2880_v62 = vrot.slane %v2878_v63, 3  ;;  %v2883_v14 = vrot.slane %v2881_v3, 4  ;;  %v2420_v26 = vor.u32 %v2418_v46, %v2416_v8  ;;  %v2735_v28 = vshll.u32 %v2723_v56, 16  ;;  %v2816_v34 = vld [vmem:[#allocation3 + $0x28] sm:$0xf] }
 0x1b1   : > { %v2424_v35 = vrot.slane %v2422_v25, 1  ;;  %v2512_v57 = vpack.c.b16 %v2507_v59, %v2506_v51  ;;  %v2697_v49 = vsel %vm5111_vm6, %v5164_v40, 0  ;;  %v2698_v20 = vsel %vm5128_vm4, %v5212_v61, 0  ;;  %3490 = vmatmul.msk.bf16.vlgmr.msrb.gmra.mxu1 %vm5938_vm12, %v2530_v48  ;;  %vm5942_vm12 = vmmov %vm5940_vm8 }
 0x1b2   : > { %v2165_v39 = vsel %vm5939_vm11, %v5276_v2, %v2164_v21  ;;  %v2884_v9 = vor.u32 %v2883_v14, %v2880_v62  ;;  %v2825_v36 = vsel %vm5266_vm14, %v2816_v34, 0  ;;  %v5373_v22 = vrot.slane %v2735_v28, 1  ;;  %vm5944_vm11 = vmmov %vm5933_vm7 }
 0x1b3   : > { %v2425_v6 = vsel %vm5933_vm7, %v2420_v26, %v2424_v35  ;;  %v2845_v30 = vunpack.c.l.b16 %v2825_v36  ;;  %v2541_v53 = vshrl.u32 %v2512_v57, 16  ;;  %v2544_v40 = vshll.u32 %v2512_v57, 16  ;;  %vm5945_vm7 = vmmov %vm5940_vm8  ;;  %v3025_v35 = vld [vmem:[#allocation3 + $0x1c] sm:$0xf] }
 0x1b4   : > { %v2885_v43 = vsel %vm5940_vm8, %v5278_v7, %v2884_v9  ;;  %v2717_v61 = vunpack.c.l.b16 %v2697_v49  ;;  %v2718_v4 = vunpack.c.l.b16 %v2698_v20  ;;  %v2739_v15 = vshrl.u32 %v2723_v56, 16  ;;  %3483 = vmatmul.msk.bf16.gmra.mxu2 %vm5935_vm5, %v2165_v39  ;;  %v2692_v39 = vld [vmem:[#allocation3 + $0x28] sm:$0x1]  ;;  %vm5948_vm8 = vmmov %vm5945_vm7 }
 0x1b5   : > { %3523 = vmatmul.msk.bf16.gmra.mxu0 %vm5941_vm2, %v2885_v43  ;;  %v2850_v2 = vpack.c.b16 %v2845_v30, %v2845_v30  ;;  %v2543_v58 = vrot.slane %v2541_v53, 3  ;;  %v2546_v8 = vrot.slane %v2544_v40, 4  ;;  %v2699_v11 = vsel %vm5234_vm0, %v5285_v0, 0  ;;  %v3026_v53 = vld [vmem:[#allocation3 + $0x20] sm:$0xf]  ;;  %vm5949_vm5 = vmmov %vm5941_vm2 }
 0x1b6   : > { %v2713_v55 = vunpack.c.l.b16 %v2693_v18  ;;  %v2714_v60 = vunpack.c.l.b16 %v2694_v5  ;;  %v2724_v12 = vpack.c.b16 %v2718_v4, %v2717_v61  ;;  %v2741_v48 = vor.u32 %v2739_v15, %v5373_v22  ;;  %v3576_v4 = vld [vmem:[#allocation3 + $0x8] sm:$0xff] }
 0x1b7   : > { %v2887_v38 = vshrl.u32 %v2850_v2, 16  ;;  %v2890_v7 = vshll.u32 %v2850_v2, 16  ;;  %v2547_v24 = vor.u32 %v2546_v8, %v2543_v58  ;;  %v2488_v32 = vsel %vm5266_vm14, %v2479_v50, 0  ;;  %vm5943_vm14 = vmmov %vm5941_vm2 }
 0x1b8   : > { %v2743_v54 = vshll.u32 %v2724_v12, 16  ;;  %v2700_v21 = vsel %vm5262_vm1, %v5322_v13, 0  ;;  %v2719_v0 = vunpack.c.l.b16 %v2699_v11  ;;  %v2508_v33 = vunpack.c.l.b16 %v2488_v32 }
 0x1b9   : > { %v2889_v18 = vrot.slane %v2887_v38, 3  ;;  %v2892_v44 = vrot.slane %v2890_v7, 4  ;;  %v2548_v46 = vsel %vm5942_vm12, %v5335_v19, %v2547_v24  ;;  %v2720_v3 = vunpack.c.l.b16 %v2700_v21  ;;  %vm5952_vm12 = vmmov %vm5941_vm2 }
 0x1ba   : > { %v2745_v63 = vrot.slane %v2743_v54, 1  ;;  %v3032_v56 = vsel %vm4945_vm9, %v3023_v23, 0  ;;  %v3033_v42 = vsel %vm4985_vm15, %v3024_v17, 0  ;;  %v2513_v25 = vpack.c.b16 %v2508_v33, %v2508_v33  ;;  %vm5946_vm9 = vmmov %vm5941_vm2  ;;  %v3577_v33 = vld [vmem:[#allocation3 + $0x10] sm:$0xff] }
 0x1bb   : > { %v2893_v37 = vor.u32 %v2892_v44, %v2889_v18  ;;  %v2722_v13 = vpack.c.b16 %v2714_v60, %v2713_v55  ;;  %v2725_v51 = vpack.c.b16 %v2720_v3, %v2719_v0  ;;  %v3052_v59 = vunpack.c.l.b16 %v3032_v56  ;;  %vm5947_vm15 = vmmov %vm5944_vm11  ;;  %v3027_v0 = vld [vmem:[#allocation3 + $0x24] sm:$0xf]  ;;  %v3028_v44 = vld [vmem:[#allocation3 + $0x28] sm:$0xf] }
 0x1bc   : > { %3488 = vmatmul.msk.bf16.gmra.mxu3 %vm5943_vm14, %v2425_v6  ;;  %v5397_v5 = vsel %vm5944_vm11, %v2741_v48, %v2745_v63  ;;  %v2550_v62 = vshrl.u32 %v2513_v25, 16  ;;  %v2553_v14 = vshll.u32 %v2513_v25, 16  ;;  %v3053_v26 = vunpack.c.l.b16 %v3033_v42  ;;  %v3029_v42 = vld [vmem:[#allocation3 + $0x2c] sm:$0x1] }
 0x1bd   : > { %v2894_v19 = vsel %vm5945_vm7, %v2884_v9, %v2893_v37  ;;  %v2747_v10 = vshrl.u32 %v2724_v12, 16  ;;  %v2751_v28 = vshll.u32 %v2725_v51, 16  ;;  %v2730_v36 = vshll.u32 %v2722_v13, 16  ;;  %vm5955_vm7 = vmmov %vm5941_vm2 }
 0x1be   : > { %v2552_v45 = vrot.slane %v2550_v62, 3  ;;  %v2555_v34 = vrot.slane %v2553_v14, 4  ;;  %v3060_v57 = vpack.c.b16 %v3053_v26, %v3052_v59  ;;  %v2701_v30 = vsel %vm5313_vm13, %v2692_v39, 0 }
 0x1bf   : > { %v2749_v49 = vor.u32 %v2747_v10, %v2745_v63  ;;  %v2753_v20 = vrot.slane %v2751_v28, 1  ;;  %v3034_v9 = vsel %vm5111_vm6, %v3025_v35, 0  ;;  %v2721_v43 = vunpack.c.l.b16 %v2701_v30  ;;  %vm5950_vm6 = vmmov %vm5944_vm11  ;;  %v3022_v28 = vld [vmem:[#allocation3 + $0x10] sm:$0xf]  ;;  %v3021_v35 = vld [vmem:[#allocation3 + $0xc] sm:$0xf] }
 0x1c0   : > { %v2556_v6 = vor.u32 %v2555_v34, %v2552_v45  ;;  %v3072_v61 = vshll.u32 %v3060_v57, 16  ;;  %v3035_v2 = vsel %vm5128_vm4, %v3026_v53, 0  ;;  %v3054_v8 = vunpack.c.l.b16 %v3034_v9  ;;  %vm5951_vm4 = vmmov %vm5950_vm6 }
 0x1c1   : > { %3491 = vmatmul.msk.bf16.gmra.mxu1 %vm5946_vm9, %v5351_v52  ;;  %v2754_v40 = vsel %vm5947_vm15, %v2749_v49, %v2753_v20  ;;  %v2726_v58 = vpack.c.b16 %v2721_v43, %v2721_v43  ;;  %v3055_v11 = vunpack.c.l.b16 %v3035_v2  ;;  %v2732_v27 = vrot.slane %v2730_v36, 1  ;;  %vm5953_vm14 = vmmov %vm5951_vm4 }
 0x1c2   : > { %v2557_v15 = vsel %vm5948_vm8, %v2547_v24, %v2556_v6  ;;  %v2755_v55 = vshrl.u32 %v2725_v51, 16  ;;  %v5412_v60 = vrot.slane %v3072_v61, 1  ;;  %v2728_v23 = vshrl.u32 %v2722_v13, 16  ;;  %vm5954_vm11 = vmmov %vm5941_vm2 }
 0x1c3   : > { %v2759_v52 = vshll.u32 %v2726_v58, 16  ;;  %v3061_v12 = vpack.c.b16 %v3055_v11, %v3054_v8  ;;  %v3076_v24 = vshrl.u32 %v3060_v57, 16  ;;  %v3036_v18 = vsel %vm5234_vm0, %v3027_v0, 0  ;;  %vm5956_vm0 = vmmov %vm5941_vm2  ;;  %v3582_v8 = vld [vmem:[#allocation3 + $0x1c] sm:$0xff] }
 0x1c4   : > { %3511 = vmatmul.msk.bf16.vlgmr.msrb.gmra.mxu2 %vm5949_vm5, %v3576_v4  ;;  %v2757_v38 = vor.u32 %v2755_v55, %v2753_v20  ;;  %v2733_v1 = vor.u32 %v2732_v27, %v2728_v23  ;;  %v3037_v63 = vsel %vm5262_vm1, %v3028_v44, 0  ;;  %v3056_v3 = vunpack.c.l.b16 %v3036_v18  ;;  %vm5957_vm1 = vmmov %vm5951_vm4  ;;  %v3579_v20 = vld [vmem:[#allocation3 + $0x20] sm:$0xff] }
 0x1c5   : > { %3524 = vmatmul.msk.bf16.gmra.mxu0 %vm5941_vm2, %v2894_v19  ;;  %v2761_v7 = vrot.slane %v2759_v52, 1  ;;  %v3080_v48 = vshll.u32 %v3061_v12, 16  ;;  %v3078_v17 = vor.u32 %v3076_v24, %v5412_v60  ;;  %v3057_v56 = vunpack.c.l.b16 %v3037_v63  ;;  %vm5958_vm9 = vmmov %vm5957_vm1 }
 0x1c6   : > { %v2738_v32 = vsel %vm5951_vm4, %v2733_v1, %v5373_v22  ;;  %v3038_v22 = vsel %vm5313_vm13, %v3029_v42, 0  ;;  %v3084_v13 = vshrl.u32 %v3061_v12, 16  ;;  %vm5959_vm15 = vmmov %vm5956_vm0  ;;  %v3031_v34 = vsel %vm5937_vm3, %v3022_v28, 0 }
 0x1c7   : > { %v2762_v50 = vsel %vm5950_vm6, %v2757_v38, %v2761_v7  ;;  %v3082_v54 = vrot.slane %v3080_v48, 1  ;;  %v3062_v37 = vpack.c.b16 %v3057_v56, %v3056_v3  ;;  %v3058_v25 = vunpack.c.l.b16 %v3038_v22  ;;  %vm5960_vm13 = vmmov %vm5956_vm0  ;;  %v3583_v38 = vld [vmem:[#allocation3 + $0x24] sm:$0xff] }
 0x1c8   : > { %vm5961_vm8 = vmmov %vm5956_vm0  ;;  %v3030_v57 = vsel %vm4790_vm10, %v3021_v35, 0  ;;  %v3051_v49 = vunpack.c.l.b16 %v3031_v34 }
 0x1c9   : > { %v3083_v21 = vsel %vm5953_vm14, %v3078_v17, %v3082_v54  ;;  %v3088_v31 = vshll.u32 %v3062_v37, 16  ;;  %v3063_v51 = vpack.c.b16 %v3058_v25, %v3058_v25  ;;  %v3086_v59 = vor.u32 %v3084_v13, %v3082_v54  ;;  %vm5962_vm5 = vmmov %vm5956_vm0 }
 0x1ca   : > { %v3092_v19 = vshrl.u32 %v3062_v37, 16  ;;  %v3050_v39 = vunpack.c.l.b16 %v3030_v57  ;;  %vm5963_vm2 = vmmov %vm5956_vm0 }
 0x1cb   : > { %v3096_v62 = vshll.u32 %v3063_v51, 16  ;;  %vm5964_vm6 = vmmov %vm5956_vm0 }
 0x1cc   : > { %3516 = vmatmul.msk.bf16.vlgmr.msra.gmra.mxu3 %vm5952_vm12, %v2738_v32  ;;  %v3059_v36 = vpack.c.b16 %v3051_v49, %v3050_v39  ;;  %vm5965_vm3 = vmmov %vm5956_vm0 }
 0x1cd   : > { %v3098_v26 = vrot.slane %v3096_v62, 1  ;;  %vm5966_vm10 = vmmov %vm5957_vm1 }
 0x1ce   : > { %v3067_v30 = vshll.u32 %v3059_v36, 16  ;;  %vm5967_vm4 = vmmov %vm5956_vm0 }
 0x1cf   : > { %vm5968_vm12 = vmmov %vm5956_vm0 }
 0x1d0   : > { %v3069_v53 = vrot.slane %v3067_v30, 1  ;;  %vm5969_vm14 = vmmov %vm5956_vm0 }
 0x1d1   : > { %3492 = vmatmul.msk.bf16.gmra.mxu1 %vm5954_vm11, %v2548_v46  ;;  %v3090_v46 = vrot.slane %v3088_v31, 1  ;;  %vm5970_vm11 = vmmov %vm5956_vm0 }
 0x1d3   : > { %v3091_v41 = vsel %vm5957_vm1, %v3086_v59, %v3090_v46  ;;  %v3094_v14 = vor.u32 %v3092_v19, %v3090_v46  ;;  %vm5972_vm1 = vcmask 60416  }
 0x1d4   : > { %3512 = vmatmul.msk.bf16.gmra.mxu2 %vm5955_vm7, %v3577_v33  ;;  %vm5971_vm7 = vmmov %vm5956_vm0 }
 0x1d5   : > { %v3099_v10 = vsel %vm5958_vm9, %v3094_v14, %v3098_v26  ;;  %vm5973_vm9 = vmmov %vm5972_vm1 }
 0x1dc   : > { %3517 = vmatmul.msk.bf16.gmra.mxu3 %vm5956_vm0, %v5397_v5  ;;  %v3580_v5 = vld [vmem:[#allocation3 + $0xc] sm:$0xff] }
 0x1e1   : > { %3493 = vmatmul.msk.bf16.gmra.mxu1 %vm5959_vm15, %v2557_v15  ;;  %vm5974_vm15 = vmmov %vm5972_vm1 }
 0x1e4   : > { %3513 = vmatmul.msk.bf16.gmra.mxu2 %vm5960_vm13, %v3578_v29  ;;  %vm5975_vm13 = vmmov %vm5972_vm1 }
 0x1e9   : > { %v2078_v45 = vpop.f32.mrf.mxu1 }
 0x1ec   : > { %3518 = vmatmul.msk.bf16.gmra.mxu3 %vm5961_vm8, %v2754_v40  ;;  %v3065_v40 = vshrl.u32 %v3059_v36, 16  ;;  %vm5976_vm8 = vmmov %vm5972_vm1 }
 0x1ee   : > { %v3070_v16 = vor.u32 %v3069_v53, %v3065_v40 }
 0x1f0   : > { %v3075_v43 = vsel %vm5966_vm10, %v3070_v16, %v5412_v60 }
 0x1f1   : > { %3542 = vmatmul.msk.bf16.vlgmr.msra.gmra.mxu1 %vm5962_vm5, %v3580_v5  ;;  %v2080_v6 = vpop.f32.mrf.mxu1  ;;  %vm5977_vm5 = vmmov %vm5972_vm1 }
 0x1f4   : > { %3514 = vmatmul.msk.bf16.gmra.mxu2 %vm5963_vm2, %v3579_v20  ;;  %vm5978_vm2 = vmmov %vm5972_vm1 }
 0x1fa   : > { %v2083_v9 = vpop.f32.mrf.mxu1 }
 0x1fc   : > { %3519 = vmatmul.msk.bf16.gmra.mxu3 %vm5964_vm6, %v2762_v50  ;;  %vm5979_vm6 = vmmov %vm5972_vm1 }
 0x201   : > { %3543 = vmatmul.msk.bf16.gmra.mxu1 %vm5965_vm3, %v3581_v47 }
 0x202   : > { %v2085_v61 = vpop.f32.mrf.mxu1 }
 0x203   : > { %v2190_v4 = vpop.f32.mrf.mxu2 }
 0x204   : > { %3547 = vmatmul.msk.bf16.vlgmr.msra.gmra.mxu2 %vm5967_vm4, %v3075_v43  ;;  %v2191_v15 = vadd.f32 %v2190_v4, %v2078_v45  ;;  %v5490_v43 = vld [vmem:[%s5554_s5] ss:$0 sm:$0xff] }
 0x20a   : > { %v2088_v2 = vpop.f32.mrf.mxu1  ;;  %v2450_v23 = vpop.f32.mrf.mxu3 }
 0x20b   : > { %v2192_v58 = vpop.f32.mrf.mxu2  ;;  %v2470_v5 = vadd.f32 %v2450_v23, %v2191_v15 }
 0x20c   : > { %v2193_v11 = vadd.f32 %v2192_v58, %v2080_v6 }
 0x210   : > { %v2919_v28 = vpop.f32.mrf.mxu0 }
 0x211   : > { %3544 = vmatmul.msk.bf16.gmra.mxu1 %vm5968_vm12, %v3582_v8 }
 0x212   : > { %v2090_v27 = vpop.f32.mrf.mxu1  ;;  %v2452_v50 = vpop.f32.mrf.mxu3 }
 0x213   : > { %v2471_v30 = vadd.f32 %v2452_v50, %v2193_v11 }
 0x214   : > { %3548 = vmatmul.msk.bf16.gmra.mxu2 %vm5969_vm14, %v3083_v21 }
 0x215   : > { %v2195_v55 = vpop.f32.mrf.mxu2 }
 0x216   : > { %v5448_v52 = vadd.f32 %v2195_v55, %v2083_v9 }
 0x218   : > { %v2921_v49 = vpop.f32.mrf.mxu0 }
 0x21d   : > { %v2197_v60 = vpop.f32.mrf.mxu2  ;;  %v2455_v21 = vpop.f32.mrf.mxu3 }
 0x21e   : > { %v2093_v12 = vpop.f32.mrf.mxu1  ;;  %v5450_v7 = vadd.f32 %v2197_v60, %v2085_v61  ;;  %v2472_v8 = vadd.f32 %v2455_v21, %v5448_v52 }
 0x221   : > { %3545 = vmatmul.msk.bf16.gmra.mxu1 %vm5970_vm11, %v3583_v38 }
 0x222   : > { %v2924_v4 = vpop.f32.mrf.mxu0 }
 0x224   : > { %3549 = vmatmul.msk.bf16.gmra.mxu2 %vm5971_vm7, %v3091_v41 }
 0x225   : > { %v2457_v33 = vpop.f32.mrf.mxu3 }
 0x226   : > { %v2095_v24 = vpop.f32.mrf.mxu1 }
 0x227   : > { %v2200_v48 = vpop.f32.mrf.mxu2 }
 0x228   : > { %v5454_v1 = vadd.f32 %v2200_v48, %v2088_v2 }
 0x22e   : > { %v2582_v17 = vpop.f32.mrf.mxu1 }
 0x22f   : > { %v2202_v54 = vpop.f32.mrf.mxu2  ;;  %v5463_v22 = vpop.f32.mrf.mxu3  ;;  %v2602_v57 = vadd.f32 %v2582_v17, %v2470_v5  ;;  %v2473_v17 = vadd.f32 %v2457_v33, %v5450_v7 }
 0x230   : > { %v5456_v32 = vadd.f32 %v2202_v54, %v2090_v27  ;;  %v2926_v54 = vpop.f32.mrf.mxu0  ;;  %v2474_v7 = vadd.f32 %v5463_v22, %v5454_v1 }
 0x234   : > { %3550 = vmatmul.msk.bf16.gmra.mxu2 %vm5956_vm0, %v3099_v10 }
 0x236   : > { %v2584_v0 = vpop.f32.mrf.mxu1 }
 0x237   : > { %v2205_v18 = vpop.f32.mrf.mxu2  ;;  %v5467_v31 = vpop.f32.mrf.mxu3  ;;  %v2603_v9 = vadd.f32 %v2584_v0, %v2471_v30 }
 0x238   : > { %v5459_v44 = vadd.f32 %v2205_v18, %v2093_v12  ;;  %v2929_v5 = vpop.f32.mrf.mxu0  ;;  %v2475_v1 = vadd.f32 %v5467_v31, %v5456_v32 }
 0x23e   : > { %v2587_v63 = vpop.f32.mrf.mxu1 }
 0x23f   : > { %v2207_v3 = vpop.f32.mrf.mxu2  ;;  %v5471_v46 = vpop.f32.mrf.mxu3  ;;  %v2604_v27 = vadd.f32 %v2587_v63, %v2472_v8 }
 0x240   : > { %v5461_v56 = vadd.f32 %v2207_v3, %v2095_v24  ;;  %v2476_v32 = vadd.f32 %v5471_v46, %v5459_v44 }
 0x246   : > { %v2589_v42 = vpop.f32.mrf.mxu1 }
 0x247   : > { %v2656_v37 = vpop.f32.mrf.mxu2  ;;  %v5475_v41 = vpop.f32.mrf.mxu3  ;;  %v2605_v18 = vadd.f32 %v2589_v42, %v2473_v17 }
 0x248   : > { %v2676_v20 = vadd.f32 %v2656_v37, %v2602_v57  ;;  %v2477_v44 = vadd.f32 %v5475_v41, %v5461_v56 }
 0x24e   : > { %v5465_v25 = vpop.f32.mrf.mxu1 }
 0x24f   : > { %v2658_v13 = vpop.f32.mrf.mxu2  ;;  %v2787_v10 = vpop.f32.mrf.mxu3  ;;  %v2606_v42 = vadd.f32 %v5465_v25, %v2474_v7 }
 0x250   : > { %v2807_v6 = vadd.f32 %v2787_v10, %v2676_v20  ;;  %v2677_v40 = vadd.f32 %v2658_v13, %v2603_v9 }
 0x252   : > { %v2939_v47 = vadd.f32 %v2919_v28, %v2807_v6 }
 0x256   : > { %v5469_v51 = vpop.f32.mrf.mxu1 }
 0x257   : > { %v2661_v59 = vpop.f32.mrf.mxu2  ;;  %v2789_v34 = vpop.f32.mrf.mxu3  ;;  %v2607_v25 = vadd.f32 %v5469_v51, %v2475_v1 }
 0x258   : > { %v2808_v15 = vadd.f32 %v2789_v34, %v2677_v40  ;;  %v2678_v60 = vadd.f32 %v2661_v59, %v2604_v27 }
 0x25a   : > { %v2940_v55 = vadd.f32 %v2921_v49, %v2808_v15 }
 0x25e   : > { %v5473_v62 = vpop.f32.mrf.mxu1 }
 0x25f   : > { %v2663_v19 = vpop.f32.mrf.mxu2  ;;  %v2792_v53 = vpop.f32.mrf.mxu3  ;;  %v2608_v27 = vadd.f32 %v5473_v62, %v2476_v32 }
 0x260   : > { %v2809_v50 = vadd.f32 %v2792_v53, %v2678_v60  ;;  %v2679_v37 = vadd.f32 %v2663_v19, %v2605_v18 }
 0x262   : > { %v2941_v63 = vadd.f32 %v2924_v4, %v2809_v50 }
 0x266   : > { %v5479_v26 = vpop.f32.mrf.mxu1 }
 0x267   : > { %v5477_v14 = vpop.f32.mrf.mxu2  ;;  %v2794_v23 = vpop.f32.mrf.mxu3  ;;  %v2609_v62 = vadd.f32 %v5479_v26, %v2477_v44 }
 0x268   : > { %v2680_v20 = vadd.f32 %v5477_v14, %v2606_v42 }
 0x26e   : > { %v2993_v35 = vpop.f32.mrf.mxu1 }
 0x26f   : > { %v5481_v29 = vpop.f32.mrf.mxu2  ;;  %v3013_v16 = vadd.f32 %v2993_v35, %v2939_v47  ;;  %v2797_v10 = vpop.f32.mrf.mxu3  ;;  %v2810_v35 = vadd.f32 %v2794_v23, %v2679_v37 }
 0x270   : > { %v2811_v53 = vadd.f32 %v2797_v10, %v2680_v20  ;;  %v2681_v14 = vadd.f32 %v5481_v29, %v2607_v25 }
 0x271   : > { %v2942_v57 = vadd.f32 %v2926_v54, %v2810_v35 }
 0x272   : > { %v2943_v40 = vadd.f32 %v2929_v5, %v2811_v53 }
 0x276   : > { %v2995_v39 = vpop.f32.mrf.mxu1 }
 0x277   : > { %v5483_v45 = vpop.f32.mrf.mxu2  ;;  %v3014_v38 = vadd.f32 %v2995_v39, %v2940_v55  ;;  %v2799_v47 = vpop.f32.mrf.mxu3 }
 0x278   : > { %v2812_v8 = vadd.f32 %v2799_v47, %v2681_v14  ;;  %v2682_v29 = vadd.f32 %v5483_v45, %v2608_v27 }
 0x27e   : > { %v2998_v58 = vpop.f32.mrf.mxu1 }
 0x27f   : > { %v5485_v36 = vpop.f32.mrf.mxu2  ;;  %v3015_v13 = vadd.f32 %v2998_v58, %v2941_v63  ;;  %v2802_v51 = vpop.f32.mrf.mxu3 }
 0x286   : > { %v3000_v0 = vpop.f32.mrf.mxu1 }
 0x287   : > { %v3124_v61 = vpop.f32.mrf.mxu2  ;;  %v3016_v39 = vadd.f32 %v3000_v0, %v2942_v57  ;;  %v2804_v45 = vpop.f32.mrf.mxu3 }
 0x288   : > { %v3144_v2 = vadd.f32 %v3124_v61, %v3013_v16  ;;  %v2931_v61 = vpop.f32.mrf.mxu0 }
 0x289   : > { %v2944_v55 = vadd.f32 %v2931_v61, %v2812_v8 }
 0x28a   : > { %v3156_v11 = vadd.f32 %v5490_v43, %v3144_v2 }
 0x28c   : > { %v3164_v12 = vmax.f32 %v3156_v11, 0.0 }
 0x28e   : > { %v3172_v24 = vpack.c.bf16 %v3164_v12, %v3164_v12  ;;  %v3003_v19 = vpop.f32.mrf.mxu1 }
 0x28f   : > { %v3126_v48 = vpop.f32.mrf.mxu2  ;;  %v3017_v4 = vadd.f32 %v3003_v19, %v2943_v40 }
 0x290   : > { %3180 = vst.msk [vmem:[%s5498_s12] sm:$0xf] %vm5972_vm1, %v3172_v24  ;;  %v3145_v52 = vadd.f32 %v3126_v48, %v3014_v38  ;;  %v2813_v24 = vadd.f32 %v2802_v51, %v2682_v29  ;;  %v2934_v50 = vpop.f32.mrf.mxu0 }
 0x292   : > { %v3157_v21 = vadd.f32 %v5490_v43, %v3145_v52  ;;  %v2945_v17 = vadd.f32 %v2934_v50, %v2813_v24 }
 0x294   : > { %v3165_v3 = vmax.f32 %v3157_v21, 0.0  ;;  %v2683_v21 = vadd.f32 %v5485_v36, %v2609_v62 }
 0x296   : > { %v3173_v59 = vpack.c.bf16 %v3165_v3, %v3165_v3  ;;  %v3005_v2 = vpop.f32.mrf.mxu1  ;;  %v2814_v3 = vadd.f32 %v2804_v45, %v2683_v21 }
 0x297   : > { %v3129_v28 = vpop.f32.mrf.mxu2  ;;  %v3018_v23 = vadd.f32 %v3005_v2, %v2944_v55 }
 0x298   : > { %3181 = vst.msk [vmem:[%s5498_s12 + $0x4] sm:$0xf] %vm5973_vm9, %v3173_v59  ;;  %v3146_v34 = vadd.f32 %v3129_v28, %v3015_v13  ;;  %v2936_v41 = vpop.f32.mrf.mxu0 }
 0x299   : > { %v2946_v59 = vadd.f32 %v2936_v41, %v2814_v3 }
 0x29a   : > { %v3158_v33 = vadd.f32 %v5490_v43, %v3146_v34 }
 0x29c   : > { %v3166_v49 = vmax.f32 %v3158_v33, 0.0 }
 0x29e   : > { %v3174_v6 = vpack.c.bf16 %v3166_v49, %v3166_v49  ;;  %v3008_v52 = vpop.f32.mrf.mxu1 }
 0x29f   : > { %v3131_v30 = vpop.f32.mrf.mxu2  ;;  %v3019_v0 = vadd.f32 %v3008_v52, %v2945_v17 }
 0x2a0   : > { %3182 = vst.msk [vmem:[%s5498_s12 + $0x8] sm:$0xf] %vm5974_vm15, %v3174_v6  ;;  %v3147_v9 = vadd.f32 %v3131_v30, %v3016_v39 }
 0x2a2   : > { %v3159_v22 = vadd.f32 %v5490_v43, %v3147_v9 }
 0x2a4   : > { %v3167_v16 = vmax.f32 %v3159_v22, 0.0 }
 0x2a6   : > { %v3175_v15 = vpack.c.bf16 %v3167_v16, %v3167_v16  ;;  %v3010_v13 = vpop.f32.mrf.mxu1 }
 0x2a7   : > { %v3134_v58 = vpop.f32.mrf.mxu2  ;;  %v3020_v10 = vadd.f32 %v3010_v13, %v2946_v59 }
 0x2a8   : > { %3183 = vst.msk [vmem:[%s5498_s12 + $0xc] sm:$0xf] %vm5975_vm13, %v3175_v15  ;;  %v3148_v11 = vadd.f32 %v3134_v58, %v3017_v4 }
 0x2aa   : > { %v3160_v31 = vadd.f32 %v5490_v43, %v3148_v11 }
 0x2ac   : > { %v3168_v12 = vmax.f32 %v3160_v31, 0.0 }
 0x2ae   : > { %v3176_v60 = vpack.c.bf16 %v3168_v12, %v3168_v12 }
 0x2af   : > { %v3136_v38 = vpop.f32.mrf.mxu2 }
 0x2b0   : > { %3184 = vst.msk [vmem:[%s5498_s12 + $0x10] sm:$0xf] %vm5976_vm8, %v3176_v60  ;;  %v3149_v48 = vadd.f32 %v3136_v38, %v3018_v23 }
 0x2b2   : > { %v3161_v46 = vadd.f32 %v5490_v43, %v3149_v48 }
 0x2b4   : > { %v3169_v54 = vmax.f32 %v3161_v46, 0.0 }
 0x2b6   : > { %v3177_v18 = vpack.c.bf16 %v3169_v54, %v3169_v54 }
 0x2b7   : > { %v3139_v63 = vpop.f32.mrf.mxu2 }
 0x2b8   : > { %3185 = vst.msk [vmem:[%s5498_s12 + $0x14] sm:$0xf] %vm5977_vm5, %v3177_v18  ;;  %v3150_v37 = vadd.f32 %v3139_v63, %v3019_v0 }
 0x2ba   : > { %v3162_v56 = vadd.f32 %v5490_v43, %v3150_v37 }
 0x2bc   : > { %v3170_v26 = vmax.f32 %v3162_v56, 0.0 }
 0x2be   : > { %v3178_v28 = vpack.c.bf16 %v3170_v26, %v3170_v26 }
 0x2bf   : > { %v3141_v35 = vpop.f32.mrf.mxu2 }
 0x2c0   : > { %3186 = vst.msk [vmem:[%s5498_s12 + $0x18] sm:$0xf] %vm5978_vm2, %v3178_v28  ;;  %v3151_v36 = vadd.f32 %v3141_v35, %v3020_v10 }
 0x2c2   : > { %v3163_v34 = vadd.f32 %v5490_v43, %v3151_v36 }
 0x2c4   : > { %v3171_v7 = vmax.f32 %v3163_v34, 0.0 }
 0x2c6   : > { %v3179_v33 = vpack.c.bf16 %v3171_v7, %v3171_v7 }
 0x2c8   : > { %3187 = vst.msk [vmem:[%s5498_s12 + $0x1c] sm:$0xf] %vm5979_vm6, %v3179_v33 }
 0x2c9 PF: > { %s16_s23 = sadd.s32 1, %s3636_s23   ;;  %s5980_s21 = smov %s3632_s22 }
 0x2ca   : > { %p13_p5 = scmp.ge.s32.totalorder %s16_s23, 4   ;;  %s5981_s22 = smov %s5983_s24 }
 0x2cc   :  { %15 = sbr.rel (!%p13_p5) target bundleno = 2 (0x2), region = 99 }

// kernel: unet_forward.17
= control target key start
LH: loop header
LB: loop body
LE: loop exit
PB: predicated region body
PF: predicated region fallthrough
CT: control target
= control target key end

     0   :  { %s574_s12 = smov 0   ;;  %s576_s13 = smov 0   ;;  %s647_s0 = inlined_call_operand.vmem [shape: bf16[2,4,32], index: 0, kind: input, shape index: {}]   ;;  %s648_s1 = inlined_call_operand.vmem [shape: bf16[4,32,16], index: 1, kind: input, shape index: {}]   ;;  %s649_s2 = inlined_call_operand.vmem [shape: f32[1,16], index: 2, kind: input, shape index: {}]   ;;  %s650_s3 = inlined_call_operand.vmem [shape: bf16[2,2,2,4,16], index: 3, kind: output, shape index: {}]  }
   0x1   :  { %s578_s14 = smov 0  }
   0x2 LB: > { %s25_s15 = sadd.s32 1, %s548_s13  ;;  %p436_p0 = scmp.ge.s32.totalorder %s552_s14, 1  ;;  %s552_s14 = sphi %s578_s14, %s13_s14   ;;  %s548_s13 = sphi %s576_s13, %s652_s13   ;;  %s544_s12 = sphi %s574_s12, %s651_s12  }
   0x3   : > { %p27_p1 = scmp.ge.s32.totalorder %s25_s15, 2  ;;  %p155_p2 = scmp.lt.s32.totalorder %s552_s14, 3 }
   0x5   : > { %s654_s15 = smov (%p27_p1, %s25_s15), 0  ;;  %p156_p3 = pnand %p436_p0, %p155_p2 }
   0x6   : > { %p184_p4 = scmp.lt.s32.totalorder (!%p156_p3), %s544_s12, 1 }
   0x7   : > { %159 = sbr.rel (%p156_p3) target bundleno = 161 (0xa1), region = 32 }
   0xc   : > { %v495_v0 = vld [vmem:[%s648_s1 + $0x8] sm:$0xff]  ;;  %v497_v1 = vld [vmem:[%s648_s1 + $0x18] sm:$0xff]  ;;  %v494_v4 = vld [vmem:[%s648_s1] sm:$0xff]  ;;  %s656_s12 = smov (!%p184_p4, %s544_s12), 1  ;;  %vm221_vm0 = vcmask 261120   ;;  %vm239_vm1 = vcmask 123904  }
   0xd   : > { %v499_v2 = vld [vmem:[%s648_s1 + $0x28] sm:$0xff]  ;;  %v501_v3 = vld [vmem:[%s648_s1 + $0x38] sm:$0xff]  ;;  %231 = vmatpush.bf16.msra.mxu0 %v495_v0  ;;  %268 = vmatpush.bf16.msra.mxu1 %v497_v1  ;;  %v496_v5 = vld [vmem:[%s648_s1 + $0x10] sm:$0xff]  ;;  %s437_s5 = sshll.u32 %s656_s12, 1  ;;  %s493_s17 = sshll.u32 %s656_s12, 3 }
   0xe   : > { %v498_v6 = vld [vmem:[%s648_s1 + $0x20] sm:$0xff]  ;;  %305 = vmatpush.bf16.msra.mxu2 %v499_v2  ;;  %342 = vmatpush.bf16.msra.mxu3 %v501_v3  ;;  %v500_v7 = vld [vmem:[%s648_s1 + $0x30] sm:$0xff]  ;;  %s190_s8 = scalar_lea.vmem %s647_s0, %s437_s5  ;;  %s198_s20 = scalar_lea.vmem %s650_s3, %s493_s17 }
   0xf   : > { %v200_v8 = vld [vmem:[%s190_s8] sm:$0x3] }
  0x10   : > { %v526_v9 = vld [vmem:[%s649_s2] ss:$0 sm:$0xff] }
  0x11   : > { %232 = vmatpush.bf16.msra.mxu0 %v494_v4  ;;  %269 = vmatpush.bf16.msra.mxu1 %v496_v5  ;;  %v527_v10 = vld [vmem:[%s649_s2] ss:$0 sm:$0xff] }
  0x12   : > { %306 = vmatpush.bf16.msra.mxu2 %v498_v6  ;;  %343 = vmatpush.bf16.msra.mxu3 %v500_v7  ;;  %v528_v17 = vld [vmem:[%s649_s2] ss:$0 sm:$0xff] }
  0x13   : > { %v529_v18 = vld [vmem:[%s649_s2] ss:$0 sm:$0xff] }
  0x14   : > { %448 = vmatmul.msk.bf16.vlgmr.msra.gmra.mxu0 %vm221_vm0, %v200_v8  ;;  %461 = vmatmul.msk.bf16.vlgmr.msra.gmra.mxu1 %vm221_vm0, %v200_v8 }
  0x15   : > { %475 = vmatmul.msk.bf16.vlgmr.msra.gmra.mxu2 %vm221_vm0, %v200_v8  ;;  %489 = vmatmul.msk.bf16.vlgmr.msra.gmra.mxu3 %vm221_vm0, %v200_v8 }
  0x91   : > { %v234_v11 = vpop.f32.mrf.mxu0  ;;  %v271_v12 = vpop.f32.mrf.mxu1 }
  0x92   : > { %v235_v13 = vadd.f32 %v526_v9, %v234_v11  ;;  %v272_v14 = vadd.f32 %v527_v10, %v271_v12 }
  0x94   : > { %v238_v15 = vpack.c.bf16 %v235_v13, %v235_v13  ;;  %v275_v16 = vpack.c.bf16 %v272_v14, %v272_v14 }
  0x96   : > { %240 = vst.msk [vmem:[%s198_s20] sm:$0x3] %vm239_vm1, %v238_v15 }
  0x97   : > { %462 = vst.msk [vmem:[%s198_s20 + $0x2] sm:$0x3] %vm239_vm1, %v275_v16 }
  0x98   : > { %v308_v19 = vpop.f32.mrf.mxu2  ;;  %v345_v20 = vpop.f32.mrf.mxu3 }
  0x99   : > { %v309_v21 = vadd.f32 %v528_v17, %v308_v19  ;;  %v346_v22 = vadd.f32 %v529_v18, %v345_v20  ;;  %v236_v23 = vpop.f32.mrf.mxu0  ;;  %v273_v24 = vpop.f32.mrf.mxu1 }
  0x9b   : > { %v312_v25 = vpack.c.bf16 %v309_v21, %v309_v21  ;;  %v349_v26 = vpack.c.bf16 %v346_v22, %v346_v22 }
  0x9d   : > { %476 = vst.msk [vmem:[%s198_s20 + $0x4] sm:$0x3] %vm239_vm1, %v312_v25 }
  0x9e   : > { %490 = vst.msk [vmem:[%s198_s20 + $0x6] sm:$0x3] %vm239_vm1, %v349_v26 }
  0xa0   : > { %v310_v27 = vpop.f32.mrf.mxu2  ;;  %v347_v28 = vpop.f32.mrf.mxu3 }
  0xa1 PF: > { %s13_s14 = sadd.s32 1, %s552_s14   ;;  %s651_s12 = smov %s548_s13 }
  0xa2   : > { %p10_p5 = scmp.ge.s32.totalorder %s13_s14, 4   ;;  %s652_s13 = smov %s654_s15 }
  0xa4   :  { %12 = sbr.rel (!%p10_p5) target bundleno = 2 (0x2), region = 68 }

// kernel: unet_forward.16
= control target key start
LH: loop header
LB: loop body
LE: loop exit
PB: predicated region body
PF: predicated region fallthrough
CT: control target
= control target key end

     0   :  { %s1702_s21 = smov 0   ;;  %s1704_s22 = smov 0   ;;  %s2081_s0 = inlined_call_operand.vmem [shape: bf16[2,20,16], index: 0, kind: input, shape index: {}, may-alias: {0,1}]   ;;  %s2082_s1 = inlined_call_operand.vmem [shape: bf16[2,20,16], index: 1, kind: input, shape index: {}, may-alias: {0,1}]   ;;  %s2083_s2 = inlined_call_operand.vmem [shape: bf16[9,16,32], index: 2, kind: input, shape index: {}]   ;;  %s2084_s3 = inlined_call_operand.vmem [shape: f32[1,32], index: 3, kind: input, shape index: {}]   ;;  %s2085_s4 = inlined_call_operand.vmem [shape: bf16[9,32,32], index: 4, kind: input, shape index: {}]   ;;  %s2086_s5 = inlined_call_operand.vmem [shape: f32[1,32], index: 5, kind: input, shape index: {}]   ;;  %s2087_s6 = inlined_call_operand.vmem [shape: bf16[2,4,32], index: 6, kind: output, shape index: {}]  }
   0x1   :  { %s1706_s1 = smov 0  }
   0x2 LB: > { %s35_s23 = sadd.s32 1, %s1660_s22  ;;  %p1393_p0 = scmp.ge.s32.totalorder %s1664_s1, 1  ;;  %s1664_s1 = sphi %s1706_s1, %s16_s1   ;;  %s1660_s22 = sphi %s1704_s22, %s2131_s22   ;;  %s1656_s21 = sphi %s1702_s21, %s2130_s21  }
   0x3   : > { %p37_p1 = scmp.ge.s32.totalorder %s35_s23, 2  ;;  %p262_p2 = scmp.lt.s32.totalorder %s1664_s1, 3 }
   0x5   : > { %s2133_s23 = smov (%p37_p1, %s35_s23), 0  ;;  %p263_p3 = pnand %p1393_p0, %p262_p2 }
   0x6   : > { %p309_p4 = scmp.lt.s32.totalorder (!%p263_p3), %s1656_s21, 1 }
   0x7   : > { %266 = sbr.rel (%p263_p3) target bundleno = 380 (0x17c), region = 44 }
   0xc   : > { %v1586_v0 = vld [vmem:[%s2083_s2 + $0x8] sm:$0xff]  ;;  %v1584_v1 = vld [vmem:[%s2083_s2] sm:$0xff]  ;;  %v339_v2 = vlaneseq  ;;  %v1587_v4 = vld [vmem:[%s2083_s2 + $0x10] sm:$0xff]  ;;  %s2135_s21 = smov (!%p309_p4, %s1656_s21), 1  ;;  %vm384_vm3 = vcmask 130048   ;;  %v1666_v19 = vmov 0  }
   0xd   : > { %v1590_v3 = vld [vmem:[%s2083_s2 + $0x20] sm:$0xff]  ;;  %v1588_v5 = vld [vmem:[%s2083_s2 + $0x18] sm:$0xff]  ;;  %395 = vmatpush.bf16.msra.mxu0 %v1586_v0  ;;  %417 = vmatpush.bf16.msra.mxu1 %v1584_v1  ;;  %v1592_v7 = vld [vmem:[%s2083_s2 + $0x30] sm:$0xff]  ;;  %s1614_s16 = smul.u32 12, %s2135_s21  ;;  %v1776_v27 = vunpack.c.l.b16 %v1666_v19  ;;  %v1779_v28 = vunpack.c.h.b16 %v1666_v19  ;;  %s1395_s20 = sshll.u32 %s2135_s21, 1 }
   0xe   : > { %v340_v6 = vshrl.u32 %v339_v2, 7  ;;  %471 = vmatpush.bf16.msra.mxu2 %v1587_v4  ;;  %v1594_v8 = vld [vmem:[%s2083_s2 + $0x38] sm:$0xff]  ;;  %v1591_v9 = vld [vmem:[%s2083_s2 + $0x28] sm:$0xff]  ;;  %522 = vmatpush.bf16.msra.mxu3 %v1588_v5  ;;  %v1595_v24 = vld [vmem:[%s2083_s2 + $0x40] sm:$0xff]  ;;  %s335_s26 = scalar_lea.vmem %s2087_s6, %s1395_s20 }
   0xf   : > { %s1750_s19 = scalar_lea.vmem %s2081_s0, %s1614_s16  ;;  %v1597_v61 = vld [vmem:[%s2085_s4 + $0x8] sm:$0xff] }
  0x10   : > { %v345_v10 = vand.u32 1, %v340_v6  ;;  %v1400_v12 = vld [vmem:[%s1750_s19] sm:$0xf]  ;;  %v1585_v13 = vld [vmem:[%s1750_s19] sm:$0x10] }
  0x11   : > { %562 = vmatpush.bf16.msrb.mxu0 %v1590_v3  ;;  %613 = vmatpush.bf16.msrb.mxu1 %v1591_v9  ;;  %v355_v14 = vld [vmem:[%s1750_s19] sm:$0xf]  ;;  %v1401_v15 = vor.u32 %v1585_v13, %v1400_v12  ;;  %v1589_v41 = vld [vmem:[%s1750_s19] sm:$0x30] }
  0x12   : > { %663 = vmatpush.bf16.msrb.mxu2 %v1592_v7  ;;  %703 = vmatpush.bf16.msrb.mxu3 %v1594_v8  ;;  %vm1752_vm0 = vcmp.ne.s32.totalorder %v345_v10, 0  ;;  %vm354_vm1 = vcmp.ne.s32.totalorder %v345_v10, 1  ;;  %v423_v34 = vld [vmem:[%s1750_s19] sm:$0xe]  ;;  %v362_v46 = vld [vmem:[%s1750_s19 + $0x4] sm:$0x1] }
  0x13   : > { %vm358_vm2 = vmpackc.low %vm1752_vm0, %vm1752_vm0  ;;  %v372_v17 = vshrl.u32 %v1401_v15, 16  ;;  %v374_v18 = vshll.u32 %v1401_v15, 16  ;;  %v1430_v40 = vld [vmem:[%s1750_s19] sm:$0xe]  ;;  %v529_v12 = vld [vmem:[%s1750_s19 + $0x4] sm:$0x3] }
  0x14   : > { %v359_v16 = vsel %vm358_vm2, %v355_v14, 0  ;;  %vm426_vm4 = vmpackc.low %vm354_vm1, %vm354_vm1  ;;  %v1767_v22 = vsel %vm358_vm2, 65537, %v1666_v19  ;;  %v1431_v52 = vor.u32 %v1589_v41, %v1430_v40  ;;  %v569_v2 = vld [vmem:[%s1750_s19] sm:$0xc]  ;;  %v670_v41 = vld [vmem:[%s1750_s19 + $0x4] sm:$0x7] }
  0x15   : > { %1411 = vmatmul.msk.bf16.vlgmr.msra.gmra.mxu1 %vm384_vm3, %v359_v16  ;;  %v1764_v20 = vsel %vm426_vm4, 65537, %v1666_v19  ;;  %v376_v21 = vrot.slane %v374_v18, 1  ;;  %v479_v26 = vrot.slane %v1767_v22, 7  ;;  %v1782_v29 = vrot.slane %v1767_v22, 6  ;;  %v1593_v18 = vld [vmem:[%s1750_s19] sm:$0x70] }
  0x16   : > { %v428_v23 = vrot.slane %v1764_v20, 7  ;;  %v570_v35 = vrot.slane %v1764_v20, 6  ;;  %v1791_v38 = vrot.slane %v1764_v20, 5  ;;  %v539_v56 = vshrl.u32 %v1431_v52, 16  ;;  %v710_v40 = vld [vmem:[%s1750_s19] sm:$0x8] }
  0x17   : > { %v377_v25 = vor.u32 %v376_v21, %v372_v17  ;;  %v480_v33 = vrot.slane %v479_v26, 4  ;;  %v621_v36 = vrot.slane %v1782_v29, 4  ;;  %v622_v37 = vunpack.c.l.b16 %v1782_v29  ;;  %v1455_v17 = vld [vmem:[%s1750_s19] sm:$0xc] }
  0x18   : > { %v429_v30 = vrot.slane %v428_v23, 4  ;;  %v430_v31 = vunpack.c.l.b16 %v428_v23  ;;  %v431_v32 = vunpack.c.h.b16 %v428_v23  ;;  %v623_v42 = vunpack.c.h.b16 %v1782_v29 }
  0x19   : > { %1406 = vmatmul.msk.bf16.vlgmr.msra.gmra.mxu0 %vm384_vm3, %v377_v25  ;;  %v481_v45 = vunpack.c.l.b16 %v479_v26  ;;  %v482_v48 = vunpack.c.h.b16 %v479_v26  ;;  %v488_v49 = vunpack.c.l.b16 %v480_v33  ;;  %v489_v51 = vunpack.c.h.b16 %v480_v33  ;;  %v1607_v33 = vld [vmem:[%s2085_s4 + $0x58] sm:$0xff] }
  0x1a   : > { %754 = vmatpush.bf16.msra.mxu0 %v1595_v24  ;;  %vm434_vm5 = vcmp.ne.s32.totalorder %v430_v31, %v1776_v27  ;;  %vm435_vm6 = vcmp.ne.s32.totalorder %v431_v32, %v1779_v28  ;;  %v437_v39 = vunpack.c.l.b16 %v429_v30  ;;  %v438_v43 = vunpack.c.h.b16 %v429_v30 }
  0x1b   : > { %vm436_vm7 = vmpackc.low %vm435_vm6, %vm434_vm5  ;;  %vm1800_vm10 = vcmp.ne.s32.totalorder %v481_v45, %v1776_v27  ;;  %vm486_vm12 = vcmp.ne.s32.totalorder %v482_v48, %v1779_v28  ;;  %vm492_vm13 = vcmp.ne.s32.totalorder %v488_v49, %v1776_v27  ;;  %v571_v53 = vrot.slane %v570_v35, 4 }
  0x1c   : > { %v444_v44 = vsel %vm436_vm7, %v423_v34, 0  ;;  %vm441_vm8 = vcmp.ne.s32.totalorder %v437_v39, %v1776_v27  ;;  %vm442_vm9 = vcmp.ne.s32.totalorder %v438_v43, %v1779_v28  ;;  %v572_v54 = vunpack.c.l.b16 %v570_v35  ;;  %vm487_vm14 = vmpackc.low %vm486_vm12, %vm1800_vm10 }
  0x1d   : > { %v451_v47 = vunpack.c.l.b16 %v444_v44  ;;  %vm443_vm11 = vmpackc.low %vm442_vm9, %vm441_vm8  ;;  %vm493_vm15 = vcmp.ne.s32.totalorder %v489_v51, %v1779_v28  ;;  %v542_v57 = vshll.u32 %v1431_v52, 16  ;;  %v495_v59 = vsel %vm487_vm14, %v423_v34, 0 }
  0x1e   : > { %v445_v55 = vsel %vm443_vm11, %v362_v46, 0  ;;  %vm494_vm0 = vmpackc.low %vm493_vm15, %vm492_vm13  ;;  %v573_v60 = vunpack.c.h.b16 %v570_v35  ;;  %vm1810_vm1 = vcmp.ne.s32.totalorder %v572_v54, %v1776_v27  ;;  %v502_v63 = vunpack.c.l.b16 %v495_v59 }
  0x1f   : > { %v452_v58 = vunpack.c.l.b16 %v445_v55  ;;  %v496_v62 = vsel %vm494_vm0, %v362_v46, 0  ;;  %v541_v0 = vrot.slane %v539_v56, 1  ;;  %v544_v1 = vrot.slane %v542_v57, 2 }
  0x20   : > { %v503_v4 = vunpack.c.l.b16 %v496_v62  ;;  %vm577_vm2 = vcmp.ne.s32.totalorder %v573_v60, %v1779_v28  ;;  %v579_v5 = vunpack.c.l.b16 %v571_v53  ;;  %v580_v7 = vunpack.c.h.b16 %v571_v53  ;;  %v1599_v60 = vld [vmem:[%s2085_s4 + $0x18] sm:$0xff] }
  0x21   : > { %v453_v3 = vpack.c.b16 %v452_v58, %v451_v47  ;;  %v545_v6 = vor.u32 %v544_v1, %v541_v0  ;;  %vm578_vm4 = vmpackc.low %vm577_vm2, %vm1810_vm1  ;;  %vm1819_vm5 = vcmp.ne.s32.totalorder %v622_v37, %v1776_v27  ;;  %vm1824_vm6 = vcmp.ne.s32.totalorder %v623_v42, %v1779_v28  ;;  %832 = vmatpush.bf16.msra.mxu1 %v1599_v60 }
  0x22   : > { %v504_v11 = vpack.c.b16 %v503_v4, %v502_v63  ;;  %vm583_vm7 = vcmp.ne.s32.totalorder %v579_v5, %v1776_v27  ;;  %v586_v13 = vsel %vm578_vm4, %v569_v2, 0  ;;  %vm628_vm8 = vmpackc.low %vm1824_vm6, %vm1819_vm5  ;;  %v712_v14 = vrot.slane %v1791_v38, 4  ;;  %v1601_v63 = vld [vmem:[%s2085_s4 + $0x28] sm:$0xff] }
  0x23   : > { %v454_v10 = vrot.slane %v453_v3, 1  ;;  %vm584_vm9 = vcmp.ne.s32.totalorder %v580_v7, %v1779_v28  ;;  %v629_v15 = vunpack.c.l.b16 %v621_v36  ;;  %v630_v16 = vunpack.c.h.b16 %v621_v36 }
  0x24   : > { %v505_v21 = vrot.slane %v504_v11, 1  ;;  %vm585_vm10 = vmpackc.low %vm584_vm9, %vm583_vm7  ;;  %v593_v23 = vunpack.c.l.b16 %v586_v13  ;;  %v713_v24 = vunpack.c.l.b16 %v1791_v38  ;;  %v636_v26 = vsel %vm628_vm8, %v569_v2, 0  ;;  %v1598_v2 = vld [vmem:[%s2085_s4 + $0x10] sm:$0xff]  ;;  %v1603_v11 = vld [vmem:[%s2085_s4 + $0x38] sm:$0xff] }
  0x25   : > { %1418 = vmatmul.msk.bf16.vlgmr.msra.gmra.mxu2 %vm384_vm3, %v454_v10  ;;  %v587_v25 = vsel %vm585_vm10, %v529_v12, 0  ;;  %vm633_vm11 = vcmp.ne.s32.totalorder %v629_v15, %v1776_v27  ;;  %vm634_vm12 = vcmp.ne.s32.totalorder %v630_v16, %v1779_v28  ;;  %v1456_v30 = vor.u32 %v1593_v18, %v1455_v17  ;;  %833 = vmatpush.bf16.msra.mxu1 %v1598_v2  ;;  %v1596_v15 = vld [vmem:[%s2085_s4] sm:$0xff]  ;;  %v1605_v17 = vld [vmem:[%s2085_s4 + $0x48] sm:$0xff]  ;;  %v1602_v18 = vld [vmem:[%s2085_s4 + $0x30] sm:$0xff] }
  0x26   : > { %1425 = vmatmul.msk.bf16.vlgmr.msra.gmra.mxu3 %vm384_vm3, %v505_v21  ;;  %v594_v29 = vunpack.c.l.b16 %v587_v25  ;;  %vm635_vm13 = vmpackc.low %vm634_vm12, %vm633_vm11  ;;  %v714_v31 = vunpack.c.h.b16 %v1791_v38  ;;  %vm1851_vm14 = vcmp.ne.s32.totalorder %v713_v24, %v1776_v27  ;;  %v720_v34 = vunpack.c.l.b16 %v712_v14  ;;  %873 = vmatpush.bf16.msra.mxu2 %v1597_v61  ;;  %v1600_v16 = vld [vmem:[%s2085_s4 + $0x20] sm:$0xff] }
  0x27   : > { %v637_v32 = vsel %vm635_vm13, %v529_v12, 0  ;;  %v721_v35 = vunpack.c.h.b16 %v712_v14  ;;  %v643_v37 = vunpack.c.l.b16 %v636_v26  ;;  %v680_v42 = vshrl.u32 %v1456_v30, 16  ;;  %932 = vmatpush.bf16.msra.mxu3 %v1601_v63 }
  0x28   : > { %v595_v36 = vpack.c.b16 %v594_v29, %v593_v23  ;;  %v644_v39 = vunpack.c.l.b16 %v637_v32  ;;  %vm718_vm15 = vcmp.ne.s32.totalorder %v714_v31, %v1779_v28  ;;  %vm724_vm0 = vcmp.ne.s32.totalorder %v720_v34, %v1776_v27  ;;  %v1604_v34 = vld [vmem:[%s2085_s4 + $0x40] sm:$0xff] }
  0x29   : > { %1436 = vmatmul.msk.bf16.vlgmr.msrb.gmra.mxu0 %vm384_vm3, %v545_v6  ;;  %vm725_vm1 = vcmp.ne.s32.totalorder %v721_v35, %v1779_v28  ;;  %v683_v43 = vshll.u32 %v1456_v30, 16  ;;  %vm719_vm2 = vmpackc.low %vm718_vm15, %vm1851_vm14  ;;  %v682_v49 = vrot.slane %v680_v42, 2  ;;  %v777_v12 = vshll.u32 %v1767_v22, 16  ;;  %v1609_v35 = vld [vmem:[%s2085_s4 + $0x68] sm:$0xff] }
  0x2a   : > { %v596_v38 = vrot.slane %v595_v36, 2  ;;  %vm726_vm4 = vmpackc.low %vm725_vm1, %vm724_vm0  ;;  %v727_v44 = vsel %vm719_vm2, %v710_v40, 0  ;;  %v645_v45 = vpack.c.b16 %v644_v39, %v643_v37  ;;  %v780_v13 = vshrl.u32 %v1767_v22, 16  ;;  %986 = vmatpush.bf16.msrb.mxu0 %v1603_v11  ;;  %874 = vmatpush.bf16.msra.mxu2 %v1596_v15  ;;  %v1640_v37 = vld [vmem:[%s2084_s3] ss:$0 sm:$0xff] }
  0x2b   : > { %v728_v46 = vsel %vm726_vm4, %v670_v41, 0  ;;  %v734_v47 = vunpack.c.l.b16 %v727_v44  ;;  %v685_v50 = vrot.slane %v683_v43, 3  ;;  %v779_v21 = vrot.slane %v777_v12, 5  ;;  %933 = vmatpush.bf16.msra.mxu3 %v1600_v16 }
  0x2c   : > { %1443 = vmatmul.msk.bf16.vlgmr.msrb.gmra.mxu1 %vm384_vm3, %v596_v38  ;;  %v735_v48 = vunpack.c.l.b16 %v728_v46  ;;  %v646_v52 = vrot.slane %v645_v45, 2  ;;  %v782_v22 = vrot.slane %v780_v13, 4  ;;  %v1896_v24 = vshrl.u32 %v1764_v20, 16  ;;  %v1606_v45 = vld [vmem:[%s2085_s4 + $0x50] sm:$0xff]  ;;  %v1611_v46 = vld [vmem:[%s2085_s4 + $0x78] sm:$0xff] }
  0x2d   : > { %v686_v54 = vor.u32 %v685_v50, %v682_v49  ;;  %1025 = vmatpush.bf16.msrb.mxu1 %v1605_v17  ;;  %v940_v26 = vrot.slane %v780_v13, 7  ;;  %v1899_v31 = vshll.u32 %v1764_v20, 16  ;;  %v1090_v41 = vrot.slane %v780_v13, 6 }
  0x2e   : > { %v736_v51 = vpack.c.b16 %v735_v48, %v734_v47  ;;  %987 = vmatpush.bf16.msrb.mxu0 %v1602_v18  ;;  %v783_v20 = vor.u32 %v782_v22, %v779_v21  ;;  %v884_v39 = vrot.slane %v1896_v24, 7  ;;  %v1091_v38 = vrot.slane %v777_v12, 7  ;;  %v1608_v47 = vld [vmem:[%s2085_s4 + $0x60] sm:$0xff]  ;;  %v1613_v18 = vld [vmem:[%s2085_s4 + $0x88] sm:$0xff] }
  0x2f   : > { %v941_v40 = vor.u32 %v940_v26, %v777_v12  ;;  %v1034_v43 = vrot.slane %v1896_v24, 6  ;;  %v1035_v44 = vrot.slane %v1899_v31, 7  ;;  %vm770_vm5 = vcmask 253952  }
  0x30   : > { %v737_v53 = vrot.slane %v736_v51, 3  ;;  %v784_v49 = vrot.slane %v783_v20, 4  ;;  %v887_v50 = vor.u32 %v1899_v31, %v884_v39  ;;  %vm772_vm6 = vcmask 257027   ;;  %v1612_v39 = vld [vmem:[%s2085_s4 + $0x80] sm:$0xff] }
  0x31   : > { %1026 = vmatpush.bf16.msrb.mxu1 %v1604_v34  ;;  %vm822_vm2 = vcmask 261120  }
  0x32   : > { %v793_v63 = vunpack.c.h.b16 %v784_v49  ;;  %v888_v2 = vunpack.c.l.b16 %v887_v50 }
  0x34   : > { %vm797_vm13 = vcmp.ne.s32.totalorder %v793_v63, %v1779_v28  ;;  %vm1961_vm14 = vcmp.ne.s32.totalorder %v888_v2, %v1776_v27 }
  0x35   : > { %1450 = vmatmul.msk.bf16.vlgmr.msrb.gmra.mxu2 %vm384_vm3, %v646_v52  ;;  %v785_v52 = vunpack.c.l.b16 %v779_v21 }
  0x36   : > { %1461 = vmatmul.msk.bf16.vlgmr.msrb.gmra.mxu3 %vm384_vm3, %v686_v54  ;;  %1082 = vmatpush.bf16.msrb.mxu2 %v1607_v33  ;;  %v1610_v54 = vld [vmem:[%s2085_s4 + $0x70] sm:$0xff] }
  0x37   : > { %1138 = vmatpush.bf16.msrb.mxu3 %v1609_v35  ;;  %vm1930_vm7 = vcmp.ne.s32.totalorder %v785_v52, %v1776_v27 }
  0x39   : > { %1468 = vmatmul.msk.bf16.vlgmr.msra.gmra.mxu0 %vm384_vm3, %v737_v53  ;;  %v786_v53 = vunpack.c.h.b16 %v779_v21  ;;  %vm768_vm3 = vcmask 257024  }
  0x3a   : > { %1083 = vmatpush.bf16.msrb.mxu2 %v1606_v45  ;;  %1177 = vmatpush.bf16.msra.mxu0 %v1611_v46 }
  0x3b   : > { %1139 = vmatpush.bf16.msrb.mxu3 %v1608_v47  ;;  %vm1935_vm8 = vcmp.ne.s32.totalorder %v786_v53, %v1779_v28 }
  0x3c   : > { %vm791_vm11 = vmpackc.low %vm1935_vm8, %vm1930_vm7 }
  0x3e   : > { %1178 = vmatpush.bf16.msra.mxu0 %v1610_v54 }
  0x92   : > { %v419_v55 = vpop.f32.mrf.mxu1 }
  0x96   : > { %v397_v56 = vpop.f32.mrf.mxu0 }
  0x97   : > { %v420_v0 = vadd.f32 %v419_v55, %v397_v56  ;;  %v942_v55 = vunpack.c.l.b16 %v941_v40  ;;  %v1092_v56 = vor.u32 %v1091_v38, %v1090_v41 }
  0x99   : > { %vm1942_vm9 = vcmp.ne.s32.totalorder %v942_v55, %v1776_v27 }
  0x9a   : > { %v421_v57 = vpop.f32.mrf.mxu1 }
  0x9e   : > { %v399_v58 = vpop.f32.mrf.mxu0 }
  0x9f   : > { %v943_v58 = vunpack.c.h.b16 %v941_v40 }
  0xa1   : > { %vm1947_vm10 = vcmp.ne.s32.totalorder %v943_v58, %v1779_v28 }
  0xa2   : > { %vm948_vm0 = vmpackc.low %vm1947_vm10, %vm1942_vm9 }
  0xa6   : > { %v564_v59 = vpop.f32.mrf.mxu0 }
  0xa8   : > { %v473_v62 = vpop.f32.mrf.mxu2 }
  0xa9   : > { %v524_v3 = vpop.f32.mrf.mxu3  ;;  %v615_v4 = vpop.f32.mrf.mxu1  ;;  %v477_v5 = vadd.f32 %v473_v62, %v420_v0  ;;  %v792_v62 = vunpack.c.l.b16 %v784_v49 }
  0xab   : > { %v528_v6 = vadd.f32 %v524_v3, %v477_v5  ;;  %v889_v3 = vunpack.c.h.b16 %v887_v50  ;;  %v1188_v5 = vrot.slane %v1899_v31, 6  ;;  %vm796_vm12 = vcmp.ne.s32.totalorder %v792_v62, %v1776_v27 }
  0xac   : > { %vm1974_vm1 = vmpackc.low %vm797_vm13, %vm796_vm12 }
  0xad   : > { %v568_v14 = vadd.f32 %v564_v59, %v528_v6  ;;  %v1036_v59 = vor.u32 %v1035_v44, %v1034_v43  ;;  %vm1966_vm15 = vcmp.ne.s32.totalorder %v889_v3, %v1779_v28 }
  0xae   : > { %v566_v1 = vpop.f32.mrf.mxu0  ;;  %vm894_vm4 = vmpackc.low %vm1966_vm15, %vm1961_vm14 }
  0xaf   : > { %v619_v23 = vadd.f32 %v615_v4, %v568_v14  ;;  %v1187_v4 = vrot.slane %v1896_v24, 5  ;;  %v1038_v17 = vunpack.c.h.b16 %v1036_v59 }
  0xb0   : > { %v475_v7 = vpop.f32.mrf.mxu2 }
  0xb1   : > { %v526_v9 = vpop.f32.mrf.mxu3  ;;  %v617_v10 = vpop.f32.mrf.mxu1  ;;  %v1189_v13 = vor.u32 %v1188_v5, %v1187_v4  ;;  %v1190_v14 = vrot.slane %v1187_v4, 4  ;;  %vm2009_vm7 = vcmp.ne.s32.totalorder %v1038_v17, %v1779_v28 }
  0xb2   : > { %v774_v9 = vld [vmem:[#allocation3] sm:$0x8]  ;;  %v1094_v10 = vunpack.c.h.b16 %v1092_v56 }
  0xb3   : > { %v799_v16 = vsel %vm791_vm11, %v774_v9, 0  ;;  %v1198_v31 = vunpack.c.l.b16 %v1190_v14  ;;  %v1199_v40 = vunpack.c.h.b16 %v1190_v14 }
  0xb5   : > { %vm2035_vm12 = vcmp.ne.s32.totalorder %v1198_v31, %v1776_v27  ;;  %vm2040_vm13 = vcmp.ne.s32.totalorder %v1199_v40, %v1779_v28 }
  0xb6   : > { %v756_v8 = vpop.f32.mrf.mxu0  ;;  %vm1204_vm15 = vmpackc.low %vm2040_vm13, %vm2035_vm12 }
  0xb8   : > { %v665_v25 = vpop.f32.mrf.mxu2 }
  0xb9   : > { %v669_v29 = vadd.f32 %v665_v25, %v619_v23  ;;  %v705_v32 = vpop.f32.mrf.mxu3  ;;  %v841_v25 = vunpack.c.l.b16 %v799_v16 }
  0xbb   : > { %v709_v36 = vadd.f32 %v705_v32, %v669_v29  ;;  %v1191_v29 = vunpack.c.l.b16 %v1189_v13 }
  0xbd   : > { %v760_v42 = vadd.f32 %v756_v8, %v709_v36  ;;  %v1093_v8 = vunpack.c.l.b16 %v1092_v56  ;;  %vm2025_vm10 = vcmp.ne.s32.totalorder %v1191_v29, %v1776_v27 }
  0xbe   : > { %v758_v30 = vpop.f32.mrf.mxu0 }
  0xbf   : > { %v765_v48 = vadd.f32 %v1640_v37, %v760_v42  ;;  %v1192_v30 = vunpack.c.h.b16 %v1189_v13 }
  0xc0   : > { %v667_v51 = vpop.f32.mrf.mxu2 }
  0xc1   : > { %v766_v57 = vmax.f32 %v765_v48, 0.0  ;;  %v707_v60 = vpop.f32.mrf.mxu3  ;;  %vm2030_vm11 = vcmp.ne.s32.totalorder %v1192_v30, %v1779_v28 }
  0xc2   : > { %vm1197_vm14 = vmpackc.low %vm2030_vm11, %vm2025_vm10 }
  0xc3   : > { %v767_v61 = vpack.c.bf16 %v766_v57, %v766_v57 }
  0xc5   : > { %769 = vst.msk [vmem:[#allocation3 + $0x4] sm:$0xf] %vm768_vm3, %v767_v61  ;;  %vm1986_vm3 = vcmp.ne.s32.totalorder %v1093_v8, %v1776_v27  ;;  %v1186_v61 = vld [vmem:[#allocation3 + $0x8] sm:$0x1] }
  0xc6   : > { %771 = vst.msk [vmem:[#allocation3 + $0x4] sm:$0x1] %vm770_vm5, %v1666_v19  ;;  %vm1991_vm5 = vcmp.ne.s32.totalorder %v1094_v10, %v1779_v28  ;;  %v1206_v5 = vsel %vm1204_vm15, %v1186_v61, 0 }
  0xc7   : > { %773 = vst.msk [vmem:[#allocation3 + $0x4] sm:$0x8] %vm772_vm6, %v1666_v19  ;;  %v1037_v19 = vunpack.c.l.b16 %v1036_v59  ;;  %vm1099_vm8 = vmpackc.low %vm1991_vm5, %vm1986_vm3  ;;  %v1215_v10 = vunpack.c.l.b16 %v1206_v5 }
  0xc9   : > { %vm1996_vm6 = vcmp.ne.s32.totalorder %v1037_v19, %v1776_v27 }
  0xca   : > { %vm1043_vm9 = vmpackc.low %vm2009_vm7, %vm1996_vm6 }
  0xcc   : > { %v994_v43 = vld [vmem:[#allocation3 + $0x4] sm:$0x6] }
  0xcd   : > { %v775_v24 = vld [vmem:[#allocation3 + $0x4] sm:$0x3]  ;;  %v1001_v53 = vunpack.c.l.b16 %v994_v43 }
  0xce   : > { %v880_v26 = vld [vmem:[#allocation3 + $0x4] sm:$0x7]  ;;  %v800_v32 = vsel %vm1974_vm1, %v775_v24, 0  ;;  %1481 = vmatmul.msk.bf16.vlgmr.msra.gmra.mxu1 %vm822_vm2, %v775_v24 }
  0xcf   : > { %v895_v33 = vsel %vm894_vm4, %v880_v26, 0  ;;  %v949_v34 = vsel %vm948_vm0, %v880_v26, 0  ;;  %v842_v36 = vunpack.c.l.b16 %v800_v32  ;;  %1246 = vmatpush.bf16.msra.mxu1 %v1613_v18  ;;  %v1033_v44 = vld [vmem:[#allocation3 + $0x4] sm:$0xe]  ;;  %v1002_v3 = vpack.c.b16 %v1001_v53, %v1001_v53 }
  0xd0   : > { %v902_v37 = vunpack.c.l.b16 %v895_v33  ;;  %v956_v20 = vunpack.c.l.b16 %v949_v34  ;;  %v1044_v54 = vsel %vm1043_vm9, %v1033_v44, 0  ;;  %v1100_v27 = vsel %vm1099_vm8, %v1033_v44, 0  ;;  %v1185_v60 = vld [vmem:[#allocation3 + $0x4] sm:$0xc] }
  0xd1   : > { %v843_v41 = vpack.c.b16 %v842_v36, %v841_v25  ;;  %v1051_v0 = vunpack.c.l.b16 %v1044_v54  ;;  %v1107_v1 = vunpack.c.l.b16 %v1100_v27  ;;  %v1205_v4 = vsel %vm1197_vm14, %v1185_v60, 0  ;;  %v1146_v11 = vld [vmem:[#allocation3 + $0x4] sm:$0xc]  ;;  %v1641_v27 = vld [vmem:[%s2086_s5] ss:$0 sm:$0xff] }
  0xd2   : > { %v903_v38 = vpack.c.b16 %v902_v37, %v902_v37  ;;  %v957_v42 = vpack.c.b16 %v956_v20, %v956_v20  ;;  %v1003_v8 = vrot.slane %v1002_v3, 1  ;;  %v1214_v9 = vunpack.c.l.b16 %v1205_v4 }
  0xd3   : > { %v845_v48 = vshrl.u32 %v843_v41, 16  ;;  %v848_v49 = vshll.u32 %v843_v41, 16  ;;  %1247 = vmatpush.bf16.msra.mxu1 %v1612_v39  ;;  %v1052_v6 = vpack.c.b16 %v1051_v0, %v1051_v0  ;;  %v1108_v7 = vpack.c.b16 %v1107_v1, %v1107_v1 }
  0xd4   : > { %v907_v50 = vshll.u32 %v903_v38, 16  ;;  %v961_v52 = vshll.u32 %v957_v42, 16  ;;  %v905_v57 = vshrl.u32 %v903_v38, 16  ;;  %v959_v28 = vshrl.u32 %v957_v42, 16 }
  0xd5   : > { %v847_v55 = vrot.slane %v845_v48, 3  ;;  %v850_v56 = vrot.slane %v848_v49, 4  ;;  %v1054_v12 = vshrl.u32 %v1052_v6, 16  ;;  %v1057_v19 = vshll.u32 %v1052_v6, 16 }
  0xd6   : > { %v909_v58 = vrot.slane %v907_v50, 1  ;;  %v963_v59 = vrot.slane %v961_v52, 1  ;;  %v1110_v13 = vshrl.u32 %v1108_v7, 16  ;;  %v1113_v14 = vshll.u32 %v1108_v7, 16 }
  0xd7   : > { %v851_v62 = vor.u32 %v850_v56, %v847_v55  ;;  %v1153_v15 = vunpack.c.l.b16 %v1146_v11  ;;  %v1216_v16 = vpack.c.b16 %v1215_v10, %v1214_v9  ;;  %v1056_v17 = vrot.slane %v1054_v12, 1 }
  0xd8   : > { %v910_v63 = vor.u32 %v909_v58, %v905_v57  ;;  %v964_v2 = vor.u32 %v963_v59, %v959_v28  ;;  %v1059_v18 = vrot.slane %v1057_v19, 2  ;;  %v1112_v21 = vrot.slane %v1110_v13, 1 }
  0xd9   : > { %1490 = vmatmul.msk.bf16.vlgmr.msra.gmra.mxu2 %vm822_vm2, %v851_v62  ;;  %v1115_v22 = vrot.slane %v1113_v14, 2  ;;  %v1154_v23 = vpack.c.b16 %v1153_v15, %v1153_v15  ;;  %v1218_v24 = vshrl.u32 %v1216_v16, 16  ;;  %v1221_v25 = vshll.u32 %v1216_v16, 16 }
  0xda   : > { %1503 = vmatmul.msk.bf16.vlgmr.msra.gmra.mxu3 %vm822_vm2, %v910_v63  ;;  %1516 = vmatmul.msk.bf16.vlgmr.msrb.gmra.mxu0 %vm822_vm2, %v964_v2  ;;  %v1060_v26 = vor.u32 %v1059_v18, %v1056_v17  ;;  %vm1261_vm0 = vcmask 254976  }
  0xdb   : > { %v1116_v29 = vor.u32 %v1115_v22, %v1112_v21  ;;  %v1155_v30 = vrot.slane %v1154_v23, 2  ;;  %v1220_v31 = vrot.slane %v1218_v24, 2  ;;  %v1223_v32 = vrot.slane %v1221_v25, 3 }
  0xdd   : > { %v1224_v33 = vor.u32 %v1223_v32, %v1220_v31 }
  0xde   : > { %1529 = vmatmul.msk.bf16.vlgmr.msrb.gmra.mxu1 %vm822_vm2, %v1003_v8 }
  0xe9   : > { %1542 = vmatmul.msk.bf16.vlgmr.msrb.gmra.mxu2 %vm822_vm2, %v1060_v26 }
  0xea   : > { %1555 = vmatmul.msk.bf16.vlgmr.msrb.gmra.mxu3 %vm822_vm2, %v1116_v29  ;;  %1568 = vmatmul.msk.bf16.vlgmr.msra.gmra.mxu0 %vm822_vm2, %v1155_v30 }
  0xee   : > { %1581 = vmatmul.msk.bf16.vlgmr.msra.gmra.mxu1 %vm822_vm2, %v1224_v33 }
 0x14b   : > { %v835_v34 = vpop.f32.mrf.mxu1 }
 0x153   : > { %v837_v35 = vpop.f32.mrf.mxu1 }
 0x157   : > { %v989_v36 = vpop.f32.mrf.mxu0 }
 0x15b   : > { %v1028_v37 = vpop.f32.mrf.mxu1 }
 0x15c   : > { %v876_v20 = vpop.f32.mrf.mxu2 }
 0x15d   : > { %v935_v39 = vpop.f32.mrf.mxu3  ;;  %v877_v40 = vadd.f32 %v876_v20, %v835_v34 }
 0x15f   : > { %v991_v41 = vpop.f32.mrf.mxu0  ;;  %v939_v38 = vadd.f32 %v935_v39, %v877_v40 }
 0x161   : > { %v993_v45 = vadd.f32 %v989_v36, %v939_v38 }
 0x163   : > { %v1030_v42 = vpop.f32.mrf.mxu1  ;;  %v1032_v48 = vadd.f32 %v1028_v37, %v993_v45 }
 0x164   : > { %v878_v43 = vpop.f32.mrf.mxu2 }
 0x165   : > { %v937_v44 = vpop.f32.mrf.mxu3 }
 0x167   : > { %v1180_v46 = vpop.f32.mrf.mxu0 }
 0x16b   : > { %v1249_v47 = vpop.f32.mrf.mxu1 }
 0x16c   : > { %v1085_v49 = vpop.f32.mrf.mxu2 }
 0x16d   : > { %v1141_v50 = vpop.f32.mrf.mxu3  ;;  %v1089_v51 = vadd.f32 %v1085_v49, %v1032_v48 }
 0x16f   : > { %v1145_v52 = vadd.f32 %v1141_v50, %v1089_v51  ;;  %v1182_v53 = vpop.f32.mrf.mxu0 }
 0x171   : > { %v1184_v54 = vadd.f32 %v1180_v46, %v1145_v52 }
 0x173   : > { %v1253_v55 = vadd.f32 %v1249_v47, %v1184_v54  ;;  %v1251_v56 = vpop.f32.mrf.mxu1 }
 0x174   : > { %v1087_v57 = vpop.f32.mrf.mxu2 }
 0x175   : > { %v1143_v58 = vpop.f32.mrf.mxu3  ;;  %v1258_v28 = vadd.f32 %v1641_v27, %v1253_v55 }
 0x177   : > { %v1259_v59 = vmax.f32 %v1258_v28, 0.0 }
 0x179   : > { %v1260_v60 = vpack.c.bf16 %v1259_v59, %v1259_v59 }
 0x17b   : > { %1262 = vst.msk [vmem:[%s335_s26] sm:$0x3] %vm1261_vm0, %v1260_v60 }
 0x17c PF: > { %s16_s1 = sadd.s32 1, %s1664_s1   ;;  %s2130_s21 = smov %s1660_s22 }
 0x17d   : > { %p13_p5 = scmp.ge.s32.totalorder %s16_s1, 4   ;;  %s2131_s22 = smov %s2133_s23 }
 0x17f   :  { %15 = sbr.rel (!%p13_p5) target bundleno = 2 (0x2), region = 99 }

// kernel: unet_forward.18
= control target key start
LH: loop header
LB: loop body
LE: loop exit
PB: predicated region body
PF: predicated region fallthrough
CT: control target
= control target key end

     0   :  { %s658_s15 = smov 0   ;;  %s660_s16 = smov 0   ;;  %s736_s0 = inlined_call_operand.vmem [shape: bf16[2,16,16], index: 0, kind: input, shape index: {}]   ;;  %s737_s1 = inlined_call_operand.vmem [shape: bf16[2,16,16], index: 1, kind: input, shape index: {}]   ;;  %s738_s2 = inlined_call_operand.vmem [shape: bf16[4,16,8], index: 2, kind: input, shape index: {}]   ;;  %s739_s3 = inlined_call_operand.vmem [shape: f32[1,8], index: 3, kind: input, shape index: {}]   ;;  %s740_s4 = inlined_call_operand.vmem [shape: bf16[2,2,2,16,8], index: 4, kind: output, shape index: {}]  }
   0x1   :  { %s662_s17 = smov 0  }
   0x2 LB: > { %s26_s18 = sadd.s32 1, %s627_s16  ;;  %p525_p0 = scmp.ge.s32.totalorder %s631_s17, 1  ;;  %s631_s17 = sphi %s662_s17, %s14_s17   ;;  %s627_s16 = sphi %s660_s16, %s742_s16   ;;  %s623_s15 = sphi %s658_s15, %s741_s15  }
   0x3   : > { %p28_p1 = scmp.ge.s32.totalorder %s26_s18, 2  ;;  %p200_p2 = scmp.lt.s32.totalorder %s631_s17, 3 }
   0x5   : > { %s744_s18 = smov (%p28_p1, %s26_s18), 0  ;;  %p201_p3 = pnand %p525_p0, %p200_p2 }
   0x6   : > { %p244_p4 = scmp.lt.s32.totalorder (!%p201_p3), %s623_s15, 1 }
   0x7   : > { %204 = sbr.rel (%p201_p3) target bundleno = 170 (0xaa), region = 36 }
   0xc   : > { %v569_v0 = vld [vmem:[%s738_s2] sm:$0xff]  ;;  %v570_v1 = vld [vmem:[%s738_s2 + $0x8] sm:$0xff]  ;;  %v571_v2 = vld [vmem:[%s738_s2 + $0x10] sm:$0xff]  ;;  %s746_s15 = smov (!%p244_p4, %s623_s15), 1  ;;  %vm297_vm0 = vcmask 130048   ;;  %vm317_vm1 = vcmask 60416  }
   0xd   : > { %v572_v3 = vld [vmem:[%s738_s2 + $0x18] sm:$0xff]  ;;  %308 = vmatpush.bf16.msra.mxu0 %v569_v0  ;;  %340 = vmatpush.bf16.msra.mxu1 %v570_v1  ;;  %s566_s27 = sshll.u32 %s746_s15, 3  ;;  %v605_v13 = vld [vmem:[%s739_s3] ss:$0 sm:$0xff]  ;;  %s568_s12 = sshll.u32 %s746_s15, 5 }
   0xe   : > { %372 = vmatpush.bf16.msra.mxu2 %v571_v2  ;;  %404 = vmatpush.bf16.msra.mxu3 %v572_v3  ;;  %s251_s30 = scalar_lea.vmem %s736_s0, %s566_s27  ;;  %s261_s7 = scalar_lea.vmem %s737_s1, %s566_s27  ;;  %v606_v14 = vld [vmem:[%s739_s3] ss:$0 sm:$0xff] }
   0xf   : > { %v574_v4 = vld [vmem:[%s251_s30] sm:$0xff]   ;;  %s703_s19 = scalar_lea.vmem %s740_s4, %s568_s12 }
  0x10   : > { %v578_v5 = vld [vmem:[%s261_s7] sm:$0xff]   ;;  %v575_v6 = vunpack.c.l.bf16 %v574_v4  ;;  %v576_v7 = vunpack.c.h.bf16 %v574_v4 }
  0x11   : > { %v579_v8 = vunpack.c.l.bf16 %v578_v5  ;;  %v580_v9 = vunpack.c.h.bf16 %v578_v5  ;;  %v607_v21 = vld [vmem:[%s739_s3] ss:$0 sm:$0xff] }
  0x12   : > { %v608_v22 = vld [vmem:[%s739_s3] ss:$0 sm:$0xff] }
  0x13   : > { %v282_v10 = vadd.f32 %v579_v8, %v575_v6  ;;  %v283_v11 = vadd.f32 %v580_v9, %v576_v7 }
  0x15   : > { %v284_v12 = vpack.c.bf16 %v283_v11, %v282_v10 }
  0x17   : > { %536 = vmatmul.msk.bf16.vlgmr.msra.gmra.mxu0 %vm297_vm0, %v284_v12  ;;  %543 = vmatmul.msk.bf16.vlgmr.msra.gmra.mxu1 %vm297_vm0, %v284_v12 }
  0x18   : > { %552 = vmatmul.msk.bf16.vlgmr.msra.gmra.mxu2 %vm297_vm0, %v284_v12  ;;  %561 = vmatmul.msk.bf16.vlgmr.msra.gmra.mxu3 %vm297_vm0, %v284_v12 }
  0x94   : > { %v310_v15 = vpop.f32.mrf.mxu0  ;;  %v342_v16 = vpop.f32.mrf.mxu1 }
  0x95   : > { %v311_v17 = vadd.f32 %v605_v13, %v310_v15  ;;  %v343_v18 = vadd.f32 %v606_v14, %v342_v16 }
  0x97   : > { %v315_v19 = vpack.c.bf16 %v311_v17, %v311_v17  ;;  %v347_v20 = vpack.c.bf16 %v343_v18, %v343_v18 }
  0x99   : > { %318 = vst.msk [vmem:[%s703_s19] sm:$0xf] %vm317_vm1, %v315_v19 }
  0x9a   : > { %544 = vst.msk [vmem:[%s703_s19 + $0x8] sm:$0xf] %vm317_vm1, %v347_v20 }
  0x9b   : > { %v374_v23 = vpop.f32.mrf.mxu2  ;;  %v406_v24 = vpop.f32.mrf.mxu3 }
  0x9c   : > { %v375_v25 = vadd.f32 %v607_v21, %v374_v23  ;;  %v407_v26 = vadd.f32 %v608_v22, %v406_v24  ;;  %v312_v27 = vpop.f32.mrf.mxu0  ;;  %v344_v28 = vpop.f32.mrf.mxu1 }
  0x9d   : > { %v313_v29 = vadd.f32 %v605_v13, %v312_v27  ;;  %v345_v30 = vadd.f32 %v606_v14, %v344_v28 }
  0x9e   : > { %v379_v31 = vpack.c.bf16 %v375_v25, %v375_v25  ;;  %v411_v32 = vpack.c.bf16 %v407_v26, %v407_v26 }
  0x9f   : > { %v316_v33 = vpack.c.bf16 %v313_v29, %v313_v29  ;;  %v348_v34 = vpack.c.bf16 %v345_v30, %v345_v30 }
  0xa0   : > { %553 = vst.msk [vmem:[%s703_s19 + $0x10] sm:$0xf] %vm317_vm1, %v379_v31 }
  0xa1   : > { %562 = vst.msk [vmem:[%s703_s19 + $0x18] sm:$0xf] %vm317_vm1, %v411_v32 }
  0xa2   : > { %319 = vst.msk [vmem:[%s703_s19 + $0x4] sm:$0xf] %vm317_vm1, %v316_v33 }
  0xa3   : > { %545 = vst.msk [vmem:[%s703_s19 + $0xc] sm:$0xf] %vm317_vm1, %v348_v34  ;;  %v376_v35 = vpop.f32.mrf.mxu2  ;;  %v408_v36 = vpop.f32.mrf.mxu3 }
  0xa4   : > { %v377_v37 = vadd.f32 %v607_v21, %v376_v35  ;;  %v409_v38 = vadd.f32 %v608_v22, %v408_v36 }
  0xa6   : > { %v380_v39 = vpack.c.bf16 %v377_v37, %v377_v37  ;;  %v412_v40 = vpack.c.bf16 %v409_v38, %v409_v38 }
  0xa8   : > { %554 = vst.msk [vmem:[%s703_s19 + $0x14] sm:$0xf] %vm317_vm1, %v380_v39 }
  0xa9   : > { %563 = vst.msk [vmem:[%s703_s19 + $0x1c] sm:$0xf] %vm317_vm1, %v412_v40 }
  0xaa PF: > { %s14_s17 = sadd.s32 1, %s631_s17   ;;  %s741_s15 = smov %s627_s16 }
  0xab   : > { %p11_p5 = scmp.ge.s32.totalorder %s14_s17, 4   ;;  %s742_s16 = smov %s744_s18 }
  0xad   :  { %13 = sbr.rel (!%p11_p5) target bundleno = 2 (0x2), region = 75 }

// kernel: unet_forward.19
= control target key start
LH: loop header
LB: loop body
LE: loop exit
PB: predicated region body
PF: predicated region fallthrough
CT: control target
= control target key end

     0   :  { %s1094_s21 = smov 0   ;;  %s1096_s22 = smov 0   ;;  %s1300_s0 = inlined_call_operand.vmem [shape: bf16[2,64,8], index: 0, kind: input, shape index: {}]   ;;  %s1301_s1 = inlined_call_operand.vmem [shape: bf16[2,64,8], index: 1, kind: input, shape index: {}]   ;;  %s1302_s2 = inlined_call_operand.vmem [shape: bf16[4,8,8], index: 2, kind: input, shape index: {}]   ;;  %s1303_s3 = inlined_call_operand.vmem [shape: f32[1,8], index: 3, kind: input, shape index: {}]   ;;  %s1304_s4 = inlined_call_operand.vmem [shape: bf16[8,3], index: 4, kind: input, shape index: {}]   ;;  %s1305_s5 = inlined_call_operand.vmem [shape: f32[1,3], index: 5, kind: input, shape index: {}]   ;;  %s1306_s6 = inlined_call_operand.vmem [shape: f32[2,2,2,64,3], index: 6, kind: output, shape index: {}]  }
   0x1   :  { %s1098_s23 = smov 0  }
   0x2 LB: > { %s28_s24 = sadd.s32 1, %s1053_s22  ;;  %p894_p0 = scmp.ge.s32.totalorder %s1057_s23, 1  ;;  %s1057_s23 = sphi %s1098_s23, %s16_s23   ;;  %s1053_s22 = sphi %s1096_s22, %s1308_s22   ;;  %s1049_s21 = sphi %s1094_s21, %s1307_s21  }
   0x3   : > { %p30_p1 = scmp.ge.s32.totalorder %s28_s24, 2  ;;  %p250_p2 = scmp.lt.s32.totalorder %s1057_s23, 3 }
   0x5   : > { %s1310_s24 = smov (%p30_p1, %s28_s24), 0  ;;  %p251_p3 = pnand %p894_p0, %p250_p2 }
   0x6   : > { %p298_p4 = scmp.lt.s32.totalorder (!%p251_p3), %s1049_s21, 1 }
   0x7   : > { %254 = sbr.rel (%p251_p3) target bundleno = 423 (0x1a7), region = 44 }
   0xc   : > { %v372_v0 = vld [vmem:[%s1302_s2] sm:$0xf]  ;;  %vm390_vm0 = vcmask 1043456   ;;  %v909_v1 = vld [vmem:[%s1302_s2 + $0x4] sm:$0xf]  ;;  %s1312_s21 = smov (!%p298_p4, %s1049_s21), 1 }
   0xd   : > { %v392_v2 = vsel %vm390_vm0, %v372_v0, 0  ;;  %v492_v3 = vsel %vm390_vm0, %v909_v1, 0  ;;  %v943_v4 = vld [vmem:[%s1302_s2 + $0xc] sm:$0xf]  ;;  %v926_v6 = vld [vmem:[%s1302_s2 + $0x8] sm:$0xf] }
   0xe   : > { %401 = vmatpush.bf16.msra.mxu0 %v392_v2  ;;  %501 = vmatpush.bf16.msra.mxu2 %v492_v3  ;;  %v692_v5 = vsel %vm390_vm0, %v943_v4, 0  ;;  %v592_v7 = vsel %vm390_vm0, %v926_v6, 0  ;;  %s962_s9 = sshll.u32 %s1312_s21, 5  ;;  %vm377_vm1 = vcmask 64512   ;;  %v427_v44 = vld [vmem:[%s1304_s4] sm:$0xf] }
   0xf   : > { %s1134_s12 = scalar_lea.vmem %s1300_s0, %s962_s9  ;;  %s1139_s15 = scalar_lea.vmem %s1301_s1, %s962_s9  ;;  %v445_v45 = vsel %vm390_vm0, %v427_v44, 0  ;;  %v527_v46 = vld [vmem:[%s1304_s4] sm:$0xf]  ;;  %vm476_vm2 = vcmask 23552  }
  0x10   : > { %v966_v8 = vld [vmem:[%s1134_s12] sm:$0xff]   ;;  %v997_v17 = vld [vmem:[%s1134_s12 + $0x8] sm:$0xff]   ;;  %v998_v26 = vld [vmem:[%s1134_s12 + $0x10] sm:$0xff]   ;;  %454 = vmatpush.bf16.msra.mxu1 %v445_v45  ;;  %v545_v47 = vsel %vm390_vm0, %v527_v46, 0 }
  0x11   : > { %v982_v9 = vld [vmem:[%s1139_s15] sm:$0xff]   ;;  %v967_v10 = vunpack.c.l.bf16 %v966_v8  ;;  %v968_v11 = vunpack.c.h.bf16 %v966_v8  ;;  %v1000_v18 = vld [vmem:[%s1139_s15 + $0x8] sm:$0xff]   ;;  %v971_v19 = vunpack.c.l.bf16 %v997_v17  ;;  %v972_v20 = vunpack.c.h.bf16 %v997_v17  ;;  %v1001_v27 = vld [vmem:[%s1139_s15 + $0x10] sm:$0xff]   ;;  %554 = vmatpush.bf16.msra.mxu3 %v545_v47 }
  0x12   : > { %701 = vmatpush.bf16.msrb.mxu2 %v692_v5  ;;  %601 = vmatpush.bf16.msrb.mxu0 %v592_v7  ;;  %v983_v12 = vunpack.c.l.bf16 %v982_v9  ;;  %v984_v13 = vunpack.c.h.bf16 %v982_v9  ;;  %v987_v21 = vunpack.c.l.bf16 %v1000_v18  ;;  %v988_v22 = vunpack.c.h.bf16 %v1000_v18  ;;  %v999_v35 = vld [vmem:[%s1134_s12 + $0x18] sm:$0xff]   ;;  %v727_v48 = vld [vmem:[%s1304_s4] sm:$0xf]  ;;  %s964_s12 = sshll.u32 %s1312_s21, 8 }
  0x13   : > { %v975_v28 = vunpack.c.l.bf16 %v998_v26  ;;  %v976_v29 = vunpack.c.h.bf16 %v998_v26  ;;  %v991_v30 = vunpack.c.l.bf16 %v1001_v27  ;;  %v992_v31 = vunpack.c.h.bf16 %v1001_v27  ;;  %v1002_v36 = vld [vmem:[%s1139_s15 + $0x18] sm:$0xff]   ;;  %v627_v50 = vld [vmem:[%s1304_s4] sm:$0xf]  ;;  %s1216_s17 = scalar_lea.vmem %s1306_s6, %s964_s12 }
  0x14   : > { %v360_v14 = vadd.f32 %v983_v12, %v967_v10  ;;  %v361_v15 = vadd.f32 %v984_v13, %v968_v11  ;;  %v362_v23 = vadd.f32 %v987_v21, %v971_v19  ;;  %v363_v24 = vadd.f32 %v988_v22, %v972_v20  ;;  %v1027_v53 = vld [vmem:[%s1303_s3] ss:$0 sm:$0xff] }
  0x15   : > { %v364_v32 = vadd.f32 %v991_v30, %v975_v28  ;;  %v365_v33 = vadd.f32 %v992_v31, %v976_v29  ;;  %v979_v37 = vunpack.c.l.bf16 %v999_v35  ;;  %v980_v38 = vunpack.c.h.bf16 %v999_v35  ;;  %v1028_v58 = vld [vmem:[%s1303_s3] ss:$0 sm:$0xff] }
  0x16   : > { %v368_v16 = vpack.c.bf16 %v361_v15, %v360_v14  ;;  %v369_v25 = vpack.c.bf16 %v363_v24, %v362_v23  ;;  %v995_v39 = vunpack.c.l.bf16 %v1002_v36  ;;  %v996_v40 = vunpack.c.h.bf16 %v1002_v36  ;;  %v1029_v31 = vld [vmem:[%s1303_s3] ss:$0 sm:$0xff] }
  0x17   : > { %v370_v34 = vpack.c.bf16 %v365_v33, %v364_v32  ;;  %v745_v49 = vsel %vm390_vm0, %v727_v48, 0  ;;  %v645_v51 = vsel %vm390_vm0, %v627_v50, 0  ;;  %v1030_v36 = vld [vmem:[%s1303_s3] ss:$0 sm:$0xff] }
  0x18   : > { %901 = vmatmul.msk.bf16.vlgmr.msra.gmra.mxu0 %vm377_vm1, %v368_v16  ;;  %910 = vmatmul.msk.bf16.vlgmr.msra.gmra.mxu2 %vm377_vm1, %v368_v16  ;;  %v366_v41 = vadd.f32 %v995_v39, %v979_v37  ;;  %v367_v42 = vadd.f32 %v996_v40, %v980_v38 }
  0x19   : > { %754 = vmatpush.bf16.msrb.mxu3 %v745_v49  ;;  %654 = vmatpush.bf16.msrb.mxu1 %v645_v51 }
  0x1a   : > { %v371_v43 = vpack.c.bf16 %v367_v42, %v366_v41 }
  0x28   : > { %902 = vmatmul.msk.bf16.gmra.mxu0 %vm377_vm1, %v369_v25  ;;  %911 = vmatmul.msk.bf16.gmra.mxu2 %vm377_vm1, %v369_v25 }
  0x38   : > { %903 = vmatmul.msk.bf16.gmra.mxu0 %vm377_vm1, %v370_v34  ;;  %912 = vmatmul.msk.bf16.gmra.mxu2 %vm377_vm1, %v370_v34 }
  0x48   : > { %904 = vmatmul.msk.bf16.gmra.mxu0 %vm377_vm1, %v371_v43  ;;  %913 = vmatmul.msk.bf16.gmra.mxu2 %vm377_vm1, %v371_v43 }
  0x58   : > { %927 = vmatmul.msk.bf16.vlgmr.msrb.gmra.mxu0 %vm377_vm1, %v368_v16  ;;  %944 = vmatmul.msk.bf16.vlgmr.msrb.gmra.mxu2 %vm377_vm1, %v368_v16 }
  0x68   : > { %928 = vmatmul.msk.bf16.gmra.mxu0 %vm377_vm1, %v369_v25  ;;  %945 = vmatmul.msk.bf16.gmra.mxu2 %vm377_vm1, %v369_v25 }
  0x78   : > { %929 = vmatmul.msk.bf16.gmra.mxu0 %vm377_vm1, %v370_v34  ;;  %946 = vmatmul.msk.bf16.gmra.mxu2 %vm377_vm1, %v370_v34 }
  0x88   : > { %930 = vmatmul.msk.bf16.gmra.mxu0 %vm377_vm1, %v371_v43  ;;  %947 = vmatmul.msk.bf16.gmra.mxu2 %vm377_vm1, %v371_v43 }
  0x95   : > { %v403_v52 = vpop.f32.mrf.mxu0 }
  0x96   : > { %v404_v55 = vadd.f32 %v1027_v53, %v403_v52 }
  0x9b   : > { %v503_v54 = vpop.f32.mrf.mxu2 }
  0x9c   : > { %v504_v61 = vadd.f32 %v1028_v58, %v503_v54 }
  0x9d   : > { %v405_v56 = vpop.f32.mrf.mxu0 }
  0x9e   : > { %v406_v57 = vadd.f32 %v1027_v53, %v405_v56 }
  0xa0   : > { %v423_v59 = vpack.c.bf16 %v406_v57, %v404_v55 }
  0xa2   : > { %905 = vmatmul.msk.bf16.vlgmr.msra.gmra.mxu1 %vm377_vm1, %v423_v59 }
  0xa3   : > { %v505_v60 = vpop.f32.mrf.mxu2 }
  0xa4   : > { %v506_v62 = vadd.f32 %v1028_v58, %v505_v60 }
  0xa5   : > { %v408_v63 = vpop.f32.mrf.mxu0 }
  0xa6   : > { %v523_v0 = vpack.c.bf16 %v506_v62, %v504_v61  ;;  %v409_v2 = vadd.f32 %v1027_v53, %v408_v63 }
  0xa8   : > { %914 = vmatmul.msk.bf16.vlgmr.msra.gmra.mxu3 %vm377_vm1, %v523_v0 }
  0xab   : > { %v508_v1 = vpop.f32.mrf.mxu2 }
  0xac   : > { %v509_v7 = vadd.f32 %v1028_v58, %v508_v1 }
  0xad   : > { %v410_v3 = vpop.f32.mrf.mxu0 }
  0xae   : > { %v411_v4 = vadd.f32 %v1027_v53, %v410_v3 }
  0xb0   : > { %v424_v5 = vpack.c.bf16 %v411_v4, %v409_v2 }
  0xb2   : > { %906 = vmatmul.msk.bf16.gmra.mxu1 %vm377_vm1, %v424_v5 }
  0xb3   : > { %v510_v6 = vpop.f32.mrf.mxu2 }
  0xb4   : > { %v511_v8 = vadd.f32 %v1028_v58, %v510_v6 }
  0xb5   : > { %v413_v9 = vpop.f32.mrf.mxu0 }
  0xb6   : > { %v524_v10 = vpack.c.bf16 %v511_v8, %v509_v7  ;;  %v414_v12 = vadd.f32 %v1027_v53, %v413_v9  ;;  %v1031_v8 = vld [vmem:[%s1305_s5] ss:$0 sm:$0xff] }
  0xb8   : > { %915 = vmatmul.msk.bf16.gmra.mxu3 %vm377_vm1, %v524_v10 }
  0xbb   : > { %v513_v11 = vpop.f32.mrf.mxu2 }
  0xbc   : > { %v514_v17 = vadd.f32 %v1028_v58, %v513_v11 }
  0xbd   : > { %v415_v13 = vpop.f32.mrf.mxu0 }
  0xbe   : > { %v416_v14 = vadd.f32 %v1027_v53, %v415_v13  ;;  %v1032_v13 = vld [vmem:[%s1305_s5] ss:$0 sm:$0xff] }
  0xc0   : > { %v425_v15 = vpack.c.bf16 %v416_v14, %v414_v12 }
  0xc2   : > { %907 = vmatmul.msk.bf16.gmra.mxu1 %vm377_vm1, %v425_v15 }
  0xc3   : > { %v515_v16 = vpop.f32.mrf.mxu2 }
  0xc4   : > { %v516_v18 = vadd.f32 %v1028_v58, %v515_v16 }
  0xc5   : > { %v418_v19 = vpop.f32.mrf.mxu0 }
  0xc6   : > { %v525_v20 = vpack.c.bf16 %v516_v18, %v514_v17  ;;  %v419_v22 = vadd.f32 %v1027_v53, %v418_v19 }
  0xc8   : > { %916 = vmatmul.msk.bf16.gmra.mxu3 %vm377_vm1, %v525_v20 }
  0xcb   : > { %v518_v21 = vpop.f32.mrf.mxu2 }
  0xcc   : > { %v519_v27 = vadd.f32 %v1028_v58, %v518_v21 }
  0xcd   : > { %v420_v23 = vpop.f32.mrf.mxu0 }
  0xce   : > { %v421_v24 = vadd.f32 %v1027_v53, %v420_v23 }
  0xd0   : > { %v426_v25 = vpack.c.bf16 %v421_v24, %v419_v22 }
  0xd2   : > { %908 = vmatmul.msk.bf16.gmra.mxu1 %vm377_vm1, %v426_v25 }
  0xd3   : > { %v520_v26 = vpop.f32.mrf.mxu2 }
  0xd4   : > { %v521_v28 = vadd.f32 %v1028_v58, %v520_v26 }
  0xd5   : > { %v603_v29 = vpop.f32.mrf.mxu0 }
  0xd6   : > { %v526_v30 = vpack.c.bf16 %v521_v28, %v519_v27  ;;  %v604_v33 = vadd.f32 %v1029_v31, %v603_v29 }
  0xd8   : > { %917 = vmatmul.msk.bf16.gmra.mxu3 %vm377_vm1, %v526_v30 }
  0xdb   : > { %v703_v32 = vpop.f32.mrf.mxu2 }
  0xdc   : > { %v704_v39 = vadd.f32 %v1030_v36, %v703_v32 }
  0xdd   : > { %v605_v34 = vpop.f32.mrf.mxu0 }
  0xde   : > { %v606_v35 = vadd.f32 %v1029_v31, %v605_v34 }
  0xe0   : > { %v623_v37 = vpack.c.bf16 %v606_v35, %v604_v33 }
  0xe2   : > { %931 = vmatmul.msk.bf16.vlgmr.msrb.gmra.mxu1 %vm377_vm1, %v623_v37 }
  0xe3   : > { %v705_v38 = vpop.f32.mrf.mxu2 }
  0xe4   : > { %v706_v40 = vadd.f32 %v1030_v36, %v705_v38 }
  0xe5   : > { %v608_v41 = vpop.f32.mrf.mxu0 }
  0xe6   : > { %v723_v42 = vpack.c.bf16 %v706_v40, %v704_v39  ;;  %v609_v44 = vadd.f32 %v1029_v31, %v608_v41  ;;  %v1033_v40 = vld [vmem:[%s1305_s5] ss:$0 sm:$0xff] }
  0xe8   : > { %948 = vmatmul.msk.bf16.vlgmr.msrb.gmra.mxu3 %vm377_vm1, %v723_v42 }
  0xeb   : > { %v708_v43 = vpop.f32.mrf.mxu2 }
  0xec   : > { %v709_v49 = vadd.f32 %v1030_v36, %v708_v43 }
  0xed   : > { %v610_v45 = vpop.f32.mrf.mxu0 }
  0xee   : > { %v611_v46 = vadd.f32 %v1029_v31, %v610_v45 }
  0xf0   : > { %v624_v47 = vpack.c.bf16 %v611_v46, %v609_v44 }
  0xf2   : > { %932 = vmatmul.msk.bf16.gmra.mxu1 %vm377_vm1, %v624_v47  ;;  %v1034_v47 = vld [vmem:[%s1305_s5] ss:$0 sm:$0xff] }
  0xf3   : > { %v710_v48 = vpop.f32.mrf.mxu2 }
  0xf4   : > { %v711_v50 = vadd.f32 %v1030_v36, %v710_v48 }
  0xf5   : > { %v613_v51 = vpop.f32.mrf.mxu0 }
  0xf6   : > { %v724_v52 = vpack.c.bf16 %v711_v50, %v709_v49  ;;  %v614_v54 = vadd.f32 %v1029_v31, %v613_v51 }
  0xf8   : > { %949 = vmatmul.msk.bf16.gmra.mxu3 %vm377_vm1, %v724_v52 }
  0xfb   : > { %v713_v53 = vpop.f32.mrf.mxu2 }
  0xfc   : > { %v714_v59 = vadd.f32 %v1030_v36, %v713_v53 }
  0xfd   : > { %v615_v55 = vpop.f32.mrf.mxu0 }
  0xfe   : > { %v616_v56 = vadd.f32 %v1029_v31, %v615_v55 }
 0x100   : > { %v625_v57 = vpack.c.bf16 %v616_v56, %v614_v54 }
 0x102   : > { %933 = vmatmul.msk.bf16.gmra.mxu1 %vm377_vm1, %v625_v57 }
 0x103   : > { %v715_v58 = vpop.f32.mrf.mxu2 }
 0x104   : > { %v716_v60 = vadd.f32 %v1030_v36, %v715_v58 }
 0x105   : > { %v618_v61 = vpop.f32.mrf.mxu0 }
 0x106   : > { %v725_v62 = vpack.c.bf16 %v716_v60, %v714_v59  ;;  %v619_v0 = vadd.f32 %v1029_v31, %v618_v61 }
 0x108   : > { %950 = vmatmul.msk.bf16.gmra.mxu3 %vm377_vm1, %v725_v62 }
 0x10b   : > { %v718_v63 = vpop.f32.mrf.mxu2 }
 0x10c   : > { %v719_v5 = vadd.f32 %v1030_v36, %v718_v63 }
 0x10d   : > { %v620_v1 = vpop.f32.mrf.mxu0 }
 0x10e   : > { %v621_v2 = vadd.f32 %v1029_v31, %v620_v1 }
 0x110   : > { %v626_v3 = vpack.c.bf16 %v621_v2, %v619_v0 }
 0x112   : > { %934 = vmatmul.msk.bf16.gmra.mxu1 %vm377_vm1, %v626_v3 }
 0x113   : > { %v720_v4 = vpop.f32.mrf.mxu2 }
 0x114   : > { %v721_v6 = vadd.f32 %v1030_v36, %v720_v4 }
 0x116   : > { %v726_v7 = vpack.c.bf16 %v721_v6, %v719_v5 }
 0x118   : > { %951 = vmatmul.msk.bf16.gmra.mxu3 %vm377_vm1, %v726_v7 }
 0x11f   : > { %v456_v9 = vpop.f32.mrf.mxu1 }
 0x120   : > { %v457_v10 = vadd.f32 %v1031_v8, %v456_v9 }
 0x122   : > { %477 = vst.msk [vmem:[%s1216_s17] sm:$0xff] %vm476_vm2, %v457_v10 }
 0x127   : > { %v458_v11 = vpop.f32.mrf.mxu1 }
 0x128   : > { %v459_v12 = vadd.f32 %v1031_v8, %v458_v11 }
 0x12a   : > { %478 = vst.msk [vmem:[%s1216_s17 + $0x8] sm:$0xff] %vm476_vm2, %v459_v12 }
 0x12b   : > { %v556_v14 = vpop.f32.mrf.mxu3 }
 0x12c   : > { %v557_v15 = vadd.f32 %v1032_v13, %v556_v14 }
 0x12e   : > { %918 = vst.msk [vmem:[%s1216_s17 + $0x40] sm:$0xff] %vm476_vm2, %v557_v15 }
 0x12f   : > { %v461_v16 = vpop.f32.mrf.mxu1 }
 0x130   : > { %v462_v17 = vadd.f32 %v1031_v8, %v461_v16 }
 0x132   : > { %479 = vst.msk [vmem:[%s1216_s17 + $0x10] sm:$0xff] %vm476_vm2, %v462_v17 }
 0x133   : > { %v558_v18 = vpop.f32.mrf.mxu3 }
 0x134   : > { %v559_v19 = vadd.f32 %v1032_v13, %v558_v18 }
 0x136   : > { %919 = vst.msk [vmem:[%s1216_s17 + $0x48] sm:$0xff] %vm476_vm2, %v559_v19 }
 0x137   : > { %v463_v20 = vpop.f32.mrf.mxu1 }
 0x138   : > { %v464_v21 = vadd.f32 %v1031_v8, %v463_v20 }
 0x13a   : > { %480 = vst.msk [vmem:[%s1216_s17 + $0x18] sm:$0xff] %vm476_vm2, %v464_v21 }
 0x13b   : > { %v561_v22 = vpop.f32.mrf.mxu3 }
 0x13c   : > { %v562_v23 = vadd.f32 %v1032_v13, %v561_v22 }
 0x13e   : > { %920 = vst.msk [vmem:[%s1216_s17 + $0x50] sm:$0xff] %vm476_vm2, %v562_v23 }
 0x13f   : > { %v466_v24 = vpop.f32.mrf.mxu1 }
 0x140   : > { %v467_v25 = vadd.f32 %v1031_v8, %v466_v24 }
 0x142   : > { %481 = vst.msk [vmem:[%s1216_s17 + $0x20] sm:$0xff] %vm476_vm2, %v467_v25 }
 0x143   : > { %v563_v26 = vpop.f32.mrf.mxu3 }
 0x144   : > { %v564_v27 = vadd.f32 %v1032_v13, %v563_v26 }
 0x146   : > { %921 = vst.msk [vmem:[%s1216_s17 + $0x58] sm:$0xff] %vm476_vm2, %v564_v27 }
 0x147   : > { %v468_v28 = vpop.f32.mrf.mxu1 }
 0x148   : > { %v469_v29 = vadd.f32 %v1031_v8, %v468_v28 }
 0x14a   : > { %482 = vst.msk [vmem:[%s1216_s17 + $0x28] sm:$0xff] %vm476_vm2, %v469_v29 }
 0x14b   : > { %v566_v30 = vpop.f32.mrf.mxu3 }
 0x14c   : > { %v567_v31 = vadd.f32 %v1032_v13, %v566_v30 }
 0x14e   : > { %922 = vst.msk [vmem:[%s1216_s17 + $0x60] sm:$0xff] %vm476_vm2, %v567_v31 }
 0x14f   : > { %v471_v32 = vpop.f32.mrf.mxu1 }
 0x150   : > { %v472_v33 = vadd.f32 %v1031_v8, %v471_v32 }
 0x152   : > { %483 = vst.msk [vmem:[%s1216_s17 + $0x30] sm:$0xff] %vm476_vm2, %v472_v33 }
 0x153   : > { %v568_v34 = vpop.f32.mrf.mxu3 }
 0x154   : > { %v569_v35 = vadd.f32 %v1032_v13, %v568_v34 }
 0x156   : > { %923 = vst.msk [vmem:[%s1216_s17 + $0x68] sm:$0xff] %vm476_vm2, %v569_v35 }
 0x157   : > { %v473_v36 = vpop.f32.mrf.mxu1 }
 0x158   : > { %v474_v37 = vadd.f32 %v1031_v8, %v473_v36 }
 0x15a   : > { %484 = vst.msk [vmem:[%s1216_s17 + $0x38] sm:$0xff] %vm476_vm2, %v474_v37 }
 0x15b   : > { %v571_v38 = vpop.f32.mrf.mxu3 }
 0x15c   : > { %v572_v39 = vadd.f32 %v1032_v13, %v571_v38 }
 0x15e   : > { %924 = vst.msk [vmem:[%s1216_s17 + $0x70] sm:$0xff] %vm476_vm2, %v572_v39 }
 0x15f   : > { %v656_v41 = vpop.f32.mrf.mxu1 }
 0x160   : > { %v657_v42 = vadd.f32 %v1033_v40, %v656_v41 }
 0x162   : > { %935 = vst.msk [vmem:[%s1216_s17 + $0x80] sm:$0xff] %vm476_vm2, %v657_v42 }
 0x163   : > { %v573_v43 = vpop.f32.mrf.mxu3 }
 0x164   : > { %v574_v44 = vadd.f32 %v1032_v13, %v573_v43 }
 0x166   : > { %925 = vst.msk [vmem:[%s1216_s17 + $0x78] sm:$0xff] %vm476_vm2, %v574_v44 }
 0x167   : > { %v658_v45 = vpop.f32.mrf.mxu1 }
 0x168   : > { %v659_v46 = vadd.f32 %v1033_v40, %v658_v45 }
 0x16a   : > { %936 = vst.msk [vmem:[%s1216_s17 + $0x88] sm:$0xff] %vm476_vm2, %v659_v46 }
 0x16b   : > { %v756_v48 = vpop.f32.mrf.mxu3 }
 0x16c   : > { %v757_v49 = vadd.f32 %v1034_v47, %v756_v48 }
 0x16e   : > { %952 = vst.msk [vmem:[%s1216_s17 + $0xc0] sm:$0xff] %vm476_vm2, %v757_v49 }
 0x16f   : > { %v661_v50 = vpop.f32.mrf.mxu1 }
 0x170   : > { %v662_v51 = vadd.f32 %v1033_v40, %v661_v50 }
 0x172   : > { %937 = vst.msk [vmem:[%s1216_s17 + $0x90] sm:$0xff] %vm476_vm2, %v662_v51 }
 0x173   : > { %v758_v52 = vpop.f32.mrf.mxu3 }
 0x174   : > { %v759_v53 = vadd.f32 %v1034_v47, %v758_v52 }
 0x176   : > { %953 = vst.msk [vmem:[%s1216_s17 + $0xc8] sm:$0xff] %vm476_vm2, %v759_v53 }
 0x177   : > { %v663_v54 = vpop.f32.mrf.mxu1 }
 0x178   : > { %v664_v55 = vadd.f32 %v1033_v40, %v663_v54 }
 0x17a   : > { %938 = vst.msk [vmem:[%s1216_s17 + $0x98] sm:$0xff] %vm476_vm2, %v664_v55 }
 0x17b   : > { %v761_v56 = vpop.f32.mrf.mxu3 }
 0x17c   : > { %v762_v57 = vadd.f32 %v1034_v47, %v761_v56 }
 0x17e   : > { %954 = vst.msk [vmem:[%s1216_s17 + $0xd0] sm:$0xff] %vm476_vm2, %v762_v57 }
 0x17f   : > { %v666_v58 = vpop.f32.mrf.mxu1 }
 0x180   : > { %v667_v59 = vadd.f32 %v1033_v40, %v666_v58 }
 0x182   : > { %939 = vst.msk [vmem:[%s1216_s17 + $0xa0] sm:$0xff] %vm476_vm2, %v667_v59 }
 0x183   : > { %v763_v60 = vpop.f32.mrf.mxu3 }
 0x184   : > { %v764_v61 = vadd.f32 %v1034_v47, %v763_v60 }
 0x186   : > { %955 = vst.msk [vmem:[%s1216_s17 + $0xd8] sm:$0xff] %vm476_vm2, %v764_v61 }
 0x187   : > { %v668_v62 = vpop.f32.mrf.mxu1 }
 0x188   : > { %v669_v63 = vadd.f32 %v1033_v40, %v668_v62 }
 0x18a   : > { %940 = vst.msk [vmem:[%s1216_s17 + $0xa8] sm:$0xff] %vm476_vm2, %v669_v63 }
 0x18b   : > { %v766_v0 = vpop.f32.mrf.mxu3 }
 0x18c   : > { %v767_v1 = vadd.f32 %v1034_v47, %v766_v0 }
 0x18e   : > { %956 = vst.msk [vmem:[%s1216_s17 + $0xe0] sm:$0xff] %vm476_vm2, %v767_v1 }
 0x18f   : > { %v671_v2 = vpop.f32.mrf.mxu1 }
 0x190   : > { %v672_v3 = vadd.f32 %v1033_v40, %v671_v2 }
 0x192   : > { %941 = vst.msk [vmem:[%s1216_s17 + $0xb0] sm:$0xff] %vm476_vm2, %v672_v3 }
 0x193   : > { %v768_v4 = vpop.f32.mrf.mxu3 }
 0x194   : > { %v769_v5 = vadd.f32 %v1034_v47, %v768_v4 }
 0x196   : > { %957 = vst.msk [vmem:[%s1216_s17 + $0xe8] sm:$0xff] %vm476_vm2, %v769_v5 }
 0x197   : > { %v673_v6 = vpop.f32.mrf.mxu1 }
 0x198   : > { %v674_v7 = vadd.f32 %v1033_v40, %v673_v6 }
 0x19a   : > { %942 = vst.msk [vmem:[%s1216_s17 + $0xb8] sm:$0xff] %vm476_vm2, %v674_v7 }
 0x19b   : > { %v771_v8 = vpop.f32.mrf.mxu3 }
 0x19c   : > { %v772_v9 = vadd.f32 %v1034_v47, %v771_v8 }
 0x19e   : > { %958 = vst.msk [vmem:[%s1216_s17 + $0xf0] sm:$0xff] %vm476_vm2, %v772_v9 }
 0x1a3   : > { %v773_v10 = vpop.f32.mrf.mxu3 }
 0x1a4   : > { %v774_v11 = vadd.f32 %v1034_v47, %v773_v10 }
 0x1a6   : > { %959 = vst.msk [vmem:[%s1216_s17 + $0xf8] sm:$0xff] %vm476_vm2, %v774_v11 }
 0x1a7 PF: > { %s16_s23 = sadd.s32 1, %s1057_s23   ;;  %s1307_s21 = smov %s1053_s22 }
 0x1a8   : > { %p13_p5 = scmp.ge.s32.totalorder %s16_s23, 4   ;;  %s1308_s22 = smov %s1310_s24 }
 0x1aa   :  { %15 = sbr.rel (!%p13_p5) target bundleno = 2 (0x2), region = 83 }

</bundles_post_ra>
